<compile_context>
chip_gen: v5e
topology: v5e:2x2
jax: 0.10.0
libtpu: 0.0.40
codegen_flags: <defaults>
</compile_context>

<pallas_src>
import math

import numpy as np

import jax
import jax.numpy as jnp
from jax.experimental import pallas as pl
from jax.experimental.pallas import tpu as pltpu

# ----------------------------------------------------------------------------
# Static architecture configuration (EfficientNetV2-style toy config)
#   stem : 3x3 s2 conv 3->16, BN, SiLU                     16x16 -> 8x8
#   b0   : FusedMBConv e=1 : 3x3 s1 16->16, BN, SiLU, +res  8x8
#   b1   : FusedMBConv e=4 : 3x3 s2 16->64 | 1x1 64->32     8x8  -> 4x4
#   b2   : MBConv     e=4 : 1x1 32->128 | dw3x3 | SE(8) | 1x1 128->32, +res
#   head : 1x1 32->128, BN, SiLU | GAP | Linear 128->10
# ----------------------------------------------------------------------------
BN_EPS = 1e-5
BN_SCALE = 1.0 / math.sqrt(1.0 + BN_EPS)   # folded eval BN (mean 0, var 1, affine 1/0)

H_IN = W_IN = 16
C_IN = 3
NUM_CLASSES = 10
LAST_CHANNEL = 128
CLS_PAD = 128                               # lane-dense classifier width


# ----------------------------------------------------------------------------
# The fused network kernel (one image per grid step)
# ----------------------------------------------------------------------------
def _efficientnetv2_kan_kernel(
        x_ref,
        stem_w, stem_b,
        b0_w, b0_b,
        b1_ew, b1_eb, b1_pw, b1_pb,
        b2_ew, b2_eb, b2_dw,
        se_w1, se_b1, se_w2, se_b2,
        b2_pw, b2_pb,
        head_w, head_b,
        fc_w, fc_b,
        sel16, sel8,
        o_ref,
        pad_stem, pad_blk, pad_dw):
    f32 = jnp.float32

    def silu(v):
        return v * (1.0 / (1.0 + jnp.exp(-v)))

    def sigmoid(v):
        return 1.0 / (1.0 + jnp.exp(-v))

    def conv3x3_same(pad_ref, x3d, w_ref, h, w, cin, cout):
        """Dense (stride-1, pad-1) 3x3 conv as 9 shifted-window MXU dots.

        x3d: (h, w, cin) value; pad_ref: (h+2, w+2, cin) VMEM scratch;
        w_ref: (9*cin, cout).  Returns (h*w, cout) f32.
        """
        pad_ref[...] = jnp.zeros_like(pad_ref)
        pad_ref[1:h + 1, 1:w + 1, :] = x3d
        acc = jnp.zeros((h * w, cout), f32)
        for t in range(9):
            di, dj = t // 3, t % 3
            win = pad_ref[di:di + h, dj:dj + w, :].reshape(h * w, cin)
            acc = acc + jnp.dot(win, w_ref[t * cin:(t + 1) * cin, :],
                                preferred_element_type=f32)
        return acc

    # ---- stem: 3x3 s2 conv 3->16 (+folded BN) + SiLU : 16x16x3 -> 8x8x16 ----
    x = x_ref[0].astype(f32)                                        # (16,16,3)
    y = conv3x3_same(pad_stem, x, stem_w, 16, 16, 3, 16)            # (256,16) dense
    y = jnp.dot(sel16[...], y, preferred_element_type=f32)          # stride-2 pick -> (64,16)
    x0 = silu(y + stem_b[...])                                      # 8x8x16 as (64,16)

    # ---- block 0: FusedMBConv(e=1): 3x3 s1 16->16 + BN + SiLU, + residual ----
    y = conv3x3_same(pad_blk, x0.reshape(8, 8, 16), b0_w, 8, 8, 16, 16)
    x1 = silu(y + b0_b[...]) + x0                                   # (64,16)

    # ---- block 1: FusedMBConv(e=4): 3x3 s2 16->64 + SiLU, 1x1 64->32 + SiLU ----
    y = conv3x3_same(pad_blk, x1.reshape(8, 8, 16), b1_ew, 8, 8, 16, 64)
    y = jnp.dot(sel8[...], y, preferred_element_type=f32)           # (16,64)
    h = silu(y + b1_eb[...])                                        # 4x4x64
    # std_conv_wrapper applies SiLU even for the project conv (base_activation=None)
    x2 = silu(jnp.dot(h, b1_pw[...], preferred_element_type=f32) + b1_pb[...])     # (16,32)

    # ---- block 2: MBConv(e=4, se=0.25) ----
    e = silu(jnp.dot(x2, b2_ew[...], preferred_element_type=f32) + b2_eb[...])     # (16,128)
    # depthwise 3x3 s1 (+folded BN, no bias) + SiLU
    pad_dw[...] = jnp.zeros_like(pad_dw)
    pad_dw[1:5, 1:5, :] = e.reshape(4, 4, 128)
    acc = jnp.zeros((4, 4, 128), f32)
    for t in range(9):
        di, dj = t // 3, t % 3
        acc = acc + pad_dw[di:di + 4, dj:dj + 4, :] * b2_dw[t, :]
    d = silu(acc.reshape(16, 128))
    # squeeze-excitation: GAP -> fc1/SiLU -> fc2/sigmoid -> channel rescale
    pooled = jnp.mean(d, axis=0, keepdims=True)                                     # (1,128)
    s = silu(jnp.dot(pooled, se_w1[...], preferred_element_type=f32) + se_b1[...])  # (1,8)
    s = sigmoid(jnp.dot(s, se_w2[...], preferred_element_type=f32) + se_b2[...])    # (1,128)
    d = d * s
    # 1x1 project 128->32 (+BN, SiLU quirk) + residual
    x3 = silu(jnp.dot(d, b2_pw[...], preferred_element_type=f32) + b2_pb[...]) + x2  # (16,32)

    # ---- head: 1x1 32->128 + BN + SiLU | global-avg-pool | Linear classifier ----
    h = silu(jnp.dot(x3, head_w[...], preferred_element_type=f32) + head_b[...])    # (16,128)
    pooled = jnp.mean(h, axis=0, keepdims=True)                                     # (1,128)
    logits = jnp.dot(pooled, fc_w[...], preferred_element_type=f32) + fc_b[...]     # (1,128)
    o_ref[0] = logits                                               # lane-dense store


# ----------------------------------------------------------------------------
# Parameter init (deterministic, synthetic; module-like layouts)
# ----------------------------------------------------------------------------
def init_params(key):
    ks = jax.random.split(key, 12)

    def conv_w(k, kh, kw, cin, cout):              # kaiming fan-out, like the module
        fan_out = kh * kw * cout
        return jax.random.normal(k, (kh, kw, cin, cout), jnp.float32) * math.sqrt(2.0 / fan_out)

    p = {}
    p["stem_w"] = conv_w(ks[0], 3, 3, C_IN, 16);   p["stem_b"] = jnp.zeros((16,), jnp.float32)
    p["b0_w"] = conv_w(ks[1], 3, 3, 16, 16);       p["b0_b"] = jnp.zeros((16,), jnp.float32)
    p["b1_ew"] = conv_w(ks[2], 3, 3, 16, 64);      p["b1_eb"] = jnp.zeros((64,), jnp.float32)
    p["b1_pw"] = conv_w(ks[3], 1, 1, 64, 32);      p["b1_pb"] = jnp.zeros((32,), jnp.float32)
    p["b2_ew"] = conv_w(ks[4], 1, 1, 32, 128);     p["b2_eb"] = jnp.zeros((128,), jnp.float32)
    p["b2_dw"] = jax.random.normal(ks[5], (3, 3, 128), jnp.float32) * math.sqrt(2.0 / 9.0)
    p["b2_s1w"] = jax.random.normal(ks[6], (128, 8), jnp.float32) * math.sqrt(2.0 / 8.0)
    p["b2_s1b"] = jnp.zeros((8,), jnp.float32)
    p["b2_s2w"] = jax.random.normal(ks[7], (8, 128), jnp.float32) * math.sqrt(2.0 / 128.0)
    p["b2_s2b"] = jnp.zeros((128,), jnp.float32)
    p["b2_pw"] = conv_w(ks[8], 1, 1, 128, 32);     p["b2_pb"] = jnp.zeros((32,), jnp.float32)
    p["head_w"] = conv_w(ks[9], 1, 1, 32, LAST_CHANNEL)
    p["head_b"] = jnp.zeros((LAST_CHANNEL,), jnp.float32)
    # nn.Linear init: normal(0, 0.01), zero bias
    p["fc_w"] = jax.random.normal(ks[10], (LAST_CHANNEL, NUM_CLASSES), jnp.float32) * 0.01
    p["fc_b"] = jnp.zeros((NUM_CLASSES,), jnp.float32)
    return p


def _down2_select(h, w):
    """(h//2*w//2, h*w) 0/1 matrix picking rows (2i, 2j) of a dense stride-1 conv map."""
    ho, wo = h // 2, w // 2
    s = np.zeros((ho * wo, h * w), np.float32)
    for i in range(ho):
        for j in range(wo):
            s[i * wo + j, (2 * i) * w + 2 * j] = 1.0
    return jnp.asarray(s)


def prepare_params(p):
    """Fold eval-mode BN into weights/bias, reshape to matmul layout, pad the classifier."""
    sc = BN_SCALE

    def cw(w):                                   # (kh,kw,cin,cout) -> (kh*kw*cin, cout)
        kh, kw, ci, co = w.shape
        return (w * sc).reshape(kh * kw * ci, co).astype(jnp.float32)

    def cb(b):
        return (b * sc).reshape(1, -1).astype(jnp.float32)

    fc_w = jnp.pad(p["fc_w"], ((0, 0), (0, CLS_PAD - NUM_CLASSES))).astype(jnp.float32)
    fc_b = jnp.pad(p["fc_b"], (0, CLS_PAD - NUM_CLASSES)).reshape(1, CLS_PAD).astype(jnp.float32)

    return (
        cw(p["stem_w"]), cb(p["stem_b"]),
        cw(p["b0_w"]), cb(p["b0_b"]),
        cw(p["b1_ew"]), cb(p["b1_eb"]),
        cw(p["b1_pw"]), cb(p["b1_pb"]),
        cw(p["b2_ew"]), cb(p["b2_eb"]),
        (p["b2_dw"] * sc).reshape(9, 128).astype(jnp.float32),
        p["b2_s1w"].astype(jnp.float32), p["b2_s1b"].reshape(1, 8).astype(jnp.float32),
        p["b2_s2w"].astype(jnp.float32), p["b2_s2b"].reshape(1, 128).astype(jnp.float32),
        cw(p["b2_pw"]), cb(p["b2_pb"]),
        cw(p["head_w"]), cb(p["head_b"]),
        fc_w, fc_b,
        _down2_select(16, 16),    # stem stride-2 selector  (64, 256)
        _down2_select(8, 8),      # block-1 stride-2 selector (16, 64)
    )


# ----------------------------------------------------------------------------
# Forward pass: one fused pallas_call over the batch
# ----------------------------------------------------------------------------
def forward(prepared, x_nchw):
    n = x_nchw.shape[0]
    x = jnp.transpose(x_nchw, (0, 2, 3, 1)).astype(jnp.float32)      # NCHW -> NHWC

    weight_specs = [pl.BlockSpec(w.shape, lambda i: (0, 0)) for w in prepared]

    out = pl.pallas_call(
        _efficientnetv2_kan_kernel,
        out_shape=jax.ShapeDtypeStruct((n, 1, CLS_PAD), jnp.float32),
        grid=(n,),
        in_specs=[pl.BlockSpec((1, H_IN, W_IN, C_IN), lambda i: (i, 0, 0, 0))] + weight_specs,
        out_specs=pl.BlockSpec((1, 1, CLS_PAD), lambda i: (i, 0, 0)),
        scratch_shapes=[
            pltpu.VMEM((H_IN + 2, W_IN + 2, C_IN), jnp.float32),     # stem padded input
            pltpu.VMEM((10, 10, 16), jnp.float32),                   # 8x8x16 padded (b0/b1)
            pltpu.VMEM((6, 6, 128), jnp.float32),                    # 4x4x128 padded (dw)
        ],
        compiler_params=pltpu.CompilerParams(
            dimension_semantics=("parallel",),                       # batch -> megacore on v7x
        ),
    )(x, *prepared)

    return out.reshape(n, CLS_PAD)[:, :NUM_CLASSES]


if __name__ == "__main__":
    key = jax.random.PRNGKey(0)
    pkey, xkey = jax.random.split(key)
    params = init_params(pkey)
    prepared = prepare_params(params)                 # arrays only -> jit-safe
    x = jax.random.normal(xkey, (2, C_IN, H_IN, W_IN), jnp.float32)  # NCHW, like PyTorch
    fwd = jax.jit(forward)
    out = jax.block_until_ready(fwd(prepared, x))
    assert out.shape == (2, NUM_CLASSES), out.shape
    assert bool(jnp.all(jnp.isfinite(out)))
    print("KERNEL_OK")
</pallas_src>

<mosaic_0001>
module attributes {stable_mosaic.version = 11 : i64} {
  func.func @_efficientnetv2_kan_kernel(%arg0: i32, %arg1: memref<1x16x16x3xf32, #tpu.memory_space<vmem>>, %arg2: memref<27x16xf32, #tpu.memory_space<vmem>>, %arg3: memref<1x16xf32, #tpu.memory_space<vmem>>, %arg4: memref<144x16xf32, #tpu.memory_space<vmem>>, %arg5: memref<1x16xf32, #tpu.memory_space<vmem>>, %arg6: memref<144x64xf32, #tpu.memory_space<vmem>>, %arg7: memref<1x64xf32, #tpu.memory_space<vmem>>, %arg8: memref<64x32xf32, #tpu.memory_space<vmem>>, %arg9: memref<1x32xf32, #tpu.memory_space<vmem>>, %arg10: memref<32x128xf32, #tpu.memory_space<vmem>>, %arg11: memref<1x128xf32, #tpu.memory_space<vmem>>, %arg12: memref<9x128xf32, #tpu.memory_space<vmem>>, %arg13: memref<128x8xf32, #tpu.memory_space<vmem>>, %arg14: memref<1x8xf32, #tpu.memory_space<vmem>>, %arg15: memref<8x128xf32, #tpu.memory_space<vmem>>, %arg16: memref<1x128xf32, #tpu.memory_space<vmem>>, %arg17: memref<128x32xf32, #tpu.memory_space<vmem>>, %arg18: memref<1x32xf32, #tpu.memory_space<vmem>>, %arg19: memref<32x128xf32, #tpu.memory_space<vmem>>, %arg20: memref<1x128xf32, #tpu.memory_space<vmem>>, %arg21: memref<128x128xf32, #tpu.memory_space<vmem>>, %arg22: memref<1x128xf32, #tpu.memory_space<vmem>>, %arg23: memref<64x256xf32, #tpu.memory_space<vmem>>, %arg24: memref<16x64xf32, #tpu.memory_space<vmem>>, %arg25: memref<1x1x128xf32, #tpu.memory_space<vmem>>, %arg26: memref<18x18x3xf32, #tpu.memory_space<vmem>>, %arg27: memref<10x10x16xf32, #tpu.memory_space<vmem>>, %arg28: memref<6x6x128xf32, #tpu.memory_space<vmem>>) attributes {dimension_semantics = [#tpu.dimension_semantics<parallel>], iteration_bounds = array<i64: 2>, scalar_prefetch = 0 : i64, scratch_operands = 3 : i64, tpu.core_type = #tpu.core_type<tc>, window_params = [{transform_indices = @transform_0, window_bounds = array<i64: 1, 16, 16, 3>}, {pipeline_mode = #tpu.pipeline_mode<synchronous>, transform_indices = @transform_1, window_bounds = array<i64: 27, 16>}, {pipeline_mode = #tpu.pipeline_mode<synchronous>, transform_indices = @transform_2, window_bounds = array<i64: 1, 16>}, {pipeline_mode = #tpu.pipeline_mode<synchronous>, transform_indices = @transform_3, window_bounds = array<i64: 144, 16>}, {pipeline_mode = #tpu.pipeline_mode<synchronous>, transform_indices = @transform_4, window_bounds = array<i64: 1, 16>}, {pipeline_mode = #tpu.pipeline_mode<synchronous>, transform_indices = @transform_5, window_bounds = array<i64: 144, 64>}, {pipeline_mode = #tpu.pipeline_mode<synchronous>, transform_indices = @transform_6, window_bounds = array<i64: 1, 64>}, {pipeline_mode = #tpu.pipeline_mode<synchronous>, transform_indices = @transform_7, window_bounds = array<i64: 64, 32>}, {pipeline_mode = #tpu.pipeline_mode<synchronous>, transform_indices = @transform_8, window_bounds = array<i64: 1, 32>}, {pipeline_mode = #tpu.pipeline_mode<synchronous>, transform_indices = @transform_9, window_bounds = array<i64: 32, 128>}, {pipeline_mode = #tpu.pipeline_mode<synchronous>, transform_indices = @transform_10, window_bounds = array<i64: 1, 128>}, {pipeline_mode = #tpu.pipeline_mode<synchronous>, transform_indices = @transform_11, window_bounds = array<i64: 9, 128>}, {pipeline_mode = #tpu.pipeline_mode<synchronous>, transform_indices = @transform_12, window_bounds = array<i64: 128, 8>}, {pipeline_mode = #tpu.pipeline_mode<synchronous>, transform_indices = @transform_13, window_bounds = array<i64: 1, 8>}, {pipeline_mode = #tpu.pipeline_mode<synchronous>, transform_indices = @transform_14, window_bounds = array<i64: 8, 128>}, {pipeline_mode = #tpu.pipeline_mode<synchronous>, transform_indices = @transform_15, window_bounds = array<i64: 1, 128>}, {pipeline_mode = #tpu.pipeline_mode<synchronous>, transform_indices = @transform_16, window_bounds = array<i64: 128, 32>}, {pipeline_mode = #tpu.pipeline_mode<synchronous>, transform_indices = @transform_17, window_bounds = array<i64: 1, 32>}, {pipeline_mode = #tpu.pipeline_mode<synchronous>, transform_indices = @transform_18, window_bounds = array<i64: 32, 128>}, {pipeline_mode = #tpu.pipeline_mode<synchronous>, transform_indices = @transform_19, window_bounds = array<i64: 1, 128>}, {pipeline_mode = #tpu.pipeline_mode<synchronous>, transform_indices = @transform_20, window_bounds = array<i64: 128, 128>}, {pipeline_mode = #tpu.pipeline_mode<synchronous>, transform_indices = @transform_21, window_bounds = array<i64: 1, 128>}, {pipeline_mode = #tpu.pipeline_mode<synchronous>, transform_indices = @transform_22, window_bounds = array<i64: 64, 256>}, {pipeline_mode = #tpu.pipeline_mode<synchronous>, transform_indices = @transform_23, window_bounds = array<i64: 16, 64>}, {transform_indices = @transform_24, window_bounds = array<i64: 1, 1, 128>}]} {
    %c0 = arith.constant 0 : index
    %c0_0 = arith.constant 0 : index
    %c0_1 = arith.constant 0 : index
    %c0_2 = arith.constant 0 : index
    %0 = vector.load %arg1[%c0, %c0_0, %c0_1, %c0_2] : memref<1x16x16x3xf32, #tpu.memory_space<vmem>>, vector<1x16x16x3xf32>
    %1 = vector.shape_cast %0 : vector<1x16x16x3xf32> to vector<16x16x3xf32>
    %cst = arith.constant 0.000000e+00 : f32
    %2 = vector.broadcast %cst : f32 to vector<18x18x3xf32>
    %c0_3 = arith.constant 0 : index
    %c0_4 = arith.constant 0 : index
    %c0_5 = arith.constant 0 : index
    %3 = vector.load %arg26[%c0_3, %c0_4, %c0_5] : memref<18x18x3xf32, #tpu.memory_space<vmem>>, vector<18x18x3xf32>
    tpu.vector_store %arg26[%c0_3, %c0_4, %c0_5], %2 {strides = array<i32>} : memref<18x18x3xf32, #tpu.memory_space<vmem>>, vector<18x18x3xf32>,
    %c1 = arith.constant 1 : index
    %c1_6 = arith.constant 1 : index
    %c0_7 = arith.constant 0 : index
    %4 = vector.load %arg26[%c1, %c1_6, %c0_7] : memref<18x18x3xf32, #tpu.memory_space<vmem>>, vector<16x16x3xf32>
    tpu.vector_store %arg26[%c1, %c1_6, %c0_7], %1 {strides = array<i32>} : memref<18x18x3xf32, #tpu.memory_space<vmem>>, vector<16x16x3xf32>,
    %cst_8 = arith.constant 0.000000e+00 : f32
    %5 = vector.broadcast %cst_8 : f32 to vector<256x16xf32>
    %c0_9 = arith.constant 0 : index
    %c0_10 = arith.constant 0 : index
    %c0_11 = arith.constant 0 : index
    %6 = vector.load %arg26[%c0_9, %c0_10, %c0_11] : memref<18x18x3xf32, #tpu.memory_space<vmem>>, vector<16x16x3xf32>
    %7 = vector.shape_cast %6 : vector<16x16x3xf32> to vector<256x3xf32>
    %c0_12 = arith.constant 0 : index
    %c0_13 = arith.constant 0 : index
    %8 = vector.load %arg2[%c0_12, %c0_13] : memref<27x16xf32, #tpu.memory_space<vmem>>, vector<3x16xf32>
    %cst_14 = arith.constant dense<0.000000e+00> : vector<256x16xf32>
    %9 = tpu.matmul %7, %8, %cst_14 {dimension_numbers = #tpu.dot_dimension_numbers<[1], [0], [0], [1], [0, 0, 1, 1], [], []>} : vector<256x3xf32>, vector<3x16xf32>, vector<256x16xf32> -> vector<256x16xf32>
    %10 = arith.addf %5, %9 : vector<256x16xf32>
    %c0_15 = arith.constant 0 : index
    %c1_16 = arith.constant 1 : index
    %c0_17 = arith.constant 0 : index
    %11 = vector.load %arg26[%c0_15, %c1_16, %c0_17] : memref<18x18x3xf32, #tpu.memory_space<vmem>>, vector<16x16x3xf32>
    %12 = vector.shape_cast %11 : vector<16x16x3xf32> to vector<256x3xf32>
    %c3 = arith.constant 3 : index
    %c0_18 = arith.constant 0 : index
    %13 = vector.load %arg2[%c3, %c0_18] : memref<27x16xf32, #tpu.memory_space<vmem>>, vector<3x16xf32>
    %cst_19 = arith.constant dense<0.000000e+00> : vector<256x16xf32>
    %14 = tpu.matmul %12, %13, %cst_19 {dimension_numbers = #tpu.dot_dimension_numbers<[1], [0], [0], [1], [0, 0, 1, 1], [], []>} : vector<256x3xf32>, vector<3x16xf32>, vector<256x16xf32> -> vector<256x16xf32>
    %15 = arith.addf %10, %14 : vector<256x16xf32>
    %c0_20 = arith.constant 0 : index
    %c2 = arith.constant 2 : index
    %c0_21 = arith.constant 0 : index
    %16 = vector.load %arg26[%c0_20, %c2, %c0_21] : memref<18x18x3xf32, #tpu.memory_space<vmem>>, vector<16x16x3xf32>
    %17 = vector.shape_cast %16 : vector<16x16x3xf32> to vector<256x3xf32>
    %c6 = arith.constant 6 : index
    %c0_22 = arith.constant 0 : index
    %18 = vector.load %arg2[%c6, %c0_22] : memref<27x16xf32, #tpu.memory_space<vmem>>, vector<3x16xf32>
    %cst_23 = arith.constant dense<0.000000e+00> : vector<256x16xf32>
    %19 = tpu.matmul %17, %18, %cst_23 {dimension_numbers = #tpu.dot_dimension_numbers<[1], [0], [0], [1], [0, 0, 1, 1], [], []>} : vector<256x3xf32>, vector<3x16xf32>, vector<256x16xf32> -> vector<256x16xf32>
    %20 = arith.addf %15, %19 : vector<256x16xf32>
    %c1_24 = arith.constant 1 : index
    %c0_25 = arith.constant 0 : index
    %c0_26 = arith.constant 0 : index
    %21 = vector.load %arg26[%c1_24, %c0_25, %c0_26] : memref<18x18x3xf32, #tpu.memory_space<vmem>>, vector<16x16x3xf32>
    %22 = vector.shape_cast %21 : vector<16x16x3xf32> to vector<256x3xf32>
    %c9 = arith.constant 9 : index
    %c0_27 = arith.constant 0 : index
    %23 = vector.load %arg2[%c9, %c0_27] : memref<27x16xf32, #tpu.memory_space<vmem>>, vector<3x16xf32>
    %cst_28 = arith.constant dense<0.000000e+00> : vector<256x16xf32>
    %24 = tpu.matmul %22, %23, %cst_28 {dimension_numbers = #tpu.dot_dimension_numbers<[1], [0], [0], [1], [0, 0, 1, 1], [], []>} : vector<256x3xf32>, vector<3x16xf32>, vector<256x16xf32> -> vector<256x16xf32>
    %25 = arith.addf %20, %24 : vector<256x16xf32>
    %c1_29 = arith.constant 1 : index
    %c1_30 = arith.constant 1 : index
    %c0_31 = arith.constant 0 : index
    %26 = vector.load %arg26[%c1_29, %c1_30, %c0_31] : memref<18x18x3xf32, #tpu.memory_space<vmem>>, vector<16x16x3xf32>
    %27 = vector.shape_cast %26 : vector<16x16x3xf32> to vector<256x3xf32>
    %c12 = arith.constant 12 : index
    %c0_32 = arith.constant 0 : index
    %28 = vector.load %arg2[%c12, %c0_32] : memref<27x16xf32, #tpu.memory_space<vmem>>, vector<3x16xf32>
    %cst_33 = arith.constant dense<0.000000e+00> : vector<256x16xf32>
    %29 = tpu.matmul %27, %28, %cst_33 {dimension_numbers = #tpu.dot_dimension_numbers<[1], [0], [0], [1], [0, 0, 1, 1], [], []>} : vector<256x3xf32>, vector<3x16xf32>, vector<256x16xf32> -> vector<256x16xf32>
    %30 = arith.addf %25, %29 : vector<256x16xf32>
    %c1_34 = arith.constant 1 : index
    %c2_35 = arith.constant 2 : index
    %c0_36 = arith.constant 0 : index
    %31 = vector.load %arg26[%c1_34, %c2_35, %c0_36] : memref<18x18x3xf32, #tpu.memory_space<vmem>>, vector<16x16x3xf32>
    %32 = vector.shape_cast %31 : vector<16x16x3xf32> to vector<256x3xf32>
    %c15 = arith.constant 15 : index
    %c0_37 = arith.constant 0 : index
    %33 = vector.load %arg2[%c15, %c0_37] : memref<27x16xf32, #tpu.memory_space<vmem>>, vector<3x16xf32>
    %cst_38 = arith.constant dense<0.000000e+00> : vector<256x16xf32>
    %34 = tpu.matmul %32, %33, %cst_38 {dimension_numbers = #tpu.dot_dimension_numbers<[1], [0], [0], [1], [0, 0, 1, 1], [], []>} : vector<256x3xf32>, vector<3x16xf32>, vector<256x16xf32> -> vector<256x16xf32>
    %35 = arith.addf %30, %34 : vector<256x16xf32>
    %c2_39 = arith.constant 2 : index
    %c0_40 = arith.constant 0 : index
    %c0_41 = arith.constant 0 : index
    %36 = vector.load %arg26[%c2_39, %c0_40, %c0_41] : memref<18x18x3xf32, #tpu.memory_space<vmem>>, vector<16x16x3xf32>
    %37 = vector.shape_cast %36 : vector<16x16x3xf32> to vector<256x3xf32>
    %c18 = arith.constant 18 : index
    %c0_42 = arith.constant 0 : index
    %38 = vector.load %arg2[%c18, %c0_42] : memref<27x16xf32, #tpu.memory_space<vmem>>, vector<3x16xf32>
    %cst_43 = arith.constant dense<0.000000e+00> : vector<256x16xf32>
    %39 = tpu.matmul %37, %38, %cst_43 {dimension_numbers = #tpu.dot_dimension_numbers<[1], [0], [0], [1], [0, 0, 1, 1], [], []>} : vector<256x3xf32>, vector<3x16xf32>, vector<256x16xf32> -> vector<256x16xf32>
    %40 = arith.addf %35, %39 : vector<256x16xf32>
    %c2_44 = arith.constant 2 : index
    %c1_45 = arith.constant 1 : index
    %c0_46 = arith.constant 0 : index
    %41 = vector.load %arg26[%c2_44, %c1_45, %c0_46] : memref<18x18x3xf32, #tpu.memory_space<vmem>>, vector<16x16x3xf32>
    %42 = vector.shape_cast %41 : vector<16x16x3xf32> to vector<256x3xf32>
    %c21 = arith.constant 21 : index
    %c0_47 = arith.constant 0 : index
    %43 = vector.load %arg2[%c21, %c0_47] : memref<27x16xf32, #tpu.memory_space<vmem>>, vector<3x16xf32>
    %cst_48 = arith.constant dense<0.000000e+00> : vector<256x16xf32>
    %44 = tpu.matmul %42, %43, %cst_48 {dimension_numbers = #tpu.dot_dimension_numbers<[1], [0], [0], [1], [0, 0, 1, 1], [], []>} : vector<256x3xf32>, vector<3x16xf32>, vector<256x16xf32> -> vector<256x16xf32>
    %45 = arith.addf %40, %44 : vector<256x16xf32>
    %c2_49 = arith.constant 2 : index
    %c2_50 = arith.constant 2 : index
    %c0_51 = arith.constant 0 : index
    %46 = vector.load %arg26[%c2_49, %c2_50, %c0_51] : memref<18x18x3xf32, #tpu.memory_space<vmem>>, vector<16x16x3xf32>
    %47 = vector.shape_cast %46 : vector<16x16x3xf32> to vector<256x3xf32>
    %c24 = arith.constant 24 : index
    %c0_52 = arith.constant 0 : index
    %48 = vector.load %arg2[%c24, %c0_52] : memref<27x16xf32, #tpu.memory_space<vmem>>, vector<3x16xf32>
    %cst_53 = arith.constant dense<0.000000e+00> : vector<256x16xf32>
    %49 = tpu.matmul %47, %48, %cst_53 {dimension_numbers = #tpu.dot_dimension_numbers<[1], [0], [0], [1], [0, 0, 1, 1], [], []>} : vector<256x3xf32>, vector<3x16xf32>, vector<256x16xf32> -> vector<256x16xf32>
    %50 = arith.addf %45, %49 : vector<256x16xf32>
    %c0_54 = arith.constant 0 : index
    %c0_55 = arith.constant 0 : index
    %51 = vector.load %arg23[%c0_54, %c0_55] : memref<64x256xf32, #tpu.memory_space<vmem>>, vector<64x256xf32>
    %cst_56 = arith.constant dense<0.000000e+00> : vector<64x16xf32>
    %52 = tpu.matmul %51, %50, %cst_56 {dimension_numbers = #tpu.dot_dimension_numbers<[1], [0], [0], [1], [0, 0, 1, 1], [], []>} : vector<64x256xf32>, vector<256x16xf32>, vector<64x16xf32> -> vector<64x16xf32>
    %c0_57 = arith.constant 0 : index
    %c0_58 = arith.constant 0 : index
    %53 = vector.load %arg3[%c0_57, %c0_58] : memref<1x16xf32, #tpu.memory_space<vmem>>, vector<1x16xf32>
    %54 = vector.broadcast %53 : vector<1x16xf32> to vector<64x16xf32>
    %55 = arith.addf %52, %54 : vector<64x16xf32>
    %cst_59 = arith.constant 0.000000e+00 : f32
    %56 = vector.broadcast %cst_59 : f32 to vector<64x16xf32>
    %57 = arith.subf %56, %55 : vector<64x16xf32>
    %58 = math.exp %57 : vector<64x16xf32>
    %cst_60 = arith.constant 1.000000e+00 : f32
    %59 = vector.broadcast %cst_60 : f32 to vector<64x16xf32>
    %60 = arith.addf %59, %58 : vector<64x16xf32>
    %cst_61 = arith.constant 1.000000e+00 : f32
    %61 = vector.broadcast %cst_61 : f32 to vector<64x16xf32>
    %62 = arith.divf %61, %60 : vector<64x16xf32>
    %63 = arith.mulf %55, %62 : vector<64x16xf32>
    %64 = vector.shape_cast %63 : vector<64x16xf32> to vector<8x8x16xf32>
    %cst_62 = arith.constant 0.000000e+00 : f32
    %65 = vector.broadcast %cst_62 : f32 to vector<10x10x16xf32>
    %c0_63 = arith.constant 0 : index
    %c0_64 = arith.constant 0 : index
    %c0_65 = arith.constant 0 : index
    %66 = vector.load %arg27[%c0_63, %c0_64, %c0_65] : memref<10x10x16xf32, #tpu.memory_space<vmem>>, vector<10x10x16xf32>
    tpu.vector_store %arg27[%c0_63, %c0_64, %c0_65], %65 {strides = array<i32>} : memref<10x10x16xf32, #tpu.memory_space<vmem>>, vector<10x10x16xf32>,
    %c1_66 = arith.constant 1 : index
    %c1_67 = arith.constant 1 : index
    %c0_68 = arith.constant 0 : index
    %67 = vector.load %arg27[%c1_66, %c1_67, %c0_68] : memref<10x10x16xf32, #tpu.memory_space<vmem>>, vector<8x8x16xf32>
    tpu.vector_store %arg27[%c1_66, %c1_67, %c0_68], %64 {strides = array<i32>} : memref<10x10x16xf32, #tpu.memory_space<vmem>>, vector<8x8x16xf32>,
    %cst_69 = arith.constant 0.000000e+00 : f32
    %68 = vector.broadcast %cst_69 : f32 to vector<64x16xf32>
    %c0_70 = arith.constant 0 : index
    %c0_71 = arith.constant 0 : index
    %c0_72 = arith.constant 0 : index
    %69 = vector.load %arg27[%c0_70, %c0_71, %c0_72] : memref<10x10x16xf32, #tpu.memory_space<vmem>>, vector<8x8x16xf32>
    %70 = vector.shape_cast %69 : vector<8x8x16xf32> to vector<64x16xf32>
    %c0_73 = arith.constant 0 : index
    %c0_74 = arith.constant 0 : index
    %71 = vector.load %arg4[%c0_73, %c0_74] : memref<144x16xf32, #tpu.memory_space<vmem>>, vector<16x16xf32>
    %cst_75 = arith.constant dense<0.000000e+00> : vector<64x16xf32>
    %72 = tpu.matmul %70, %71, %cst_75 {dimension_numbers = #tpu.dot_dimension_numbers<[1], [0], [0], [1], [0, 0, 1, 1], [], []>} : vector<64x16xf32>, vector<16x16xf32>, vector<64x16xf32> -> vector<64x16xf32>
    %73 = arith.addf %68, %72 : vector<64x16xf32>
    %c0_76 = arith.constant 0 : index
    %c1_77 = arith.constant 1 : index
    %c0_78 = arith.constant 0 : index
    %74 = vector.load %arg27[%c0_76, %c1_77, %c0_78] : memref<10x10x16xf32, #tpu.memory_space<vmem>>, vector<8x8x16xf32>
    %75 = vector.shape_cast %74 : vector<8x8x16xf32> to vector<64x16xf32>
    %c16 = arith.constant 16 : index
    %c0_79 = arith.constant 0 : index
    %76 = vector.load %arg4[%c16, %c0_79] : memref<144x16xf32, #tpu.memory_space<vmem>>, vector<16x16xf32>
    %cst_80 = arith.constant dense<0.000000e+00> : vector<64x16xf32>
    %77 = tpu.matmul %75, %76, %cst_80 {dimension_numbers = #tpu.dot_dimension_numbers<[1], [0], [0], [1], [0, 0, 1, 1], [], []>} : vector<64x16xf32>, vector<16x16xf32>, vector<64x16xf32> -> vector<64x16xf32>
    %78 = arith.addf %73, %77 : vector<64x16xf32>
    %c0_81 = arith.constant 0 : index
    %c2_82 = arith.constant 2 : index
    %c0_83 = arith.constant 0 : index
    %79 = vector.load %arg27[%c0_81, %c2_82, %c0_83] : memref<10x10x16xf32, #tpu.memory_space<vmem>>, vector<8x8x16xf32>
    %80 = vector.shape_cast %79 : vector<8x8x16xf32> to vector<64x16xf32>
    %c32 = arith.constant 32 : index
    %c0_84 = arith.constant 0 : index
    %81 = vector.load %arg4[%c32, %c0_84] : memref<144x16xf32, #tpu.memory_space<vmem>>, vector<16x16xf32>
    %cst_85 = arith.constant dense<0.000000e+00> : vector<64x16xf32>
    %82 = tpu.matmul %80, %81, %cst_85 {dimension_numbers = #tpu.dot_dimension_numbers<[1], [0], [0], [1], [0, 0, 1, 1], [], []>} : vector<64x16xf32>, vector<16x16xf32>, vector<64x16xf32> -> vector<64x16xf32>
    %83 = arith.addf %78, %82 : vector<64x16xf32>
    %c1_86 = arith.constant 1 : index
    %c0_87 = arith.constant 0 : index
    %c0_88 = arith.constant 0 : index
    %84 = vector.load %arg27[%c1_86, %c0_87, %c0_88] : memref<10x10x16xf32, #tpu.memory_space<vmem>>, vector<8x8x16xf32>
    %85 = vector.shape_cast %84 : vector<8x8x16xf32> to vector<64x16xf32>
    %c48 = arith.constant 48 : index
    %c0_89 = arith.constant 0 : index
    %86 = vector.load %arg4[%c48, %c0_89] : memref<144x16xf32, #tpu.memory_space<vmem>>, vector<16x16xf32>
    %cst_90 = arith.constant dense<0.000000e+00> : vector<64x16xf32>
    %87 = tpu.matmul %85, %86, %cst_90 {dimension_numbers = #tpu.dot_dimension_numbers<[1], [0], [0], [1], [0, 0, 1, 1], [], []>} : vector<64x16xf32>, vector<16x16xf32>, vector<64x16xf32> -> vector<64x16xf32>
    %88 = arith.addf %83, %87 : vector<64x16xf32>
    %c1_91 = arith.constant 1 : index
    %c1_92 = arith.constant 1 : index
    %c0_93 = arith.constant 0 : index
    %89 = vector.load %arg27[%c1_91, %c1_92, %c0_93] : memref<10x10x16xf32, #tpu.memory_space<vmem>>, vector<8x8x16xf32>
    %90 = vector.shape_cast %89 : vector<8x8x16xf32> to vector<64x16xf32>
    %c64 = arith.constant 64 : index
    %c0_94 = arith.constant 0 : index
    %91 = vector.load %arg4[%c64, %c0_94] : memref<144x16xf32, #tpu.memory_space<vmem>>, vector<16x16xf32>
    %cst_95 = arith.constant dense<0.000000e+00> : vector<64x16xf32>
    %92 = tpu.matmul %90, %91, %cst_95 {dimension_numbers = #tpu.dot_dimension_numbers<[1], [0], [0], [1], [0, 0, 1, 1], [], []>} : vector<64x16xf32>, vector<16x16xf32>, vector<64x16xf32> -> vector<64x16xf32>
    %93 = arith.addf %88, %92 : vector<64x16xf32>
    %c1_96 = arith.constant 1 : index
    %c2_97 = arith.constant 2 : index
    %c0_98 = arith.constant 0 : index
    %94 = vector.load %arg27[%c1_96, %c2_97, %c0_98] : memref<10x10x16xf32, #tpu.memory_space<vmem>>, vector<8x8x16xf32>
    %95 = vector.shape_cast %94 : vector<8x8x16xf32> to vector<64x16xf32>
    %c80 = arith.constant 80 : index
    %c0_99 = arith.constant 0 : index
    %96 = vector.load %arg4[%c80, %c0_99] : memref<144x16xf32, #tpu.memory_space<vmem>>, vector<16x16xf32>
    %cst_100 = arith.constant dense<0.000000e+00> : vector<64x16xf32>
    %97 = tpu.matmul %95, %96, %cst_100 {dimension_numbers = #tpu.dot_dimension_numbers<[1], [0], [0], [1], [0, 0, 1, 1], [], []>} : vector<64x16xf32>, vector<16x16xf32>, vector<64x16xf32> -> vector<64x16xf32>
    %98 = arith.addf %93, %97 : vector<64x16xf32>
    %c2_101 = arith.constant 2 : index
    %c0_102 = arith.constant 0 : index
    %c0_103 = arith.constant 0 : index
    %99 = vector.load %arg27[%c2_101, %c0_102, %c0_103] : memref<10x10x16xf32, #tpu.memory_space<vmem>>, vector<8x8x16xf32>
    %100 = vector.shape_cast %99 : vector<8x8x16xf32> to vector<64x16xf32>
    %c96 = arith.constant 96 : index
    %c0_104 = arith.constant 0 : index
    %101 = vector.load %arg4[%c96, %c0_104] : memref<144x16xf32, #tpu.memory_space<vmem>>, vector<16x16xf32>
    %cst_105 = arith.constant dense<0.000000e+00> : vector<64x16xf32>
    %102 = tpu.matmul %100, %101, %cst_105 {dimension_numbers = #tpu.dot_dimension_numbers<[1], [0], [0], [1], [0, 0, 1, 1], [], []>} : vector<64x16xf32>, vector<16x16xf32>, vector<64x16xf32> -> vector<64x16xf32>
    %103 = arith.addf %98, %102 : vector<64x16xf32>
    %c2_106 = arith.constant 2 : index
    %c1_107 = arith.constant 1 : index
    %c0_108 = arith.constant 0 : index
    %104 = vector.load %arg27[%c2_106, %c1_107, %c0_108] : memref<10x10x16xf32, #tpu.memory_space<vmem>>, vector<8x8x16xf32>
    %105 = vector.shape_cast %104 : vector<8x8x16xf32> to vector<64x16xf32>
    %c112 = arith.constant 112 : index
    %c0_109 = arith.constant 0 : index
    %106 = vector.load %arg4[%c112, %c0_109] : memref<144x16xf32, #tpu.memory_space<vmem>>, vector<16x16xf32>
    %cst_110 = arith.constant dense<0.000000e+00> : vector<64x16xf32>
    %107 = tpu.matmul %105, %106, %cst_110 {dimension_numbers = #tpu.dot_dimension_numbers<[1], [0], [0], [1], [0, 0, 1, 1], [], []>} : vector<64x16xf32>, vector<16x16xf32>, vector<64x16xf32> -> vector<64x16xf32>
    %108 = arith.addf %103, %107 : vector<64x16xf32>
    %c2_111 = arith.constant 2 : index
    %c2_112 = arith.constant 2 : index
    %c0_113 = arith.constant 0 : index
    %109 = vector.load %arg27[%c2_111, %c2_112, %c0_113] : memref<10x10x16xf32, #tpu.memory_space<vmem>>, vector<8x8x16xf32>
    %110 = vector.shape_cast %109 : vector<8x8x16xf32> to vector<64x16xf32>
    %c128 = arith.constant 128 : index
    %c0_114 = arith.constant 0 : index
    %111 = vector.load %arg4[%c128, %c0_114] : memref<144x16xf32, #tpu.memory_space<vmem>>, vector<16x16xf32>
    %cst_115 = arith.constant dense<0.000000e+00> : vector<64x16xf32>
    %112 = tpu.matmul %110, %111, %cst_115 {dimension_numbers = #tpu.dot_dimension_numbers<[1], [0], [0], [1], [0, 0, 1, 1], [], []>} : vector<64x16xf32>, vector<16x16xf32>, vector<64x16xf32> -> vector<64x16xf32>
    %113 = arith.addf %108, %112 : vector<64x16xf32>
    %c0_116 = arith.constant 0 : index
    %c0_117 = arith.constant 0 : index
    %114 = vector.load %arg5[%c0_116, %c0_117] : memref<1x16xf32, #tpu.memory_space<vmem>>, vector<1x16xf32>
    %115 = vector.broadcast %114 : vector<1x16xf32> to vector<64x16xf32>
    %116 = arith.addf %113, %115 : vector<64x16xf32>
    %cst_118 = arith.constant 0.000000e+00 : f32
    %117 = vector.broadcast %cst_118 : f32 to vector<64x16xf32>
    %118 = arith.subf %117, %116 : vector<64x16xf32>
    %119 = math.exp %118 : vector<64x16xf32>
    %cst_119 = arith.constant 1.000000e+00 : f32
    %120 = vector.broadcast %cst_119 : f32 to vector<64x16xf32>
    %121 = arith.addf %120, %119 : vector<64x16xf32>
    %cst_120 = arith.constant 1.000000e+00 : f32
    %122 = vector.broadcast %cst_120 : f32 to vector<64x16xf32>
    %123 = arith.divf %122, %121 : vector<64x16xf32>
    %124 = arith.mulf %116, %123 : vector<64x16xf32>
    %125 = arith.addf %124, %63 : vector<64x16xf32>
    %126 = vector.shape_cast %125 : vector<64x16xf32> to vector<8x8x16xf32>
    %cst_121 = arith.constant 0.000000e+00 : f32
    %127 = vector.broadcast %cst_121 : f32 to vector<10x10x16xf32>
    %c0_122 = arith.constant 0 : index
    %c0_123 = arith.constant 0 : index
    %c0_124 = arith.constant 0 : index
    %128 = vector.load %arg27[%c0_122, %c0_123, %c0_124] : memref<10x10x16xf32, #tpu.memory_space<vmem>>, vector<10x10x16xf32>
    tpu.vector_store %arg27[%c0_122, %c0_123, %c0_124], %127 {strides = array<i32>} : memref<10x10x16xf32, #tpu.memory_space<vmem>>, vector<10x10x16xf32>,
    %c1_125 = arith.constant 1 : index
    %c1_126 = arith.constant 1 : index
    %c0_127 = arith.constant 0 : index
    %129 = vector.load %arg27[%c1_125, %c1_126, %c0_127] : memref<10x10x16xf32, #tpu.memory_space<vmem>>, vector<8x8x16xf32>
    tpu.vector_store %arg27[%c1_125, %c1_126, %c0_127], %126 {strides = array<i32>} : memref<10x10x16xf32, #tpu.memory_space<vmem>>, vector<8x8x16xf32>,
    %cst_128 = arith.constant 0.000000e+00 : f32
    %130 = vector.broadcast %cst_128 : f32 to vector<64x64xf32>
    %c0_129 = arith.constant 0 : index
    %c0_130 = arith.constant 0 : index
    %c0_131 = arith.constant 0 : index
    %131 = vector.load %arg27[%c0_129, %c0_130, %c0_131] : memref<10x10x16xf32, #tpu.memory_space<vmem>>, vector<8x8x16xf32>
    %132 = vector.shape_cast %131 : vector<8x8x16xf32> to vector<64x16xf32>
    %c0_132 = arith.constant 0 : index
    %c0_133 = arith.constant 0 : index
    %133 = vector.load %arg6[%c0_132, %c0_133] : memref<144x64xf32, #tpu.memory_space<vmem>>, vector<16x64xf32>
    %cst_134 = arith.constant dense<0.000000e+00> : vector<64x64xf32>
    %134 = tpu.matmul %132, %133, %cst_134 {dimension_numbers = #tpu.dot_dimension_numbers<[1], [0], [0], [1], [0, 0, 1, 1], [], []>} : vector<64x16xf32>, vector<16x64xf32>, vector<64x64xf32> -> vector<64x64xf32>
    %135 = arith.addf %130, %134 : vector<64x64xf32>
    %c0_135 = arith.constant 0 : index
    %c1_136 = arith.constant 1 : index
    %c0_137 = arith.constant 0 : index
    %136 = vector.load %arg27[%c0_135, %c1_136, %c0_137] : memref<10x10x16xf32, #tpu.memory_space<vmem>>, vector<8x8x16xf32>
    %137 = vector.shape_cast %136 : vector<8x8x16xf32> to vector<64x16xf32>
    %c16_138 = arith.constant 16 : index
    %c0_139 = arith.constant 0 : index
    %138 = vector.load %arg6[%c16_138, %c0_139] : memref<144x64xf32, #tpu.memory_space<vmem>>, vector<16x64xf32>
    %cst_140 = arith.constant dense<0.000000e+00> : vector<64x64xf32>
    %139 = tpu.matmul %137, %138, %cst_140 {dimension_numbers = #tpu.dot_dimension_numbers<[1], [0], [0], [1], [0, 0, 1, 1], [], []>} : vector<64x16xf32>, vector<16x64xf32>, vector<64x64xf32> -> vector<64x64xf32>
    %140 = arith.addf %135, %139 : vector<64x64xf32>
    %c0_141 = arith.constant 0 : index
    %c2_142 = arith.constant 2 : index
    %c0_143 = arith.constant 0 : index
    %141 = vector.load %arg27[%c0_141, %c2_142, %c0_143] : memref<10x10x16xf32, #tpu.memory_space<vmem>>, vector<8x8x16xf32>
    %142 = vector.shape_cast %141 : vector<8x8x16xf32> to vector<64x16xf32>
    %c32_144 = arith.constant 32 : index
    %c0_145 = arith.constant 0 : index
    %143 = vector.load %arg6[%c32_144, %c0_145] : memref<144x64xf32, #tpu.memory_space<vmem>>, vector<16x64xf32>
    %cst_146 = arith.constant dense<0.000000e+00> : vector<64x64xf32>
    %144 = tpu.matmul %142, %143, %cst_146 {dimension_numbers = #tpu.dot_dimension_numbers<[1], [0], [0], [1], [0, 0, 1, 1], [], []>} : vector<64x16xf32>, vector<16x64xf32>, vector<64x64xf32> -> vector<64x64xf32>
    %145 = arith.addf %140, %144 : vector<64x64xf32>
    %c1_147 = arith.constant 1 : index
    %c0_148 = arith.constant 0 : index
    %c0_149 = arith.constant 0 : index
    %146 = vector.load %arg27[%c1_147, %c0_148, %c0_149] : memref<10x10x16xf32, #tpu.memory_space<vmem>>, vector<8x8x16xf32>
    %147 = vector.shape_cast %146 : vector<8x8x16xf32> to vector<64x16xf32>
    %c48_150 = arith.constant 48 : index
    %c0_151 = arith.constant 0 : index
    %148 = vector.load %arg6[%c48_150, %c0_151] : memref<144x64xf32, #tpu.memory_space<vmem>>, vector<16x64xf32>
    %cst_152 = arith.constant dense<0.000000e+00> : vector<64x64xf32>
    %149 = tpu.matmul %147, %148, %cst_152 {dimension_numbers = #tpu.dot_dimension_numbers<[1], [0], [0], [1], [0, 0, 1, 1], [], []>} : vector<64x16xf32>, vector<16x64xf32>, vector<64x64xf32> -> vector<64x64xf32>
    %150 = arith.addf %145, %149 : vector<64x64xf32>
    %c1_153 = arith.constant 1 : index
    %c1_154 = arith.constant 1 : index
    %c0_155 = arith.constant 0 : index
    %151 = vector.load %arg27[%c1_153, %c1_154, %c0_155] : memref<10x10x16xf32, #tpu.memory_space<vmem>>, vector<8x8x16xf32>
    %152 = vector.shape_cast %151 : vector<8x8x16xf32> to vector<64x16xf32>
    %c64_156 = arith.constant 64 : index
    %c0_157 = arith.constant 0 : index
    %153 = vector.load %arg6[%c64_156, %c0_157] : memref<144x64xf32, #tpu.memory_space<vmem>>, vector<16x64xf32>
    %cst_158 = arith.constant dense<0.000000e+00> : vector<64x64xf32>
    %154 = tpu.matmul %152, %153, %cst_158 {dimension_numbers = #tpu.dot_dimension_numbers<[1], [0], [0], [1], [0, 0, 1, 1], [], []>} : vector<64x16xf32>, vector<16x64xf32>, vector<64x64xf32> -> vector<64x64xf32>
    %155 = arith.addf %150, %154 : vector<64x64xf32>
    %c1_159 = arith.constant 1 : index
    %c2_160 = arith.constant 2 : index
    %c0_161 = arith.constant 0 : index
    %156 = vector.load %arg27[%c1_159, %c2_160, %c0_161] : memref<10x10x16xf32, #tpu.memory_space<vmem>>, vector<8x8x16xf32>
    %157 = vector.shape_cast %156 : vector<8x8x16xf32> to vector<64x16xf32>
    %c80_162 = arith.constant 80 : index
    %c0_163 = arith.constant 0 : index
    %158 = vector.load %arg6[%c80_162, %c0_163] : memref<144x64xf32, #tpu.memory_space<vmem>>, vector<16x64xf32>
    %cst_164 = arith.constant dense<0.000000e+00> : vector<64x64xf32>
    %159 = tpu.matmul %157, %158, %cst_164 {dimension_numbers = #tpu.dot_dimension_numbers<[1], [0], [0], [1], [0, 0, 1, 1], [], []>} : vector<64x16xf32>, vector<16x64xf32>, vector<64x64xf32> -> vector<64x64xf32>
    %160 = arith.addf %155, %159 : vector<64x64xf32>
    %c2_165 = arith.constant 2 : index
    %c0_166 = arith.constant 0 : index
    %c0_167 = arith.constant 0 : index
    %161 = vector.load %arg27[%c2_165, %c0_166, %c0_167] : memref<10x10x16xf32, #tpu.memory_space<vmem>>, vector<8x8x16xf32>
    %162 = vector.shape_cast %161 : vector<8x8x16xf32> to vector<64x16xf32>
    %c96_168 = arith.constant 96 : index
    %c0_169 = arith.constant 0 : index
    %163 = vector.load %arg6[%c96_168, %c0_169] : memref<144x64xf32, #tpu.memory_space<vmem>>, vector<16x64xf32>
    %cst_170 = arith.constant dense<0.000000e+00> : vector<64x64xf32>
    %164 = tpu.matmul %162, %163, %cst_170 {dimension_numbers = #tpu.dot_dimension_numbers<[1], [0], [0], [1], [0, 0, 1, 1], [], []>} : vector<64x16xf32>, vector<16x64xf32>, vector<64x64xf32> -> vector<64x64xf32>
    %165 = arith.addf %160, %164 : vector<64x64xf32>
    %c2_171 = arith.constant 2 : index
    %c1_172 = arith.constant 1 : index
    %c0_173 = arith.constant 0 : index
    %166 = vector.load %arg27[%c2_171, %c1_172, %c0_173] : memref<10x10x16xf32, #tpu.memory_space<vmem>>, vector<8x8x16xf32>
    %167 = vector.shape_cast %166 : vector<8x8x16xf32> to vector<64x16xf32>
    %c112_174 = arith.constant 112 : index
    %c0_175 = arith.constant 0 : index
    %168 = vector.load %arg6[%c112_174, %c0_175] : memref<144x64xf32, #tpu.memory_space<vmem>>, vector<16x64xf32>
    %cst_176 = arith.constant dense<0.000000e+00> : vector<64x64xf32>
    %169 = tpu.matmul %167, %168, %cst_176 {dimension_numbers = #tpu.dot_dimension_numbers<[1], [0], [0], [1], [0, 0, 1, 1], [], []>} : vector<64x16xf32>, vector<16x64xf32>, vector<64x64xf32> -> vector<64x64xf32>
    %170 = arith.addf %165, %169 : vector<64x64xf32>
    %c2_177 = arith.constant 2 : index
    %c2_178 = arith.constant 2 : index
    %c0_179 = arith.constant 0 : index
    %171 = vector.load %arg27[%c2_177, %c2_178, %c0_179] : memref<10x10x16xf32, #tpu.memory_space<vmem>>, vector<8x8x16xf32>
    %172 = vector.shape_cast %171 : vector<8x8x16xf32> to vector<64x16xf32>
    %c128_180 = arith.constant 128 : index
    %c0_181 = arith.constant 0 : index
    %173 = vector.load %arg6[%c128_180, %c0_181] : memref<144x64xf32, #tpu.memory_space<vmem>>, vector<16x64xf32>
    %cst_182 = arith.constant dense<0.000000e+00> : vector<64x64xf32>
    %174 = tpu.matmul %172, %173, %cst_182 {dimension_numbers = #tpu.dot_dimension_numbers<[1], [0], [0], [1], [0, 0, 1, 1], [], []>} : vector<64x16xf32>, vector<16x64xf32>, vector<64x64xf32> -> vector<64x64xf32>
    %175 = arith.addf %170, %174 : vector<64x64xf32>
    %c0_183 = arith.constant 0 : index
    %c0_184 = arith.constant 0 : index
    %176 = vector.load %arg24[%c0_183, %c0_184] : memref<16x64xf32, #tpu.memory_space<vmem>>, vector<16x64xf32>
    %cst_185 = arith.constant dense<0.000000e+00> : vector<16x64xf32>
    %177 = tpu.matmul %176, %175, %cst_185 {dimension_numbers = #tpu.dot_dimension_numbers<[1], [0], [0], [1], [0, 0, 1, 1], [], []>} : vector<16x64xf32>, vector<64x64xf32>, vector<16x64xf32> -> vector<16x64xf32>
    %c0_186 = arith.constant 0 : index
    %c0_187 = arith.constant 0 : index
    %178 = vector.load %arg7[%c0_186, %c0_187] : memref<1x64xf32, #tpu.memory_space<vmem>>, vector<1x64xf32>
    %179 = vector.broadcast %178 : vector<1x64xf32> to vector<16x64xf32>
    %180 = arith.addf %177, %179 : vector<16x64xf32>
    %cst_188 = arith.constant 0.000000e+00 : f32
    %181 = vector.broadcast %cst_188 : f32 to vector<16x64xf32>
    %182 = arith.subf %181, %180 : vector<16x64xf32>
    %183 = math.exp %182 : vector<16x64xf32>
    %cst_189 = arith.constant 1.000000e+00 : f32
    %184 = vector.broadcast %cst_189 : f32 to vector<16x64xf32>
    %185 = arith.addf %184, %183 : vector<16x64xf32>
    %cst_190 = arith.constant 1.000000e+00 : f32
    %186 = vector.broadcast %cst_190 : f32 to vector<16x64xf32>
    %187 = arith.divf %186, %185 : vector<16x64xf32>
    %188 = arith.mulf %180, %187 : vector<16x64xf32>
    %c0_191 = arith.constant 0 : index
    %c0_192 = arith.constant 0 : index
    %189 = vector.load %arg8[%c0_191, %c0_192] : memref<64x32xf32, #tpu.memory_space<vmem>>, vector<64x32xf32>
    %cst_193 = arith.constant dense<0.000000e+00> : vector<16x32xf32>
    %190 = tpu.matmul %188, %189, %cst_193 {dimension_numbers = #tpu.dot_dimension_numbers<[1], [0], [0], [1], [0, 0, 1, 1], [], []>} : vector<16x64xf32>, vector<64x32xf32>, vector<16x32xf32> -> vector<16x32xf32>
    %c0_194 = arith.constant 0 : index
    %c0_195 = arith.constant 0 : index
    %191 = vector.load %arg9[%c0_194, %c0_195] : memref<1x32xf32, #tpu.memory_space<vmem>>, vector<1x32xf32>
    %192 = vector.broadcast %191 : vector<1x32xf32> to vector<16x32xf32>
    %193 = arith.addf %190, %192 : vector<16x32xf32>
    %cst_196 = arith.constant 0.000000e+00 : f32
    %194 = vector.broadcast %cst_196 : f32 to vector<16x32xf32>
    %195 = arith.subf %194, %193 : vector<16x32xf32>
    %196 = math.exp %195 : vector<16x32xf32>
    %cst_197 = arith.constant 1.000000e+00 : f32
    %197 = vector.broadcast %cst_197 : f32 to vector<16x32xf32>
    %198 = arith.addf %197, %196 : vector<16x32xf32>
    %cst_198 = arith.constant 1.000000e+00 : f32
    %199 = vector.broadcast %cst_198 : f32 to vector<16x32xf32>
    %200 = arith.divf %199, %198 : vector<16x32xf32>
    %201 = arith.mulf %193, %200 : vector<16x32xf32>
    %c0_199 = arith.constant 0 : index
    %c0_200 = arith.constant 0 : index
    %202 = vector.load %arg10[%c0_199, %c0_200] : memref<32x128xf32, #tpu.memory_space<vmem>>, vector<32x128xf32>
    %cst_201 = arith.constant dense<0.000000e+00> : vector<16x128xf32>
    %203 = tpu.matmul %201, %202, %cst_201 {dimension_numbers = #tpu.dot_dimension_numbers<[1], [0], [0], [1], [0, 0, 1, 1], [], []>} : vector<16x32xf32>, vector<32x128xf32>, vector<16x128xf32> -> vector<16x128xf32>
    %c0_202 = arith.constant 0 : index
    %c0_203 = arith.constant 0 : index
    %204 = vector.load %arg11[%c0_202, %c0_203] : memref<1x128xf32, #tpu.memory_space<vmem>>, vector<1x128xf32>
    %205 = vector.broadcast %204 : vector<1x128xf32> to vector<16x128xf32>
    %206 = arith.addf %203, %205 : vector<16x128xf32>
    %cst_204 = arith.constant 0.000000e+00 : f32
    %207 = vector.broadcast %cst_204 : f32 to vector<16x128xf32>
    %208 = arith.subf %207, %206 : vector<16x128xf32>
    %209 = math.exp %208 : vector<16x128xf32>
    %cst_205 = arith.constant 1.000000e+00 : f32
    %210 = vector.broadcast %cst_205 : f32 to vector<16x128xf32>
    %211 = arith.addf %210, %209 : vector<16x128xf32>
    %cst_206 = arith.constant 1.000000e+00 : f32
    %212 = vector.broadcast %cst_206 : f32 to vector<16x128xf32>
    %213 = arith.divf %212, %211 : vector<16x128xf32>
    %214 = arith.mulf %206, %213 : vector<16x128xf32>
    %cst_207 = arith.constant 0.000000e+00 : f32
    %215 = vector.broadcast %cst_207 : f32 to vector<6x6x128xf32>
    %c0_208 = arith.constant 0 : index
    %c0_209 = arith.constant 0 : index
    %c0_210 = arith.constant 0 : index
    %216 = vector.load %arg28[%c0_208, %c0_209, %c0_210] : memref<6x6x128xf32, #tpu.memory_space<vmem>>, vector<6x6x128xf32>
    tpu.vector_store %arg28[%c0_208, %c0_209, %c0_210], %215 {strides = array<i32>} : memref<6x6x128xf32, #tpu.memory_space<vmem>>, vector<6x6x128xf32>,
    %217 = vector.shape_cast %214 : vector<16x128xf32> to vector<4x4x128xf32>
    %c1_211 = arith.constant 1 : index
    %c1_212 = arith.constant 1 : index
    %c0_213 = arith.constant 0 : index
    %218 = vector.load %arg28[%c1_211, %c1_212, %c0_213] : memref<6x6x128xf32, #tpu.memory_space<vmem>>, vector<4x4x128xf32>
    tpu.vector_store %arg28[%c1_211, %c1_212, %c0_213], %217 {strides = array<i32>} : memref<6x6x128xf32, #tpu.memory_space<vmem>>, vector<4x4x128xf32>,
    %cst_214 = arith.constant 0.000000e+00 : f32
    %219 = vector.broadcast %cst_214 : f32 to vector<4x4x128xf32>
    %c0_215 = arith.constant 0 : index
    %c0_216 = arith.constant 0 : index
    %c0_217 = arith.constant 0 : index
    %220 = vector.load %arg28[%c0_215, %c0_216, %c0_217] : memref<6x6x128xf32, #tpu.memory_space<vmem>>, vector<4x4x128xf32>
    %c0_218 = arith.constant 0 : index
    %c0_219 = arith.constant 0 : index
    %221 = vector.load %arg12[%c0_218, %c0_219] : memref<9x128xf32, #tpu.memory_space<vmem>>, vector<1x128xf32>
    %222 = vector.shape_cast %221 : vector<1x128xf32> to vector<128xf32>
    %223 = vector.shape_cast %222 : vector<128xf32> to vector<1x1x128xf32>
    %224 = vector.broadcast %223 : vector<1x1x128xf32> to vector<4x4x128xf32>
    %225 = arith.mulf %220, %224 : vector<4x4x128xf32>
    %226 = arith.addf %219, %225 : vector<4x4x128xf32>
    %c0_220 = arith.constant 0 : index
    %c1_221 = arith.constant 1 : index
    %c0_222 = arith.constant 0 : index
    %227 = vector.load %arg28[%c0_220, %c1_221, %c0_222] : memref<6x6x128xf32, #tpu.memory_space<vmem>>, vector<4x4x128xf32>
    %c1_223 = arith.constant 1 : index
    %c0_224 = arith.constant 0 : index
    %228 = vector.load %arg12[%c1_223, %c0_224] : memref<9x128xf32, #tpu.memory_space<vmem>>, vector<1x128xf32>
    %229 = vector.shape_cast %228 : vector<1x128xf32> to vector<128xf32>
    %230 = vector.shape_cast %229 : vector<128xf32> to vector<1x1x128xf32>
    %231 = vector.broadcast %230 : vector<1x1x128xf32> to vector<4x4x128xf32>
    %232 = arith.mulf %227, %231 : vector<4x4x128xf32>
    %233 = arith.addf %226, %232 : vector<4x4x128xf32>
    %c0_225 = arith.constant 0 : index
    %c2_226 = arith.constant 2 : index
    %c0_227 = arith.constant 0 : index
    %234 = vector.load %arg28[%c0_225, %c2_226, %c0_227] : memref<6x6x128xf32, #tpu.memory_space<vmem>>, vector<4x4x128xf32>
    %c2_228 = arith.constant 2 : index
    %c0_229 = arith.constant 0 : index
    %235 = vector.load %arg12[%c2_228, %c0_229] : memref<9x128xf32, #tpu.memory_space<vmem>>, vector<1x128xf32>
    %236 = vector.shape_cast %235 : vector<1x128xf32> to vector<128xf32>
    %237 = vector.shape_cast %236 : vector<128xf32> to vector<1x1x128xf32>
    %238 = vector.broadcast %237 : vector<1x1x128xf32> to vector<4x4x128xf32>
    %239 = arith.mulf %234, %238 : vector<4x4x128xf32>
    %240 = arith.addf %233, %239 : vector<4x4x128xf32>
    %c1_230 = arith.constant 1 : index
    %c0_231 = arith.constant 0 : index
    %c0_232 = arith.constant 0 : index
    %241 = vector.load %arg28[%c1_230, %c0_231, %c0_232] : memref<6x6x128xf32, #tpu.memory_space<vmem>>, vector<4x4x128xf32>
    %c3_233 = arith.constant 3 : index
    %c0_234 = arith.constant 0 : index
    %242 = vector.load %arg12[%c3_233, %c0_234] : memref<9x128xf32, #tpu.memory_space<vmem>>, vector<1x128xf32>
    %243 = vector.shape_cast %242 : vector<1x128xf32> to vector<128xf32>
    %244 = vector.shape_cast %243 : vector<128xf32> to vector<1x1x128xf32>
    %245 = vector.broadcast %244 : vector<1x1x128xf32> to vector<4x4x128xf32>
    %246 = arith.mulf %241, %245 : vector<4x4x128xf32>
    %247 = arith.addf %240, %246 : vector<4x4x128xf32>
    %c1_235 = arith.constant 1 : index
    %c1_236 = arith.constant 1 : index
    %c0_237 = arith.constant 0 : index
    %248 = vector.load %arg28[%c1_235, %c1_236, %c0_237] : memref<6x6x128xf32, #tpu.memory_space<vmem>>, vector<4x4x128xf32>
    %c4 = arith.constant 4 : index
    %c0_238 = arith.constant 0 : index
    %249 = vector.load %arg12[%c4, %c0_238] : memref<9x128xf32, #tpu.memory_space<vmem>>, vector<1x128xf32>
    %250 = vector.shape_cast %249 : vector<1x128xf32> to vector<128xf32>
    %251 = vector.shape_cast %250 : vector<128xf32> to vector<1x1x128xf32>
    %252 = vector.broadcast %251 : vector<1x1x128xf32> to vector<4x4x128xf32>
    %253 = arith.mulf %248, %252 : vector<4x4x128xf32>
    %254 = arith.addf %247, %253 : vector<4x4x128xf32>
    %c1_239 = arith.constant 1 : index
    %c2_240 = arith.constant 2 : index
    %c0_241 = arith.constant 0 : index
    %255 = vector.load %arg28[%c1_239, %c2_240, %c0_241] : memref<6x6x128xf32, #tpu.memory_space<vmem>>, vector<4x4x128xf32>
    %c5 = arith.constant 5 : index
    %c0_242 = arith.constant 0 : index
    %256 = vector.load %arg12[%c5, %c0_242] : memref<9x128xf32, #tpu.memory_space<vmem>>, vector<1x128xf32>
    %257 = vector.shape_cast %256 : vector<1x128xf32> to vector<128xf32>
    %258 = vector.shape_cast %257 : vector<128xf32> to vector<1x1x128xf32>
    %259 = vector.broadcast %258 : vector<1x1x128xf32> to vector<4x4x128xf32>
    %260 = arith.mulf %255, %259 : vector<4x4x128xf32>
    %261 = arith.addf %254, %260 : vector<4x4x128xf32>
    %c2_243 = arith.constant 2 : index
    %c0_244 = arith.constant 0 : index
    %c0_245 = arith.constant 0 : index
    %262 = vector.load %arg28[%c2_243, %c0_244, %c0_245] : memref<6x6x128xf32, #tpu.memory_space<vmem>>, vector<4x4x128xf32>
    %c6_246 = arith.constant 6 : index
    %c0_247 = arith.constant 0 : index
    %263 = vector.load %arg12[%c6_246, %c0_247] : memref<9x128xf32, #tpu.memory_space<vmem>>, vector<1x128xf32>
    %264 = vector.shape_cast %263 : vector<1x128xf32> to vector<128xf32>
    %265 = vector.shape_cast %264 : vector<128xf32> to vector<1x1x128xf32>
    %266 = vector.broadcast %265 : vector<1x1x128xf32> to vector<4x4x128xf32>
    %267 = arith.mulf %262, %266 : vector<4x4x128xf32>
    %268 = arith.addf %261, %267 : vector<4x4x128xf32>
    %c2_248 = arith.constant 2 : index
    %c1_249 = arith.constant 1 : index
    %c0_250 = arith.constant 0 : index
    %269 = vector.load %arg28[%c2_248, %c1_249, %c0_250] : memref<6x6x128xf32, #tpu.memory_space<vmem>>, vector<4x4x128xf32>
    %c7 = arith.constant 7 : index
    %c0_251 = arith.constant 0 : index
    %270 = vector.load %arg12[%c7, %c0_251] : memref<9x128xf32, #tpu.memory_space<vmem>>, vector<1x128xf32>
    %271 = vector.shape_cast %270 : vector<1x128xf32> to vector<128xf32>
    %272 = vector.shape_cast %271 : vector<128xf32> to vector<1x1x128xf32>
    %273 = vector.broadcast %272 : vector<1x1x128xf32> to vector<4x4x128xf32>
    %274 = arith.mulf %269, %273 : vector<4x4x128xf32>
    %275 = arith.addf %268, %274 : vector<4x4x128xf32>
    %c2_252 = arith.constant 2 : index
    %c2_253 = arith.constant 2 : index
    %c0_254 = arith.constant 0 : index
    %276 = vector.load %arg28[%c2_252, %c2_253, %c0_254] : memref<6x6x128xf32, #tpu.memory_space<vmem>>, vector<4x4x128xf32>
    %c8 = arith.constant 8 : index
    %c0_255 = arith.constant 0 : index
    %277 = vector.load %arg12[%c8, %c0_255] : memref<9x128xf32, #tpu.memory_space<vmem>>, vector<1x128xf32>
    %278 = vector.shape_cast %277 : vector<1x128xf32> to vector<128xf32>
    %279 = vector.shape_cast %278 : vector<128xf32> to vector<1x1x128xf32>
    %280 = vector.broadcast %279 : vector<1x1x128xf32> to vector<4x4x128xf32>
    %281 = arith.mulf %276, %280 : vector<4x4x128xf32>
    %282 = arith.addf %275, %281 : vector<4x4x128xf32>
    %283 = vector.shape_cast %282 : vector<4x4x128xf32> to vector<16x128xf32>
    %cst_256 = arith.constant 0.000000e+00 : f32
    %284 = vector.broadcast %cst_256 : f32 to vector<16x128xf32>
    %285 = arith.subf %284, %283 : vector<16x128xf32>
    %286 = math.exp %285 : vector<16x128xf32>
    %cst_257 = arith.constant 1.000000e+00 : f32
    %287 = vector.broadcast %cst_257 : f32 to vector<16x128xf32>
    %288 = arith.addf %287, %286 : vector<16x128xf32>
    %cst_258 = arith.constant 1.000000e+00 : f32
    %289 = vector.broadcast %cst_258 : f32 to vector<16x128xf32>
    %290 = arith.divf %289, %288 : vector<16x128xf32>
    %291 = arith.mulf %283, %290 : vector<16x128xf32>
    %cst_259 = arith.constant dense<0.000000e+00> : vector<128xf32>
    %292 = vector.multi_reduction <add>, %291, %cst_259 [0] : vector<16x128xf32> to vector<128xf32>
    %293 = vector.shape_cast %292 : vector<128xf32> to vector<1x128xf32>
    %cst_260 = arith.constant 1.600000e+01 : f32
    %294 = vector.broadcast %cst_260 : f32 to vector<1x128xf32>
    %295 = arith.divf %293, %294 : vector<1x128xf32>
    %c0_261 = arith.constant 0 : index
    %c0_262 = arith.constant 0 : index
    %296 = vector.load %arg13[%c0_261, %c0_262] : memref<128x8xf32, #tpu.memory_space<vmem>>, vector<128x8xf32>
    %cst_263 = arith.constant dense<0.000000e+00> : vector<1x8xf32>
    %297 = tpu.matmul %295, %296, %cst_263 {dimension_numbers = #tpu.dot_dimension_numbers<[1], [0], [0], [1], [0, 0, 1, 1], [], []>} : vector<1x128xf32>, vector<128x8xf32>, vector<1x8xf32> -> vector<1x8xf32>
    %c0_264 = arith.constant 0 : index
    %c0_265 = arith.constant 0 : index
    %298 = vector.load %arg14[%c0_264, %c0_265] : memref<1x8xf32, #tpu.memory_space<vmem>>, vector<1x8xf32>
    %299 = arith.addf %297, %298 : vector<1x8xf32>
    %cst_266 = arith.constant 0.000000e+00 : f32
    %300 = vector.broadcast %cst_266 : f32 to vector<1x8xf32>
    %301 = arith.subf %300, %299 : vector<1x8xf32>
    %302 = math.exp %301 : vector<1x8xf32>
    %cst_267 = arith.constant 1.000000e+00 : f32
    %303 = vector.broadcast %cst_267 : f32 to vector<1x8xf32>
    %304 = arith.addf %303, %302 : vector<1x8xf32>
    %cst_268 = arith.constant 1.000000e+00 : f32
    %305 = vector.broadcast %cst_268 : f32 to vector<1x8xf32>
    %306 = arith.divf %305, %304 : vector<1x8xf32>
    %307 = arith.mulf %299, %306 : vector<1x8xf32>
    %c0_269 = arith.constant 0 : index
    %c0_270 = arith.constant 0 : index
    %308 = vector.load %arg15[%c0_269, %c0_270] : memref<8x128xf32, #tpu.memory_space<vmem>>, vector<8x128xf32>
    %cst_271 = arith.constant dense<0.000000e+00> : vector<1x128xf32>
    %309 = tpu.matmul %307, %308, %cst_271 {dimension_numbers = #tpu.dot_dimension_numbers<[1], [0], [0], [1], [0, 0, 1, 1], [], []>} : vector<1x8xf32>, vector<8x128xf32>, vector<1x128xf32> -> vector<1x128xf32>
    %c0_272 = arith.constant 0 : index
    %c0_273 = arith.constant 0 : index
    %310 = vector.load %arg16[%c0_272, %c0_273] : memref<1x128xf32, #tpu.memory_space<vmem>>, vector<1x128xf32>
    %311 = arith.addf %309, %310 : vector<1x128xf32>
    %cst_274 = arith.constant 0.000000e+00 : f32
    %312 = vector.broadcast %cst_274 : f32 to vector<1x128xf32>
    %313 = arith.subf %312, %311 : vector<1x128xf32>
    %314 = math.exp %313 : vector<1x128xf32>
    %cst_275 = arith.constant 1.000000e+00 : f32
    %315 = vector.broadcast %cst_275 : f32 to vector<1x128xf32>
    %316 = arith.addf %315, %314 : vector<1x128xf32>
    %cst_276 = arith.constant 1.000000e+00 : f32
    %317 = vector.broadcast %cst_276 : f32 to vector<1x128xf32>
    %318 = arith.divf %317, %316 : vector<1x128xf32>
    %319 = vector.broadcast %318 : vector<1x128xf32> to vector<16x128xf32>
    %320 = arith.mulf %291, %319 : vector<16x128xf32>
    %c0_277 = arith.constant 0 : index
    %c0_278 = arith.constant 0 : index
    %321 = vector.load %arg17[%c0_277, %c0_278] : memref<128x32xf32, #tpu.memory_space<vmem>>, vector<128x32xf32>
    %cst_279 = arith.constant dense<0.000000e+00> : vector<16x32xf32>
    %322 = tpu.matmul %320, %321, %cst_279 {dimension_numbers = #tpu.dot_dimension_numbers<[1], [0], [0], [1], [0, 0, 1, 1], [], []>} : vector<16x128xf32>, vector<128x32xf32>, vector<16x32xf32> -> vector<16x32xf32>
    %c0_280 = arith.constant 0 : index
    %c0_281 = arith.constant 0 : index
    %323 = vector.load %arg18[%c0_280, %c0_281] : memref<1x32xf32, #tpu.memory_space<vmem>>, vector<1x32xf32>
    %324 = vector.broadcast %323 : vector<1x32xf32> to vector<16x32xf32>
    %325 = arith.addf %322, %324 : vector<16x32xf32>
    %cst_282 = arith.constant 0.000000e+00 : f32
    %326 = vector.broadcast %cst_282 : f32 to vector<16x32xf32>
    %327 = arith.subf %326, %325 : vector<16x32xf32>
    %328 = math.exp %327 : vector<16x32xf32>
    %cst_283 = arith.constant 1.000000e+00 : f32
    %329 = vector.broadcast %cst_283 : f32 to vector<16x32xf32>
    %330 = arith.addf %329, %328 : vector<16x32xf32>
    %cst_284 = arith.constant 1.000000e+00 : f32
    %331 = vector.broadcast %cst_284 : f32 to vector<16x32xf32>
    %332 = arith.divf %331, %330 : vector<16x32xf32>
    %333 = arith.mulf %325, %332 : vector<16x32xf32>
    %334 = arith.addf %333, %201 : vector<16x32xf32>
    %c0_285 = arith.constant 0 : index
    %c0_286 = arith.constant 0 : index
    %335 = vector.load %arg19[%c0_285, %c0_286] : memref<32x128xf32, #tpu.memory_space<vmem>>, vector<32x128xf32>
    %cst_287 = arith.constant dense<0.000000e+00> : vector<16x128xf32>
    %336 = tpu.matmul %334, %335, %cst_287 {dimension_numbers = #tpu.dot_dimension_numbers<[1], [0], [0], [1], [0, 0, 1, 1], [], []>} : vector<16x32xf32>, vector<32x128xf32>, vector<16x128xf32> -> vector<16x128xf32>
    %c0_288 = arith.constant 0 : index
    %c0_289 = arith.constant 0 : index
    %337 = vector.load %arg20[%c0_288, %c0_289] : memref<1x128xf32, #tpu.memory_space<vmem>>, vector<1x128xf32>
    %338 = vector.broadcast %337 : vector<1x128xf32> to vector<16x128xf32>
    %339 = arith.addf %336, %338 : vector<16x128xf32>
    %cst_290 = arith.constant 0.000000e+00 : f32
    %340 = vector.broadcast %cst_290 : f32 to vector<16x128xf32>
    %341 = arith.subf %340, %339 : vector<16x128xf32>
    %342 = math.exp %341 : vector<16x128xf32>
    %cst_291 = arith.constant 1.000000e+00 : f32
    %343 = vector.broadcast %cst_291 : f32 to vector<16x128xf32>
    %344 = arith.addf %343, %342 : vector<16x128xf32>
    %cst_292 = arith.constant 1.000000e+00 : f32
    %345 = vector.broadcast %cst_292 : f32 to vector<16x128xf32>
    %346 = arith.divf %345, %344 : vector<16x128xf32>
    %347 = arith.mulf %339, %346 : vector<16x128xf32>
    %cst_293 = arith.constant dense<0.000000e+00> : vector<128xf32>
    %348 = vector.multi_reduction <add>, %347, %cst_293 [0] : vector<16x128xf32> to vector<128xf32>
    %349 = vector.shape_cast %348 : vector<128xf32> to vector<1x128xf32>
    %cst_294 = arith.constant 1.600000e+01 : f32
    %350 = vector.broadcast %cst_294 : f32 to vector<1x128xf32>
    %351 = arith.divf %349, %350 : vector<1x128xf32>
    %c0_295 = arith.constant 0 : index
    %c0_296 = arith.constant 0 : index
    %352 = vector.load %arg21[%c0_295, %c0_296] : memref<128x128xf32, #tpu.memory_space<vmem>>, vector<128x128xf32>
    %cst_297 = arith.constant dense<0.000000e+00> : vector<1x128xf32>
    %353 = tpu.matmul %351, %352, %cst_297 {dimension_numbers = #tpu.dot_dimension_numbers<[1], [0], [0], [1], [0, 0, 1, 1], [], []>} : vector<1x128xf32>, vector<128x128xf32>, vector<1x128xf32> -> vector<1x128xf32>
    %c0_298 = arith.constant 0 : index
    %c0_299 = arith.constant 0 : index
    %354 = vector.load %arg22[%c0_298, %c0_299] : memref<1x128xf32, #tpu.memory_space<vmem>>, vector<1x128xf32>
    %355 = arith.addf %353, %354 : vector<1x128xf32>
    %c0_300 = arith.constant 0 : index
    %c0_301 = arith.constant 0 : index
    %c0_302 = arith.constant 0 : index
    %356 = vector.load %arg25[%c0_300, %c0_301, %c0_302] : memref<1x1x128xf32, #tpu.memory_space<vmem>>, vector<1x1x128xf32>
    %357 = vector.shape_cast %356 : vector<1x1x128xf32> to vector<1x128xf32>
    %358 = vector.shape_cast %355 : vector<1x128xf32> to vector<1x1x128xf32>
    tpu.vector_store %arg25[%c0_300, %c0_301, %c0_302], %358 {strides = array<i32>} : memref<1x1x128xf32, #tpu.memory_space<vmem>>, vector<1x1x128xf32>,
    return
  }
  func.func @transform_0(%arg0: i32) -> (i32, i32, i32, i32) {
    %c0_i32 = arith.constant 0 : i32
    %c0_i32_0 = arith.constant 0 : i32
    %c0_i32_1 = arith.constant 0 : i32
    %c0_i32_2 = arith.constant 0 : i32
    return %arg0, %c0_i32, %c0_i32_0, %c0_i32_1 : i32, i32, i32, i32
  }
  func.func @transform_1(%arg0: i32) -> (i32, i32) {
    %c0_i32 = arith.constant 0 : i32
    %c0_i32_0 = arith.constant 0 : i32
    %c0_i32_1 = arith.constant 0 : i32
    return %c0_i32, %c0_i32_0 : i32, i32
  }
  func.func @transform_2(%arg0: i32) -> (i32, i32) {
    %c0_i32 = arith.constant 0 : i32
    %c0_i32_0 = arith.constant 0 : i32
    %c0_i32_1 = arith.constant 0 : i32
    return %c0_i32, %c0_i32_0 : i32, i32
  }
  func.func @transform_3(%arg0: i32) -> (i32, i32) {
    %c0_i32 = arith.constant 0 : i32
    %c0_i32_0 = arith.constant 0 : i32
    %c0_i32_1 = arith.constant 0 : i32
    return %c0_i32, %c0_i32_0 : i32, i32
  }
  func.func @transform_4(%arg0: i32) -> (i32, i32) {
    %c0_i32 = arith.constant 0 : i32
    %c0_i32_0 = arith.constant 0 : i32
    %c0_i32_1 = arith.constant 0 : i32
    return %c0_i32, %c0_i32_0 : i32, i32
  }
  func.func @transform_5(%arg0: i32) -> (i32, i32) {
    %c0_i32 = arith.constant 0 : i32
    %c0_i32_0 = arith.constant 0 : i32
    %c0_i32_1 = arith.constant 0 : i32
    return %c0_i32, %c0_i32_0 : i32, i32
  }
  func.func @transform_6(%arg0: i32) -> (i32, i32) {
    %c0_i32 = arith.constant 0 : i32
    %c0_i32_0 = arith.constant 0 : i32
    %c0_i32_1 = arith.constant 0 : i32
    return %c0_i32, %c0_i32_0 : i32, i32
  }
  func.func @transform_7(%arg0: i32) -> (i32, i32) {
    %c0_i32 = arith.constant 0 : i32
    %c0_i32_0 = arith.constant 0 : i32
    %c0_i32_1 = arith.constant 0 : i32
    return %c0_i32, %c0_i32_0 : i32, i32
  }
  func.func @transform_8(%arg0: i32) -> (i32, i32) {
    %c0_i32 = arith.constant 0 : i32
    %c0_i32_0 = arith.constant 0 : i32
    %c0_i32_1 = arith.constant 0 : i32
    return %c0_i32, %c0_i32_0 : i32, i32
  }
  func.func @transform_9(%arg0: i32) -> (i32, i32) {
    %c0_i32 = arith.constant 0 : i32
    %c0_i32_0 = arith.constant 0 : i32
    %c0_i32_1 = arith.constant 0 : i32
    return %c0_i32, %c0_i32_0 : i32, i32
  }
  func.func @transform_10(%arg0: i32) -> (i32, i32) {
    %c0_i32 = arith.constant 0 : i32
    %c0_i32_0 = arith.constant 0 : i32
    %c0_i32_1 = arith.constant 0 : i32
    return %c0_i32, %c0_i32_0 : i32, i32
  }
  func.func @transform_11(%arg0: i32) -> (i32, i32) {
    %c0_i32 = arith.constant 0 : i32
    %c0_i32_0 = arith.constant 0 : i32
    %c0_i32_1 = arith.constant 0 : i32
    return %c0_i32, %c0_i32_0 : i32, i32
  }
  func.func @transform_12(%arg0: i32) -> (i32, i32) {
    %c0_i32 = arith.constant 0 : i32
    %c0_i32_0 = arith.constant 0 : i32
    %c0_i32_1 = arith.constant 0 : i32
    return %c0_i32, %c0_i32_0 : i32, i32
  }
  func.func @transform_13(%arg0: i32) -> (i32, i32) {
    %c0_i32 = arith.constant 0 : i32
    %c0_i32_0 = arith.constant 0 : i32
    %c0_i32_1 = arith.constant 0 : i32
    return %c0_i32, %c0_i32_0 : i32, i32
  }
  func.func @transform_14(%arg0: i32) -> (i32, i32) {
    %c0_i32 = arith.constant 0 : i32
    %c0_i32_0 = arith.constant 0 : i32
    %c0_i32_1 = arith.constant 0 : i32
    return %c0_i32, %c0_i32_0 : i32, i32
  }
  func.func @transform_15(%arg0: i32) -> (i32, i32) {
    %c0_i32 = arith.constant 0 : i32
    %c0_i32_0 = arith.constant 0 : i32
    %c0_i32_1 = arith.constant 0 : i32
    return %c0_i32, %c0_i32_0 : i32, i32
  }
  func.func @transform_16(%arg0: i32) -> (i32, i32) {
    %c0_i32 = arith.constant 0 : i32
    %c0_i32_0 = arith.constant 0 : i32
    %c0_i32_1 = arith.constant 0 : i32
    return %c0_i32, %c0_i32_0 : i32, i32
  }
  func.func @transform_17(%arg0: i32) -> (i32, i32) {
    %c0_i32 = arith.constant 0 : i32
    %c0_i32_0 = arith.constant 0 : i32
    %c0_i32_1 = arith.constant 0 : i32
    return %c0_i32, %c0_i32_0 : i32, i32
  }
  func.func @transform_18(%arg0: i32) -> (i32, i32) {
    %c0_i32 = arith.constant 0 : i32
    %c0_i32_0 = arith.constant 0 : i32
    %c0_i32_1 = arith.constant 0 : i32
    return %c0_i32, %c0_i32_0 : i32, i32
  }
  func.func @transform_19(%arg0: i32) -> (i32, i32) {
    %c0_i32 = arith.constant 0 : i32
    %c0_i32_0 = arith.constant 0 : i32
    %c0_i32_1 = arith.constant 0 : i32
    return %c0_i32, %c0_i32_0 : i32, i32
  }
  func.func @transform_20(%arg0: i32) -> (i32, i32) {
    %c0_i32 = arith.constant 0 : i32
    %c0_i32_0 = arith.constant 0 : i32
    %c0_i32_1 = arith.constant 0 : i32
    return %c0_i32, %c0_i32_0 : i32, i32
  }
  func.func @transform_21(%arg0: i32) -> (i32, i32) {
    %c0_i32 = arith.constant 0 : i32
    %c0_i32_0 = arith.constant 0 : i32
    %c0_i32_1 = arith.constant 0 : i32
    return %c0_i32, %c0_i32_0 : i32, i32
  }
  func.func @transform_22(%arg0: i32) -> (i32, i32) {
    %c0_i32 = arith.constant 0 : i32
    %c0_i32_0 = arith.constant 0 : i32
    %c0_i32_1 = arith.constant 0 : i32
    return %c0_i32, %c0_i32_0 : i32, i32
  }
  func.func @transform_23(%arg0: i32) -> (i32, i32) {
    %c0_i32 = arith.constant 0 : i32
    %c0_i32_0 = arith.constant 0 : i32
    %c0_i32_1 = arith.constant 0 : i32
    return %c0_i32, %c0_i32_0 : i32, i32
  }
  func.func @transform_24(%arg0: i32) -> (i32, i32, i32) {
    %c0_i32 = arith.constant 0 : i32
    %c0_i32_0 = arith.constant 0 : i32
    %c0_i32_1 = arith.constant 0 : i32
    return %arg0, %c0_i32, %c0_i32_0 : i32, i32, i32
  }
}

</mosaic_0001>

<bundles_post_ra>
// kernel: forward.1
= control target key start
LH: loop header
LB: loop body
LE: loop exit
PB: predicated region body
PF: predicated region fallthrough
CT: control target
= control target key end

     0   :  { %s9681_s0 = inlined_call_operand.vmem [shape: f32[2,16,16,3], index: 0, kind: input, shape index: {}]   ;;  %s9682_s1 = inlined_call_operand.vmem [shape: f32[27,16], index: 1, kind: input, shape index: {}]   ;;  %s9683_s2 = inlined_call_operand.vmem [shape: f32[1,16], index: 2, kind: input, shape index: {}]   ;;  %s9684_s3 = inlined_call_operand.vmem [shape: f32[144,16], index: 3, kind: input, shape index: {}]   ;;  %s9685_s4 = inlined_call_operand.vmem [shape: f32[1,16], index: 4, kind: input, shape index: {}]   ;;  %s9686_s5 = inlined_call_operand.vmem [shape: f32[144,64], index: 5, kind: input, shape index: {}]   ;;  %s9687_s6 = inlined_call_operand.vmem [shape: f32[1,64], index: 6, kind: input, shape index: {}]   ;;  %s9688_s7 = inlined_call_operand.vmem [shape: f32[64,32], index: 7, kind: input, shape index: {}]   ;;  %s9689_s8 = inlined_call_operand.vmem [shape: f32[1,32], index: 8, kind: input, shape index: {}]   ;;  %s9690_s9 = inlined_call_operand.vmem [shape: f32[32,128], index: 9, kind: input, shape index: {}]   ;;  %s9691_s10 = inlined_call_operand.vmem [shape: f32[1,128], index: 10, kind: input, shape index: {}]   ;;  %s9692_s11 = inlined_call_operand.vmem [shape: f32[9,128], index: 11, kind: input, shape index: {}]   ;;  %s9693_s12 = inlined_call_operand.vmem [shape: f32[128,8], index: 12, kind: input, shape index: {}]   ;;  %s9694_s13 = inlined_call_operand.vmem [shape: f32[1,8], index: 13, kind: input, shape index: {}]   ;;  %s9695_s14 = inlined_call_operand.vmem [shape: f32[8,128], index: 14, kind: input, shape index: {}]   ;;  %s9696_s15 = inlined_call_operand.vmem [shape: f32[1,128], index: 15, kind: input, shape index: {}]   ;;  %s9697_s16 = inlined_call_operand.vmem [shape: f32[128,32], index: 16, kind: input, shape index: {}]   ;;  %s9698_s17 = inlined_call_operand.vmem [shape: f32[1,32], index: 17, kind: input, shape index: {}]   ;;  %s9699_s18 = inlined_call_operand.vmem [shape: f32[32,128], index: 18, kind: input, shape index: {}]   ;;  %s9700_s19 = inlined_call_operand.vmem [shape: f32[1,128], index: 19, kind: input, shape index: {}]   ;;  %s9701_s20 = inlined_call_operand.vmem [shape: f32[128,128], index: 20, kind: input, shape index: {}]   ;;  %s9702_s21 = inlined_call_operand.vmem [shape: f32[1,128], index: 21, kind: input, shape index: {}]   ;;  %s9703_s22 = inlined_call_operand.vmem [shape: f32[64,256], index: 22, kind: input, shape index: {}]   ;;  %s9704_s23 = inlined_call_operand.vmem [shape: f32[16,64], index: 23, kind: input, shape index: {}]   ;;  %s9705_s24 = inlined_call_operand.hbm [shape: f32[2,1,128], index: 24, kind: output, shape index: {}]  }
   0x1   :  { %9771 = sst [smem:[#allocation83_spill]] %s9681_s0 }
   0x2   :  { %9772 = sst [smem:[#allocation84_spill]] %s9682_s1 }
   0x3   :  { %9773 = sst [smem:[#allocation85_spill]] %s9683_s2 }
   0x4   :  { %9774 = sst [smem:[#allocation86_spill]] %s9684_s3 }
   0x5   :  { %9775 = sst [smem:[#allocation87_spill]] %s9685_s4 }
   0x6   :  { %9776 = sst [smem:[#allocation88_spill]] %s9686_s5 }
   0x7   :  { %9777 = sst [smem:[#allocation89_spill]] %s9687_s6 }
   0x8   :  { %9778 = sst [smem:[#allocation90_spill]] %s9688_s7 }
   0x9   :  { %9779 = sst [smem:[#allocation91_spill]] %s9689_s8 }
   0xa   :  { %9780 = sst [smem:[#allocation92_spill]] %s9690_s9 }
   0xb   :  { %9781 = sst [smem:[#allocation93_spill]] %s9703_s22 }
   0xc   :  { %9782 = sst [smem:[#allocation94_spill]] %s9704_s23 }
   0xd   :  { %29 = vsyncpa [#allocation6], 0 }
   0xe   :  { %31 = vsyncpa [#allocation6 + $0x1], 0  ;;  %s6979_s5 = smov 0   ;;  %s6981_s26 = smov 0  }
   0xf   :  { %s6983_s27 = smov 0   ;;  %s6985_s28 = smov 0  }
  0x10 LB: > { %9783 = sst [smem:[#allocation8_spill]] %s6846_s27  ;;  %s7000_s6 = sadd.s32 4294967295, %s6850_s28   ;;  %s6850_s28 = sphi %s6985_s28, %s10049_s28   ;;  %s6846_s27 = sphi %s6983_s27, %s10051_s27   ;;  %s6842_s26 = sphi %s6981_s26, %s10053_s26   ;;  %s6838_s5 = sphi %s6979_s5, %s10052_s5  }
  0x11   : > { %s6141_s2 = sadd.s32 4294967294, %s6850_s28   ;;  %s7004_s29 = sadd.s32 1, %s6850_s28  }
  0x12   : > { %9784 = sst [smem:[#allocation9_spill]] %s7004_s29  ;;  %s553_s0 = sadd.s32 1, %s6846_s27 }
  0x13   : > { %s550_s7 = ssub.s32 %s6850_s28, %s7004_s29  ;;  %p563_p0 = scmp.ne.s32.totalorder %s6846_s27, %s6842_s26 }
  0x14   : > { %p551_p1 = scmp.eq.s32.totalorder %s550_s7, 0  ;;  %p564_p2 = scmp.eq.s32.totalorder %s7000_s6, 1 }
  0x15   : > { %p569_p3 = scmp.ne.s32.totalorder %s6842_s26, %s6838_s5  ;;  %p570_p4 = scmp.eq.s32.totalorder %s6141_s2, 1 }
  0x16   : > { %s7015_s30 = scalar_select %p551_p1, %s6846_s27, %s553_s0  }
  0x17   : > { %p7017_p5 = por %p564_p2, %p563_p0  ;;  %p7021_p6 = por %p570_p4, %p569_p3 }
  0x18   : > { %9785 = sst [smem:[#allocation10_spill]] %s7015_s30  ;;  %p6144_p7 = scmp.ge.s32.totalorder %s6850_s28, 1 }
  0x19   : > { %s9787_s25 = scalar_select %p7021_p6, 1, 0 }
  0x1a   : > { %p665_p8 = scmp.lt.s32.totalorder %s6850_s28, 3 }
  0x1b   : > { %9788 = sst [smem:[#allocation11_spill]] %s9787_s25 }
  0x1c   : > { %p666_p9 = pnand %p6144_p7, %p665_p8 }
  0x1e   : > { %669 = sbr.rel (%p666_p9) target bundleno = 3215 (0xc8f), region = 116 }
  0x23   : > { %s9789_s1 = sld [smem:[#allocation84_spill]]  ;;  %vm1018_vm0 = vcmask 1042432   ;;  %vm767_vm1 = vcmask 23552   ;;  %v9710_v3 = vmov 0.0   ;;  %p730_p10 = scmp.lt.s32.totalorder %s7000_s6, 1  ;;  %vm770_vm2 = vcmask 17408  }
  0x24   : > { %768 = vst.msk [vmem:[#allocation2] sm:$0xff] %vm767_vm1, %v9710_v3  ;;  %s9790_s30 = sld [smem:[#allocation83_spill]]  ;;  %vm3549_vm3 = vcmask 130048   ;;  %vm3551_vm4 = vcmask 123904  }
  0x25   : > { %769 = vst.msk [vmem:[#allocation2 + $0x8] sm:$0xff] %vm767_vm1, %v9710_v3  ;;  %s731_s4 = scalar_select %p730_p10, %s7000_s6, 1 }
  0x26   : > { %772 = vst.msk [vmem:[#allocation2 + $0x18] sm:$0xff] %vm767_vm1, %v9710_v3  ;;  %s9991_s22 = sld [smem:[#allocation93_spill]] }
  0x27   : > { %773 = vst.msk [vmem:[#allocation2 + $0x20] sm:$0xff] %vm767_vm1, %v9710_v3  ;;  %s6599_s2 = sshll.u32 %s731_s4, 8  ;;  %s10034_s27 = sld [smem:[#allocation85_spill]] }
  0x28   : > { %775 = vst.msk [vmem:[#allocation2 + $0x30] sm:$0xff] %vm767_vm1, %v9710_v3  ;;  %s10039_s25 = sld [smem:[#allocation87_spill]] }
  0x29   : > { %v921_v0 = vld [vmem:[%s9789_s1 + $0x3] sm:$0x7]  ;;  %v888_v1 = vld [vmem:[%s9789_s1] sm:$0x7]  ;;  %v1379_v2 = vld [vmem:[%s9789_s1 + $0x6] sm:$0x7] }
  0x2a   : > { %6147 = vmatpush.msk.msra.mxu0 %vm1018_vm0, %v921_v0  ;;  %6180 = vmatpush.msk.msra.mxu1 %vm1018_vm0, %v888_v1  ;;  %776 = vst.msk [vmem:[#allocation2 + $0x38] sm:$0xff] %vm767_vm1, %v9710_v3  ;;  %v1656_v8 = vld [vmem:[%s9789_s1 + $0x9] sm:$0x7]  ;;  %s7127_s8 = scalar_lea.vmem %s9790_s30, %s6599_s2  ;;  %s10040_s7 = sld [smem:[#allocation88_spill]] }
  0x2b   : > { %6213 = vmatpush.msk.msra.mxu2 %vm1018_vm0, %v1379_v2  ;;  %6600 = vmatpush.msk.msra.mxu3 %vm1018_vm0, %v921_v0  ;;  %778 = vst.msk [vmem:[#allocation2 + $0x48] sm:$0xff] %vm767_vm1, %v9710_v3  ;;  %v856_v4 = vld [vmem:[#allocation2] sm:$0xff]  ;;  %v735_v13 = vld [vmem:[%s7127_s8] sm:$0xff]  ;;  %v737_v15 = vld [vmem:[%s7127_s8 + $0x10] sm:$0xff]  ;;  %s10043_s23 = sld [smem:[#allocation94_spill]] }
  0x2c   : > { %779 = vst.msk [vmem:[#allocation2 + $0x50] sm:$0xff] %vm767_vm1, %v9710_v3  ;;  %v889_v5 = vld [vmem:[#allocation2 + $0x1] sm:$0xff]  ;;  %6181 = vmatmul.msk.f32.vlgmr.msra.gmra.mxu1 %vm767_vm1, %v856_v4  ;;  %v738_v16 = vld [vmem:[%s7127_s8 + $0x18] sm:$0xff]  ;;  %v739_v17 = vld [vmem:[%s7127_s8 + $0x20] sm:$0xff]  ;;  %s10044_s30 = sld [smem:[#allocation90_spill]] }
  0x2d   : > { %781 = vst.msk [vmem:[#allocation2 + $0x60] sm:$0xff] %vm767_vm1, %v9710_v3  ;;  %v1347_v6 = vld [vmem:[#allocation2 + $0x2] sm:$0xff]  ;;  %6148 = vmatmul.msk.f32.vlgmr.msra.gmra.mxu0 %vm767_vm1, %v889_v5  ;;  %6246 = vmatpush.msk.msrb.mxu3 %vm1018_vm0, %v1656_v8  ;;  %v742_v26 = vld [vmem:[%s7127_s8 + $0x38] sm:$0xff]  ;;  %v743_v33 = vld [vmem:[%s7127_s8 + $0x40] sm:$0xff]  ;;  %s10046_s9 = sld [smem:[#allocation92_spill]] }
  0x2e   : > { %782 = vst.msk [vmem:[#allocation2 + $0x68] sm:$0xff] %vm767_vm1, %v9710_v3  ;;  %6214 = vmatmul.msk.f32.vlgmr.msra.gmra.mxu2 %vm767_vm1, %v1347_v6  ;;  %v857_v7 = vld [vmem:[#allocation2 + $0x8] sm:$0xff]  ;;  %v764_v9 = vld [vmem:[%s7127_s8 + $0xe8] sm:$0xff]  ;;  %v746_v42 = vld [vmem:[%s7127_s8 + $0x58] sm:$0xff]  ;;  %s10047_s0 = sld [smem:[#allocation91_spill]] }
  0x2f   : > { %784 = vst.msk [vmem:[#allocation2 + $0x78] sm:$0xff] %vm767_vm1, %v9710_v3  ;;  %v736_v14 = vld [vmem:[%s7127_s8 + $0x8] sm:$0xff]  ;;  %v741_v25 = vld [vmem:[%s7127_s8 + $0x30] sm:$0xff]  ;;  %v747_v49 = vld [vmem:[%s7127_s8 + $0x60] sm:$0xff] }
  0x30   : > { %785 = vst.msk [vmem:[#allocation2 + $0x80] sm:$0xff] %vm767_vm1, %v9710_v3  ;;  %v740_v18 = vld [vmem:[%s7127_s8 + $0x28] sm:$0xff]  ;;  %v745_v41 = vld [vmem:[%s7127_s8 + $0x50] sm:$0xff]  ;;  %v750_v58 = vld [vmem:[%s7127_s8 + $0x78] sm:$0xff] }
  0x31   : > { %787 = vst.msk [vmem:[#allocation2 + $0x90] sm:$0xff] %vm767_vm1, %v9710_v3  ;;  %v744_v34 = vld [vmem:[%s7127_s8 + $0x48] sm:$0xff]  ;;  %v749_v57 = vld [vmem:[%s7127_s8 + $0x70] sm:$0xff]  ;;  %v751_v1 = vld [vmem:[%s7127_s8 + $0x80] sm:$0xff] }
  0x32   : > { %788 = vst.msk [vmem:[#allocation2 + $0x98] sm:$0xff] %vm767_vm1, %v9710_v3  ;;  %v748_v50 = vld [vmem:[%s7127_s8 + $0x68] sm:$0xff] }
  0x33   : > { %790 = vst.msk [vmem:[#allocation2 + $0xa8] sm:$0xff] %vm767_vm1, %v9710_v3  ;;  %v752_v2 = vld [vmem:[%s7127_s8 + $0x88] sm:$0xff] }
  0x34   : > { %791 = vst.msk [vmem:[#allocation2 + $0xb0] sm:$0xff] %vm767_vm1, %v9710_v3  ;;  %6182 = vmatmul.msk.f32.gmra.mxu1 %vm767_vm1, %v857_v7 }
  0x35   : > { %793 = vst.msk [vmem:[#allocation2 + $0xc0] sm:$0xff] %vm767_vm1, %v9710_v3 }
  0x36   : > { %794 = vst.msk [vmem:[#allocation2 + $0xc8] sm:$0xff] %vm767_vm1, %v9710_v3 }
  0x37   : > { %796 = vst.msk [vmem:[#allocation2 + $0xd8] sm:$0xff] %vm767_vm1, %v9710_v3 }
  0x38   : > { %797 = vst.msk [vmem:[#allocation2 + $0xe0] sm:$0xff] %vm767_vm1, %v9710_v3 }
  0x39   : > { %799 = vst.msk [vmem:[#allocation2 + $0xf0] sm:$0xff] %vm767_vm1, %v9710_v3 }
  0x3a   : > { %800 = vst.msk [vmem:[#allocation2 + $0xf8] sm:$0xff] %vm767_vm1, %v9710_v3 }
  0x3b   : > { %802 = vst.msk [vmem:[#allocation2 + $0x108] sm:$0xff] %vm767_vm1, %v9710_v3 }
  0x3c   : > { %803 = vst.msk [vmem:[#allocation2 + $0x110] sm:$0xff] %vm767_vm1, %v9710_v3 }
  0x3d   : > { %805 = vst.msk [vmem:[#allocation2 + $0x120] sm:$0xff] %vm767_vm1, %v9710_v3 }
  0x3e   : > { %806 = vst.msk [vmem:[#allocation2 + $0x128] sm:$0xff] %vm767_vm1, %v9710_v3 }
  0x3f   : > { %808 = vst.msk [vmem:[#allocation2 + $0x138] sm:$0xff] %vm767_vm1, %v9710_v3 }
  0x40   : > { %809 = vst.msk [vmem:[#allocation2 + $0x140] sm:$0xff] %vm767_vm1, %v9710_v3 }
  0x41   : > { %811 = vst.msk [vmem:[#allocation2 + $0x150] sm:$0xff] %vm767_vm1, %v9710_v3 }
  0x42   : > { %812 = vst.msk [vmem:[#allocation2 + $0x158] sm:$0xff] %vm767_vm1, %v9710_v3 }
  0x43   : > { %814 = vst.msk [vmem:[#allocation2 + $0x168] sm:$0xff] %vm767_vm1, %v9710_v3 }
  0x44   : > { %815 = vst.msk [vmem:[#allocation2 + $0x170] sm:$0xff] %vm767_vm1, %v9710_v3 }
  0x45   : > { %817 = vst.msk [vmem:[#allocation2 + $0x180] sm:$0xff] %vm767_vm1, %v9710_v3 }
  0x46   : > { %818 = vst.msk [vmem:[#allocation2 + $0x188] sm:$0xff] %vm767_vm1, %v9710_v3 }
  0x47   : > { %820 = vst.msk [vmem:[#allocation2 + $0x198] sm:$0xff] %vm767_vm1, %v9710_v3 }
  0x48   : > { %821 = vst.msk [vmem:[#allocation2 + $0x1a0] sm:$0xff] %vm767_vm1, %v9710_v3 }
  0x49   : > { %5486 = vst [vmem:[#allocation4] sm:$0x3f] %v9710_v3 }
  0x4a   : > { %5487 = vst [vmem:[#allocation4 + $0x8] sm:$0x3f] %v9710_v3 }
  0x4b   : > { %5488 = vst [vmem:[#allocation4 + $0x10] sm:$0x3f] %v9710_v3 }
  0x4c   : > { %5489 = vst [vmem:[#allocation4 + $0x18] sm:$0x3f] %v9710_v3 }
  0x4d   : > { %5490 = vst [vmem:[#allocation4 + $0x20] sm:$0x3f] %v9710_v3 }
  0x4e   : > { %5491 = vst [vmem:[#allocation4 + $0x28] sm:$0x3f] %v9710_v3 }
  0x4f   : > { %816 = vst.msk [vmem:[#allocation2 + $0x178] sm:$0x3] %vm770_vm2, %v9710_v3 }
  0x50   : > { %853 = vst.msk [vmem:[#allocation2 + $0x171] sm:$0xff] %vm767_vm1, %v764_v9 }
  0x51   : > { %771 = vst.msk [vmem:[#allocation2 + $0x10] sm:$0x3] %vm770_vm2, %v9710_v3 }
  0x52   : > { %774 = vst.msk [vmem:[#allocation2 + $0x28] sm:$0x3] %vm770_vm2, %v9710_v3 }
  0x53   : > { %777 = vst.msk [vmem:[#allocation2 + $0x40] sm:$0x3] %vm770_vm2, %v9710_v3 }
  0x54   : > { %780 = vst.msk [vmem:[#allocation2 + $0x58] sm:$0x3] %vm770_vm2, %v9710_v3 }
  0x55   : > { %783 = vst.msk [vmem:[#allocation2 + $0x70] sm:$0x3] %vm770_vm2, %v9710_v3 }
  0x56   : > { %786 = vst.msk [vmem:[#allocation2 + $0x88] sm:$0x3] %vm770_vm2, %v9710_v3 }
  0x57   : > { %v920_v10 = vld [vmem:[#allocation2 + $0x171] sm:$0xff]  ;;  %789 = vst.msk [vmem:[#allocation2 + $0xa0] sm:$0x3] %vm770_vm2, %v9710_v3 }
  0x58   : > { %6179 = vmatmul.msk.f32.vlgmr.msra.gmra.mxu3 %vm767_vm1, %v920_v10  ;;  %792 = vst.msk [vmem:[#allocation2 + $0xb8] sm:$0x3] %vm770_vm2, %v9710_v3  ;;  %v890_v11 = vld [vmem:[#allocation2 + $0x9] sm:$0xff] }
  0x59   : > { %v1348_v12 = vld [vmem:[#allocation2 + $0xa] sm:$0xff]  ;;  %795 = vst.msk [vmem:[#allocation2 + $0xd0] sm:$0x3] %vm770_vm2, %v9710_v3  ;;  %6149 = vmatmul.msk.f32.gmra.mxu0 %vm767_vm1, %v890_v11 }
  0x5a   : > { %6215 = vmatmul.msk.f32.gmra.mxu2 %vm767_vm1, %v1348_v12  ;;  %798 = vst.msk [vmem:[#allocation2 + $0xe8] sm:$0x3] %vm770_vm2, %v9710_v3  ;;  %v753_v10 = vld [vmem:[%s7127_s8 + $0x90] sm:$0xff]  ;;  %v754_v12 = vld [vmem:[%s7127_s8 + $0x98] sm:$0xff] }
  0x5b   : > { %801 = vst.msk [vmem:[#allocation2 + $0x100] sm:$0x3] %vm770_vm2, %v9710_v3 }
  0x5c   : > { %804 = vst.msk [vmem:[#allocation2 + $0x118] sm:$0x3] %vm770_vm2, %v9710_v3 }
  0x5d   : > { %807 = vst.msk [vmem:[#allocation2 + $0x130] sm:$0x3] %vm770_vm2, %v9710_v3 }
  0x5e   : > { %810 = vst.msk [vmem:[#allocation2 + $0x148] sm:$0x3] %vm770_vm2, %v9710_v3 }
  0x5f   : > { %813 = vst.msk [vmem:[#allocation2 + $0x160] sm:$0x3] %vm770_vm2, %v9710_v3 }
  0x60   : > { %819 = vst.msk [vmem:[#allocation2 + $0x190] sm:$0x3] %vm770_vm2, %v9710_v3 }
  0x61   : > { %822 = vst.msk [vmem:[#allocation2 + $0x1a8] sm:$0x3] %vm770_vm2, %v9710_v3 }
  0x62   : > { %824 = vst.msk [vmem:[#allocation2 + $0x19] sm:$0xff] %vm767_vm1, %v735_v13 }
  0x63   : > { %825 = vst.msk [vmem:[#allocation2 + $0x21] sm:$0xff] %vm767_vm1, %v736_v14 }
  0x64   : > { %826 = vst.msk [vmem:[#allocation2 + $0x31] sm:$0xff] %vm767_vm1, %v737_v15 }
  0x65   : > { %827 = vst.msk [vmem:[#allocation2 + $0x39] sm:$0xff] %vm767_vm1, %v738_v16 }
  0x66   : > { %828 = vst.msk [vmem:[#allocation2 + $0x49] sm:$0xff] %vm767_vm1, %v739_v17 }
  0x67   : > { %829 = vst.msk [vmem:[#allocation2 + $0x51] sm:$0xff] %vm767_vm1, %v740_v18 }
  0x68   : > { %830 = vst.msk [vmem:[#allocation2 + $0x61] sm:$0xff] %vm767_vm1, %v741_v25 }
  0x69   : > { %v1624_v19 = vld [vmem:[#allocation2 + $0x18] sm:$0xff]  ;;  %831 = vst.msk [vmem:[#allocation2 + $0x69] sm:$0xff] %vm767_vm1, %v742_v26 }
  0x6a   : > { %v7186_v20 = vld [vmem:[#allocation2 + $0x19] sm:$0xff]  ;;  %6247 = vmatmul.msk.f32.vlgmr.msrb.gmra.mxu3 %vm767_vm1, %v1624_v19  ;;  %6183 = vmatmul.msk.f32.gmra.mxu1 %vm767_vm1, %v1624_v19  ;;  %v7196_v23 = vld [vmem:[#allocation2 + $0x21] sm:$0xff]  ;;  %832 = vst.msk [vmem:[#allocation2 + $0x79] sm:$0xff] %vm767_vm1, %v743_v33 }
  0x6b   : > { %6150 = vmatmul.msk.f32.gmra.mxu0 %vm767_vm1, %v7186_v20  ;;  %v7191_v21 = vld [vmem:[#allocation2 + $0x1a] sm:$0xff]  ;;  %v7198_v24 = vld [vmem:[#allocation2 + $0x22] sm:$0xff]  ;;  %v7210_v27 = vld [vmem:[#allocation2 + $0x30] sm:$0xff]  ;;  %833 = vst.msk [vmem:[#allocation2 + $0x81] sm:$0xff] %vm767_vm1, %v744_v34 }
  0x6c   : > { %6216 = vmatmul.msk.f32.gmra.mxu2 %vm767_vm1, %v7191_v21  ;;  %v1625_v22 = vld [vmem:[#allocation2 + $0x20] sm:$0xff]  ;;  %v7212_v28 = vld [vmem:[#allocation2 + $0x31] sm:$0xff]  ;;  %834 = vst.msk [vmem:[#allocation2 + $0x91] sm:$0xff] %vm767_vm1, %v745_v41 }
  0x6d   : > { %v7214_v29 = vld [vmem:[#allocation2 + $0x32] sm:$0xff]  ;;  %v7228_v32 = vld [vmem:[#allocation2 + $0x3a] sm:$0xff]  ;;  %v7242_v35 = vld [vmem:[#allocation2 + $0x48] sm:$0xff]  ;;  %835 = vst.msk [vmem:[#allocation2 + $0x99] sm:$0xff] %vm767_vm1, %v746_v42 }
  0x6e   : > { %v7224_v30 = vld [vmem:[#allocation2 + $0x38] sm:$0xff]  ;;  %v7244_v36 = vld [vmem:[#allocation2 + $0x49] sm:$0xff]  ;;  %836 = vst.msk [vmem:[#allocation2 + $0xa9] sm:$0xff] %vm767_vm1, %v747_v49  ;;  %v756_v41 = vld [vmem:[%s7127_s8 + $0xa8] sm:$0xff] }
  0x6f   : > { %v7226_v31 = vld [vmem:[#allocation2 + $0x39] sm:$0xff]  ;;  %v7246_v37 = vld [vmem:[#allocation2 + $0x4a] sm:$0xff]  ;;  %v7276_v44 = vld [vmem:[#allocation2 + $0x61] sm:$0xff]  ;;  %837 = vst.msk [vmem:[#allocation2 + $0xb1] sm:$0xff] %vm767_vm1, %v748_v50 }
  0x70   : > { %v7256_v38 = vld [vmem:[#allocation2 + $0x50] sm:$0xff]  ;;  %v7274_v43 = vld [vmem:[#allocation2 + $0x60] sm:$0xff]  ;;  %v7288_v46 = vld [vmem:[#allocation2 + $0x68] sm:$0xff]  ;;  %838 = vst.msk [vmem:[#allocation2 + $0xc1] sm:$0xff] %vm767_vm1, %v749_v57 }
  0x71   : > { %v7258_v39 = vld [vmem:[#allocation2 + $0x51] sm:$0xff]  ;;  %v7278_v45 = vld [vmem:[#allocation2 + $0x62] sm:$0xff]  ;;  %v7308_v52 = vld [vmem:[#allocation2 + $0x79] sm:$0xff]  ;;  %839 = vst.msk [vmem:[#allocation2 + $0xc9] sm:$0xff] %vm767_vm1, %v750_v58 }
  0x72   : > { %6248 = vmatmul.msk.f32.gmra.mxu3 %vm767_vm1, %v1625_v22  ;;  %6184 = vmatmul.msk.f32.gmra.mxu1 %vm767_vm1, %v1625_v22  ;;  %v7260_v40 = vld [vmem:[#allocation2 + $0x52] sm:$0xff]  ;;  %v7290_v47 = vld [vmem:[#allocation2 + $0x69] sm:$0xff]  ;;  %v7310_v53 = vld [vmem:[#allocation2 + $0x7a] sm:$0xff]  ;;  %840 = vst.msk [vmem:[#allocation2 + $0xd9] sm:$0xff] %vm767_vm1, %v751_v1 }
  0x73   : > { %6151 = vmatmul.msk.f32.gmra.mxu0 %vm767_vm1, %v7196_v23  ;;  %v7292_v48 = vld [vmem:[#allocation2 + $0x6a] sm:$0xff]  ;;  %v7306_v51 = vld [vmem:[#allocation2 + $0x78] sm:$0xff]  ;;  %v7320_v54 = vld [vmem:[#allocation2 + $0x80] sm:$0xff]  ;;  %841 = vst.msk [vmem:[#allocation2 + $0xe1] sm:$0xff] %vm767_vm1, %v752_v2 }
  0x74   : > { %6217 = vmatmul.msk.f32.gmra.mxu2 %vm767_vm1, %v7198_v24  ;;  %v7322_v55 = vld [vmem:[#allocation2 + $0x81] sm:$0xff]  ;;  %v7338_v59 = vld [vmem:[#allocation2 + $0x90] sm:$0xff]  ;;  %v7352_v62 = vld [vmem:[#allocation2 + $0x98] sm:$0xff]  ;;  %842 = vst.msk [vmem:[#allocation2 + $0xf1] sm:$0xff] %vm767_vm1, %v753_v10 }
  0x75   : > { %v7324_v56 = vld [vmem:[#allocation2 + $0x82] sm:$0xff]  ;;  %v7340_v60 = vld [vmem:[#allocation2 + $0x91] sm:$0xff]  ;;  %v7354_v63 = vld [vmem:[#allocation2 + $0x99] sm:$0xff]  ;;  %843 = vst.msk [vmem:[#allocation2 + $0xf9] sm:$0xff] %vm767_vm1, %v754_v12 }
  0x76   : > { %v7342_v61 = vld [vmem:[#allocation2 + $0x92] sm:$0xff]  ;;  %v7356_v0 = vld [vmem:[#allocation2 + $0x9a] sm:$0xff]  ;;  %v7370_v4 = vld [vmem:[#allocation2 + $0xa8] sm:$0xff]  ;;  %845 = vst.msk [vmem:[#allocation2 + $0x111] sm:$0xff] %vm767_vm1, %v756_v41 }
  0x77   : > { %v7372_v5 = vld [vmem:[#allocation2 + $0xa9] sm:$0xff]  ;;  %v7386_v8 = vld [vmem:[#allocation2 + $0xb1] sm:$0xff]  ;;  %v7406_v14 = vld [vmem:[#allocation2 + $0xc0] sm:$0xff] }
  0x78   : > { %v7374_v6 = vld [vmem:[#allocation2 + $0xaa] sm:$0xff]  ;;  %v7388_v9 = vld [vmem:[#allocation2 + $0xb2] sm:$0xff]  ;;  %v7408_v15 = vld [vmem:[#allocation2 + $0xc1] sm:$0xff] }
  0x79   : > { %v7384_v7 = vld [vmem:[#allocation2 + $0xb0] sm:$0xff]  ;;  %v7410_v16 = vld [vmem:[#allocation2 + $0xc2] sm:$0xff]  ;;  %v755_v33 = vld [vmem:[%s7127_s8 + $0xa0] sm:$0xff] }
  0x7a   : > { %6249 = vmatmul.msk.f32.gmra.mxu3 %vm767_vm1, %v7210_v27  ;;  %6185 = vmatmul.msk.f32.gmra.mxu1 %vm767_vm1, %v7210_v27  ;;  %9793 = vst [vmem:[#allocation14_spill] sm:$0xff] %v7410_v16  ;;  %v7426_v22 = vld [vmem:[#allocation2 + $0xc8] sm:$0xff]  ;;  %v7448_v50 = vld [vmem:[#allocation2 + $0xd8] sm:$0xff] }
  0x7b   : > { %6152 = vmatmul.msk.f32.gmra.mxu0 %vm767_vm1, %v7212_v28  ;;  %v7428_v25 = vld [vmem:[#allocation2 + $0xc9] sm:$0xff]  ;;  %844 = vst.msk [vmem:[#allocation2 + $0x109] sm:$0xff] %vm767_vm1, %v755_v33  ;;  %v7450_v57 = vld [vmem:[#allocation2 + $0xd9] sm:$0xff]  ;;  %v7466_v41 = vld [vmem:[#allocation2 + $0xe1] sm:$0xff] }
  0x7c   : > { %6218 = vmatmul.msk.f32.gmra.mxu2 %vm767_vm1, %v7214_v29  ;;  %v7430_v26 = vld [vmem:[#allocation2 + $0xca] sm:$0xff]  ;;  %9800 = vst [vmem:[#allocation21_spill] sm:$0xff] %v7448_v50  ;;  %v7452_v1 = vld [vmem:[#allocation2 + $0xda] sm:$0xff] }
  0x7d   : > { %9797 = vst [vmem:[#allocation18_spill] sm:$0xff] %v7430_v26  ;;  %v7464_v33 = vld [vmem:[#allocation2 + $0xe0] sm:$0xff] }
  0x7e   : > { %9801 = vst [vmem:[#allocation22_spill] sm:$0xff] %v7450_v57 }
  0x7f   : > { %9802 = vst [vmem:[#allocation23_spill] sm:$0xff] %v7452_v1 }
  0x80   : > { %9804 = vst [vmem:[#allocation25_spill] sm:$0xff] %v7464_v33 }
  0x81   : > { %9805 = vst [vmem:[#allocation26_spill] sm:$0xff] %v7466_v41 }
  0x82   : > { %6250 = vmatmul.msk.f32.gmra.mxu3 %vm767_vm1, %v7224_v30  ;;  %6186 = vmatmul.msk.f32.gmra.mxu1 %vm767_vm1, %v7224_v30 }
  0x83   : > { %6153 = vmatmul.msk.f32.gmra.mxu0 %vm767_vm1, %v7226_v31 }
  0x84   : > { %6219 = vmatmul.msk.f32.gmra.mxu2 %vm767_vm1, %v7228_v32 }
  0x8a   : > { %6251 = vmatmul.msk.f32.gmra.mxu3 %vm767_vm1, %v7242_v35  ;;  %6187 = vmatmul.msk.f32.gmra.mxu1 %vm767_vm1, %v7242_v35 }
  0x8b   : > { %6154 = vmatmul.msk.f32.gmra.mxu0 %vm767_vm1, %v7244_v36 }
  0x8c   : > { %6220 = vmatmul.msk.f32.gmra.mxu2 %vm767_vm1, %v7246_v37 }
  0x92   : > { %6252 = vmatmul.msk.f32.gmra.mxu3 %vm767_vm1, %v7256_v38  ;;  %6188 = vmatmul.msk.f32.gmra.mxu1 %vm767_vm1, %v7256_v38 }
  0x93   : > { %6155 = vmatmul.msk.f32.gmra.mxu0 %vm767_vm1, %v7258_v39 }
  0x94   : > { %6221 = vmatmul.msk.f32.gmra.mxu2 %vm767_vm1, %v7260_v40 }
  0x9a   : > { %6253 = vmatmul.msk.f32.gmra.mxu3 %vm767_vm1, %v7274_v43  ;;  %6189 = vmatmul.msk.f32.gmra.mxu1 %vm767_vm1, %v7274_v43 }
  0x9b   : > { %6156 = vmatmul.msk.f32.gmra.mxu0 %vm767_vm1, %v7276_v44 }
  0x9c   : > { %6222 = vmatmul.msk.f32.gmra.mxu2 %vm767_vm1, %v7278_v45 }
  0xa2   : > { %6254 = vmatmul.msk.f32.gmra.mxu3 %vm767_vm1, %v7288_v46  ;;  %6190 = vmatmul.msk.f32.gmra.mxu1 %vm767_vm1, %v7288_v46 }
  0xa3   : > { %6157 = vmatmul.msk.f32.gmra.mxu0 %vm767_vm1, %v7290_v47 }
  0xa4   : > { %6223 = vmatmul.msk.f32.gmra.mxu2 %vm767_vm1, %v7292_v48 }
  0xa9   : > { %v7403_v13 = vpop.f32.mrf.mxu1 }
  0xaa   : > { %6255 = vmatmul.msk.f32.gmra.mxu3 %vm767_vm1, %v7306_v51  ;;  %6191 = vmatmul.msk.f32.gmra.mxu1 %vm767_vm1, %v7306_v51  ;;  %v7400_v11 = vpop.f32.mrf.mxu0  ;;  %9792 = vst [vmem:[#allocation13_spill] sm:$0xff] %v7403_v13  ;;  %v7486_v13 = vld [vmem:[#allocation2 + $0xf1] sm:$0xff] }
  0xab   : > { %6158 = vmatmul.msk.f32.gmra.mxu0 %vm767_vm1, %v7308_v52  ;;  %9791 = vst [vmem:[#allocation12_spill] sm:$0xff] %v7400_v11 }
  0xac   : > { %6224 = vmatmul.msk.f32.gmra.mxu2 %vm767_vm1, %v7310_v53  ;;  %9809 = vst [vmem:[#allocation30_spill] sm:$0xff] %v7486_v13 }
  0xb1   : > { %v7416_v17 = vpop.f32.mrf.mxu2  ;;  %v7424_v19 = vpop.f32.mrf.mxu1 }
  0xb2   : > { %6256 = vmatmul.msk.f32.gmra.mxu3 %vm767_vm1, %v7320_v54  ;;  %6192 = vmatmul.msk.f32.gmra.mxu1 %vm767_vm1, %v7320_v54  ;;  %9794 = vst [vmem:[#allocation15_spill] sm:$0xff] %v7416_v17  ;;  %v7484_v17 = vld [vmem:[#allocation2 + $0xf0] sm:$0xff] }
  0xb3   : > { %6159 = vmatmul.msk.f32.gmra.mxu0 %vm767_vm1, %v7322_v55  ;;  %9796 = vst [vmem:[#allocation17_spill] sm:$0xff] %v7424_v19  ;;  %v758_v19 = vld [vmem:[%s7127_s8 + $0xb8] sm:$0xff] }
  0xb4   : > { %6225 = vmatmul.msk.f32.gmra.mxu2 %vm767_vm1, %v7324_v56  ;;  %847 = vst.msk [vmem:[#allocation2 + $0x129] sm:$0xff] %vm767_vm1, %v758_v19 }
  0xb5   : > { %9808 = vst [vmem:[#allocation29_spill] sm:$0xff] %v7484_v17 }
  0xba   : > { %6257 = vmatmul.msk.f32.gmra.mxu3 %vm767_vm1, %v7338_v59  ;;  %6193 = vmatmul.msk.f32.gmra.mxu1 %vm767_vm1, %v7338_v59 }
  0xbb   : > { %6160 = vmatmul.msk.f32.gmra.mxu0 %vm767_vm1, %v7340_v60 }
  0xbc   : > { %6226 = vmatmul.msk.f32.gmra.mxu2 %vm767_vm1, %v7342_v61 }
  0xc2   : > { %6258 = vmatmul.msk.f32.gmra.mxu3 %vm767_vm1, %v7352_v62  ;;  %6194 = vmatmul.msk.f32.gmra.mxu1 %vm767_vm1, %v7352_v62 }
  0xc3   : > { %6161 = vmatmul.msk.f32.gmra.mxu0 %vm767_vm1, %v7354_v63 }
  0xc4   : > { %6227 = vmatmul.msk.f32.gmra.mxu2 %vm767_vm1, %v7356_v0 }
  0xca   : > { %6259 = vmatmul.msk.f32.gmra.mxu3 %vm767_vm1, %v7370_v4  ;;  %6195 = vmatmul.msk.f32.gmra.mxu1 %vm767_vm1, %v7370_v4 }
  0xcb   : > { %6162 = vmatmul.msk.f32.gmra.mxu0 %vm767_vm1, %v7372_v5 }
  0xcc   : > { %6228 = vmatmul.msk.f32.gmra.mxu2 %vm767_vm1, %v7374_v6 }
  0xd2   : > { %6260 = vmatmul.msk.f32.gmra.mxu3 %vm767_vm1, %v7384_v7  ;;  %6196 = vmatmul.msk.f32.gmra.mxu1 %vm767_vm1, %v7384_v7 }
  0xd3   : > { %6163 = vmatmul.msk.f32.gmra.mxu0 %vm767_vm1, %v7386_v8 }
  0xd4   : > { %6229 = vmatmul.msk.f32.gmra.mxu2 %vm767_vm1, %v7388_v9 }
  0xd6   : > { %v7422_v18 = vpop.f32.mrf.mxu0 }
  0xd7   : > { %9795 = vst [vmem:[#allocation16_spill] sm:$0xff] %v7422_v18 }
  0xda   : > { %6261 = vmatmul.msk.f32.gmra.mxu3 %vm767_vm1, %v7406_v14  ;;  %6197 = vmatmul.msk.f32.gmra.mxu1 %vm767_vm1, %v7406_v14 }
  0xdb   : > { %6164 = vmatmul.msk.f32.gmra.mxu0 %vm767_vm1, %v7408_v15  ;;  %v7442_v34 = vpop.f32.mrf.mxu3 }
  0xdc   : > { %6230 = vmatmul.msk.f32.gmra.mxu2 %vm767_vm1, %v7410_v16  ;;  %9798 = vst [vmem:[#allocation19_spill] sm:$0xff] %v7442_v34  ;;  %v7468_v34 = vld [vmem:[#allocation2 + $0xe2] sm:$0xff] }
  0xdd   : > { %v7445_v42 = vpop.f32.mrf.mxu2  ;;  %9806 = vst [vmem:[#allocation27_spill] sm:$0xff] %v7468_v34 }
  0xde   : > { %9799 = vst [vmem:[#allocation20_spill] sm:$0xff] %v7445_v42  ;;  %v757_v42 = vld [vmem:[%s7127_s8 + $0xb0] sm:$0xff] }
  0xdf   : > { %846 = vst.msk [vmem:[#allocation2 + $0x121] sm:$0xff] %vm767_vm1, %v757_v42  ;;  %v7488_v42 = vld [vmem:[#allocation2 + $0xf2] sm:$0xff] }
  0xe0   : > { %9810 = vst [vmem:[#allocation31_spill] sm:$0xff] %v7488_v42 }
  0xe2   : > { %6262 = vmatmul.msk.f32.gmra.mxu3 %vm767_vm1, %v7426_v22  ;;  %6198 = vmatmul.msk.f32.gmra.mxu1 %vm767_vm1, %v7426_v22 }
  0xe3   : > { %6165 = vmatmul.msk.f32.gmra.mxu0 %vm767_vm1, %v7428_v25 }
  0xe4   : > { %6231 = vmatmul.msk.f32.gmra.mxu2 %vm767_vm1, %v7430_v26 }
  0xe7   : > { %v1257_v58 = vpop.f32.mrf.mxu1 }
  0xe8   : > { %v1045_v49 = vpop.f32.mrf.mxu0 }
  0xe9   : > { %v1258_v11 = vadd.f32 %v1257_v58, %v1045_v49  ;;  %v7500_v49 = vld [vmem:[#allocation2 + $0xf8] sm:$0xff] }
  0xea   : > { %6263 = vmatmul.msk.f32.gmra.mxu3 %vm767_vm1, %v7448_v50  ;;  %6199 = vmatmul.msk.f32.gmra.mxu1 %vm767_vm1, %v7448_v50  ;;  %9812 = vst [vmem:[#allocation33_spill] sm:$0xff] %v7500_v49  ;;  %v7502_v58 = vld [vmem:[#allocation2 + $0xf9] sm:$0xff] }
  0xeb   : > { %6166 = vmatmul.msk.f32.gmra.mxu0 %vm767_vm1, %v7450_v57  ;;  %9813 = vst [vmem:[#allocation34_spill] sm:$0xff] %v7502_v58  ;;  %v7504_v50 = vld [vmem:[#allocation2 + $0xfa] sm:$0xff] }
  0xec   : > { %6232 = vmatmul.msk.f32.gmra.mxu2 %vm767_vm1, %v7452_v1  ;;  %9814 = vst [vmem:[#allocation35_spill] sm:$0xff] %v7504_v50 }
  0xed   : > { %v7462_v2 = vpop.f32.mrf.mxu3 }
  0xee   : > { %9803 = vst [vmem:[#allocation24_spill] sm:$0xff] %v7462_v2 }
  0xef   : > { %v1502_v10 = vpop.f32.mrf.mxu2  ;;  %v1260_v3 = vpop.f32.mrf.mxu1 }
  0xf0   : > { %v1048_v12 = vpop.f32.mrf.mxu0  ;;  %v1594_v19 = vadd.f32 %v1502_v10, %v1258_v11  ;;  %v760_v11 = vld [vmem:[%s7127_s8 + $0xc8] sm:$0xff] }
  0xf1   : > { %v1261_v16 = vadd.f32 %v1260_v3, %v1048_v12  ;;  %849 = vst.msk [vmem:[#allocation2 + $0x141] sm:$0xff] %vm767_vm1, %v760_v11 }
  0xf2   : > { %6264 = vmatmul.msk.f32.gmra.mxu3 %vm767_vm1, %v7464_v33  ;;  %6200 = vmatmul.msk.f32.gmra.mxu1 %vm767_vm1, %v7464_v33 }
  0xf3   : > { %6167 = vmatmul.msk.f32.gmra.mxu0 %vm767_vm1, %v7466_v41 }
  0xf4   : > { %6233 = vmatmul.msk.f32.gmra.mxu2 %vm767_vm1, %v7468_v34 }
  0xf5   : > { %v7482_v18 = vpop.f32.mrf.mxu3 }
  0xf6   : > { %9807 = vst [vmem:[#allocation28_spill] sm:$0xff] %v7482_v18 }
  0xf7   : > { %v1505_v1 = vpop.f32.mrf.mxu2  ;;  %v1263_v41 = vpop.f32.mrf.mxu1 }
  0xf8   : > { %v1051_v2 = vpop.f32.mrf.mxu0 }
  0xfa   : > { %6265 = vmatmul.msk.f32.gmra.mxu3 %vm767_vm1, %v7484_v17  ;;  %6201 = vmatmul.msk.f32.gmra.mxu1 %vm767_vm1, %v7484_v17 }
  0xfb   : > { %6168 = vmatmul.msk.f32.gmra.mxu0 %vm767_vm1, %v7486_v13  ;;  %v759_v13 = vld [vmem:[%s7127_s8 + $0xc0] sm:$0xff] }
  0xfc   : > { %6234 = vmatmul.msk.f32.gmra.mxu2 %vm767_vm1, %v7488_v42  ;;  %848 = vst.msk [vmem:[#allocation2 + $0x139] sm:$0xff] %vm767_vm1, %v759_v13  ;;  %v7520_v42 = vld [vmem:[#allocation2 + $0x108] sm:$0xff] }
  0xfd   : > { %v1779_v34 = vpop.f32.mrf.mxu3  ;;  %9816 = vst [vmem:[#allocation37_spill] sm:$0xff] %v7520_v42 }
  0xfe   : > { %v7498_v18 = vadd.f32 %v1779_v34, %v1594_v19  ;;  %v1595_v34 = vadd.f32 %v1505_v1, %v1261_v16 }
  0xff   : > { %v1508_v33 = vpop.f32.mrf.mxu2  ;;  %v1266_v57 = vpop.f32.mrf.mxu1 }
 0x100   : > { %9811 = vst [vmem:[#allocation32_spill] sm:$0xff] %v7498_v18  ;;  %v1054_v26 = vpop.f32.mrf.mxu0  ;;  %v7522_v18 = vld [vmem:[#allocation2 + $0x109] sm:$0xff] }
 0x101   : > { %9817 = vst [vmem:[#allocation38_spill] sm:$0xff] %v7522_v18  ;;  %v1267_v17 = vadd.f32 %v1266_v57, %v1054_v26 }
 0x102   : > { %6266 = vmatmul.msk.f32.gmra.mxu3 %vm767_vm1, %v7500_v49  ;;  %6202 = vmatmul.msk.f32.gmra.mxu1 %vm767_vm1, %v7500_v49  ;;  %v1264_v49 = vadd.f32 %v1263_v41, %v1051_v2  ;;  %v7536_v2 = vld [vmem:[#allocation2 + $0x110] sm:$0xff] }
 0x103   : > { %6169 = vmatmul.msk.f32.gmra.mxu0 %vm767_vm1, %v7502_v58  ;;  %v7524_v58 = vld [vmem:[#allocation2 + $0x10a] sm:$0xff]  ;;  %9820 = vst [vmem:[#allocation41_spill] sm:$0xff] %v7536_v2 }
 0x104   : > { %6235 = vmatmul.msk.f32.gmra.mxu2 %vm767_vm1, %v7504_v50  ;;  %9818 = vst [vmem:[#allocation39_spill] sm:$0xff] %v7524_v58  ;;  %v1596_v16 = vadd.f32 %v1508_v33, %v1264_v49  ;;  %v7538_v41 = vld [vmem:[#allocation2 + $0x111] sm:$0xff] }
 0x105   : > { %v1782_v10 = vpop.f32.mrf.mxu3  ;;  %9821 = vst [vmem:[#allocation42_spill] sm:$0xff] %v7538_v41  ;;  %v762_v33 = vld [vmem:[%s7127_s8 + $0xd8] sm:$0xff] }
 0x106   : > { %v7518_v3 = vadd.f32 %v1782_v10, %v1595_v34  ;;  %851 = vst.msk [vmem:[#allocation2 + $0x159] sm:$0xff] %vm767_vm1, %v762_v33 }
 0x107   : > { %v1511_v12 = vpop.f32.mrf.mxu2  ;;  %v1269_v13 = vpop.f32.mrf.mxu1 }
 0x108   : > { %9815 = vst [vmem:[#allocation36_spill] sm:$0xff] %v7518_v3  ;;  %v1057_v19 = vpop.f32.mrf.mxu0  ;;  %v7540_v3 = vld [vmem:[#allocation2 + $0x112] sm:$0xff]  ;;  %v1597_v49 = vadd.f32 %v1511_v12, %v1267_v17 }
 0x109   : > { %9822 = vst [vmem:[#allocation43_spill] sm:$0xff] %v7540_v3 }
 0x10a   : > { %6267 = vmatmul.msk.f32.gmra.mxu3 %vm767_vm1, %v7520_v42  ;;  %6203 = vmatmul.msk.f32.gmra.mxu1 %vm767_vm1, %v7520_v42 }
 0x10b   : > { %6170 = vmatmul.msk.f32.gmra.mxu0 %vm767_vm1, %v7522_v18  ;;  %v761_v18 = vld [vmem:[%s7127_s8 + $0xd0] sm:$0xff] }
 0x10c   : > { %6236 = vmatmul.msk.f32.gmra.mxu2 %vm767_vm1, %v7524_v58  ;;  %850 = vst.msk [vmem:[#allocation2 + $0x151] sm:$0xff] %vm767_vm1, %v761_v18  ;;  %v7556_v58 = vld [vmem:[#allocation2 + $0x120] sm:$0xff] }
 0x10d   : > { %v1785_v1 = vpop.f32.mrf.mxu3  ;;  %9824 = vst [vmem:[#allocation45_spill] sm:$0xff] %v7556_v58 }
 0x10e   : > { %v7534_v11 = vadd.f32 %v1785_v1, %v1596_v16 }
 0x10f   : > { %v1514_v34 = vpop.f32.mrf.mxu2  ;;  %v1272_v50 = vpop.f32.mrf.mxu1 }
 0x110   : > { %9819 = vst [vmem:[#allocation40_spill] sm:$0xff] %v7534_v11  ;;  %v1060_v10 = vpop.f32.mrf.mxu0  ;;  %v7558_v11 = vld [vmem:[#allocation2 + $0x121] sm:$0xff] }
 0x111   : > { %9825 = vst [vmem:[#allocation46_spill] sm:$0xff] %v7558_v11 }
 0x112   : > { %6268 = vmatmul.msk.f32.gmra.mxu3 %vm767_vm1, %v7536_v2  ;;  %6204 = vmatmul.msk.f32.gmra.mxu1 %vm767_vm1, %v7536_v2  ;;  %v1270_v2 = vadd.f32 %v1269_v13, %v1057_v19  ;;  %v1933_v19 = vld [vmem:[%s9789_s1 + $0xc] sm:$0x7] }
 0x113   : > { %6171 = vmatmul.msk.f32.gmra.mxu0 %vm767_vm1, %v7538_v41  ;;  %v7560_v41 = vld [vmem:[#allocation2 + $0x122] sm:$0xff] }
 0x114   : > { %6237 = vmatmul.msk.f32.gmra.mxu2 %vm767_vm1, %v7540_v3  ;;  %9826 = vst [vmem:[#allocation47_spill] sm:$0xff] %v7560_v41  ;;  %v1598_v17 = vadd.f32 %v1514_v34, %v1270_v2  ;;  %v7577_v3 = vld [vmem:[#allocation2 + $0x129] sm:$0xff]  ;;  %6279 = vmatpush.msk.msrb.mxu0 %vm1018_vm0, %v1933_v19  ;;  %v1273_v34 = vadd.f32 %v1272_v50, %v1060_v10  ;;  %v7594_v10 = vld [vmem:[#allocation2 + $0x138] sm:$0xff] }
 0x115   : > { %v1788_v16 = vpop.f32.mrf.mxu3  ;;  %9829 = vst [vmem:[#allocation50_spill] sm:$0xff] %v7577_v3 }
 0x116   : > { %v7554_v26 = vadd.f32 %v1788_v16, %v1597_v49  ;;  %v7575_v16 = vld [vmem:[#allocation2 + $0x128] sm:$0xff]  ;;  %9832 = vst [vmem:[#allocation53_spill] sm:$0xff] %v7594_v10 }
 0x117   : > { %v1517_v57 = vpop.f32.mrf.mxu2  ;;  %v1275_v18 = vpop.f32.mrf.mxu1  ;;  %9828 = vst [vmem:[#allocation49_spill] sm:$0xff] %v7575_v16 }
 0x118   : > { %9823 = vst [vmem:[#allocation44_spill] sm:$0xff] %v7554_v26  ;;  %v1063_v1 = vpop.f32.mrf.mxu0  ;;  %v1599_v2 = vadd.f32 %v1517_v57, %v1273_v34 }
 0x11a   : > { %6269 = vmatmul.msk.f32.gmra.mxu3 %vm767_vm1, %v7556_v58  ;;  %6205 = vmatmul.msk.f32.gmra.mxu1 %vm767_vm1, %v7556_v58 }
 0x11b   : > { %6172 = vmatmul.msk.f32.gmra.mxu0 %vm767_vm1, %v7558_v11  ;;  %v7580_v11 = vld [vmem:[#allocation2 + $0x12a] sm:$0xff] }
 0x11c   : > { %6238 = vmatmul.msk.f32.gmra.mxu2 %vm767_vm1, %v7560_v41  ;;  %9830 = vst [vmem:[#allocation51_spill] sm:$0xff] %v7580_v11  ;;  %v763_v41 = vld [vmem:[%s7127_s8 + $0xe0] sm:$0xff] }
 0x11d   : > { %v1791_v12 = vpop.f32.mrf.mxu3  ;;  %852 = vst.msk [vmem:[#allocation2 + $0x169] sm:$0xff] %vm767_vm1, %v763_v41  ;;  %v1276_v41 = vadd.f32 %v1275_v18, %v1063_v1  ;;  %v7612_v1 = vld [vmem:[#allocation2 + $0x141] sm:$0xff] }
 0x11e   : > { %v7570_v33 = vadd.f32 %v1791_v12, %v1598_v17  ;;  %9837 = vst [vmem:[#allocation58_spill] sm:$0xff] %v7612_v1 }
 0x11f   : > { %v1520_v49 = vpop.f32.mrf.mxu2  ;;  %v1278_v26 = vpop.f32.mrf.mxu1 }
 0x120   : > { %9827 = vst [vmem:[#allocation48_spill] sm:$0xff] %v7570_v33  ;;  %v1066_v13 = vpop.f32.mrf.mxu0  ;;  %v7596_v33 = vld [vmem:[#allocation2 + $0x139] sm:$0xff]  ;;  %v1600_v57 = vadd.f32 %v1520_v49, %v1276_v41 }
 0x121   : > { %9833 = vst [vmem:[#allocation54_spill] sm:$0xff] %v7596_v33  ;;  %v1279_v42 = vadd.f32 %v1278_v26, %v1066_v13  ;;  %v7628_v13 = vld [vmem:[#allocation2 + $0x150] sm:$0xff] }
 0x122   : > { %6270 = vmatmul.msk.f32.gmra.mxu3 %vm767_vm1, %v7575_v16  ;;  %6206 = vmatmul.msk.f32.gmra.mxu1 %vm767_vm1, %v7575_v16  ;;  %v7614_v16 = vld [vmem:[#allocation2 + $0x142] sm:$0xff]  ;;  %9840 = vst [vmem:[#allocation61_spill] sm:$0xff] %v7628_v13 }
 0x123   : > { %6173 = vmatmul.msk.f32.gmra.mxu0 %vm767_vm1, %v7577_v3  ;;  %v7598_v3 = vld [vmem:[#allocation2 + $0x13a] sm:$0xff]  ;;  %9838 = vst [vmem:[#allocation59_spill] sm:$0xff] %v7614_v16 }
 0x124   : > { %6239 = vmatmul.msk.f32.gmra.mxu2 %vm767_vm1, %v7580_v11  ;;  %9834 = vst [vmem:[#allocation55_spill] sm:$0xff] %v7598_v3 }
 0x125   : > { %v1794_v17 = vpop.f32.mrf.mxu3 }
 0x126   : > { %v7592_v12 = vadd.f32 %v1794_v17, %v1599_v2 }
 0x127   : > { %v1523_v19 = vpop.f32.mrf.mxu2  ;;  %v1281_v58 = vpop.f32.mrf.mxu1 }
 0x128   : > { %9831 = vst [vmem:[#allocation52_spill] sm:$0xff] %v7592_v12  ;;  %v1069_v50 = vpop.f32.mrf.mxu0  ;;  %v7610_v12 = vld [vmem:[#allocation2 + $0x140] sm:$0xff]  ;;  %v1601_v49 = vadd.f32 %v1523_v19, %v1279_v42  ;;  %v2488_v19 = vld [vmem:[%s9789_s1 + $0x12] sm:$0x7] }
 0x129   : > { %9836 = vst [vmem:[#allocation57_spill] sm:$0xff] %v7610_v12  ;;  %v2210_v42 = vld [vmem:[%s9789_s1 + $0xf] sm:$0x7]  ;;  %6345 = vmatpush.msk.msrb.mxu2 %vm1018_vm0, %v2488_v19 }
 0x12a   : > { %6271 = vmatmul.msk.f32.gmra.mxu3 %vm767_vm1, %v7594_v10  ;;  %6207 = vmatmul.msk.f32.gmra.mxu1 %vm767_vm1, %v7594_v10  ;;  %v1282_v10 = vadd.f32 %v1281_v58, %v1069_v50 }
 0x12b   : > { %6174 = vmatmul.msk.f32.gmra.mxu0 %vm767_vm1, %v7596_v33  ;;  %v765_v33 = vld [vmem:[%s7127_s8 + $0xf0] sm:$0xff]  ;;  %6312 = vmatpush.msk.msrb.mxu1 %vm1018_vm0, %v2210_v42 }
 0x12c   : > { %6240 = vmatmul.msk.f32.gmra.mxu2 %vm767_vm1, %v7598_v3  ;;  %854 = vst.msk [vmem:[#allocation2 + $0x181] sm:$0xff] %vm767_vm1, %v765_v33  ;;  %v766_v33 = vld [vmem:[%s7127_s8 + $0xf8] sm:$0xff]  ;;  %s10036_s8 = sld [smem:[#allocation86_spill]] }
 0x12d   : > { %v1797_v34 = vpop.f32.mrf.mxu3  ;;  %855 = vst.msk [vmem:[#allocation2 + $0x189] sm:$0xff] %vm767_vm1, %v766_v33 }
 0x12e   : > { %v7608_v2 = vadd.f32 %v1797_v34, %v1600_v57 }
 0x12f   : > { %v1526_v17 = vpop.f32.mrf.mxu2  ;;  %v1284_v18 = vpop.f32.mrf.mxu1 }
 0x130   : > { %9835 = vst [vmem:[#allocation56_spill] sm:$0xff] %v7608_v2  ;;  %v1072_v11 = vpop.f32.mrf.mxu0  ;;  %v7630_v2 = vld [vmem:[#allocation2 + $0x151] sm:$0xff]  ;;  %v1602_v58 = vadd.f32 %v1526_v17, %v1282_v10 }
 0x131   : > { %9841 = vst [vmem:[#allocation62_spill] sm:$0xff] %v7630_v2 }
 0x132   : > { %6272 = vmatmul.msk.f32.gmra.mxu3 %vm767_vm1, %v7610_v12  ;;  %6208 = vmatmul.msk.f32.gmra.mxu1 %vm767_vm1, %v7610_v12  ;;  %v7658_v12 = vld [vmem:[#allocation2 + $0x15a] sm:$0xff] }
 0x133   : > { %6175 = vmatmul.msk.f32.gmra.mxu0 %vm767_vm1, %v7612_v1  ;;  %v7632_v1 = vld [vmem:[#allocation2 + $0x152] sm:$0xff]  ;;  %9845 = vst [vmem:[#allocation66_spill] sm:$0xff] %v7658_v12 }
 0x134   : > { %6241 = vmatmul.msk.f32.gmra.mxu2 %vm767_vm1, %v7614_v16  ;;  %9842 = vst [vmem:[#allocation63_spill] sm:$0xff] %v7632_v1  ;;  %v7654_v16 = vld [vmem:[#allocation2 + $0x158] sm:$0xff] }
 0x135   : > { %v1800_v41 = vpop.f32.mrf.mxu3 }
 0x136   : > { %v7626_v57 = vadd.f32 %v1800_v41, %v1601_v49 }
 0x137   : > { %v1529_v34 = vpop.f32.mrf.mxu2  ;;  %v1287_v3 = vpop.f32.mrf.mxu1 }
 0x138   : > { %9839 = vst [vmem:[#allocation60_spill] sm:$0xff] %v7626_v57  ;;  %v1075_v26 = vpop.f32.mrf.mxu0 }
 0x13a   : > { %6273 = vmatmul.msk.f32.gmra.mxu3 %vm767_vm1, %v7628_v13  ;;  %6209 = vmatmul.msk.f32.gmra.mxu1 %vm767_vm1, %v7628_v13  ;;  %v1285_v13 = vadd.f32 %v1284_v18, %v1072_v11  ;;  %v7672_v11 = vld [vmem:[#allocation2 + $0x169] sm:$0xff] }
 0x13b   : > { %6176 = vmatmul.msk.f32.gmra.mxu0 %vm767_vm1, %v7630_v2  ;;  %v7656_v2 = vld [vmem:[#allocation2 + $0x159] sm:$0xff] }
 0x13c   : > { %6242 = vmatmul.msk.f32.gmra.mxu2 %vm767_vm1, %v7632_v1  ;;  %9844 = vst [vmem:[#allocation65_spill] sm:$0xff] %v7656_v2  ;;  %v1603_v10 = vadd.f32 %v1529_v34, %v1285_v13  ;;  %v2765_v1 = vld [vmem:[%s9789_s1 + $0x15] sm:$0x7] }
 0x13d   : > { %v1803_v50 = vpop.f32.mrf.mxu3  ;;  %6378 = vmatpush.msk.msra.mxu3 %vm1018_vm0, %v2765_v1  ;;  %v7690_v1 = vld [vmem:[#allocation2 + $0x170] sm:$0xff] }
 0x13e   : > { %v7652_v49 = vadd.f32 %v1803_v50, %v1602_v58  ;;  %v7670_v50 = vld [vmem:[#allocation2 + $0x168] sm:$0xff] }
 0x13f   : > { %v1532_v41 = vpop.f32.mrf.mxu2  ;;  %v1290_v33 = vpop.f32.mrf.mxu1 }
 0x140   : > { %9843 = vst [vmem:[#allocation64_spill] sm:$0xff] %v7652_v49  ;;  %v1078_v57 = vpop.f32.mrf.mxu0  ;;  %v7674_v49 = vld [vmem:[#allocation2 + $0x16a] sm:$0xff] }
 0x141   : > { %9847 = vst [vmem:[#allocation68_spill] sm:$0xff] %v7674_v49 }
 0x142   : > { %6274 = vmatmul.msk.f32.gmra.mxu3 %vm767_vm1, %v7654_v16  ;;  %6210 = vmatmul.msk.f32.gmra.mxu1 %vm767_vm1, %v7654_v16 }
 0x143   : > { %6177 = vmatmul.msk.f32.gmra.mxu0 %vm767_vm1, %v7656_v2  ;;  %v1291_v2 = vadd.f32 %v1290_v33, %v1078_v57 }
 0x144   : > { %6243 = vmatmul.msk.f32.gmra.mxu2 %vm767_vm1, %v7658_v12  ;;  %v1288_v12 = vadd.f32 %v1287_v3, %v1075_v26  ;;  %v7692_v26 = vld [vmem:[#allocation2 + $0x172] sm:$0xff] }
 0x145   : > { %v1806_v17 = vpop.f32.mrf.mxu3 }
 0x146   : > { %v7668_v42 = vadd.f32 %v1806_v17, %v1603_v10  ;;  %v1604_v34 = vadd.f32 %v1532_v41, %v1288_v12 }
 0x147   : > { %v1535_v19 = vpop.f32.mrf.mxu2  ;;  %v1293_v18 = vpop.f32.mrf.mxu1 }
 0x148   : > { %9846 = vst [vmem:[#allocation67_spill] sm:$0xff] %v7668_v42  ;;  %v1081_v58 = vpop.f32.mrf.mxu0  ;;  %v1605_v12 = vadd.f32 %v1535_v19, %v1291_v2 }
 0x149   : > { %v1294_v33 = vadd.f32 %v1293_v18, %v1081_v58 }
 0x14a   : > { %6275 = vmatmul.msk.f32.gmra.mxu3 %vm767_vm1, %v7670_v50  ;;  %6211 = vmatmul.msk.f32.gmra.mxu1 %vm767_vm1, %v7670_v50 }
 0x14b   : > { %6178 = vmatmul.msk.f32.gmra.mxu0 %vm767_vm1, %v7672_v11 }
 0x14c   : > { %6244 = vmatmul.msk.f32.gmra.mxu2 %vm767_vm1, %v7674_v49  ;;  %v7704_v49 = vld [vmem:[#allocation2 + $0x180] sm:$0xff] }
 0x14d   : > { %v1809_v13 = vpop.f32.mrf.mxu3 }
 0x14e   : > { %v7688_v10 = vadd.f32 %v1809_v13, %v1604_v34 }
 0x14f   : > { %v1538_v17 = vpop.f32.mrf.mxu2  ;;  %v1296_v3 = vpop.f32.mrf.mxu1 }
 0x150   : > { %9848 = vst [vmem:[#allocation69_spill] sm:$0xff] %v7688_v10  ;;  %v1084_v42 = vpop.f32.mrf.mxu0 }
 0x151   : > { %v1297_v18 = vadd.f32 %v1296_v3, %v1084_v42 }
 0x152   : > { %6276 = vmatmul.msk.f32.gmra.mxu3 %vm767_vm1, %v7690_v1  ;;  %6212 = vmatmul.msk.f32.gmra.mxu1 %vm767_vm1, %v7690_v1 }
 0x153   : > { %6280 = vmatmul.msk.f32.vlgmr.msrb.gmra.mxu0 %vm767_vm1, %v7186_v20  ;;  %v1606_v20 = vadd.f32 %v1538_v17, %v1294_v33 }
 0x154   : > { %6245 = vmatmul.msk.f32.gmra.mxu2 %vm767_vm1, %v7692_v26 }
 0x155   : > { %v1812_v41 = vpop.f32.mrf.mxu3 }
 0x156   : > { %v7702_v34 = vadd.f32 %v1812_v41, %v1605_v12 }
 0x157   : > { %v1541_v13 = vpop.f32.mrf.mxu2  ;;  %v1299_v57 = vpop.f32.mrf.mxu1 }
 0x158   : > { %9849 = vst [vmem:[#allocation70_spill] sm:$0xff] %v7702_v34  ;;  %v1087_v10 = vpop.f32.mrf.mxu0  ;;  %v7716_v34 = vld [vmem:[#allocation2 + $0x188] sm:$0xff] }
 0x159   : > { %v1300_v42 = vadd.f32 %v1299_v57, %v1087_v10 }
 0x15a   : > { %6277 = vmatmul.msk.f32.gmra.mxu3 %vm767_vm1, %v7704_v49  ;;  %6313 = vmatmul.msk.f32.vlgmr.msrb.gmra.mxu1 %vm767_vm1, %v7191_v21  ;;  %v1607_v21 = vadd.f32 %v1541_v13, %v1297_v18 }
 0x15b   : > { %6281 = vmatmul.msk.f32.gmra.mxu0 %vm767_vm1, %v7196_v23 }
 0x15c   : > { %6346 = vmatmul.msk.f32.vlgmr.msrb.gmra.mxu2 %vm767_vm1, %v7210_v27 }
 0x15d   : > { %v1815_v2 = vpop.f32.mrf.mxu3 }
 0x15e   : > { %v7714_v19 = vadd.f32 %v1815_v2, %v1606_v20 }
 0x15f   : > { %v1544_v12 = vpop.f32.mrf.mxu2  ;;  %v1302_v58 = vpop.f32.mrf.mxu1 }
 0x160   : > { %v1090_v41 = vpop.f32.mrf.mxu0 }
 0x161   : > { %v1303_v10 = vadd.f32 %v1302_v58, %v1090_v41 }
 0x162   : > { %6278 = vmatmul.msk.f32.gmra.mxu3 %vm767_vm1, %v7716_v34  ;;  %6314 = vmatmul.msk.f32.gmra.mxu1 %vm767_vm1, %v7198_v24  ;;  %v1608_v24 = vadd.f32 %v1544_v12, %v1300_v42 }
 0x163   : > { %6282 = vmatmul.msk.f32.gmra.mxu0 %vm767_vm1, %v7212_v28 }
 0x164   : > { %6347 = vmatmul.msk.f32.gmra.mxu2 %vm767_vm1, %v7224_v30 }
 0x165   : > { %v1818_v23 = vpop.f32.mrf.mxu3 }
 0x166   : > { %v7726_v27 = vadd.f32 %v1818_v23, %v1607_v21 }
 0x167   : > { %v1547_v17 = vpop.f32.mrf.mxu2  ;;  %v1305_v20 = vpop.f32.mrf.mxu1 }
 0x168   : > { %v1093_v33 = vpop.f32.mrf.mxu0 }
 0x169   : > { %v1306_v41 = vadd.f32 %v1305_v20, %v1093_v33 }
 0x16a   : > { %6379 = vmatmul.msk.f32.vlgmr.msra.gmra.mxu3 %vm767_vm1, %v7212_v28  ;;  %6315 = vmatmul.msk.f32.gmra.mxu1 %vm767_vm1, %v7214_v29  ;;  %v1609_v28 = vadd.f32 %v1547_v17, %v1303_v10 }
 0x16b   : > { %6283 = vmatmul.msk.f32.gmra.mxu0 %vm767_vm1, %v7226_v31 }
 0x16c   : > { %6348 = vmatmul.msk.f32.gmra.mxu2 %vm767_vm1, %v7242_v35 }
 0x16d   : > { %v1821_v30 = vpop.f32.mrf.mxu3 }
 0x16e   : > { %v7736_v3 = vadd.f32 %v1821_v30, %v1608_v24 }
 0x16f   : > { %v1550_v13 = vpop.f32.mrf.mxu2  ;;  %v1308_v18 = vpop.f32.mrf.mxu1 }
 0x170   : > { %9850 = vst [vmem:[#allocation71_spill] sm:$0xff] %v7736_v3  ;;  %v1096_v2 = vpop.f32.mrf.mxu0 }
 0x171   : > { %v1309_v33 = vadd.f32 %v1308_v18, %v1096_v2 }
 0x172   : > { %6380 = vmatmul.msk.f32.gmra.mxu3 %vm767_vm1, %v7226_v31  ;;  %6316 = vmatmul.msk.f32.gmra.mxu1 %vm767_vm1, %v7228_v32  ;;  %v1610_v31 = vadd.f32 %v1550_v13, %v1306_v41 }
 0x173   : > { %6284 = vmatmul.msk.f32.gmra.mxu0 %vm767_vm1, %v7244_v36 }
 0x174   : > { %6349 = vmatmul.msk.f32.gmra.mxu2 %vm767_vm1, %v7256_v38 }
 0x175   : > { %v1824_v29 = vpop.f32.mrf.mxu3 }
 0x176   : > { %v7746_v35 = vadd.f32 %v1824_v29, %v1609_v28 }
 0x177   : > { %v1553_v57 = vpop.f32.mrf.mxu2  ;;  %v1311_v21 = vpop.f32.mrf.mxu1 }
 0x178   : > { %9851 = vst [vmem:[#allocation72_spill] sm:$0xff] %v7746_v35  ;;  %v1099_v12 = vpop.f32.mrf.mxu0  ;;  %v3030_v35 = vld [vmem:[#allocation2 + $0x122] sm:$0xff] }
 0x179   : > { %v1312_v30 = vadd.f32 %v1311_v21, %v1099_v12 }
 0x17a   : > { %6381 = vmatmul.msk.f32.gmra.mxu3 %vm767_vm1, %v7244_v36  ;;  %6317 = vmatmul.msk.f32.gmra.mxu1 %vm767_vm1, %v7246_v37  ;;  %v1611_v36 = vadd.f32 %v1553_v57, %v1309_v33 }
 0x17b   : > { %6285 = vmatmul.msk.f32.gmra.mxu0 %vm767_vm1, %v7258_v39 }
 0x17c   : > { %6350 = vmatmul.msk.f32.gmra.mxu2 %vm767_vm1, %v7274_v43 }
 0x17d   : > { %v1827_v32 = vpop.f32.mrf.mxu3 }
 0x17e   : > { %v7756_v38 = vadd.f32 %v1827_v32, %v1610_v31 }
 0x17f   : > { %v1556_v58 = vpop.f32.mrf.mxu2  ;;  %v1314_v17 = vpop.f32.mrf.mxu1 }
 0x180   : > { %9852 = vst [vmem:[#allocation73_spill] sm:$0xff] %v7756_v38  ;;  %v1102_v23 = vpop.f32.mrf.mxu0 }
 0x181   : > { %v1315_v10 = vadd.f32 %v1314_v17, %v1102_v23 }
 0x182   : > { %6382 = vmatmul.msk.f32.gmra.mxu3 %vm767_vm1, %v7258_v39  ;;  %6318 = vmatmul.msk.f32.gmra.mxu1 %vm767_vm1, %v7260_v40  ;;  %v1612_v39 = vadd.f32 %v1556_v58, %v1312_v30 }
 0x183   : > { %6286 = vmatmul.msk.f32.gmra.mxu0 %vm767_vm1, %v7276_v44 }
 0x184   : > { %6351 = vmatmul.msk.f32.gmra.mxu2 %vm767_vm1, %v7288_v46 }
 0x185   : > { %v1830_v37 = vpop.f32.mrf.mxu3 }
 0x186   : > { %v7766_v43 = vadd.f32 %v1830_v37, %v1611_v36 }
 0x187   : > { %v1559_v20 = vpop.f32.mrf.mxu2  ;;  %v1317_v24 = vpop.f32.mrf.mxu1 }
 0x188   : > { %9853 = vst [vmem:[#allocation74_spill] sm:$0xff] %v7766_v43  ;;  %v1105_v42 = vpop.f32.mrf.mxu0 }
 0x189   : > { %v1318_v12 = vadd.f32 %v1317_v24, %v1105_v42 }
 0x18a   : > { %6383 = vmatmul.msk.f32.gmra.mxu3 %vm767_vm1, %v7276_v44  ;;  %6319 = vmatmul.msk.f32.gmra.mxu1 %vm767_vm1, %v7278_v45  ;;  %v1613_v44 = vadd.f32 %v1559_v20, %v1315_v10 }
 0x18b   : > { %6287 = vmatmul.msk.f32.gmra.mxu0 %vm767_vm1, %v7290_v47 }
 0x18c   : > { %6352 = vmatmul.msk.f32.gmra.mxu2 %vm767_vm1, %v7306_v51 }
 0x18d   : > { %v1833_v40 = vpop.f32.mrf.mxu3 }
 0x18e   : > { %v7776_v46 = vadd.f32 %v1833_v40, %v1612_v39 }
 0x18f   : > { %v1562_v13 = vpop.f32.mrf.mxu2  ;;  %v1320_v18 = vpop.f32.mrf.mxu1 }
 0x190   : > { %9854 = vst [vmem:[#allocation75_spill] sm:$0xff] %v7776_v46  ;;  %v1108_v2 = vpop.f32.mrf.mxu0  ;;  %v3032_v46 = vld [vmem:[#allocation2 + $0x13a] sm:$0xff] }
 0x191   : > { %v1321_v32 = vadd.f32 %v1320_v18, %v1108_v2 }
 0x192   : > { %6384 = vmatmul.msk.f32.gmra.mxu3 %vm767_vm1, %v7290_v47  ;;  %6320 = vmatmul.msk.f32.gmra.mxu1 %vm767_vm1, %v7292_v48  ;;  %v1614_v47 = vadd.f32 %v1562_v13, %v1318_v12 }
 0x193   : > { %6288 = vmatmul.msk.f32.gmra.mxu0 %vm767_vm1, %v7308_v52 }
 0x194   : > { %6353 = vmatmul.msk.f32.gmra.mxu2 %vm767_vm1, %v7320_v54 }
 0x195   : > { %v1836_v45 = vpop.f32.mrf.mxu3 }
 0x196   : > { %v7786_v51 = vadd.f32 %v1836_v45, %v1613_v44 }
 0x197   : > { %v1565_v28 = vpop.f32.mrf.mxu2  ;;  %v1323_v57 = vpop.f32.mrf.mxu1 }
 0x198   : > { %9855 = vst [vmem:[#allocation76_spill] sm:$0xff] %v7786_v51  ;;  %v1111_v29 = vpop.f32.mrf.mxu0 }
 0x199   : > { %v1324_v33 = vadd.f32 %v1323_v57, %v1111_v29 }
 0x19a   : > { %6385 = vmatmul.msk.f32.gmra.mxu3 %vm767_vm1, %v7308_v52  ;;  %6321 = vmatmul.msk.f32.gmra.mxu1 %vm767_vm1, %v7310_v53  ;;  %v1615_v52 = vadd.f32 %v1565_v28, %v1321_v32  ;;  %v9867_v32 = vld [vmem:[#allocation25_spill] sm:$0xff] }
 0x19b   : > { %6289 = vmatmul.msk.f32.gmra.mxu0 %vm767_vm1, %v7322_v55 }
 0x19c   : > { %6354 = vmatmul.msk.f32.gmra.mxu2 %vm767_vm1, %v7338_v59 }
 0x19d   : > { %v1839_v48 = vpop.f32.mrf.mxu3 }
 0x19e   : > { %v7796_v54 = vadd.f32 %v1839_v48, %v1614_v47 }
 0x19f   : > { %v1568_v21 = vpop.f32.mrf.mxu2  ;;  %v1326_v31 = vpop.f32.mrf.mxu1 }
 0x1a0   : > { %9856 = vst [vmem:[#allocation77_spill] sm:$0xff] %v7796_v54  ;;  %v1114_v41 = vpop.f32.mrf.mxu0  ;;  %v3033_v54 = vld [vmem:[#allocation2 + $0x142] sm:$0xff] }
 0x1a1   : > { %v1327_v42 = vadd.f32 %v1326_v31, %v1114_v41  ;;  %v9866_v31 = vld [vmem:[#allocation18_spill] sm:$0xff] }
 0x1a2   : > { %6386 = vmatmul.msk.f32.gmra.mxu3 %vm767_vm1, %v7322_v55  ;;  %6322 = vmatmul.msk.f32.gmra.mxu1 %vm767_vm1, %v7324_v56  ;;  %v1616_v55 = vadd.f32 %v1568_v21, %v1324_v33 }
 0x1a3   : > { %6290 = vmatmul.msk.f32.gmra.mxu0 %vm767_vm1, %v7340_v60 }
 0x1a4   : > { %6355 = vmatmul.msk.f32.gmra.mxu2 %vm767_vm1, %v7352_v62 }
 0x1a5   : > { %v1842_v53 = vpop.f32.mrf.mxu3 }
 0x1a6   : > { %v7806_v59 = vadd.f32 %v1842_v53, %v1615_v52  ;;  %v9868_v53 = vld [vmem:[#allocation12_spill] sm:$0xff] }
 0x1a7   : > { %v1571_v58 = vpop.f32.mrf.mxu2  ;;  %v1329_v17 = vpop.f32.mrf.mxu1 }
 0x1a8   : > { %9857 = vst [vmem:[#allocation78_spill] sm:$0xff] %v7806_v59  ;;  %v1117_v23 = vpop.f32.mrf.mxu0 }
 0x1a9   : > { %v1330_v40 = vadd.f32 %v1329_v17, %v1117_v23 }
 0x1aa   : > { %6387 = vmatmul.msk.f32.gmra.mxu3 %vm767_vm1, %v7340_v60  ;;  %6323 = vmatmul.msk.f32.gmra.mxu1 %vm767_vm1, %v7342_v61  ;;  %v1617_v60 = vadd.f32 %v1571_v58, %v1327_v42  ;;  %v9869_v58 = vld [vmem:[#allocation13_spill] sm:$0xff] }
 0x1ab   : > { %6291 = vmatmul.msk.f32.gmra.mxu0 %vm767_vm1, %v7354_v63  ;;  %v1252_v23 = vadd.f32 %v9869_v58, %v9868_v53 }
 0x1ac   : > { %6356 = vmatmul.msk.f32.gmra.mxu2 %vm767_vm1, %v7370_v4 }
 0x1ad   : > { %v1845_v56 = vpop.f32.mrf.mxu3 }
 0x1ae   : > { %v7816_v62 = vadd.f32 %v1845_v56, %v1616_v55  ;;  %v9871_v56 = vld [vmem:[#allocation15_spill] sm:$0xff] }
 0x1af   : > { %v1574_v36 = vpop.f32.mrf.mxu2  ;;  %v1332_v20 = vpop.f32.mrf.mxu1 }
 0x1b0   : > { %9858 = vst [vmem:[#allocation79_spill] sm:$0xff] %v7816_v62  ;;  %v1120_v37 = vpop.f32.mrf.mxu0  ;;  %v3034_v62 = vld [vmem:[#allocation2 + $0x152] sm:$0xff] }
 0x1b1   : > { %v1333_v10 = vadd.f32 %v1332_v20, %v1120_v37  ;;  %v9872_v20 = vld [vmem:[#allocation24_spill] sm:$0xff] }
 0x1b2   : > { %6388 = vmatmul.msk.f32.gmra.mxu3 %vm767_vm1, %v7354_v63  ;;  %6324 = vmatmul.msk.f32.gmra.mxu1 %vm767_vm1, %v7356_v0  ;;  %v1618_v63 = vadd.f32 %v1574_v36, %v1330_v40  ;;  %v1592_v36 = vadd.f32 %v9871_v56, %v1252_v23  ;;  %v9886_v56 = vld [vmem:[#allocation34_spill] sm:$0xff] }
 0x1b3   : > { %6292 = vmatmul.msk.f32.gmra.mxu0 %vm767_vm1, %v7372_v5 }
 0x1b4   : > { %6357 = vmatmul.msk.f32.gmra.mxu2 %vm767_vm1, %v7384_v7  ;;  %v1869_v42 = vadd.f32 %v9872_v20, %v1592_v36  ;;  %v9887_v36 = vld [vmem:[#allocation32_spill] sm:$0xff] }
 0x1b5   : > { %v1848_v61 = vpop.f32.mrf.mxu3 }
 0x1b6   : > { %v7826_v4 = vadd.f32 %v1848_v61, %v1617_v60  ;;  %v9873_v61 = vld [vmem:[#allocation26_spill] sm:$0xff] }
 0x1b7   : > { %v1577_v24 = vpop.f32.mrf.mxu2  ;;  %v1335_v39 = vpop.f32.mrf.mxu1 }
 0x1b8   : > { %9859 = vst [vmem:[#allocation80_spill] sm:$0xff] %v7826_v4  ;;  %v1123_v30 = vpop.f32.mrf.mxu0 }
 0x1b9   : > { %v1336_v29 = vadd.f32 %v1335_v39, %v1123_v30  ;;  %v9874_v30 = vld [vmem:[#allocation23_spill] sm:$0xff]  ;;  %v9875_v39 = vld [vmem:[#allocation29_spill] sm:$0xff] }
 0x1ba   : > { %6389 = vmatmul.msk.f32.gmra.mxu3 %vm767_vm1, %v7372_v5  ;;  %6325 = vmatmul.msk.f32.gmra.mxu1 %vm767_vm1, %v7374_v6  ;;  %v1619_v5 = vadd.f32 %v1577_v24, %v1333_v10 }
 0x1bb   : > { %6293 = vmatmul.msk.f32.gmra.mxu0 %vm767_vm1, %v7386_v8 }
 0x1bc   : > { %6358 = vmatmul.msk.f32.gmra.mxu2 %vm767_vm1, %v7406_v14 }
 0x1bd   : > { %v1851_v0 = vpop.f32.mrf.mxu3 }
 0x1be   : > { %v7836_v7 = vadd.f32 %v1851_v0, %v1618_v63  ;;  %v9876_v63 = vld [vmem:[#allocation16_spill] sm:$0xff]  ;;  %v9877_v0 = vld [vmem:[#allocation17_spill] sm:$0xff] }
 0x1bf   : > { %v1580_v13 = vpop.f32.mrf.mxu2  ;;  %v1338_v18 = vpop.f32.mrf.mxu1 }
 0x1c0   : > { %9860 = vst [vmem:[#allocation81_spill] sm:$0xff] %v7836_v7  ;;  %v1126_v2 = vpop.f32.mrf.mxu0 }
 0x1c1   : > { %v1339_v41 = vadd.f32 %v1338_v18, %v1126_v2 }
 0x1c2   : > { %6390 = vmatmul.msk.f32.gmra.mxu3 %vm767_vm1, %v7386_v8  ;;  %6326 = vmatmul.msk.f32.gmra.mxu1 %vm767_vm1, %v7388_v9  ;;  %v9862_v8 = vld [vmem:[#allocation14_spill] sm:$0xff]  ;;  %v9863_v9 = vld [vmem:[#allocation21_spill] sm:$0xff] }
 0x1c3   : > { %6294 = vmatmul.msk.f32.gmra.mxu0 %vm767_vm1, %v7408_v15 }
 0x1c4   : > { %6359 = vmatmul.msk.f32.gmra.mxu2 %vm767_vm1, %v7426_v22  ;;  %v1620_v22 = vadd.f32 %v1580_v13, %v1336_v29  ;;  %v1255_v13 = vadd.f32 %v9877_v0, %v9876_v63  ;;  %v9892_v63 = vld [vmem:[#allocation36_spill] sm:$0xff] }
 0x1c5   : > { %v1854_v6 = vpop.f32.mrf.mxu3 }
 0x1c6   : > { %v7846_v14 = vadd.f32 %v1854_v6, %v1619_v5  ;;  %v9879_v6 = vld [vmem:[#allocation20_spill] sm:$0xff] }
 0x1c7   : > { %v1583_v44 = vpop.f32.mrf.mxu2  ;;  %v1341_v28 = vpop.f32.mrf.mxu1 }
 0x1c8   : > { %9861 = vst [vmem:[#allocation82_spill] sm:$0xff] %v7846_v14  ;;  %v1129_v45 = vpop.f32.mrf.mxu0  ;;  %v1621_v52 = vadd.f32 %v1583_v44, %v1339_v41  ;;  %v1593_v44 = vadd.f32 %v9879_v6, %v1255_v13  ;;  %v9883_v41 = vld [vmem:[#allocation27_spill] sm:$0xff] }
 0x1c9   : > { %v1342_v60 = vadd.f32 %v1341_v28, %v1129_v45  ;;  %v9893_v13 = vld [vmem:[#allocation35_spill] sm:$0xff] }
 0x1ca   : > { %6391 = vmatmul.msk.f32.gmra.mxu3 %vm767_vm1, %v7408_v15  ;;  %6327 = vmatmul.msk.f32.gmra.mxu1 %vm767_vm1, %v9862_v8  ;;  %v9865_v15 = vld [vmem:[#allocation22_spill] sm:$0xff]  ;;  %v9880_v8 = vld [vmem:[#allocation28_spill] sm:$0xff] }
 0x1cb   : > { %6295 = vmatmul.msk.f32.gmra.mxu0 %vm767_vm1, %v7428_v25 }
 0x1cc   : > { %6360 = vmatmul.msk.f32.gmra.mxu2 %vm767_vm1, %v9863_v9  ;;  %v1870_v9 = vadd.f32 %v9880_v8, %v1593_v44  ;;  %v9896_v8 = vld [vmem:[#allocation42_spill] sm:$0xff] }
 0x1cd   : > { %v1857_v57 = vpop.f32.mrf.mxu3 }
 0x1ce   : > { %v7856_v12 = vadd.f32 %v1857_v57, %v1620_v22  ;;  %v9881_v22 = vld [vmem:[#allocation19_spill] sm:$0xff] }
 0x1cf   : > { %v1586_v47 = vpop.f32.mrf.mxu2  ;;  %v1344_v21 = vpop.f32.mrf.mxu1 }
 0x1d0   : > { %9864 = vst [vmem:[#allocation14_spill] sm:$0xff] %v7856_v12  ;;  %v2050_v48 = vpop.f32.mrf.mxu0  ;;  %v1622_v40 = vadd.f32 %v1586_v47, %v1342_v60  ;;  %v1345_v57 = vadd.f32 %v1344_v21, %v9881_v22  ;;  %v9882_v47 = vld [vmem:[#allocation30_spill] sm:$0xff] }
 0x1d1   : > { %v2146_v24 = vadd.f32 %v2050_v48, %v1869_v42 }
 0x1d2   : > { %6392 = vmatmul.msk.f32.gmra.mxu3 %vm767_vm1, %v7428_v25  ;;  %6328 = vmatmul.msk.f32.gmra.mxu1 %vm767_vm1, %v9866_v31 }
 0x1d3   : > { %6296 = vmatmul.msk.f32.gmra.mxu0 %vm767_vm1, %v9865_v15 }
 0x1d4   : > { %6361 = vmatmul.msk.f32.gmra.mxu2 %vm767_vm1, %v9867_v32 }
 0x1d5   : > { %v1860_v17 = vpop.f32.mrf.mxu3 }
 0x1d6   : > { %v7868_v33 = vadd.f32 %v1860_v17, %v1621_v52 }
 0x1d7   : > { %v1589_v55 = vpop.f32.mrf.mxu2  ;;  %v2327_v37 = vpop.f32.mrf.mxu1 }
 0x1d8   : > { %9870 = vst [vmem:[#allocation21_spill] sm:$0xff] %v7868_v33  ;;  %v2053_v25 = vpop.f32.mrf.mxu0  ;;  %v2423_v2 = vadd.f32 %v2327_v37, %v2146_v24  ;;  %v1623_v31 = vadd.f32 %v1589_v55, %v1345_v57  ;;  %v9888_v37 = vld [vmem:[#allocation31_spill] sm:$0xff]  ;;  %v9889_v55 = vld [vmem:[#allocation37_spill] sm:$0xff]  ;;  %v3037_v33 = vld [vmem:[#allocation2 + $0x172] sm:$0xff] }
 0x1d9   : > { %v2147_v48 = vadd.f32 %v2053_v25, %v1870_v9  ;;  %v9897_v9 = vld [vmem:[#allocation40_spill] sm:$0xff]  ;;  %v9898_v57 = vld [vmem:[#allocation39_spill] sm:$0xff] }
 0x1da   : > { %6393 = vmatmul.msk.f32.gmra.mxu3 %vm767_vm1, %v9865_v15  ;;  %6329 = vmatmul.msk.f32.gmra.mxu1 %vm767_vm1, %v9874_v30  ;;  %v9884_v15 = vld [vmem:[#allocation33_spill] sm:$0xff] }
 0x1db   : > { %6297 = vmatmul.msk.f32.gmra.mxu0 %vm767_vm1, %v9873_v61 }
 0x1dc   : > { %6362 = vmatmul.msk.f32.gmra.mxu2 %vm767_vm1, %v9875_v39 }
 0x1dd   : > { %v1863_v18 = vpop.f32.mrf.mxu3 }
 0x1de   : > { %v7882_v10 = vadd.f32 %v1863_v18, %v1622_v40  ;;  %v9891_v40 = vld [vmem:[#allocation38_spill] sm:$0xff] }
 0x1df   : > { %v2605_v5 = vpop.f32.mrf.mxu2  ;;  %v2330_v29 = vpop.f32.mrf.mxu1 }
 0x1e0   : > { %9878 = vst [vmem:[#allocation22_spill] sm:$0xff] %v7882_v10  ;;  %v2701_v45 = vadd.f32 %v2605_v5, %v2423_v2  ;;  %v2056_v28 = vpop.f32.mrf.mxu0  ;;  %v2424_v32 = vadd.f32 %v2330_v29, %v2147_v48  ;;  %v9894_v2 = vld [vmem:[#allocation41_spill] sm:$0xff] }
 0x1e1   : > { %v2148_v25 = vadd.f32 %v2056_v28, %v9887_v36  ;;  %v9904_v36 = vld [vmem:[#allocation49_spill] sm:$0xff] }
 0x1e2   : > { %6394 = vmatmul.msk.f32.gmra.mxu3 %vm767_vm1, %v9873_v61  ;;  %6330 = vmatmul.msk.f32.gmra.mxu1 %vm767_vm1, %v9883_v41 }
 0x1e3   : > { %6298 = vmatmul.msk.f32.gmra.mxu0 %vm767_vm1, %v9882_v47 }
 0x1e4   : > { %6363 = vmatmul.msk.f32.gmra.mxu2 %vm767_vm1, %v9884_v15 }
 0x1e5   : > { %v1866_v52 = vpop.f32.mrf.mxu3 }
 0x1e6   : > { %v7895_v53 = vadd.f32 %v1866_v52, %v1623_v31 }
 0x1e7   : > { %v2608_v58 = vpop.f32.mrf.mxu2  ;;  %v2333_v17 = vpop.f32.mrf.mxu1 }
 0x1e8   : > { %9885 = vst [vmem:[#allocation18_spill] sm:$0xff] %v7895_v53  ;;  %v2702_v21 = vadd.f32 %v2608_v58, %v2424_v32  ;;  %v2059_v23 = vpop.f32.mrf.mxu0  ;;  %v2425_v20 = vadd.f32 %v2333_v17, %v2148_v25 }
 0x1e9   : > { %v2149_v0 = vadd.f32 %v2059_v23, %v9892_v63  ;;  %v9902_v23 = vld [vmem:[#allocation44_spill] sm:$0xff]  ;;  %v9908_v63 = vld [vmem:[#allocation47_spill] sm:$0xff] }
 0x1ea   : > { %6395 = vmatmul.msk.f32.gmra.mxu3 %vm767_vm1, %v9882_v47  ;;  %6331 = vmatmul.msk.f32.gmra.mxu1 %vm767_vm1, %v9888_v37  ;;  %v9899_v47 = vld [vmem:[#allocation45_spill] sm:$0xff] }
 0x1eb   : > { %6299 = vmatmul.msk.f32.gmra.mxu0 %vm767_vm1, %v9886_v56 }
 0x1ec   : > { %6364 = vmatmul.msk.f32.gmra.mxu2 %vm767_vm1, %v9889_v55 }
 0x1ed   : > { %v2882_v42 = vpop.f32.mrf.mxu3 }
 0x1ee   : > { %v7906_v60 = vadd.f32 %v2882_v42, %v2701_v45 }
 0x1ef   : > { %v2611_v61 = vpop.f32.mrf.mxu2  ;;  %v2336_v39 = vpop.f32.mrf.mxu1 }
 0x1f0   : > { %9890 = vst [vmem:[#allocation25_spill] sm:$0xff] %v7906_v60  ;;  %v2703_v24 = vadd.f32 %v2611_v61, %v2425_v20  ;;  %v2062_v30 = vpop.f32.mrf.mxu0  ;;  %v2426_v18 = vadd.f32 %v2336_v39, %v2149_v0  ;;  %v9907_v39 = vld [vmem:[#allocation48_spill] sm:$0xff]  ;;  %v9909_v0 = vld [vmem:[#allocation53_spill] sm:$0xff] }
 0x1f1   : > { %v2150_v22 = vadd.f32 %v2062_v30, %v9897_v9  ;;  %v9906_v30 = vld [vmem:[#allocation50_spill] sm:$0xff] }
 0x1f2   : > { %6396 = vmatmul.msk.f32.gmra.mxu3 %vm767_vm1, %v9886_v56  ;;  %6332 = vmatmul.msk.f32.gmra.mxu1 %vm767_vm1, %v9893_v13  ;;  %v9903_v56 = vld [vmem:[#allocation43_spill] sm:$0xff] }
 0x1f3   : > { %6300 = vmatmul.msk.f32.gmra.mxu0 %vm767_vm1, %v9891_v40 }
 0x1f4   : > { %6365 = vmatmul.msk.f32.gmra.mxu2 %vm767_vm1, %v9894_v2 }
 0x1f5   : > { %v2885_v5 = vpop.f32.mrf.mxu3 }
 0x1f6   : > { %v7917_v6 = vadd.f32 %v2885_v5, %v2702_v21  ;;  %v9901_v21 = vld [vmem:[#allocation46_spill] sm:$0xff] }
 0x1f7   : > { %v2614_v44 = vpop.f32.mrf.mxu2  ;;  %v2339_v29 = vpop.f32.mrf.mxu1 }
 0x1f8   : > { %9895 = vst [vmem:[#allocation12_spill] sm:$0xff] %v7917_v6  ;;  %v2704_v45 = vadd.f32 %v2614_v44, %v2426_v18  ;;  %v2065_v28 = vpop.f32.mrf.mxu0  ;;  %v2427_v48 = vadd.f32 %v2339_v29, %v2150_v22  ;;  %v9910_v29 = vld [vmem:[#allocation54_spill] sm:$0xff]  ;;  %v9912_v22 = vld [vmem:[#allocation51_spill] sm:$0xff]  ;;  %v9953_v6 = vld [vmem:[#allocation69_spill] sm:$0xff] }
 0x1f9   : > { %v2151_v17 = vadd.f32 %v2065_v28, %v9902_v23  ;;  %v9915_v23 = vld [vmem:[#allocation55_spill] sm:$0xff] }
 0x1fa   : > { %6397 = vmatmul.msk.f32.gmra.mxu3 %vm767_vm1, %v9891_v40  ;;  %6333 = vmatmul.msk.f32.gmra.mxu1 %vm767_vm1, %v9898_v57  ;;  %v9913_v57 = vld [vmem:[#allocation57_spill] sm:$0xff] }
 0x1fb   : > { %6301 = vmatmul.msk.f32.gmra.mxu0 %vm767_vm1, %v9896_v8 }
 0x1fc   : > { %6366 = vmatmul.msk.f32.gmra.mxu2 %vm767_vm1, %v9899_v47 }
 0x1fd   : > { %v2888_v41 = vpop.f32.mrf.mxu3 }
 0x1fe   : > { %v7928_v15 = vadd.f32 %v2888_v41, %v2703_v24 }
 0x1ff   : > { %v2617_v31 = vpop.f32.mrf.mxu2  ;;  %v2342_v58 = vpop.f32.mrf.mxu1 }
 0x200   : > { %9900 = vst [vmem:[#allocation13_spill] sm:$0xff] %v7928_v15  ;;  %v2705_v32 = vadd.f32 %v2617_v31, %v2427_v48  ;;  %v2068_v52 = vpop.f32.mrf.mxu0  ;;  %v2428_v25 = vadd.f32 %v2342_v58, %v2151_v17  ;;  %v9916_v17 = vld [vmem:[#allocation61_spill] sm:$0xff] }
 0x201   : > { %v2152_v40 = vadd.f32 %v2068_v52, %v9907_v39  ;;  %v9920_v39 = vld [vmem:[#allocation63_spill] sm:$0xff] }
 0x202   : > { %6398 = vmatmul.msk.f32.gmra.mxu3 %vm767_vm1, %v9896_v8  ;;  %6334 = vmatmul.msk.f32.gmra.mxu1 %vm767_vm1, %v9903_v56  ;;  %v9911_v8 = vld [vmem:[#allocation52_spill] sm:$0xff] }
 0x203   : > { %6302 = vmatmul.msk.f32.gmra.mxu0 %vm767_vm1, %v9901_v21 }
 0x204   : > { %6367 = vmatmul.msk.f32.gmra.mxu2 %vm767_vm1, %v9904_v36 }
 0x205   : > { %v2891_v37 = vpop.f32.mrf.mxu3 }
 0x206   : > { %v7939_v55 = vadd.f32 %v2891_v37, %v2704_v45  ;;  %v9917_v37 = vld [vmem:[#allocation62_spill] sm:$0xff] }
 0x207   : > { %v2620_v20 = vpop.f32.mrf.mxu2  ;;  %v2345_v24 = vpop.f32.mrf.mxu1 }
 0x208   : > { %9905 = vst [vmem:[#allocation15_spill] sm:$0xff] %v7939_v55  ;;  %v2706_v42 = vadd.f32 %v2620_v20, %v2428_v25  ;;  %v2071_v61 = vpop.f32.mrf.mxu0  ;;  %v2429_v13 = vadd.f32 %v2345_v24, %v2152_v40  ;;  %v9918_v20 = vld [vmem:[#allocation59_spill] sm:$0xff] }
 0x209   : > { %v2153_v9 = vadd.f32 %v2071_v61, %v9911_v8  ;;  %v2763_v8 = vld [vmem:[#allocation2 + $0x199] sm:$0xff] }
 0x20a   : > { %6399 = vmatmul.msk.f32.gmra.mxu3 %vm767_vm1, %v9901_v21  ;;  %6335 = vmatmul.msk.f32.gmra.mxu1 %vm767_vm1, %v9908_v63  ;;  %v9914_v21 = vld [vmem:[#allocation58_spill] sm:$0xff] }
 0x20b   : > { %6303 = vmatmul.msk.f32.gmra.mxu0 %vm767_vm1, %v9906_v30 }
 0x20c   : > { %6368 = vmatmul.msk.f32.gmra.mxu2 %vm767_vm1, %v9909_v0  ;;  %v1930_v0 = vld [vmem:[#allocation2 + $0x171] sm:$0xff] }
 0x20d   : > { %v2894_v2 = vpop.f32.mrf.mxu3 }
 0x20e   : > { %v7950_v18 = vadd.f32 %v2894_v2, %v2705_v32  ;;  %v3042_v32 = vld [vmem:[%s9789_s1 + $0x18] sm:$0x7]  ;;  %v1931_v2 = vld [vmem:[#allocation2 + $0x181] sm:$0xff] }
 0x20f   : > { %v2623_v5 = vpop.f32.mrf.mxu2  ;;  %v2348_v28 = vpop.f32.mrf.mxu1  ;;  %6411 = vmatpush.msk.msra.mxu0 %vm1018_vm0, %v3042_v32 }
 0x210   : > { %v2707_v44 = vadd.f32 %v2623_v5, %v2429_v13  ;;  %v7952_v45 = vpop.f32.mrf.mxu0  ;;  %v2430_v47 = vadd.f32 %v2348_v28, %v2153_v9  ;;  %v8032_v5 = vld [vmem:[#allocation2 + $0x182] sm:$0xff]  ;;  %v8041_v28 = vld [vmem:[#allocation2 + $0x18a] sm:$0xff]  ;;  %v3011_v9 = vld [vmem:[#allocation2 + $0x3a] sm:$0xff] }
 0x212   : > { %6400 = vmatmul.msk.f32.gmra.mxu3 %vm767_vm1, %v9906_v30  ;;  %6336 = vmatmul.msk.f32.gmra.mxu1 %vm767_vm1, %v9912_v22  ;;  %v9919_v30 = vld [vmem:[#allocation65_spill] sm:$0xff] }
 0x213   : > { %6304 = vmatmul.msk.f32.gmra.mxu0 %vm767_vm1, %v9910_v29 }
 0x214   : > { %6369 = vmatmul.msk.f32.gmra.mxu2 %vm767_vm1, %v9913_v57  ;;  %v2764_v57 = vld [vmem:[#allocation2 + $0x1a1] sm:$0xff] }
 0x215   : > { %v2897_v48 = vpop.f32.mrf.mxu3 }
 0x216   : > { %v7963_v41 = vadd.f32 %v2897_v48, %v2706_v42 }
 0x217   : > { %v2626_v31 = vpop.f32.mrf.mxu2 }
 0x218   : > { %v2708_v52 = vadd.f32 %v2626_v31, %v2430_v47  ;;  %v7968_v58 = vpop.f32.mrf.mxu0  ;;  %v3012_v47 = vld [vmem:[#allocation2 + $0x4a] sm:$0xff]  ;;  %v3013_v31 = vld [vmem:[#allocation2 + $0x52] sm:$0xff] }
 0x21a   : > { %6401 = vmatmul.msk.f32.gmra.mxu3 %vm767_vm1, %v9910_v29  ;;  %6337 = vmatmul.msk.f32.gmra.mxu1 %vm767_vm1, %v9915_v23  ;;  %v3015_v23 = vld [vmem:[#allocation2 + $0x6a] sm:$0xff] }
 0x21b   : > { %6305 = vmatmul.msk.f32.gmra.mxu0 %vm767_vm1, %v9914_v21 }
 0x21c   : > { %6370 = vmatmul.msk.f32.gmra.mxu2 %vm767_vm1, %v9916_v17 }
 0x21d   : > { %v2900_v56 = vpop.f32.mrf.mxu3 }
 0x21e   : > { %v7979_v36 = vadd.f32 %v2900_v56, %v2707_v44  ;;  %v2486_v44 = vld [vmem:[#allocation2 + $0x198] sm:$0xff] }
 0x21f   : > { %v3016_v56 = vld [vmem:[#allocation2 + $0x7a] sm:$0xff] }
 0x220   : > { %v7981_v25 = vpop.f32.mrf.mxu0 }
 0x222   : > { %6402 = vmatmul.msk.f32.gmra.mxu3 %vm767_vm1, %v9914_v21  ;;  %6338 = vmatmul.msk.f32.gmra.mxu1 %vm767_vm1, %v9918_v20  ;;  %v3017_v20 = vld [vmem:[#allocation2 + $0x82] sm:$0xff] }
 0x223   : > { %6306 = vmatmul.msk.f32.gmra.mxu0 %vm767_vm1, %v9917_v37 }
 0x224   : > { %6371 = vmatmul.msk.f32.gmra.mxu2 %vm767_vm1, %v7654_v16  ;;  %v9921_v16 = vld [vmem:[#allocation66_spill] sm:$0xff] }
 0x225   : > { %v2903_v42 = vpop.f32.mrf.mxu3 }
 0x226   : > { %v7991_v61 = vadd.f32 %v2903_v42, %v2708_v52  ;;  %v3014_v52 = vld [vmem:[#allocation2 + $0x62] sm:$0xff] }
 0x228   : > { %v7993_v24 = vpop.f32.mrf.mxu0 }
 0x22a   : > { %6403 = vmatmul.msk.f32.gmra.mxu3 %vm767_vm1, %v9917_v37  ;;  %6339 = vmatmul.msk.f32.gmra.mxu1 %vm767_vm1, %v9920_v39 }
 0x22b   : > { %6307 = vmatmul.msk.f32.gmra.mxu0 %vm767_vm1, %v9919_v30 }
 0x22c   : > { %6372 = vmatmul.msk.f32.gmra.mxu2 %vm767_vm1, %v7670_v50  ;;  %v9922_v50 = vld [vmem:[#allocation68_spill] sm:$0xff] }
 0x230   : > { %v8003_v40 = vpop.f32.mrf.mxu0 }
 0x232   : > { %6404 = vmatmul.msk.f32.gmra.mxu3 %vm767_vm1, %v9919_v30  ;;  %6340 = vmatmul.msk.f32.gmra.mxu1 %vm767_vm1, %v9921_v16  ;;  %v3018_v30 = vld [vmem:[#allocation2 + $0x92] sm:$0xff]  ;;  %v3019_v16 = vld [vmem:[#allocation2 + $0x9a] sm:$0xff] }
 0x233   : > { %6308 = vmatmul.msk.f32.gmra.mxu0 %vm767_vm1, %v7672_v11 }
 0x234   : > { %6373 = vmatmul.msk.f32.gmra.mxu2 %vm767_vm1, %v7690_v1  ;;  %v1932_v1 = vld [vmem:[#allocation2 + $0x189] sm:$0xff] }
 0x238   : > { %v8013_v63 = vpop.f32.mrf.mxu0 }
 0x23a   : > { %6405 = vmatmul.msk.f32.gmra.mxu3 %vm767_vm1, %v7672_v11  ;;  %6341 = vmatmul.msk.f32.gmra.mxu1 %vm767_vm1, %v9922_v50  ;;  %v3020_v50 = vld [vmem:[#allocation2 + $0xaa] sm:$0xff] }
 0x23b   : > { %6309 = vmatmul.msk.f32.gmra.mxu0 %vm767_vm1, %v1930_v0 }
 0x23c   : > { %6374 = vmatmul.msk.f32.gmra.mxu2 %vm767_vm1, %v7704_v49 }
 0x240   : > { %v8022_v13 = vpop.f32.mrf.mxu0 }
 0x242   : > { %6406 = vmatmul.msk.f32.gmra.mxu3 %vm767_vm1, %v1930_v0  ;;  %6342 = vmatmul.msk.f32.gmra.mxu1 %vm767_vm1, %v7692_v26  ;;  %v3010_v26 = vld [vmem:[#allocation2 + $0x32] sm:$0xff] }
 0x243   : > { %6310 = vmatmul.msk.f32.gmra.mxu0 %vm767_vm1, %v1931_v2 }
 0x244   : > { %6375 = vmatmul.msk.f32.gmra.mxu2 %vm767_vm1, %v7716_v34  ;;  %v2487_v34 = vld [vmem:[#allocation2 + $0x1a0] sm:$0xff] }
 0x248   : > { %v8030_v11 = vpop.f32.mrf.mxu0 }
 0x249   : > { %v2161_v60 = vadd.f32 %v8030_v11, %v7726_v27  ;;  %v9954_v27 = vld [vmem:[#allocation67_spill] sm:$0xff] }
 0x24a   : > { %6407 = vmatmul.msk.f32.gmra.mxu3 %vm767_vm1, %v1931_v2  ;;  %6343 = vmatmul.msk.f32.gmra.mxu1 %vm767_vm1, %v8032_v5  ;;  %v2157_v11 = vadd.f32 %v7993_v24, %v9954_v27  ;;  %v9958_v24 = vld [vmem:[#allocation60_spill] sm:$0xff] }
 0x24b   : > { %6311 = vmatmul.msk.f32.gmra.mxu0 %vm767_vm1, %v1932_v1 }
 0x24c   : > { %6376 = vmatmul.msk.f32.gmra.mxu2 %vm767_vm1, %v2486_v44 }
 0x250   : > { %v8039_v49 = vpop.f32.mrf.mxu0 }
 0x251   : > { %9923 = vst [vmem:[#allocation24_spill] sm:$0xff] %v8039_v49  ;;  %v3029_v49 = vld [vmem:[#allocation2 + $0x112] sm:$0xff] }
 0x252   : > { %6408 = vmatmul.msk.f32.gmra.mxu3 %vm767_vm1, %v1932_v1  ;;  %6344 = vmatmul.msk.f32.gmra.mxu1 %vm767_vm1, %v8041_v28  ;;  %v3021_v1 = vld [vmem:[#allocation2 + $0xb2] sm:$0xff] }
 0x253   : > { %6412 = vmatmul.msk.f32.vlgmr.msra.gmra.mxu0 %vm767_vm1, %v3010_v26  ;;  %v3022_v26 = vld [vmem:[#allocation2 + $0xc2] sm:$0xff] }
 0x254   : > { %6377 = vmatmul.msk.f32.gmra.mxu2 %vm767_vm1, %v2487_v34 }
 0x258   : > { %v8048_v29 = vpop.f32.mrf.mxu0 }
 0x259   : > { %9924 = vst [vmem:[#allocation26_spill] sm:$0xff] %v8048_v29 }
 0x25a   : > { %6409 = vmatmul.msk.f32.gmra.mxu3 %vm767_vm1, %v2763_v8  ;;  %v3023_v8 = vld [vmem:[#allocation2 + $0xca] sm:$0xff] }
 0x25b   : > { %6413 = vmatmul.msk.f32.gmra.mxu0 %vm767_vm1, %v3011_v9 }
 0x260   : > { %v8052_v22 = vpop.f32.mrf.mxu0 }
 0x261   : > { %9925 = vst [vmem:[#allocation23_spill] sm:$0xff] %v8052_v22 }
 0x262   : > { %6410 = vmatmul.msk.f32.gmra.mxu3 %vm767_vm1, %v2764_v57  ;;  %v3024_v57 = vld [vmem:[#allocation2 + $0xda] sm:$0xff] }
 0x263   : > { %6414 = vmatmul.msk.f32.gmra.mxu0 %vm767_vm1, %v3012_v47 }
 0x268   : > { %v8056_v48 = vpop.f32.mrf.mxu0 }
 0x269   : > { %9926 = vst [vmem:[#allocation29_spill] sm:$0xff] %v8056_v48  ;;  %v3031_v48 = vld [vmem:[#allocation2 + $0x12a] sm:$0xff] }
 0x26b   : > { %6415 = vmatmul.msk.f32.gmra.mxu0 %vm767_vm1, %v3013_v31  ;;  %v3025_v31 = vld [vmem:[#allocation2 + $0xe2] sm:$0xff] }
 0x270   : > { %v8059_v32 = vpop.f32.mrf.mxu0 }
 0x271   : > { %9927 = vst [vmem:[#allocation16_spill] sm:$0xff] %v8059_v32 }
 0x273   : > { %6416 = vmatmul.msk.f32.gmra.mxu0 %vm767_vm1, %v3014_v52 }
 0x278   : > { %v8062_v21 = vpop.f32.mrf.mxu0 }
 0x279   : > { %9928 = vst [vmem:[#allocation17_spill] sm:$0xff] %v8062_v21 }
 0x27b   : > { %6417 = vmatmul.msk.f32.gmra.mxu0 %vm767_vm1, %v3015_v23  ;;  %v3026_v23 = vld [vmem:[#allocation2 + $0xf2] sm:$0xff] }
 0x280   : > { %v8065_v17 = vpop.f32.mrf.mxu0 }
 0x281   : > { %9929 = vst [vmem:[#allocation20_spill] sm:$0xff] %v8065_v17 }
 0x283   : > { %6418 = vmatmul.msk.f32.gmra.mxu0 %vm767_vm1, %v3016_v56 }
 0x288   : > { %v8068_v37 = vpop.f32.mrf.mxu0 }
 0x289   : > { %9930 = vst [vmem:[#allocation28_spill] sm:$0xff] %v8068_v37 }
 0x28b   : > { %6419 = vmatmul.msk.f32.gmra.mxu0 %vm767_vm1, %v3017_v20  ;;  %v3027_v20 = vld [vmem:[#allocation2 + $0xfa] sm:$0xff] }
 0x290   : > { %v8071_v42 = vpop.f32.mrf.mxu0 }
 0x291   : > { %9931 = vst [vmem:[#allocation19_spill] sm:$0xff] %v8071_v42 }
 0x293   : > { %6420 = vmatmul.msk.f32.gmra.mxu0 %vm767_vm1, %v3018_v30  ;;  %v8100_v30 = vpop.f32.mrf.mxu1 }
 0x298   : > { %v8074_v39 = vpop.f32.mrf.mxu0 }
 0x299   : > { %9932 = vst [vmem:[#allocation30_spill] sm:$0xff] %v8074_v39 }
 0x29b   : > { %6421 = vmatmul.msk.f32.gmra.mxu0 %vm767_vm1, %v3019_v16  ;;  %v8103_v16 = vpop.f32.mrf.mxu2 }
 0x2a0   : > { %v8077_v0 = vpop.f32.mrf.mxu0 }
 0x2a1   : > { %9933 = vst [vmem:[#allocation27_spill] sm:$0xff] %v8077_v0  ;;  %v3035_v0 = vld [vmem:[#allocation2 + $0x15a] sm:$0xff] }
 0x2a3   : > { %6422 = vmatmul.msk.f32.gmra.mxu0 %vm767_vm1, %v3020_v50  ;;  %v8105_v50 = vpop.f32.mrf.mxu3 }
 0x2a8   : > { %v8080_v2 = vpop.f32.mrf.mxu0 }
 0x2a9   : > { %9934 = vst [vmem:[#allocation33_spill] sm:$0xff] %v8080_v2 }
 0x2ab   : > { %6423 = vmatmul.msk.f32.gmra.mxu0 %vm767_vm1, %v3021_v1 }
 0x2b0   : > { %v8083_v44 = vpop.f32.mrf.mxu0 }
 0x2b1   : > { %9935 = vst [vmem:[#allocation34_spill] sm:$0xff] %v8083_v44 }
 0x2b3   : > { %6424 = vmatmul.msk.f32.gmra.mxu0 %vm767_vm1, %v3022_v26  ;;  %v3028_v26 = vld [vmem:[#allocation2 + $0x10a] sm:$0xff] }
 0x2b8   : > { %v8086_v34 = vpop.f32.mrf.mxu0 }
 0x2b9   : > { %9936 = vst [vmem:[#allocation32_spill] sm:$0xff] %v8086_v34 }
 0x2bb   : > { %6425 = vmatmul.msk.f32.gmra.mxu0 %vm767_vm1, %v3023_v8  ;;  %v8110_v8 = vpop.f32.mrf.mxu1 }
 0x2c0   : > { %v8089_v9 = vpop.f32.mrf.mxu0 }
 0x2c1   : > { %9937 = vst [vmem:[#allocation31_spill] sm:$0xff] %v8089_v9 }
 0x2c3   : > { %6426 = vmatmul.msk.f32.gmra.mxu0 %vm767_vm1, %v3024_v57  ;;  %v8112_v57 = vpop.f32.mrf.mxu2 }
 0x2c8   : > { %v8092_v47 = vpop.f32.mrf.mxu0 }
 0x2c9   : > { %9938 = vst [vmem:[#allocation37_spill] sm:$0xff] %v8092_v47 }
 0x2cb   : > { %6427 = vmatmul.msk.f32.gmra.mxu0 %vm767_vm1, %v3025_v31  ;;  %v8114_v31 = vpop.f32.mrf.mxu3  ;;  %v8121_v3 = vpop.f32.mrf.mxu2 }
 0x2d0   : > { %v8095_v52 = vpop.f32.mrf.mxu0 }
 0x2d1   : > { %9939 = vst [vmem:[#allocation38_spill] sm:$0xff] %v8095_v52 }
 0x2d3   : > { %6428 = vmatmul.msk.f32.gmra.mxu0 %vm767_vm1, %v3026_v23  ;;  %v8125_v22 = vpop.f32.mrf.mxu3  ;;  %v8132_v43 = vpop.f32.mrf.mxu2 }
 0x2d8   : > { %v8098_v56 = vpop.f32.mrf.mxu0 }
 0x2d9   : > { %9940 = vst [vmem:[#allocation36_spill] sm:$0xff] %v8098_v56 }
 0x2db   : > { %6429 = vmatmul.msk.f32.gmra.mxu0 %vm767_vm1, %v3027_v20  ;;  %v8119_v20 = vpop.f32.mrf.mxu1  ;;  %v8140_v51 = vpop.f32.mrf.mxu2 }
 0x2e0   : > { %v8107_v1 = vpop.f32.mrf.mxu0 }
 0x2e1   : > { %9941 = vst [vmem:[#allocation35_spill] sm:$0xff] %v8107_v1 }
 0x2e3   : > { %6430 = vmatmul.msk.f32.gmra.mxu0 %vm767_vm1, %v3028_v26  ;;  %v8128_v26 = vpop.f32.mrf.mxu1  ;;  %v2644_v59 = vpop.f32.mrf.mxu2 }
 0x2e8   : > { %v8116_v23 = vpop.f32.mrf.mxu0 }
 0x2e9   : > { %9942 = vst [vmem:[#allocation41_spill] sm:$0xff] %v8116_v23 }
 0x2eb   : > { %6431 = vmatmul.msk.f32.gmra.mxu0 %vm767_vm1, %v3029_v49  ;;  %v8135_v49 = vpop.f32.mrf.mxu3  ;;  %v2363_v21 = vpop.f32.mrf.mxu1 }
 0x2ec   : > { %v2647_v4 = vpop.f32.mrf.mxu2 }
 0x2f0   : > { %v8123_v29 = vpop.f32.mrf.mxu0 }
 0x2f3   : > { %6432 = vmatmul.msk.f32.gmra.mxu0 %vm767_vm1, %v3030_v35  ;;  %v8142_v35 = vpop.f32.mrf.mxu3  ;;  %v2366_v37 = vpop.f32.mrf.mxu1 }
 0x2f4   : > { %v2650_v44 = vpop.f32.mrf.mxu2 }
 0x2f8   : > { %v8130_v38 = vpop.f32.mrf.mxu0 }
 0x2fb   : > { %6433 = vmatmul.msk.f32.gmra.mxu0 %vm767_vm1, %v3031_v48  ;;  %v2921_v48 = vpop.f32.mrf.mxu3  ;;  %v2369_v39 = vpop.f32.mrf.mxu1 }
 0x300   : > { %v8137_v32 = vpop.f32.mrf.mxu0 }
 0x303   : > { %6434 = vmatmul.msk.f32.gmra.mxu0 %vm767_vm1, %v3032_v46  ;;  %v2924_v7 = vpop.f32.mrf.mxu3  ;;  %v2372_v2 = vpop.f32.mrf.mxu1 }
 0x308   : > { %v8144_v17 = vpop.f32.mrf.mxu0 }
 0x30b   : > { %6435 = vmatmul.msk.f32.gmra.mxu0 %vm767_vm1, %v3033_v54  ;;  %v3036_v54 = vld [vmem:[#allocation2 + $0x16a] sm:$0xff]  ;;  %v2927_v12 = vpop.f32.mrf.mxu3  ;;  %v8156_v9 = vpop.f32.mrf.mxu1 }
 0x30c   : > { %9943 = vst [vmem:[#allocation42_spill] sm:$0xff] %v8156_v9 }
 0x310   : > { %v8147_v42 = vpop.f32.mrf.mxu0 }
 0x313   : > { %6436 = vmatmul.msk.f32.gmra.mxu0 %vm767_vm1, %v3034_v62  ;;  %v8159_v62 = vpop.f32.mrf.mxu2  ;;  %v8161_v10 = vpop.f32.mrf.mxu3 }
 0x314   : > { %9944 = vst [vmem:[#allocation40_spill] sm:$0xff] %v8159_v62 }
 0x315   : > { %9945 = vst [vmem:[#allocation39_spill] sm:$0xff] %v8161_v10  ;;  %v3040_v10 = vld [vmem:[#allocation2 + $0x19a] sm:$0xff] }
 0x318   : > { %v8150_v46 = vpop.f32.mrf.mxu0 }
 0x31b   : > { %6437 = vmatmul.msk.f32.gmra.mxu0 %vm767_vm1, %v3035_v0  ;;  %v8165_v0 = vpop.f32.mrf.mxu1  ;;  %v8167_v53 = vpop.f32.mrf.mxu2 }
 0x31c   : > { %9946 = vst [vmem:[#allocation45_spill] sm:$0xff] %v8165_v0  ;;  %v2438_v0 = vadd.f32 %v2372_v2, %v2161_v60  ;;  %v3041_v60 = vld [vmem:[#allocation2 + $0x1a2] sm:$0xff] }
 0x31d   : > { %9947 = vst [vmem:[#allocation46_spill] sm:$0xff] %v8167_v53  ;;  %v2160_v53 = vadd.f32 %v8022_v13, %v7714_v19 }
 0x31f   : > { %v2437_v56 = vadd.f32 %v2369_v39, %v2160_v53  ;;  %v2434_v39 = vadd.f32 %v8128_v26, %v2157_v11 }
 0x320   : > { %v8153_v14 = vpop.f32.mrf.mxu0 }
 0x321   : > { %v2715_v15 = vadd.f32 %v2647_v4, %v2437_v56 }
 0x323   : > { %6438 = vmatmul.msk.f32.gmra.mxu0 %vm767_vm1, %v3036_v54  ;;  %v8169_v54 = vpop.f32.mrf.mxu3  ;;  %v8173_v9 = vpop.f32.mrf.mxu1  ;;  %v2992_v2 = vadd.f32 %v2924_v7, %v2715_v15  ;;  %v2712_v15 = vadd.f32 %v8132_v43, %v2434_v39 }
 0x324   : > { %9948 = vst [vmem:[#allocation44_spill] sm:$0xff] %v8169_v54  ;;  %v9952_v54 = vld [vmem:[#allocation70_spill] sm:$0xff] }
 0x325   : > { %9949 = vst [vmem:[#allocation43_spill] sm:$0xff] %v8173_v9  ;;  %v2716_v9 = vadd.f32 %v2650_v44, %v2438_v0  ;;  %v9960_v44 = vld [vmem:[#allocation56_spill] sm:$0xff]  ;;  %v2989_v56 = vadd.f32 %v8135_v49, %v2712_v15 }
 0x327   : > { %v2993_v23 = vadd.f32 %v2927_v12, %v2716_v9 }
 0x328   : > { %v3192_v34 = vpop.f32.mrf.mxu0 }
 0x32b   : > { %6439 = vmatmul.msk.f32.gmra.mxu0 %vm767_vm1, %v3037_v33  ;;  %v8175_v33 = vpop.f32.mrf.mxu2 }
 0x32c   : > { %9950 = vst [vmem:[#allocation49_spill] sm:$0xff] %v8175_v33  ;;  %v2158_v33 = vadd.f32 %v8003_v40, %v9953_v6 }
 0x32e   : > { %v2435_v13 = vadd.f32 %v2363_v21, %v2158_v33  ;;  %v2155_v21 = vadd.f32 %v7968_v58, %v9958_v24 }
 0x330   : > { %v3195_v47 = vpop.f32.mrf.mxu0  ;;  %v2713_v4 = vadd.f32 %v8140_v51, %v2435_v13  ;;  %v2154_v51 = vadd.f32 %v7952_v45, %v9960_v44  ;;  %v2432_v9 = vadd.f32 %v8110_v8, %v2155_v21 }
 0x332   : > { %v2710_v43 = vadd.f32 %v8112_v57, %v2432_v9 }
 0x333   : > { %6440 = vmatmul.msk.f32.gmra.mxu0 %vm767_vm1, %v8032_v5  ;;  %v8179_v5 = vpop.f32.mrf.mxu3  ;;  %v8195_v6 = vpop.f32.mrf.mxu2 }
 0x334   : > { %9951 = vst [vmem:[#allocation50_spill] sm:$0xff] %v8179_v5  ;;  %v8190_v5 = vpop.f32.mrf.mxu1 }
 0x335   : > { %9955 = vst [vmem:[#allocation48_spill] sm:$0xff] %v8190_v5 }
 0x336   : > { %9957 = vst [vmem:[#allocation47_spill] sm:$0xff] %v8195_v6  ;;  %v9987_v6 = vld [vmem:[#allocation82_spill] sm:$0xff] }
 0x338   : > { %v3198_v52 = vpop.f32.mrf.mxu0 }
 0x33b   : > { %6441 = vmatmul.msk.f32.gmra.mxu0 %vm767_vm1, %v8041_v28  ;;  %v2159_v28 = vadd.f32 %v8013_v63, %v9952_v54  ;;  %v9956_v63 = vld [vmem:[#allocation64_spill] sm:$0xff] }
 0x33c   : > { %v2156_v53 = vadd.f32 %v7981_v25, %v9956_v63  ;;  %v2990_v25 = vadd.f32 %v8142_v35, %v2713_v4  ;;  %v8216_v26 = vpop.f32.mrf.mxu1 }
 0x33d   : > { %v2436_v1 = vadd.f32 %v2366_v37, %v2159_v28 }
 0x33e   : > { %v2433_v7 = vadd.f32 %v8119_v20, %v2156_v53  ;;  %v3267_v58 = vadd.f32 %v3195_v47, %v2990_v25  ;;  %v3266_v20 = vadd.f32 %v3192_v34, %v2989_v56  ;;  %v8221_v47 = vpop.f32.mrf.mxu2 }
 0x33f   : > { %9962 = vst [vmem:[#allocation52_spill] sm:$0xff] %v8221_v47 }
 0x340   : > { %v3201_v62 = vpop.f32.mrf.mxu0 }
 0x341   : > { %v3269_v40 = vadd.f32 %v3201_v62, %v2992_v2  ;;  %v9970_v62 = vld [vmem:[#allocation35_spill] sm:$0xff] }
 0x343   : > { %6442 = vmatmul.msk.f32.gmra.mxu0 %vm767_vm1, %v3040_v10  ;;  %v2714_v10 = vadd.f32 %v2644_v59, %v2436_v1  ;;  %v8201_v59 = vpop.f32.mrf.mxu3 }
 0x344   : > { %9959 = vst [vmem:[#allocation53_spill] sm:$0xff] %v8201_v59 }
 0x345   : > { %v2991_v12 = vadd.f32 %v2921_v48, %v2714_v10 }
 0x346   : > { %v8238_v35 = vpop.f32.mrf.mxu2 }
 0x347   : > { %v3268_v37 = vadd.f32 %v3198_v52, %v2991_v12 }
 0x348   : > { %v3204_v19 = vpop.f32.mrf.mxu0 }
 0x349   : > { %v3270_v55 = vadd.f32 %v3204_v19, %v2993_v23  ;;  %v2431_v23 = vadd.f32 %v8100_v30, %v2154_v51 }
 0x34b   : > { %6443 = vmatmul.msk.f32.gmra.mxu0 %vm767_vm1, %v3041_v60  ;;  %3307 = vmatpush.msra.mxu1 %v3270_v55  ;;  %v2711_v55 = vadd.f32 %v8121_v3, %v2433_v7  ;;  %v2709_v45 = vadd.f32 %v8103_v16, %v2431_v23  ;;  %v2987_v3 = vadd.f32 %v8114_v31, %v2710_v43  ;;  %v8225_v57 = vpop.f32.mrf.mxu3  ;;  %v8234_v31 = vpop.f32.mrf.mxu1 }
 0x34c   : > { %9963 = vst [vmem:[#allocation51_spill] sm:$0xff] %v8225_v57  ;;  %v3262_v16 = vadd.f32 %v8144_v17, %v7991_v61  ;;  %v9967_v17 = vld [vmem:[#allocation15_spill] sm:$0xff] }
 0x34d   : > { %3308 = vmatpush.msra.mxu1 %v3269_v40  ;;  %v2988_v52 = vadd.f32 %v8125_v22, %v2711_v55  ;;  %v2986_v49 = vadd.f32 %v8105_v50, %v2709_v45  ;;  %v3264_v30 = vadd.f32 %v8150_v46, %v2987_v3  ;;  %v3260_v50 = vadd.f32 %v8130_v38, %v7963_v41  ;;  %v9968_v46 = vld [vmem:[#allocation41_spill] sm:$0xff]  ;;  %v9971_v38 = vld [vmem:[#allocation12_spill] sm:$0xff] }
 0x34e   : > { %v9972_v41 = vld [vmem:[#allocation36_spill] sm:$0xff]  ;;  %v8256_v27 = vpop.f32.mrf.mxu2 }
 0x34f   : > { %3309 = vmatpush.msra.mxu1 %v3268_v37  ;;  %v3265_v8 = vadd.f32 %v8153_v14, %v2988_v52  ;;  %v3263_v22 = vadd.f32 %v8147_v42, %v2986_v49  ;;  %v3261_v14 = vadd.f32 %v8137_v32, %v7979_v36  ;;  %v3259_v42 = vadd.f32 %v8123_v29, %v7950_v18  ;;  %v9969_v32 = vld [vmem:[#allocation13_spill] sm:$0xff]  ;;  %v9974_v29 = vld [vmem:[#allocation38_spill] sm:$0xff] }
 0x350   : > { %v8211_v1 = vpop.f32.mrf.mxu0  ;;  %v3258_v36 = vadd.f32 %v9968_v46, %v9967_v17  ;;  %v3257_v0 = vadd.f32 %v9970_v62, %v9969_v32  ;;  %v3256_v54 = vadd.f32 %v9972_v41, %v9971_v38  ;;  %v9973_v18 = vld [vmem:[#allocation25_spill] sm:$0xff]  ;;  %v9979_v17 = vld [vmem:[#allocation18_spill] sm:$0xff] }
 0x351   : > { %9961 = vst [vmem:[#allocation54_spill] sm:$0xff] %v8211_v1  ;;  %3310 = vmatpush.msra.mxu1 %v3267_v58  ;;  %v3255_v28 = vadd.f32 %v9974_v29, %v9973_v18  ;;  %v9980_v46 = vld [vmem:[#allocation37_spill] sm:$0xff]  ;;  %v9981_v62 = vld [vmem:[#allocation22_spill] sm:$0xff]  ;;  %v9984_v29 = vld [vmem:[#allocation32_spill] sm:$0xff] }
 0x352   : > { %v9983_v18 = vld [vmem:[#allocation21_spill] sm:$0xff] }
 0x353   : > { %3311 = vmatpush.msra.mxu1 %v3266_v20  ;;  %v8242_v48 = vpop.f32.mrf.mxu3  ;;  %v8252_v33 = vpop.f32.mrf.mxu1 }
 0x354   : > { %9965 = vst [vmem:[#allocation58_spill] sm:$0xff] %v8242_v48 }
 0x355   : > { %3312 = vmatpush.msra.mxu1 %v3265_v8 }
 0x356   : > { %v8266_v10 = vpop.f32.mrf.mxu2 }
 0x357   : > { %3313 = vmatpush.msra.mxu1 %v3264_v30 }
 0x358   : > { %v8228_v34 = vpop.f32.mrf.mxu0 }
 0x359   : > { %9964 = vst [vmem:[#allocation57_spill] sm:$0xff] %v8228_v34  ;;  %3314 = vmatpush.msra.mxu1 %v3263_v22 }
 0x35b   : > { %3315 = vmatpush.msra.mxu1 %v3262_v16  ;;  %v8260_v19 = vpop.f32.mrf.mxu3  ;;  %v8262_v60 = vpop.f32.mrf.mxu1 }
 0x35d   : > { %3316 = vmatpush.msra.mxu1 %v3261_v14 }
 0x35e   : > { %v8274_v39 = vpop.f32.mrf.mxu2 }
 0x35f   : > { %3317 = vmatpush.msra.mxu1 %v3260_v50 }
 0x360   : > { %v8244_v61 = vpop.f32.mrf.mxu0 }
 0x361   : > { %9966 = vst [vmem:[#allocation55_spill] sm:$0xff] %v8244_v61  ;;  %3318 = vmatpush.msra.mxu1 %v3259_v42  ;;  %v9985_v61 = vld [vmem:[#allocation14_spill] sm:$0xff] }
 0x363   : > { %3319 = vmatpush.msra.mxu1 %v3258_v36  ;;  %v8268_v2 = vpop.f32.mrf.mxu3  ;;  %v8272_v53 = vpop.f32.mrf.mxu1  ;;  %v2177_v36 = vadd.f32 %v9980_v46, %v9979_v17 }
 0x365   : > { %3320 = vmatpush.msra.mxu1 %v3257_v0  ;;  %v9982_v0 = vld [vmem:[#allocation31_spill] sm:$0xff] }
 0x366   : > { %v8280_v24 = vpop.f32.mrf.mxu2  ;;  %v2176_v38 = vadd.f32 %v9982_v0, %v9981_v62  ;;  %v9990_v0 = vld [vmem:[#allocation27_spill] sm:$0xff] }
 0x367   : > { %3321 = vmatpush.msra.mxu1 %v3256_v54 }
 0x368   : > { %v8258_v11 = vpop.f32.mrf.mxu0 }
 0x369   : > { %9975 = vst [vmem:[#allocation61_spill] sm:$0xff] %v8258_v11  ;;  %3322 = vmatpush.msra.mxu1 %v3255_v28  ;;  %v2175_v28 = vadd.f32 %v9984_v29, %v9983_v18  ;;  %v9986_v11 = vld [vmem:[#allocation34_spill] sm:$0xff]  ;;  %v10002_v29 = vld [vmem:[#allocation75_spill] sm:$0xff] }
 0x36b   : > { %v8276_v4 = vpop.f32.mrf.mxu3  ;;  %v2402_v40 = vpop.f32.mrf.mxu1 }
 0x36e   : > { %v2683_v25 = vpop.f32.mrf.mxu2 }
 0x370   : > { %v8264_v13 = vpop.f32.mrf.mxu0 }
 0x371   : > { %9976 = vst [vmem:[#allocation62_spill] sm:$0xff] %v8264_v13  ;;  %v2174_v13 = vadd.f32 %v9986_v11, %v9985_v61 }
 0x373   : > { %v8282_v21 = vpop.f32.mrf.mxu3  ;;  %v2405_v15 = vpop.f32.mrf.mxu1 }
 0x376   : > { %v2686_v55 = vpop.f32.mrf.mxu2 }
 0x378   : > { %v8270_v63 = vpop.f32.mrf.mxu0 }
 0x379   : > { %9977 = vst [vmem:[#allocation59_spill] sm:$0xff] %v8270_v63 }
 0x37b   : > { %v2960_v44 = vpop.f32.mrf.mxu3  ;;  %v2408_v51 = vpop.f32.mrf.mxu1 }
 0x37e   : > { %v2689_v43 = vpop.f32.mrf.mxu2 }
 0x380   : > { %v8278_v12 = vpop.f32.mrf.mxu0 }
 0x381   : > { %9978 = vst [vmem:[#allocation65_spill] sm:$0xff] %v8278_v12  ;;  %v9988_v12 = vld [vmem:[#allocation33_spill] sm:$0xff] }
 0x382   : > { %v2173_v17 = vadd.f32 %v9988_v12, %v9987_v6  ;;  %v9993_v6 = vld [vmem:[#allocation30_spill] sm:$0xff] }
 0x383   : > { %v2963_v56 = vpop.f32.mrf.mxu3  ;;  %v2411_v23 = vpop.f32.mrf.mxu1 }
 0x384   : > { %v2451_v48 = vadd.f32 %v2411_v23, %v2174_v13  ;;  %v2450_v18 = vadd.f32 %v2408_v51, %v2173_v17  ;;  %v9994_v23 = vld [vmem:[#allocation79_spill] sm:$0xff] }
 0x386   : > { %v2692_v3 = vpop.f32.mrf.mxu2  ;;  %v2729_v61 = vadd.f32 %v2689_v43, %v2451_v48  ;;  %v9997_v48 = vld [vmem:[#allocation28_spill] sm:$0xff] }
 0x388   : > { %v8284_v7 = vpop.f32.mrf.mxu0 }
 0x38b   : > { %v2966_v52 = vpop.f32.mrf.mxu3  ;;  %v2414_v45 = vpop.f32.mrf.mxu1 }
 0x38c   : > { %v2452_v59 = vadd.f32 %v2414_v45, %v2175_v28  ;;  %v9995_v45 = vld [vmem:[#allocation19_spill] sm:$0xff] }
 0x38d   : > { %v2170_v51 = vadd.f32 %v9995_v45, %v9994_v23  ;;  %v10017_v23 = vld [vmem:[#allocation59_spill] sm:$0xff] }
 0x38e   : > { %v2695_v22 = vpop.f32.mrf.mxu2  ;;  %v2730_v47 = vadd.f32 %v2692_v3, %v2452_v59  ;;  %v2728_v59 = vadd.f32 %v2686_v55, %v2450_v18  ;;  %v9998_v55 = vld [vmem:[#allocation77_spill] sm:$0xff]  ;;  %v10008_v18 = vld [vmem:[#allocation48_spill] sm:$0xff] }
 0x390   : > { %v8286_v37 = vpop.f32.mrf.mxu0 }
 0x393   : > { %v2969_v8 = vpop.f32.mrf.mxu3  ;;  %v2417_v30 = vpop.f32.mrf.mxu1 }
 0x394   : > { %v2453_v1 = vadd.f32 %v2417_v30, %v2176_v38  ;;  %v3287_v30 = vld [vmem:[%s9991_s22] sm:$0xff]  ;;  %v3007_v11 = vadd.f32 %v2969_v8, %v2730_v47  ;;  %v2447_v8 = vadd.f32 %v8272_v53, %v2170_v51 }
 0x395   : > { %3323 = vmatmul.f32.vlgmr.msra.gmra.mxu1 %v3287_v30  ;;  %v9996_v47 = vld [vmem:[#allocation78_spill] sm:$0xff]  ;;  %v10009_v30 = vld [vmem:[#allocation52_spill] sm:$0xff]  ;;  %v10018_v51 = vld [vmem:[#allocation71_spill] sm:$0xff] }
 0x396   : > { %v2698_v32 = vpop.f32.mrf.mxu2  ;;  %v2731_v63 = vadd.f32 %v2695_v22, %v2453_v1  ;;  %v2169_v43 = vadd.f32 %v9997_v48, %v9996_v47  ;;  %v10021_v47 = vld [vmem:[#allocation49_spill] sm:$0xff] }
 0x398   : > { %v8288_v9 = vpop.f32.mrf.mxu0  ;;  %v2446_v38 = vadd.f32 %v8262_v60, %v2169_v43  ;;  %v10022_v43 = vld [vmem:[#allocation53_spill] sm:$0xff] }
 0x39b   : > { %v2972_v14 = vpop.f32.mrf.mxu3  ;;  %v2420_v50 = vpop.f32.mrf.mxu1 }
 0x39c   : > { %v2454_v41 = vadd.f32 %v2420_v50, %v2177_v36  ;;  %v3008_v62 = vadd.f32 %v2972_v14, %v2731_v63  ;;  %v9989_v36 = vld [vmem:[#allocation81_spill] sm:$0xff]  ;;  %v3006_v63 = vadd.f32 %v2966_v52, %v2729_v61  ;;  %v3005_v14 = vadd.f32 %v2963_v56, %v2728_v59  ;;  %v9999_v52 = vld [vmem:[#allocation20_spill] sm:$0xff] }
 0x39d   : > { %v2172_v5 = vadd.f32 %v9990_v0, %v9989_v36  ;;  %v10007_v0 = vld [vmem:[#allocation23_spill] sm:$0xff] }
 0x39e   : > { %v2732_v34 = vadd.f32 %v2698_v32, %v2454_v41  ;;  %v2724_v41 = vadd.f32 %v8266_v10, %v2446_v38  ;;  %v10026_v38 = vld [vmem:[#allocation50_spill] sm:$0xff] }
 0x39f   : > { %v2449_v13 = vadd.f32 %v2405_v15, %v2172_v5 }
 0x3a0   : > { %v8290_v58 = vpop.f32.mrf.mxu0  ;;  %v3001_v17 = vadd.f32 %v8268_v2, %v2724_v41  ;;  %v10030_v41 = vld [vmem:[#allocation55_spill] sm:$0xff] }
 0x3a1   : > { %v2727_v22 = vadd.f32 %v2683_v25, %v2449_v13  ;;  %v2725_v25 = vadd.f32 %v8274_v39, %v2447_v8  ;;  %v10003_v39 = vld [vmem:[#allocation16_spill] sm:$0xff]  ;;  %v10015_v13 = vld [vmem:[#allocation47_spill] sm:$0xff] }
 0x3a2   : > { %v2166_v28 = vadd.f32 %v10003_v39, %v10002_v29  ;;  %v3278_v36 = vadd.f32 %v8284_v7, %v3001_v17  ;;  %v10013_v7 = vld [vmem:[#allocation26_spill] sm:$0xff]  ;;  %v10032_v39 = vld [vmem:[#allocation57_spill] sm:$0xff]  ;;  %v3288_v17 = vld [vmem:[%s9991_s22 + $0x8] sm:$0xff] }
 0x3a3   : > { %v2975_v54 = vpop.f32.mrf.mxu3  ;;  %v3004_v5 = vadd.f32 %v2960_v44, %v2727_v22  ;;  %v10001_v44 = vld [vmem:[#allocation17_spill] sm:$0xff]  ;;  %v3002_v60 = vadd.f32 %v8276_v4, %v2725_v25 }
 0x3a4   : > { %v3009_v57 = vadd.f32 %v2975_v54, %v2732_v34  ;;  %v9992_v34 = vld [vmem:[#allocation80_spill] sm:$0xff]  ;;  %v2443_v4 = vadd.f32 %v8216_v26, %v2166_v28  ;;  %v10027_v25 = vld [vmem:[#allocation61_spill] sm:$0xff] }
 0x3a5   : > { %v2171_v12 = vadd.f32 %v9993_v6, %v9992_v34  ;;  %v3281_v53 = vadd.f32 %v8290_v58, %v3004_v5  ;;  %v10014_v6 = vld [vmem:[#allocation43_spill] sm:$0xff] }
 0x3a6   : > { %v2721_v61 = vadd.f32 %v10009_v30, %v2443_v4  ;;  %v3299_v4 = vld [vmem:[%s9991_s22 + $0x60] sm:$0xff] }
 0x3a7   : > { %v2448_v3 = vadd.f32 %v2402_v40, %v2171_v12  ;;  %v3289_v40 = vld [vmem:[%s9991_s22 + $0x10] sm:$0xff] }
 0x3a8   : > { %v3240_v20 = vpop.f32.mrf.mxu0  ;;  %3326 = vmatmul.f32.gmra.mxu1 %v3289_v40 }
 0x3a9   : > { %v3282_v15 = vadd.f32 %v3240_v20, %v3005_v14  ;;  %v10020_v14 = vld [vmem:[#allocation45_spill] sm:$0xff] }
 0x3b0   : > { %v3243_v49 = vpop.f32.mrf.mxu0 }
 0x3b1   : > { %v3283_v32 = vadd.f32 %v3243_v49, %v3006_v63  ;;  %v10016_v63 = vld [vmem:[#allocation51_spill] sm:$0xff] }
 0x3b8   : > { %v3246_v16 = vpop.f32.mrf.mxu0 }
 0x3c0   : > { %v3249_v42 = vpop.f32.mrf.mxu0 }
 0x3c1   : > { %v3285_v1 = vadd.f32 %v3249_v42, %v3008_v62  ;;  %v2726_v42 = vadd.f32 %v8280_v24, %v2448_v3  ;;  %v10000_v24 = vld [vmem:[#allocation76_spill] sm:$0xff]  ;;  %v10005_v62 = vld [vmem:[#allocation29_spill] sm:$0xff] }
 0x3c2   : > { %v2167_v20 = vadd.f32 %v10001_v44, %v10000_v24  ;;  %v10019_v3 = vld [vmem:[#allocation24_spill] sm:$0xff] }
 0x3c3   : > { %v3003_v56 = vadd.f32 %v8282_v21, %v2726_v42  ;;  %v2162_v22 = vadd.f32 %v10019_v3, %v10018_v51  ;;  %v10023_v42 = vld [vmem:[#allocation62_spill] sm:$0xff]  ;;  %v10028_v24 = vld [vmem:[#allocation40_spill] sm:$0xff] }
 0x3c4   : > { %v2444_v21 = vadd.f32 %v8234_v31, %v2167_v20  ;;  %v10006_v31 = vld [vmem:[#allocation73_spill] sm:$0xff]  ;;  %v10029_v20 = vld [vmem:[#allocation44_spill] sm:$0xff] }
 0x3c5   : > { %v3280_v54 = vadd.f32 %v8288_v9, %v3003_v56 }
 0x3c6   : > { %v2722_v9 = vadd.f32 %v8238_v35, %v2444_v21  ;;  %v10033_v21 = vld [vmem:[#allocation54_spill] sm:$0xff] }
 0x3c8   : > { %v3252_v46 = vpop.f32.mrf.mxu0 }
 0x3c9   : > { %v3286_v50 = vadd.f32 %v3252_v46, %v3009_v57  ;;  %v3284_v57 = vadd.f32 %v3246_v16, %v3007_v11  ;;  %v2168_v16 = vadd.f32 %v9999_v52, %v9998_v55  ;;  %v3279_v46 = vadd.f32 %v8286_v37, %v3002_v60  ;;  %v3291_v37 = vld [vmem:[%s9991_s22 + $0x20] sm:$0xff] }
 0x3ca   : > { %v10010_v11 = vld [vmem:[#allocation58_spill] sm:$0xff]  ;;  %3329 = vmatmul.f32.gmra.mxu1 %v3291_v37 }
 0x3cb   : > { %3348 = vmatpush.msra.mxu2 %v3286_v50  ;;  %v2445_v49 = vadd.f32 %v8252_v33, %v2168_v16  ;;  %v10004_v33 = vld [vmem:[#allocation74_spill] sm:$0xff]  ;;  %v2999_v26 = vadd.f32 %v10010_v11, %v2722_v9 }
 0x3cc   : > { %v2165_v10 = vadd.f32 %v10005_v62, %v10004_v33  ;;  %v10025_v52 = vld [vmem:[#allocation46_spill] sm:$0xff]  ;;  %v3297_v62 = vld [vmem:[%s9991_s22 + $0x50] sm:$0xff] }
 0x3cd   : > { %3349 = vmatpush.msra.mxu2 %v3285_v1  ;;  %v2723_v58 = vadd.f32 %v8256_v27, %v2445_v49  ;;  %v2164_v27 = vadd.f32 %v10007_v0, %v10006_v31  ;;  %v10011_v1 = vld [vmem:[#allocation65_spill] sm:$0xff]  ;;  %v3276_v45 = vadd.f32 %v10017_v23, %v2999_v26  ;;  %v3300_v0 = vld [vmem:[%s9991_s22 + $0x68] sm:$0xff]  ;;  %v8415_v37 = vld [vmem:[%s10034_s27] ss:$0 sm:$0xff] }
 0x3ce   : > { %v2442_v2 = vadd.f32 %v10008_v18, %v2165_v10  ;;  %v3290_v33 = vld [vmem:[%s9991_s22 + $0x18] sm:$0xff]  ;;  %v3292_v10 = vld [vmem:[%s9991_s22 + $0x28] sm:$0xff] }
 0x3cf   : > { %3350 = vmatpush.msra.mxu2 %v3284_v57  ;;  %v3000_v50 = vadd.f32 %v8260_v19, %v2723_v58  ;;  %v10012_v19 = vld [vmem:[#allocation72_spill] sm:$0xff]  ;;  %v2441_v12 = vadd.f32 %v10014_v6, %v2164_v27  ;;  %v2998_v57 = vadd.f32 %v10016_v63, %v2721_v61  ;;  %v3294_v9 = vld [vmem:[%s9991_s22 + $0x38] sm:$0xff]  ;;  %v10035_v61 = vmov 0.0  }
 0x3d0   : > { %v2163_v34 = vadd.f32 %v10013_v7, %v10012_v19  ;;  %v2720_v59 = vadd.f32 %v10015_v13, %v2442_v2  ;;  %v3298_v31 = vld [vmem:[%s9991_s22 + $0x58] sm:$0xff]  ;;  %3553 = vst.msk [vmem:[#allocation3 + $0x10] sm:$0xff] %vm3549_vm3, %v10035_v61  ;;  %v3589_v19 = vld [vmem:[%s10036_s8 + $0x8] sm:$0xff]  ;;  %v3598_v6 = vld [vmem:[%s10036_s8 + $0x10] sm:$0xff] }
 0x3d1   : > { %3351 = vmatpush.msra.mxu2 %v3283_v32  ;;  %v3277_v35 = vadd.f32 %v10011_v1, %v3000_v50  ;;  %v2719_v48 = vadd.f32 %v10021_v47, %v2441_v12  ;;  %v3275_v5 = vadd.f32 %v10023_v42, %v2998_v57  ;;  %v3301_v50 = vld [vmem:[%s9991_s22 + $0x70] sm:$0xff]  ;;  %v3302_v27 = vld [vmem:[%s9991_s22 + $0x78] sm:$0xff]  ;;  %3554 = vst.msk [vmem:[#allocation3 + $0x18] sm:$0x3] %vm3551_vm4, %v10035_v61  ;;  %v3738_v12 = vld [vmem:[%s10036_s8 + $0x20] sm:$0xff] }
 0x3d2   : > { %v2440_v32 = vadd.f32 %v10020_v14, %v2163_v34  ;;  %v2997_v8 = vadd.f32 %v10022_v43, %v2720_v59  ;;  %3550 = vst.msk [vmem:[#allocation3] sm:$0xff] %vm3549_vm3, %v10035_v61  ;;  %v3599_v1 = vld [vmem:[%s10036_s8 + $0x18] sm:$0xff]  ;;  %3703 = vmatpush.msrb.mxu1 %v3589_v19  ;;  %v3588_v13 = vld [vmem:[%s10036_s8] sm:$0xff] }
 0x3d3   : > { %3352 = vmatpush.msra.mxu2 %v3282_v15  ;;  %v10024_v15 = vld [vmem:[#allocation42_spill] sm:$0xff]  ;;  %v2996_v40 = vadd.f32 %v10026_v38, %v2719_v48  ;;  %3552 = vst.msk [vmem:[#allocation3 + $0x8] sm:$0x3] %vm3551_vm4, %v10035_v61  ;;  %3638 = vmatpush.msrb.mxu3 %v3599_v1 }
 0x3d4   : > { %v2439_v55 = vadd.f32 %v10024_v15, %v2162_v22  ;;  %v2718_v16 = vadd.f32 %v10025_v52, %v2440_v32  ;;  %v3274_v56 = vadd.f32 %v10027_v25, %v2997_v8  ;;  %3555 = vst.msk [vmem:[#allocation3 + $0x20] sm:$0xff] %vm3549_vm3, %v10035_v61  ;;  %3704 = vmatpush.msrb.mxu1 %v3588_v13 }
 0x3d5   : > { %3353 = vmatpush.msra.mxu2 %v3281_v53  ;;  %v3293_v53 = vld [vmem:[%s9991_s22 + $0x30] sm:$0xff]  ;;  %v3273_v60 = vadd.f32 %v10030_v41, %v2996_v40  ;;  %3556 = vst.msk [vmem:[#allocation3 + $0x28] sm:$0x3] %vm3551_vm4, %v10035_v61  ;;  %3639 = vmatpush.msrb.mxu3 %v3598_v6 }
 0x3d6   : > { %v2717_v44 = vadd.f32 %v10028_v24, %v2439_v55  ;;  %v2995_v49 = vadd.f32 %v10029_v20, %v2718_v16  ;;  %3332 = vmatmul.f32.gmra.mxu1 %v3293_v53  ;;  %3557 = vst.msk [vmem:[#allocation3 + $0x30] sm:$0xff] %vm3549_vm3, %v10035_v61 }
 0x3d7   : > { %3354 = vmatpush.msra.mxu2 %v3280_v54  ;;  %v10031_v54 = vld [vmem:[#allocation39_spill] sm:$0xff]  ;;  %3558 = vst.msk [vmem:[#allocation3 + $0x38] sm:$0x3] %vm3551_vm4, %v10035_v61 }
 0x3d8   : > { %v2994_v29 = vadd.f32 %v10031_v54, %v2717_v44  ;;  %v3272_v28 = vadd.f32 %v10032_v39, %v2995_v49  ;;  %3559 = vst.msk [vmem:[#allocation3 + $0x40] sm:$0xff] %vm3549_vm3, %v10035_v61 }
 0x3d9   : > { %3355 = vmatpush.msra.mxu2 %v3279_v46  ;;  %v3295_v46 = vld [vmem:[%s9991_s22 + $0x40] sm:$0xff]  ;;  %3560 = vst.msk [vmem:[#allocation3 + $0x48] sm:$0x3] %vm3551_vm4, %v10035_v61  ;;  %v3580_v57 = vld [vmem:[#allocation3] sm:$0xff] }
 0x3da   : > { %v3271_v58 = vadd.f32 %v10033_v21, %v2994_v29  ;;  %3561 = vst.msk [vmem:[#allocation3 + $0x50] sm:$0xff] %vm3549_vm3, %v10035_v61  ;;  %v3590_v23 = vld [vmem:[#allocation3 + $0x1] sm:$0xff] }
 0x3db   : > { %3356 = vmatpush.msra.mxu2 %v3278_v36  ;;  %v3296_v36 = vld [vmem:[%s9991_s22 + $0x48] sm:$0xff]  ;;  %3562 = vst.msk [vmem:[#allocation3 + $0x58] sm:$0x3] %vm3551_vm4, %v10035_v61  ;;  %6444 = vmatmul.msk.f32.vlgmr.msrb.gmra.mxu3 %vm3549_vm3, %v3590_v23 }
 0x3dc   : > { %3563 = vst.msk [vmem:[#allocation3 + $0x60] sm:$0xff] %vm3549_vm3, %v10035_v61 }
 0x3dd   : > { %3357 = vmatpush.msra.mxu2 %v3277_v35  ;;  %v3739_v35 = vld [vmem:[%s10036_s8 + $0x28] sm:$0xff]  ;;  %3564 = vst.msk [vmem:[#allocation3 + $0x68] sm:$0x3] %vm3551_vm4, %v10035_v61 }
 0x3de   : > { %3335 = vmatmul.f32.gmra.mxu1 %v3295_v46  ;;  %3565 = vst.msk [vmem:[#allocation3 + $0x70] sm:$0xff] %vm3549_vm3, %v10035_v61 }
 0x3df   : > { %3358 = vmatpush.msra.mxu2 %v3276_v45  ;;  %v3730_v45 = vld [vmem:[#allocation3 + $0x2] sm:$0xff]  ;;  %3566 = vst.msk [vmem:[#allocation3 + $0x78] sm:$0x3] %vm3551_vm4, %v10035_v61 }
 0x3e0   : > { %3567 = vst.msk [vmem:[#allocation3 + $0x80] sm:$0xff] %vm3549_vm3, %v10035_v61 }
 0x3e1   : > { %3359 = vmatpush.msra.mxu2 %v3275_v5  ;;  %3568 = vst.msk [vmem:[#allocation3 + $0x88] sm:$0x3] %vm3551_vm4, %v10035_v61 }
 0x3e2   : > { %3569 = vst.msk [vmem:[#allocation3 + $0x90] sm:$0xff] %vm3549_vm3, %v10035_v61 }
 0x3e3   : > { %3360 = vmatpush.msra.mxu2 %v3274_v56  ;;  %3570 = vst.msk [vmem:[#allocation3 + $0x98] sm:$0x3] %vm3551_vm4, %v10035_v61 }
 0x3e4   : > { %4493 = vst.msk [vmem:[#allocation3 + $0x8] sm:$0x3] %vm3551_vm4, %v10035_v61 }
 0x3e5   : > { %3361 = vmatpush.msra.mxu2 %v3273_v60  ;;  %4492 = vst.msk [vmem:[#allocation3] sm:$0xff] %vm3549_vm3, %v10035_v61 }
 0x3e6   : > { %3338 = vmatmul.f32.gmra.mxu1 %v3297_v62 }
 0x3e7   : > { %3362 = vmatpush.msra.mxu2 %v3272_v28 }
 0x3e9   : > { %3363 = vmatpush.msra.mxu2 %v3271_v58 }
 0x3ea   : > { %3364 = vmatmul.f32.vlgmr.msra.gmra.mxu2 %v3288_v17 }
 0x3eb   : > { %3778 = vmatpush.msrb.mxu2 %v3739_v35 }
 0x3ed   : > { %3779 = vmatpush.msrb.mxu2 %v3738_v12 }
 0x3ee   : > { %3341 = vmatmul.f32.gmra.mxu1 %v3299_v4 }
 0x3f2   : > { %3367 = vmatmul.f32.gmra.mxu2 %v3290_v33 }
 0x3f6   : > { %3344 = vmatmul.f32.gmra.mxu1 %v3301_v50 }
 0x3fa   : > { %3370 = vmatmul.f32.gmra.mxu2 %v3292_v10 }
 0x3fe   : > { %6452 = vmatmul.msk.f32.vlgmr.msrb.gmra.mxu1 %vm3549_vm3, %v3580_v57 }
 0x402   : > { %3373 = vmatmul.f32.gmra.mxu2 %v3294_v9 }
 0x40a   : > { %3376 = vmatmul.f32.gmra.mxu2 %v3296_v36 }
 0x412   : > { %3379 = vmatmul.f32.gmra.mxu2 %v3298_v31  ;;  %v3324_v18 = vpop.f32.mrf.mxu1 }
 0x413   : > { %v3325_v30 = vadd.f32 %v8415_v37, %v3324_v18 }
 0x41a   : > { %3382 = vmatmul.f32.gmra.mxu2 %v3300_v0 }
 0x422   : > { %3385 = vmatmul.f32.gmra.mxu2 %v3302_v27 }
 0x425   : > { %v3327_v2 = vpop.f32.mrf.mxu1 }
 0x426   : > { %v3328_v63 = vadd.f32 %v8415_v37, %v3327_v2 }
 0x42a   : > { %6460 = vmatmul.msk.f32.vlgmr.msrb.gmra.mxu2 %vm3549_vm3, %v3730_v45 }
 0x447   : > { %v3330_v7 = vpop.f32.mrf.mxu1 }
 0x448   : > { %v3331_v48 = vadd.f32 %v8415_v37, %v3330_v7 }
 0x453   : > { %v3333_v14 = vpop.f32.mrf.mxu1 }
 0x454   : > { %v3334_v52 = vadd.f32 %v8415_v37, %v3333_v14 }
 0x45b   : > { %v3336_v40 = vpop.f32.mrf.mxu1 }
 0x45c   : > { %v3337_v39 = vadd.f32 %v8415_v37, %v3336_v40 }
 0x463   : > { %v3339_v10 = vpop.f32.mrf.mxu1 }
 0x46b   : > { %v3342_v23 = vpop.f32.mrf.mxu1 }
 0x46d   : > { %v3365_v11 = vpop.f32.mrf.mxu2 }
 0x46e   : > { %v8426_v26 = vadd.f32 %v3365_v11, %v3325_v30  ;;  %v3340_v11 = vadd.f32 %v8415_v37, %v3339_v10 }
 0x470   : > { %v3389_v34 = vsub.f32 0.0, %v8426_v26 }
 0x472   : > { %v3397_v59 = vmul.f32 1.442695, %v3389_v34 }
 0x474   : > { %6658 = vpow2.f32 %v3397_v59 }
 0x475   : > { %v3368_v51 = vpop.f32.mrf.mxu2 }
 0x476   : > { %v8469_v3 = vadd.f32 %v3368_v51, %v3328_v63 }
 0x478   : > { %v3390_v22 = vsub.f32 0.0, %v8469_v3 }
 0x47a   : > { %v6659_v32 = vpop.eup %6658  ;;  %v3399_v47 = vmul.f32 1.442695, %v3390_v22 }
 0x47b   : > { %v3413_v43 = vadd.f32 1.0, %v6659_v32 }
 0x47c   : > { %6660 = vpow2.f32 %v3399_v47 }
 0x47d   : > { %6662 = vrcp.f32 %v3413_v43  ;;  %v3371_v8 = vpop.f32.mrf.mxu2  ;;  %v3432_v44 = vand.u32 2147483648, %v3413_v43  ;;  %v3430_v49 = vand.u32 2147483647, %v3413_v43  ;;  %vm3426_vm6 = vweird.f32 %v3413_v43 }
 0x47e   : > { %v8487_v42 = vadd.f32 %v3371_v8, %v3331_v48 }
 0x47f   : > { %v3433_v21 = vor.u32 1.1754944e-38, %v3432_v44  ;;  %vm3431_vm8 = vcmp.eq.f32.partialorder %v3430_v49, 8.507059e+37 }
 0x480   : > { %v3391_v5 = vsub.f32 0.0, %v8487_v42 }
 0x482   : > { %v6661_v15 = vpop.eup %6660  ;;  %v3401_v55 = vmul.f32 1.442695, %v3391_v5 }
 0x483   : > { %v6663_v16 = vpop.eup %6662  ;;  %v3414_v38 = vadd.f32 1.0, %v6661_v15 }
 0x484   : > { %v3422_v25 = vmul.f32 %v6663_v16, %v3413_v43  ;;  %6664 = vpow2.f32 %v3401_v55  ;;  %vm3427_vm5 = vweird.f32 %v6663_v16  ;;  %v3343_v43 = vadd.f32 %v8415_v37, %v3342_v23 }
 0x485   : > { %6666 = vrcp.f32 %v3414_v38  ;;  %v3374_v56 = vpop.f32.mrf.mxu2  ;;  %vm3428_vm7 = vmor %vm3426_vm6, %vm3427_vm5  ;;  %v3447_v36 = vand.u32 2147483648, %v3414_v38  ;;  %v3445_v0 = vand.u32 2147483647, %v3414_v38  ;;  %vm3441_vm10 = vweird.f32 %v3414_v38 }
 0x486   : > { %v3423_v53 = vsub.f32 1.0, %v3422_v25  ;;  %v8495_v24 = vadd.f32 %v3374_v56, %v3334_v52 }
 0x487   : > { %v3448_v1 = vor.u32 1.1754944e-38, %v3447_v36  ;;  %vm3446_vm12 = vcmp.eq.f32.partialorder %v3445_v0, 8.507059e+37 }
 0x488   : > { %v3424_v20 = vmul.f32 %v6663_v16, %v3423_v53  ;;  %v3392_v41 = vsub.f32 0.0, %v8495_v24 }
 0x48a   : > { %v6665_v60 = vpop.eup %6664  ;;  %v3425_v54 = vadd.f32 %v6663_v16, %v3424_v20  ;;  %v3403_v29 = vmul.f32 1.442695, %v3392_v41  ;;  %v3345_v41 = vpop.f32.mrf.mxu1 }
 0x48b   : > { %v6667_v28 = vpop.eup %6666  ;;  %v8499_v58 = vadd.f32 1.0, %v6665_v60 }
 0x48c   : > { %v3429_v17 = vsel %vm3428_vm7, %v6663_v16, %v3425_v54  ;;  %v3437_v46 = vmul.f32 %v6667_v28, %v3414_v38  ;;  %6668 = vpow2.f32 %v3403_v29  ;;  %vm3442_vm9 = vweird.f32 %v6667_v28 }
 0x48d   : > { %v3434_v33 = vsel %vm3431_vm8, %v3433_v21, %v3429_v17  ;;  %6670 = vrcp.f32 %v8499_v58  ;;  %v3377_v62 = vpop.f32.mrf.mxu2  ;;  %vm3443_vm11 = vmor %vm3441_vm10, %vm3442_vm9  ;;  %v3462_v63 = vand.u32 2147483648, %v8499_v58  ;;  %vm3456_vm14 = vweird.f32 %v8499_v58 }
 0x48e   : > { %v8503_v4 = vmul.f32 %v3434_v33, %v8426_v26  ;;  %v3438_v9 = vsub.f32 1.0, %v3437_v46  ;;  %v8505_v50 = vadd.f32 %v3377_v62, %v3337_v39  ;;  %v3346_v21 = vadd.f32 %v8415_v37, %v3345_v41 }
 0x48f   : > { %v3463_v5 = vor.u32 1.1754944e-38, %v3462_v63 }
 0x490   : > { %3572 = vst.msk [vmem:[#allocation3 + $0x11] sm:$0xff] %vm3549_vm3, %v8503_v4  ;;  %v3439_v31 = vmul.f32 %v6667_v28, %v3438_v9  ;;  %v3393_v27 = vsub.f32 0.0, %v8505_v50 }
 0x492   : > { %v6669_v18 = vpop.eup %6668  ;;  %v3440_v2 = vadd.f32 %v6667_v28, %v3439_v31  ;;  %v3405_v30 = vmul.f32 1.442695, %v3393_v27 }
 0x493   : > { %v6671_v26 = vpop.eup %6670  ;;  %v8511_v35 = vadd.f32 1.0, %v6669_v18 }
 0x494   : > { %v3444_v19 = vsel %vm3443_vm11, %v6667_v28, %v3440_v2  ;;  %v3452_v7 = vmul.f32 %v6671_v26, %v8499_v58  ;;  %6672 = vpow2.f32 %v3405_v30  ;;  %vm3457_vm13 = vweird.f32 %v6671_v26 }
 0x495   : > { %v3449_v34 = vsel %vm3446_vm12, %v3448_v1, %v3444_v19  ;;  %6674 = vrcp.f32 %v8511_v35  ;;  %v3380_v6 = vpop.f32.mrf.mxu2  ;;  %vm3458_vm15 = vmor %vm3456_vm14, %vm3457_vm13  ;;  %v3477_v53 = vand.u32 2147483648, %v8511_v35  ;;  %vm3471_vm2 = vweird.f32 %v8511_v35 }
 0x496   : > { %v8516_v12 = vmul.f32 %v3449_v34, %v8469_v3  ;;  %v3453_v13 = vsub.f32 1.0, %v3452_v7  ;;  %v8518_v59 = vadd.f32 %v3380_v6, %v3340_v11  ;;  %v3460_v3 = vand.u32 2147483647, %v8499_v58 }
 0x497   : > { %v8521_v57 = vld [vmem:[#allocation3 + $0x11] sm:$0xff]  ;;  %v3478_v17 = vor.u32 1.1754944e-38, %v3477_v53 }
 0x498   : > { %v8523_v45 = vld [vmem:[#allocation3 + $0x12] sm:$0xff]  ;;  %3573 = vst.msk [vmem:[#allocation3 + $0x21] sm:$0xff] %vm3549_vm3, %v8516_v12  ;;  %v3454_v22 = vmul.f32 %v6671_v26, %v3453_v13  ;;  %v3394_v14 = vsub.f32 0.0, %v8518_v59  ;;  %6445 = vmatmul.msk.f32.gmra.mxu3 %vm3549_vm3, %v8521_v57  ;;  %vm3461_vm0 = vcmp.eq.f32.partialorder %v3460_v3, 8.507059e+37 }
 0x499   : > { %v8525_v51 = vld [vmem:[#allocation3 + $0x10] sm:$0xff]  ;;  %6461 = vmatmul.msk.f32.gmra.mxu2 %vm3549_vm3, %v8523_v45  ;;  %4495 = vst.msk [vmem:[#allocation3 + $0x18] sm:$0x3] %vm3551_vm4, %v10035_v61 }
 0x49a   : > { %6453 = vmatmul.msk.f32.gmra.mxu1 %vm3549_vm3, %v8525_v51  ;;  %4494 = vst.msk [vmem:[#allocation3 + $0x10] sm:$0xff] %vm3549_vm3, %v10035_v61  ;;  %v6673_v32 = vpop.eup %6672  ;;  %v3455_v47 = vadd.f32 %v6671_v26, %v3454_v22  ;;  %v3407_v48 = vmul.f32 1.442695, %v3394_v14 }
 0x49b   : > { %v6675_v8 = vpop.eup %6674  ;;  %v8543_v15 = vadd.f32 1.0, %v6673_v32  ;;  %v3988_v32 = vld [vmem:[%s10036_s8 + $0x58] sm:$0xff] }
 0x49c   : > { %v3459_v55 = vsel %vm3458_vm15, %v6671_v26, %v3455_v47  ;;  %v3467_v52 = vmul.f32 %v6675_v8, %v8511_v35  ;;  %6676 = vpow2.f32 %v3407_v48  ;;  %vm3472_vm1 = vweird.f32 %v6675_v8  ;;  %v3821_v26 = vld [vmem:[%s10036_s8 + $0x30] sm:$0xff]  ;;  %v3905_v47 = vld [vmem:[%s10036_s8 + $0x48] sm:$0xff]  ;;  %4027 = vmatpush.msra.mxu2 %v3988_v32 }
 0x49d   : > { %v3464_v16 = vsel %vm3461_vm0, %v3463_v5, %v3459_v55  ;;  %6678 = vrcp.f32 %v8543_v15  ;;  %v3383_v38 = vpop.f32.mrf.mxu2  ;;  %vm3473_vm5 = vmor %vm3471_vm2, %vm3472_vm1  ;;  %v3492_v0 = vand.u32 2147483648, %v8543_v15  ;;  %v3490_v11 = vand.u32 2147483647, %v8543_v15  ;;  %3944 = vmatpush.msra.mxu1 %v3905_v47  ;;  %v3987_v55 = vld [vmem:[%s10036_s8 + $0x50] sm:$0xff] }
 0x49e   : > { %v8548_v40 = vmul.f32 %v3464_v16, %v8487_v42  ;;  %v3468_v25 = vsub.f32 1.0, %v3467_v52  ;;  %v8550_v56 = vadd.f32 %v3383_v38, %v3343_v43  ;;  %v3475_v42 = vand.u32 2147483647, %v8511_v35  ;;  %v3904_v52 = vld [vmem:[%s10036_s8 + $0x40] sm:$0xff]  ;;  %4028 = vmatpush.msra.mxu2 %v3987_v55  ;;  %v8797_v55 = vpop.f32.mrf.mxu1 }
 0x49f   : > { %v8553_v44 = vld [vmem:[#allocation3 + $0x21] sm:$0xff]  ;;  %vm3486_vm8 = vweird.f32 %v8543_v15  ;;  %v3493_v6 = vor.u32 1.1754944e-38, %v3492_v0  ;;  %vm3491_vm10 = vcmp.eq.f32.partialorder %v3490_v11, 8.507059e+37  ;;  %3945 = vmatpush.msra.mxu1 %v3904_v52  ;;  %v8803_v52 = vpop.f32.mrf.mxu3 }
 0x4a0   : > { %v8555_v20 = vld [vmem:[#allocation3 + $0x22] sm:$0xff]  ;;  %3574 = vst.msk [vmem:[#allocation3 + $0x31] sm:$0xff] %vm3549_vm3, %v8548_v40  ;;  %v3469_v60 = vmul.f32 %v6675_v8, %v3468_v25  ;;  %v3395_v54 = vsub.f32 0.0, %v8550_v56  ;;  %6446 = vmatmul.msk.f32.gmra.mxu3 %vm3549_vm3, %v8553_v44  ;;  %vm3476_vm6 = vcmp.eq.f32.partialorder %v3475_v42, 8.507059e+37 }
 0x4a1   : > { %v8557_v49 = vld [vmem:[#allocation3 + $0x20] sm:$0xff]  ;;  %6462 = vmatmul.msk.f32.gmra.mxu2 %vm3549_vm3, %v8555_v20  ;;  %4497 = vst.msk [vmem:[#allocation3 + $0x28] sm:$0x3] %vm3551_vm4, %v10035_v61 }
 0x4a2   : > { %6454 = vmatmul.msk.f32.gmra.mxu1 %vm3549_vm3, %v8557_v49  ;;  %4496 = vst.msk [vmem:[#allocation3 + $0x20] sm:$0xff] %vm3549_vm3, %v10035_v61  ;;  %v6677_v29 = vpop.eup %6676  ;;  %v3470_v39 = vadd.f32 %v6675_v8, %v3469_v60  ;;  %v3409_v28 = vmul.f32 1.442695, %v3395_v54 }
 0x4a3   : > { %v6679_v58 = vpop.eup %6678  ;;  %v8575_v46 = vadd.f32 1.0, %v6677_v29 }
 0x4a4   : > { %v3474_v33 = vsel %vm3473_vm5, %v6675_v8, %v3470_v39  ;;  %v3482_v62 = vmul.f32 %v6679_v58, %v8543_v15  ;;  %6680 = vpow2.f32 %v3409_v28  ;;  %vm3487_vm7 = vweird.f32 %v6679_v58 }
 0x4a5   : > { %v3479_v10 = vsel %vm3476_vm6, %v3478_v17, %v3474_v33  ;;  %6682 = vrcp.f32 %v8575_v46  ;;  %v3386_v9 = vpop.f32.mrf.mxu2  ;;  %vm3488_vm9 = vmor %vm3486_vm8, %vm3487_vm7  ;;  %v3507_v48 = vand.u32 2147483648, %v8575_v46  ;;  %v3505_v15 = vand.u32 2147483647, %v8575_v46 }
 0x4a6   : > { %v8580_v36 = vmul.f32 %v3479_v10, %v8495_v24  ;;  %v3483_v37 = vsub.f32 1.0, %v3482_v62  ;;  %v8582_v31 = vadd.f32 %v3386_v9, %v3346_v21  ;;  %v3822_v24 = vld [vmem:[%s10036_s8 + $0x38] sm:$0xff]  ;;  %vm3501_vm12 = vweird.f32 %v8575_v46 }
 0x4a7   : > { %v8585_v27 = vld [vmem:[#allocation3 + $0x31] sm:$0xff]  ;;  %3861 = vmatpush.msra.mxu3 %v3822_v24  ;;  %v3508_v53 = vor.u32 1.1754944e-38, %v3507_v48  ;;  %vm3506_vm14 = vcmp.eq.f32.partialorder %v3505_v15, 8.507059e+37  ;;  %v4155_v48 = vld [vmem:[%s10036_s8 + $0x78] sm:$0xff] }
 0x4a8   : > { %v8587_v18 = vld [vmem:[#allocation3 + $0x32] sm:$0xff]  ;;  %3575 = vst.msk [vmem:[#allocation3 + $0x41] sm:$0xff] %vm3549_vm3, %v8580_v36  ;;  %v3484_v30 = vmul.f32 %v6679_v58, %v3483_v37  ;;  %6447 = vmatmul.msk.f32.gmra.mxu3 %vm3549_vm3, %v8585_v27  ;;  %v3396_v1 = vsub.f32 0.0, %v8582_v31  ;;  %4194 = vmatpush.msrb.mxu1 %v4155_v48 }
 0x4a9   : > { %v8589_v2 = vld [vmem:[#allocation3 + $0x30] sm:$0xff]  ;;  %6463 = vmatmul.msk.f32.gmra.mxu2 %vm3549_vm3, %v8587_v18  ;;  %4499 = vst.msk [vmem:[#allocation3 + $0x38] sm:$0x3] %vm3551_vm4, %v10035_v61  ;;  %3862 = vmatpush.msra.mxu3 %v3821_v26  ;;  %v4154_v15 = vld [vmem:[%s10036_s8 + $0x70] sm:$0xff] }
 0x4aa   : > { %6455 = vmatmul.msk.f32.gmra.mxu1 %vm3549_vm3, %v8589_v2  ;;  %4498 = vst.msk [vmem:[#allocation3 + $0x30] sm:$0xff] %vm3549_vm3, %v10035_v61  ;;  %v6681_v35 = vpop.eup %6680  ;;  %v3485_v19 = vadd.f32 %v6679_v58, %v3484_v30  ;;  %v3411_v7 = vmul.f32 1.442695, %v3396_v1 }
 0x4ab   : > { %v6683_v34 = vpop.eup %6682  ;;  %v8613_v13 = vadd.f32 1.0, %v6681_v35  ;;  %4195 = vmatpush.msrb.mxu1 %v4154_v15 }
 0x4ac   : > { %v3489_v63 = vsel %vm3488_vm9, %v6679_v58, %v3485_v19  ;;  %v3497_v23 = vmul.f32 %v6683_v34, %v8575_v46  ;;  %6684 = vpow2.f32 %v3411_v7  ;;  %vm3502_vm11 = vweird.f32 %v6683_v34 }
 0x4ad   : > { %v3494_v22 = vsel %vm3491_vm10, %v3493_v6, %v3489_v63  ;;  %6686 = vrcp.f32 %v8613_v13  ;;  %vm3503_vm13 = vmor %vm3501_vm12, %vm3502_vm11  ;;  %v3522_v28 = vand.u32 2147483648, %v8613_v13  ;;  %v3520_v33 = vand.u32 2147483647, %v8613_v13 }
 0x4ae   : > { %v8618_v3 = vmul.f32 %v3494_v22, %v8505_v50  ;;  %v3498_v14 = vsub.f32 1.0, %v3497_v23  ;;  %vm3516_vm0 = vweird.f32 %v8613_v13 }
 0x4af   : > { %v8627_v43 = vld [vmem:[#allocation3 + $0x41] sm:$0xff]  ;;  %v3523_v10 = vor.u32 1.1754944e-38, %v3522_v28  ;;  %vm3521_vm2 = vcmp.eq.f32.partialorder %v3520_v33, 8.507059e+37 }
 0x4b0   : > { %v8629_v8 = vld [vmem:[#allocation3 + $0x42] sm:$0xff]  ;;  %3576 = vst.msk [vmem:[#allocation3 + $0x51] sm:$0xff] %vm3549_vm3, %v8618_v3  ;;  %v3499_v50 = vmul.f32 %v6683_v34, %v3498_v14  ;;  %6448 = vmatmul.msk.f32.gmra.mxu3 %vm3549_vm3, %v8627_v43 }
 0x4b1   : > { %v8631_v5 = vld [vmem:[#allocation3 + $0x40] sm:$0xff]  ;;  %6464 = vmatmul.msk.f32.gmra.mxu2 %vm3549_vm3, %v8629_v8  ;;  %4501 = vst.msk [vmem:[#allocation3 + $0x48] sm:$0x3] %vm3551_vm4, %v10035_v61 }
 0x4b2   : > { %6456 = vmatmul.msk.f32.gmra.mxu1 %vm3549_vm3, %v8631_v5  ;;  %4500 = vst.msk [vmem:[#allocation3 + $0x40] sm:$0xff] %vm3549_vm3, %v10035_v61  ;;  %v6685_v16 = vpop.eup %6684  ;;  %v3500_v38 = vadd.f32 %v6683_v34, %v3499_v50  ;;  %v4237_v50 = vld [vmem:[%s10036_s8 + $0x80] sm:$0xff] }
 0x4b3   : > { %v6687_v25 = vpop.eup %6686  ;;  %v3420_v41 = vadd.f32 1.0, %v6685_v16  ;;  %v8805_v16 = vpop.f32.mrf.mxu2 }
 0x4b4   : > { %v3504_v60 = vsel %vm3503_vm13, %v6683_v34, %v3500_v38  ;;  %v3512_v42 = vmul.f32 %v6687_v25, %v8613_v13  ;;  %vm3517_vm15 = vweird.f32 %v6687_v25 }
 0x4b5   : > { %v3509_v54 = vsel %vm3506_vm14, %v3508_v53, %v3504_v60  ;;  %6688 = vrcp.f32 %v3420_v41  ;;  %vm3518_vm1 = vmor %vm3516_vm0, %vm3517_vm15  ;;  %vm3531_vm5 = vweird.f32 %v3420_v41  ;;  %v3537_v30 = vand.u32 2147483648, %v3420_v41  ;;  %v4236_v53 = vld [vmem:[#allocation3 + $0x92] sm:$0xff] }
 0x4b6   : > { %v8656_v29 = vmul.f32 %v3509_v54, %v8518_v59  ;;  %v3513_v39 = vsub.f32 1.0, %v3512_v42  ;;  %v3535_v26 = vand.u32 2147483647, %v3420_v41 }
 0x4b7   : > { %v8659_v21 = vld [vmem:[#allocation3 + $0x51] sm:$0xff]  ;;  %v3538_v7 = vor.u32 1.1754944e-38, %v3537_v30 }
 0x4b8   : > { %v8661_v58 = vld [vmem:[#allocation3 + $0x52] sm:$0xff]  ;;  %3577 = vst.msk [vmem:[#allocation3 + $0x61] sm:$0xff] %vm3549_vm3, %v8656_v29  ;;  %v3514_v46 = vmul.f32 %v6687_v25, %v3513_v39  ;;  %6449 = vmatmul.msk.f32.gmra.mxu3 %vm3549_vm3, %v8659_v21  ;;  %vm3536_vm8 = vcmp.eq.f32.partialorder %v3535_v26, 8.507059e+37 }
 0x4b9   : > { %v8663_v17 = vld [vmem:[#allocation3 + $0x50] sm:$0xff]  ;;  %6465 = vmatmul.msk.f32.gmra.mxu2 %vm3549_vm3, %v8661_v58  ;;  %4503 = vst.msk [vmem:[#allocation3 + $0x58] sm:$0x3] %vm3551_vm4, %v10035_v61 }
 0x4ba   : > { %6457 = vmatmul.msk.f32.gmra.mxu1 %vm3549_vm3, %v8663_v17  ;;  %4502 = vst.msk [vmem:[#allocation3 + $0x50] sm:$0xff] %vm3549_vm3, %v10035_v61  ;;  %v3515_v59 = vadd.f32 %v6687_v25, %v3514_v46 }
 0x4bb   : > { %v6689_v62 = vpop.eup %6688 }
 0x4bc   : > { %v3519_v9 = vsel %vm3518_vm1, %v6687_v25, %v3515_v59  ;;  %v3527_v37 = vmul.f32 %v6689_v62, %v3420_v41  ;;  %vm3532_vm6 = vweird.f32 %v6689_v62  ;;  %v4153_v41 = vld [vmem:[#allocation3 + $0x91] sm:$0xff] }
 0x4bd   : > { %v3524_v0 = vsel %vm3521_vm2, %v3523_v10, %v3519_v9  ;;  %vm3533_vm7 = vmor %vm3531_vm5, %vm3532_vm6  ;;  %4511 = vst.msk [vmem:[#allocation3 + $0x98] sm:$0x3] %vm3551_vm4, %v10035_v61 }
 0x4be   : > { %v8680_v11 = vmul.f32 %v3524_v0, %v8550_v56  ;;  %v3528_v24 = vsub.f32 1.0, %v3527_v37 }
 0x4bf   : > { %v8682_v1 = vld [vmem:[#allocation3 + $0x61] sm:$0xff] }
 0x4c0   : > { %10037 = vst [vmem:[#allocation63_spill] sm:$0xff] %v8680_v11  ;;  %v8684_v35 = vld [vmem:[#allocation3 + $0x62] sm:$0xff]  ;;  %6450 = vmatmul.msk.f32.gmra.mxu3 %vm3549_vm3, %v8682_v1  ;;  %v3529_v56 = vmul.f32 %v6689_v62, %v3528_v24 }
 0x4c1   : > { %v8686_v19 = vld [vmem:[#allocation3 + $0x60] sm:$0xff]  ;;  %3578 = vst.msk [vmem:[#allocation3 + $0x71] sm:$0xff] %vm3549_vm3, %v8680_v11  ;;  %6466 = vmatmul.msk.f32.gmra.mxu2 %vm3549_vm3, %v8684_v35 }
 0x4c2   : > { %6458 = vmatmul.msk.f32.gmra.mxu1 %vm3549_vm3, %v8686_v19  ;;  %4504 = vst.msk [vmem:[#allocation3 + $0x60] sm:$0xff] %vm3549_vm3, %v10035_v61  ;;  %v3530_v34 = vadd.f32 %v6689_v62, %v3529_v56 }
 0x4c3   : > { %4505 = vst.msk [vmem:[#allocation3 + $0x68] sm:$0x3] %vm3551_vm4, %v10035_v61 }
 0x4c4   : > { %v3534_v6 = vsel %vm3533_vm7, %v6689_v62, %v3530_v34 }
 0x4c5   : > { %v3539_v13 = vsel %vm3536_vm8, %v3538_v7, %v3534_v6 }
 0x4c6   : > { %v8701_v63 = vmul.f32 %v3539_v13, %v8582_v31 }
 0x4c8   : > { %10038 = vst [vmem:[#allocation66_spill] sm:$0xff] %v8701_v63  ;;  %v8703_v23 = vld [vmem:[#allocation3 + $0x71] sm:$0xff] }
 0x4c9   : > { %v8705_v22 = vld [vmem:[#allocation3 + $0x72] sm:$0xff]  ;;  %6451 = vmatmul.msk.f32.gmra.mxu3 %vm3549_vm3, %v8703_v23  ;;  %3579 = vst.msk [vmem:[#allocation3 + $0x81] sm:$0xff] %vm3549_vm3, %v8701_v63 }
 0x4ca   : > { %v8707_v14 = vld [vmem:[#allocation3 + $0x70] sm:$0xff]  ;;  %6467 = vmatmul.msk.f32.gmra.mxu2 %vm3549_vm3, %v8705_v22  ;;  %4507 = vst.msk [vmem:[#allocation3 + $0x78] sm:$0x3] %vm3551_vm4, %v10035_v61 }
 0x4cb   : > { %6459 = vmatmul.msk.f32.gmra.mxu1 %vm3549_vm3, %v8707_v14  ;;  %4506 = vst.msk [vmem:[#allocation3 + $0x70] sm:$0xff] %vm3549_vm3, %v10035_v61 }
 0x4d0   : > { %v8721_v31 = vld [vmem:[#allocation3 + $0x80] sm:$0xff] }
 0x4d1   : > { %v8723_v32 = vld [vmem:[#allocation3 + $0x82] sm:$0xff]  ;;  %6468 = vmatmul.msk.f32.vlgmr.msra.gmra.mxu3 %vm3549_vm3, %v8525_v51  ;;  %v4238_v51 = vld [vmem:[%s10036_s8 + $0x88] sm:$0xff] }
 0x4d2   : > { %v8725_v47 = vld [vmem:[#allocation3 + $0x81] sm:$0xff]  ;;  %6484 = vmatmul.msk.f32.vlgmr.msra.gmra.mxu2 %vm3549_vm3, %v8523_v45 }
 0x4d3   : > { %4508 = vst.msk [vmem:[#allocation3 + $0x80] sm:$0xff] %vm3549_vm3, %v10035_v61  ;;  %6476 = vmatmul.msk.f32.vlgmr.msra.gmra.mxu1 %vm3549_vm3, %v8521_v57  ;;  %v4072_v57 = vld [vmem:[%s10036_s8 + $0x68] sm:$0xff]  ;;  %v4071_v45 = vld [vmem:[%s10036_s8 + $0x60] sm:$0xff]  ;;  %4277 = vmatpush.msrb.mxu2 %v4238_v51 }
 0x4d4   : > { %4509 = vst.msk [vmem:[#allocation3 + $0x88] sm:$0x3] %vm3551_vm4, %v10035_v61  ;;  %4111 = vmatpush.msrb.mxu3 %v4072_v57 }
 0x4d5   : > { %4278 = vmatpush.msrb.mxu2 %v4237_v50 }
 0x4d6   : > { %4112 = vmatpush.msrb.mxu3 %v4071_v45 }
 0x4d9   : > { %6469 = vmatmul.msk.f32.gmra.mxu3 %vm3549_vm3, %v8557_v49 }
 0x4da   : > { %6485 = vmatmul.msk.f32.gmra.mxu2 %vm3549_vm3, %v8555_v20 }
 0x4db   : > { %6477 = vmatmul.msk.f32.gmra.mxu1 %vm3549_vm3, %v8553_v44 }
 0x4e1   : > { %6470 = vmatmul.msk.f32.gmra.mxu3 %vm3549_vm3, %v8589_v2 }
 0x4e2   : > { %6486 = vmatmul.msk.f32.gmra.mxu2 %vm3549_vm3, %v8587_v18 }
 0x4e3   : > { %6478 = vmatmul.msk.f32.gmra.mxu1 %vm3549_vm3, %v8585_v27 }
 0x4e9   : > { %6471 = vmatmul.msk.f32.gmra.mxu3 %vm3549_vm3, %v8631_v5 }
 0x4ea   : > { %6487 = vmatmul.msk.f32.gmra.mxu2 %vm3549_vm3, %v8629_v8 }
 0x4eb   : > { %6479 = vmatmul.msk.f32.gmra.mxu1 %vm3549_vm3, %v8627_v43 }
 0x4f1   : > { %6472 = vmatmul.msk.f32.gmra.mxu3 %vm3549_vm3, %v8663_v17 }
 0x4f2   : > { %6488 = vmatmul.msk.f32.gmra.mxu2 %vm3549_vm3, %v8661_v58 }
 0x4f3   : > { %6480 = vmatmul.msk.f32.gmra.mxu1 %vm3549_vm3, %v8659_v21 }
 0x4f9   : > { %6473 = vmatmul.msk.f32.gmra.mxu3 %vm3549_vm3, %v8686_v19 }
 0x4fa   : > { %6489 = vmatmul.msk.f32.gmra.mxu2 %vm3549_vm3, %v8684_v35 }
 0x4fb   : > { %6481 = vmatmul.msk.f32.gmra.mxu1 %vm3549_vm3, %v8682_v1 }
 0x501   : > { %6474 = vmatmul.msk.f32.gmra.mxu3 %vm3549_vm3, %v8707_v14 }
 0x502   : > { %6490 = vmatmul.msk.f32.gmra.mxu2 %vm3549_vm3, %v8705_v22 }
 0x503   : > { %6482 = vmatmul.msk.f32.gmra.mxu1 %vm3549_vm3, %v8703_v23 }
 0x509   : > { %6475 = vmatmul.msk.f32.gmra.mxu3 %vm3549_vm3, %v8721_v31 }
 0x50a   : > { %6491 = vmatmul.msk.f32.gmra.mxu2 %vm3549_vm3, %v8723_v32 }
 0x50b   : > { %6483 = vmatmul.msk.f32.gmra.mxu1 %vm3549_vm3, %v8725_v47 }
 0x511   : > { %6492 = vmatmul.msk.f32.vlgmr.msrb.gmra.mxu3 %vm3549_vm3, %v8557_v49 }
 0x512   : > { %6508 = vmatmul.msk.f32.vlgmr.msrb.gmra.mxu2 %vm3549_vm3, %v8555_v20 }
 0x513   : > { %6500 = vmatmul.msk.f32.vlgmr.msrb.gmra.mxu1 %vm3549_vm3, %v8553_v44 }
 0x517   : > { %v8809_v38 = vpop.f32.mrf.mxu1 }
 0x519   : > { %6493 = vmatmul.msk.f32.gmra.mxu3 %vm3549_vm3, %v8589_v2 }
 0x51a   : > { %6509 = vmatmul.msk.f32.gmra.mxu2 %vm3549_vm3, %v8587_v18 }
 0x51b   : > { %6501 = vmatmul.msk.f32.gmra.mxu1 %vm3549_vm3, %v8585_v27  ;;  %v8817_v49 = vpop.f32.mrf.mxu3 }
 0x51c   : > { %v8819_v20 = vpop.f32.mrf.mxu2  ;;  %v3710_v50 = vadd.f32 %v8809_v38, %v8817_v49 }
 0x51f   : > { %v8821_v25 = vpop.f32.mrf.mxu1 }
 0x521   : > { %6494 = vmatmul.msk.f32.gmra.mxu3 %vm3549_vm3, %v8631_v5  ;;  %v4070_v5 = vld [vmem:[#allocation3 + $0x90] sm:$0xff] }
 0x522   : > { %6510 = vmatmul.msk.f32.gmra.mxu2 %vm3549_vm3, %v8629_v8  ;;  %4510 = vst.msk [vmem:[#allocation3 + $0x90] sm:$0xff] %vm3549_vm3, %v10035_v61 }
 0x523   : > { %6502 = vmatmul.msk.f32.gmra.mxu1 %vm3549_vm3, %v8627_v43  ;;  %v8829_v44 = vpop.f32.mrf.mxu3 }
 0x524   : > { %v8831_v18 = vpop.f32.mrf.mxu2 }
 0x527   : > { %v8833_v27 = vpop.f32.mrf.mxu1 }
 0x529   : > { %6495 = vmatmul.msk.f32.gmra.mxu3 %vm3549_vm3, %v8663_v17 }
 0x52a   : > { %6511 = vmatmul.msk.f32.gmra.mxu2 %vm3549_vm3, %v8661_v58 }
 0x52b   : > { %6503 = vmatmul.msk.f32.gmra.mxu1 %vm3549_vm3, %v8659_v21  ;;  %v8841_v2 = vpop.f32.mrf.mxu3 }
 0x52c   : > { %v8843_v8 = vpop.f32.mrf.mxu2 }
 0x52f   : > { %v8845_v43 = vpop.f32.mrf.mxu1 }
 0x531   : > { %6496 = vmatmul.msk.f32.gmra.mxu3 %vm3549_vm3, %v8686_v19 }
 0x532   : > { %6512 = vmatmul.msk.f32.gmra.mxu2 %vm3549_vm3, %v8684_v35 }
 0x533   : > { %6504 = vmatmul.msk.f32.gmra.mxu1 %vm3549_vm3, %v8682_v1  ;;  %v8857_v60 = vpop.f32.mrf.mxu3 }
 0x534   : > { %v8859_v42 = vpop.f32.mrf.mxu2 }
 0x537   : > { %v8861_v54 = vpop.f32.mrf.mxu1 }
 0x539   : > { %6497 = vmatmul.msk.f32.gmra.mxu3 %vm3549_vm3, %v8707_v14 }
 0x53a   : > { %6513 = vmatmul.msk.f32.gmra.mxu2 %vm3549_vm3, %v8705_v22 }
 0x53b   : > { %6505 = vmatmul.msk.f32.gmra.mxu1 %vm3549_vm3, %v8703_v23  ;;  %v8869_v39 = vpop.f32.mrf.mxu3 }
 0x53c   : > { %v8871_v61 = vpop.f32.mrf.mxu2 }
 0x53f   : > { %v8873_v28 = vpop.f32.mrf.mxu1 }
 0x541   : > { %6498 = vmatmul.msk.f32.gmra.mxu3 %vm3549_vm3, %v8721_v31 }
 0x542   : > { %6514 = vmatmul.msk.f32.gmra.mxu2 %vm3549_vm3, %v8723_v32  ;;  %v3707_v32 = vadd.f32 %v8797_v55, %v8803_v52  ;;  %v3713_v52 = vadd.f32 %v8821_v25, %v8829_v44  ;;  %v4539_v44 = vld [vmem:[%s10040_s7 + $0x18] sm:$0xff] }
 0x543   : > { %6506 = vmatmul.msk.f32.gmra.mxu1 %vm3549_vm3, %v8725_v47  ;;  %v8881_v21 = vpop.f32.mrf.mxu3  ;;  %4578 = vmatpush.msra.mxu3 %v4539_v44 }
 0x544   : > { %v8883_v58 = vpop.f32.mrf.mxu2  ;;  %v3805_v57 = vadd.f32 %v8805_v16, %v3707_v32  ;;  %v3807_v49 = vadd.f32 %v8831_v18, %v3713_v52  ;;  %v4529_v18 = vld [vmem:[%s10040_s7 + $0x8] sm:$0xff] }
 0x545   : > { %4643 = vmatpush.msrb.mxu0 %v4529_v18 }
 0x548   : > { %v8885_v17 = vpop.f32.mrf.mxu1 }
 0x549   : > { %6499 = vmatmul.msk.f32.gmra.mxu3 %vm3549_vm3, %v4070_v5 }
 0x54a   : > { %6515 = vmatmul.msk.f32.gmra.mxu2 %vm3549_vm3, %v4236_v53  ;;  %v3806_v53 = vadd.f32 %v8819_v20, %v3710_v50 }
 0x54b   : > { %6507 = vmatmul.msk.f32.gmra.mxu1 %vm3549_vm3, %v4153_v41 }
 0x54c   : > { %v8890_v46 = vpop.f32.mrf.mxu3 }
 0x54d   : > { %v8892_v33 = vpop.f32.mrf.mxu2 }
 0x550   : > { %v3947_v59 = vpop.f32.mrf.mxu1 }
 0x554   : > { %v3864_v62 = vpop.f32.mrf.mxu3 }
 0x555   : > { %v4030_v10 = vpop.f32.mrf.mxu2  ;;  %v3888_v45 = vadd.f32 %v3864_v62, %v3805_v57  ;;  %v8937_v57 = vld [vmem:[%s10039_s25] ss:$0 sm:$0xff]  ;;  %s728_s25 = sand.u32 1, %s6842_s26  }
 0x556   : > { %s729_s1 = scalar_lea.vmem [#allocation5], %s728_s25 }
 0x557   : > { %v3971_v15 = vadd.f32 %v3947_v59, %v3888_v45  ;;  %s6084_s8 = sshll.u32 %s729_s1, 4  ;;  %s6085_s8 = int_to_ptr.vmem [resolvable:$true] %s6084_s8 }
 0x558   : > { %v3950_v9 = vpop.f32.mrf.mxu1 }
 0x559   : > { %v4054_v41 = vadd.f32 %v4030_v10, %v3971_v15  ;;  %v4538_v15 = vld [vmem:[%s10040_s7 + $0x10] sm:$0xff] }
 0x55a   : > { %4579 = vmatpush.msra.mxu3 %v4538_v15 }
 0x55c   : > { %v3867_v37 = vpop.f32.mrf.mxu3 }
 0x55d   : > { %v4033_v0 = vpop.f32.mrf.mxu2  ;;  %v3889_v63 = vadd.f32 %v3867_v37, %v3806_v53  ;;  %v4678_v53 = vld [vmem:[%s10040_s7 + $0x20] sm:$0xff] }
 0x55f   : > { %v3972_v62 = vadd.f32 %v3950_v9, %v3889_v63  ;;  %v4679_v9 = vld [vmem:[%s10040_s7 + $0x28] sm:$0xff] }
 0x560   : > { %v3953_v30 = vpop.f32.mrf.mxu1  ;;  %4718 = vmatpush.msra.mxu1 %v4679_v9 }
 0x561   : > { %v4055_v20 = vadd.f32 %v4033_v0, %v3972_v62 }
 0x562   : > { %4719 = vmatpush.msra.mxu1 %v4678_v53 }
 0x564   : > { %v3870_v24 = vpop.f32.mrf.mxu3 }
 0x565   : > { %v8894_v26 = vpop.f32.mrf.mxu2  ;;  %v3890_v10 = vadd.f32 %v3870_v24, %v3807_v49 }
 0x567   : > { %v3973_v0 = vadd.f32 %v3953_v30, %v3890_v10  ;;  %v4520_v30 = vld [vmem:[#allocation3] sm:$0xff] }
 0x568   : > { %v8896_v1 = vpop.f32.mrf.mxu1 }
 0x569   : > { %v4056_v62 = vadd.f32 %v8894_v26, %v3973_v0  ;;  %v4762_v26 = vld [vmem:[%s10040_s7 + $0x38] sm:$0xff] }
 0x56a   : > { %4801 = vmatpush.msra.mxu2 %v4762_v26 }
 0x56c   : > { %v8898_v35 = vpop.f32.mrf.mxu3 }
 0x56d   : > { %v8900_v19 = vpop.f32.mrf.mxu2 }
 0x570   : > { %v8902_v56 = vpop.f32.mrf.mxu1 }
 0x574   : > { %v8904_v7 = vpop.f32.mrf.mxu3 }
 0x575   : > { %v8906_v34 = vpop.f32.mrf.mxu2 }
 0x578   : > { %v8908_v6 = vpop.f32.mrf.mxu1 }
 0x57c   : > { %v8910_v13 = vpop.f32.mrf.mxu3 }
 0x57d   : > { %v8912_v23 = vpop.f32.mrf.mxu2 }
 0x580   : > { %v8914_v22 = vpop.f32.mrf.mxu1 }
 0x584   : > { %v8916_v14 = vpop.f32.mrf.mxu3 }
 0x585   : > { %v8918_v31 = vpop.f32.mrf.mxu2 }
 0x588   : > { %v8922_v47 = vpop.f32.mrf.mxu1 }
 0x58c   : > { %v8925_v51 = vpop.f32.mrf.mxu3 }
 0x58d   : > { %v8927_v48 = vpop.f32.mrf.mxu2 }
 0x590   : > { %v4197_v5 = vpop.f32.mrf.mxu1 }
 0x594   : > { %v4114_v11 = vpop.f32.mrf.mxu3 }
 0x595   : > { %v4280_v55 = vpop.f32.mrf.mxu2  ;;  %v4138_v16 = vadd.f32 %v4114_v11, %v4054_v41  ;;  %v3716_v11 = vadd.f32 %v8833_v27, %v8841_v2  ;;  %v4530_v41 = vld [vmem:[#allocation3 + $0x1] sm:$0xff] }
 0x596   : > { %6516 = vmatmul.msk.f32.vlgmr.msra.gmra.mxu3 %vm3549_vm3, %v4530_v41 }
 0x597   : > { %v4221_v32 = vadd.f32 %v4197_v5, %v4138_v16  ;;  %v4528_v5 = vld [vmem:[%s10040_s7] sm:$0xff]  ;;  %v3808_v52 = vadd.f32 %v8843_v8, %v3716_v11  ;;  %v3719_v8 = vadd.f32 %v8845_v43, %v8857_v60  ;;  %v4761_v43 = vld [vmem:[%s10040_s7 + $0x30] sm:$0xff] }
 0x598   : > { %v4200_v38 = vpop.f32.mrf.mxu1  ;;  %4644 = vmatpush.msrb.mxu0 %v4528_v5  ;;  %4802 = vmatpush.msra.mxu2 %v4761_v43 }
 0x599   : > { %v4304_v59 = vadd.f32 %v4280_v55, %v4221_v32  ;;  %v4670_v55 = vld [vmem:[#allocation3 + $0x2] sm:$0xff]  ;;  %6524 = vmatmul.msk.f32.vlgmr.msrb.gmra.mxu0 %vm3549_vm3, %v4520_v30  ;;  %v3891_v32 = vadd.f32 %v8898_v35, %v3808_v52  ;;  %v3809_v44 = vadd.f32 %v8859_v42, %v3719_v8 }
 0x59a   : > { %6532 = vmatmul.msk.f32.vlgmr.msra.gmra.mxu1 %vm3549_vm3, %v4670_v55 }
 0x59b   : > { %v8941_v37 = vadd.f32 %v8937_v57, %v4304_v59 }
 0x59c   : > { %v4117_v45 = vpop.f32.mrf.mxu3 }
 0x59d   : > { %v4283_v50 = vpop.f32.mrf.mxu2  ;;  %v4324_v63 = vsub.f32 0.0, %v8941_v37  ;;  %v4139_v25 = vadd.f32 %v4117_v45, %v4055_v20 }
 0x59f   : > { %v4332_v24 = vmul.f32 1.442695, %v4324_v63  ;;  %v4222_v27 = vadd.f32 %v4200_v38, %v4139_v25 }
 0x5a0   : > { %v4203_v2 = vpop.f32.mrf.mxu1 }
 0x5a1   : > { %6690 = vpow2.f32 %v4332_v24  ;;  %v4305_v16 = vadd.f32 %v4283_v50, %v4222_v27  ;;  %v3974_v50 = vadd.f32 %v8896_v1, %v3891_v32  ;;  %v3892_v1 = vadd.f32 %v8904_v7, %v3809_v44 }
 0x5a3   : > { %v8971_v38 = vadd.f32 %v8937_v57, %v4305_v16  ;;  %v4057_v60 = vadd.f32 %v8900_v19, %v3974_v50  ;;  %v3975_v5 = vadd.f32 %v8902_v56, %v3892_v1 }
 0x5a4   : > { %v4120_v49 = vpop.f32.mrf.mxu3 }
 0x5a5   : > { %v4286_v59 = vpop.f32.mrf.mxu2  ;;  %v4325_v20 = vsub.f32 0.0, %v8971_v38  ;;  %v4140_v10 = vadd.f32 %v4120_v49, %v4056_v62  ;;  %v4058_v62 = vadd.f32 %v8906_v34, %v3975_v5 }
 0x5a7   : > { %v6691_v45 = vpop.eup %6690  ;;  %v4334_v11 = vmul.f32 1.442695, %v4325_v20  ;;  %v4223_v63 = vadd.f32 %v4203_v2, %v4140_v10  ;;  %v3722_v2 = vadd.f32 %v8861_v54, %v8869_v39  ;;  %v3725_v39 = vadd.f32 %v8873_v28, %v8881_v21 }
 0x5a8   : > { %v4206_v25 = vpop.f32.mrf.mxu1  ;;  %v4348_v35 = vadd.f32 1.0, %v6691_v45 }
 0x5a9   : > { %6692 = vpow2.f32 %v4334_v11  ;;  %v4306_v18 = vadd.f32 %v4286_v59, %v4223_v63  ;;  %v3810_v16 = vadd.f32 %v8871_v61, %v3722_v2  ;;  %v3811_v26 = vadd.f32 %v8883_v58, %v3725_v39 }
 0x5aa   : > { %6694 = vrcp.f32 %v4348_v35  ;;  %v4365_v49 = vand.u32 2147483647, %v4348_v35  ;;  %v4367_v59 = vand.u32 2147483648, %v4348_v35  ;;  %vm4361_vm9 = vweird.f32 %v4348_v35 }
 0x5ab   : > { %v8987_v9 = vadd.f32 %v8937_v57, %v4306_v18  ;;  %v3893_v56 = vadd.f32 %v8910_v13, %v3810_v16 }
 0x5ac   : > { %v4123_v0 = vpop.f32.mrf.mxu3  ;;  %v4368_v21 = vor.u32 1.1754944e-38, %v4367_v59  ;;  %vm4366_vm11 = vcmp.eq.f32.partialorder %v4365_v49, 8.507059e+37 }
 0x5ad   : > { %v4289_v24 = vpop.f32.mrf.mxu2  ;;  %v4326_v27 = vsub.f32 0.0, %v8987_v9  ;;  %v4141_v42 = vadd.f32 %v4123_v0, %v4057_v60  ;;  %v3976_v28 = vadd.f32 %v8908_v6, %v3893_v56  ;;  %v3728_v6 = vadd.f32 %v8885_v17, %v8890_v46 }
 0x5af   : > { %v6693_v15 = vpop.eup %6692  ;;  %v4336_v53 = vmul.f32 1.442695, %v4326_v27  ;;  %v4224_v41 = vadd.f32 %v4206_v25, %v4141_v42 }
 0x5b0   : > { %v6695_v30 = vpop.eup %6694  ;;  %v8993_v19 = vadd.f32 1.0, %v6693_v15  ;;  %v4209_v52 = vpop.f32.mrf.mxu1 }
 0x5b1   : > { %v4357_v7 = vmul.f32 %v6695_v30, %v4348_v35  ;;  %6696 = vpow2.f32 %v4336_v53  ;;  %v4307_v55 = vadd.f32 %v4289_v24, %v4224_v41  ;;  %vm4362_vm4 = vweird.f32 %v6695_v30 }
 0x5b2   : > { %6698 = vrcp.f32 %v8993_v19  ;;  %vm4363_vm10 = vmor %vm4361_vm9, %vm4362_vm4  ;;  %v3894_v35 = vadd.f32 %v8916_v14, %v3811_v26  ;;  %v4059_v24 = vadd.f32 %v8912_v23, %v3976_v28  ;;  %v4380_v27 = vand.u32 2147483647, %v8993_v19 }
 0x5b3   : > { %v4358_v32 = vsub.f32 1.0, %v4357_v7  ;;  %v8999_v54 = vadd.f32 %v8937_v57, %v4307_v55  ;;  %v4382_v42 = vand.u32 2147483648, %v8993_v19  ;;  %vm4376_vm13 = vweird.f32 %v8993_v19 }
 0x5b4   : > { %v4126_v8 = vpop.f32.mrf.mxu3  ;;  %vm4381_vm15 = vcmp.eq.f32.partialorder %v4380_v27, 8.507059e+37 }
 0x5b5   : > { %v4292_v20 = vpop.f32.mrf.mxu2  ;;  %v4359_v10 = vmul.f32 %v6695_v30, %v4358_v32  ;;  %v4327_v61 = vsub.f32 0.0, %v8999_v54  ;;  %v4142_v45 = vadd.f32 %v4126_v8, %v4058_v62  ;;  %v4383_v7 = vor.u32 1.1754944e-38, %v4382_v42 }
 0x5b7   : > { %v6697_v50 = vpop.eup %6696  ;;  %v4360_v34 = vadd.f32 %v6695_v30, %v4359_v10  ;;  %v4338_v11 = vmul.f32 1.442695, %v4327_v61  ;;  %v4225_v63 = vadd.f32 %v4209_v52, %v4142_v45 }
 0x5b8   : > { %v6699_v25 = vpop.eup %6698  ;;  %v9007_v13 = vadd.f32 1.0, %v6697_v50  ;;  %v4212_v0 = vpop.f32.mrf.mxu1 }
 0x5b9   : > { %v4364_v44 = vsel %vm4363_vm10, %v6695_v30, %v4360_v34  ;;  %v4372_v18 = vmul.f32 %v6699_v25, %v8993_v19  ;;  %6700 = vpow2.f32 %v4338_v11  ;;  %v4308_v58 = vadd.f32 %v4292_v20, %v4225_v63 }
 0x5ba   : > { %v4369_v43 = vsel %vm4366_vm11, %v4368_v21, %v4364_v44  ;;  %6702 = vrcp.f32 %v9007_v13  ;;  %vm4377_vm12 = vweird.f32 %v6699_v25  ;;  %v3977_v30 = vadd.f32 %v8914_v22, %v3894_v35 }
 0x5bb   : > { %v4476_v60 = vmul.f32 %v4369_v43, %v8941_v37  ;;  %v4373_v1 = vsub.f32 1.0, %v4372_v18  ;;  %v9020_v14 = vadd.f32 %v8937_v57, %v4308_v58  ;;  %vm4378_vm14 = vmor %vm4376_vm13, %vm4377_vm12  ;;  %v4395_v49 = vand.u32 2147483647, %v9007_v13 }
 0x5bc   : > { %v4129_v2 = vpop.f32.mrf.mxu3  ;;  %v4060_v19 = vadd.f32 %v8918_v31, %v3977_v30  ;;  %v4397_v59 = vand.u32 2147483648, %v9007_v13  ;;  %vm4391_vm1 = vweird.f32 %v9007_v13 }
 0x5bd   : > { %v4484_v15 = vadd.f32 %v4476_v60, %v8503_v4  ;;  %v4374_v5 = vmul.f32 %v6699_v25, %v4373_v1  ;;  %v4295_v37 = vpop.f32.mrf.mxu2  ;;  %v4143_v53 = vadd.f32 %v4129_v2, %v4059_v24  ;;  %v4328_v46 = vsub.f32 0.0, %v9020_v14 }
 0x5be   : > { %v3812_v4 = vadd.f32 %v8892_v33, %v3728_v6  ;;  %v4398_v26 = vor.u32 1.1754944e-38, %v4397_v59  ;;  %vm4396_vm5 = vcmp.eq.f32.partialorder %v4395_v49, 8.507059e+37 }
 0x5bf   : > { %v6701_v41 = vpop.eup %6700  ;;  %4512 = vst.msk [vmem:[#allocation3 + $0x11] sm:$0xff] %vm3549_vm3, %v4484_v15  ;;  %v4375_v17 = vadd.f32 %v6699_v25, %v4374_v5  ;;  %v4226_v52 = vadd.f32 %v4212_v0, %v4143_v53  ;;  %v4340_v22 = vmul.f32 1.442695, %v4328_v46 }
 0x5c0   : > { %v6703_v23 = vpop.eup %6702  ;;  %v9027_v55 = vadd.f32 1.0, %v6701_v41  ;;  %v3895_v32 = vadd.f32 %v8925_v51, %v3812_v4  ;;  %v4215_v45 = vpop.f32.mrf.mxu1 }
 0x5c1   : > { %v4379_v16 = vsel %vm4378_vm14, %v6699_v25, %v4375_v17  ;;  %v4387_v62 = vmul.f32 %v6703_v23, %v9007_v13  ;;  %v4309_v8 = vadd.f32 %v4295_v37, %v4226_v52  ;;  %vm4392_vm0 = vweird.f32 %v6703_v23 }
 0x5c2   : > { %v4384_v39 = vsel %vm4381_vm15, %v4383_v7, %v4379_v16  ;;  %6704 = vrcp.f32 %v9027_v55  ;;  %v3978_v50 = vadd.f32 %v8922_v47, %v3895_v32  ;;  %vm4393_vm2 = vmor %vm4391_vm1, %vm4392_vm0  ;;  %v4410_v24 = vand.u32 2147483647, %v9027_v55 }
 0x5c3   : > { %v4477_v56 = vmul.f32 %v4384_v39, %v8971_v38  ;;  %v4388_v33 = vsub.f32 1.0, %v4387_v62  ;;  %6706 = vpow2.f32 %v4340_v22  ;;  %v9039_v31 = vadd.f32 %v8937_v57, %v4309_v8 }
 0x5c4   : > { %v4132_v20 = vpop.f32.mrf.mxu3  ;;  %v4061_v1 = vadd.f32 %v8927_v48, %v3978_v50  ;;  %v4412_v27 = vand.u32 2147483648, %v9027_v55  ;;  %vm4406_vm7 = vweird.f32 %v9027_v55  ;;  %vm4411_vm4 = vcmp.eq.f32.partialorder %v4410_v24, 8.507059e+37 }
 0x5c5   : > { %v4485_v10 = vadd.f32 %v4477_v56, %v8516_v12  ;;  %v4389_v61 = vmul.f32 %v6703_v23, %v4388_v33  ;;  %v4144_v51 = vadd.f32 %v4132_v20, %v4060_v19  ;;  %v4298_v47 = vpop.f32.mrf.mxu2  ;;  %v4329_v28 = vsub.f32 0.0, %v9039_v31 }
 0x5c6   : > { %v9041_v38 = vld [vmem:[#allocation3 + $0x11] sm:$0xff]  ;;  %v4413_v46 = vor.u32 1.1754944e-38, %v4412_v27 }
 0x5c7   : > { %v4521_v34 = vld [vmem:[#allocation3 + $0x10] sm:$0xff]  ;;  %4513 = vst.msk [vmem:[#allocation3 + $0x21] sm:$0xff] %vm3549_vm3, %v4485_v10  ;;  %v4390_v63 = vadd.f32 %v6703_v23, %v4389_v61  ;;  %v4227_v12 = vadd.f32 %v4215_v45, %v4144_v51  ;;  %6517 = vmatmul.msk.f32.gmra.mxu3 %vm3549_vm3, %v9041_v38  ;;  %v4342_v60 = vmul.f32 1.442695, %v4329_v28 }
 0x5c8   : > { %v9043_v11 = vld [vmem:[#allocation3 + $0x12] sm:$0xff]  ;;  %6525 = vmatmul.msk.f32.gmra.mxu0 %vm3549_vm3, %v4521_v34  ;;  %v6705_v25 = vpop.eup %6704  ;;  %6540 = vmatmul.msk.f32.vlgmr.msra.gmra.mxu2 %vm3549_vm3, %v4521_v34  ;;  %v4218_v5 = vpop.f32.mrf.mxu1 }
 0x5c9   : > { %6533 = vmatmul.msk.f32.gmra.mxu1 %vm3549_vm3, %v9043_v11  ;;  %v6707_v21 = vpop.eup %6706  ;;  %v4394_v13 = vsel %vm4393_vm2, %v6703_v23, %v4390_v63  ;;  %v4402_v44 = vmul.f32 %v6705_v25, %v9027_v55  ;;  %v4310_v18 = vadd.f32 %v4298_v47, %v4227_v12  ;;  %vm4407_vm6 = vweird.f32 %v6705_v25  ;;  %v4845_v12 = vld [vmem:[%s10040_s7 + $0x48] sm:$0xff]  ;;  %v4928_v47 = vld [vmem:[%s10040_s7 + $0x58] sm:$0xff] }
 0x5ca   : > { %v4399_v43 = vsel %vm4396_vm5, %v4398_v26, %v4394_v13  ;;  %v9056_v35 = vadd.f32 1.0, %v6707_v21  ;;  %vm4408_vm8 = vmor %vm4406_vm7, %vm4407_vm6  ;;  %4884 = vmatpush.msrb.mxu3 %v4845_v12  ;;  %4967 = vmatpush.msra.mxu0 %v4928_v47  ;;  %v4844_v21 = vld [vmem:[%s10040_s7 + $0x40] sm:$0xff] }
 0x5cb   : > { %v4478_v58 = vmul.f32 %v4399_v43, %v8987_v9  ;;  %v4403_v0 = vsub.f32 1.0, %v4402_v44  ;;  %v9061_v6 = vadd.f32 %v8937_v57, %v4310_v18  ;;  %v4927_v18 = vld [vmem:[%s10040_s7 + $0x50] sm:$0xff]  ;;  %v10042_v47 = vld [vmem:[#allocation66_spill] sm:$0xff] }
 0x5cc   : > { %6708 = vrcp.f32 %v9056_v35  ;;  %v4135_v42 = vpop.f32.mrf.mxu3  ;;  %v4427_v33 = vand.u32 2147483648, %v9056_v35  ;;  %vm4421_vm10 = vweird.f32 %v9056_v35  ;;  %4885 = vmatpush.msrb.mxu3 %v4844_v21  ;;  %4968 = vmatpush.msra.mxu0 %v4927_v18 }
 0x5cd   : > { %v4486_v2 = vadd.f32 %v4478_v58, %v8548_v40  ;;  %v4404_v15 = vmul.f32 %v6705_v25, %v4403_v0  ;;  %6710 = vpow2.f32 %v4342_v60  ;;  %v4330_v48 = vsub.f32 0.0, %v9061_v6  ;;  %v4301_v40 = vpop.f32.mrf.mxu2  ;;  %v5010_v60 = vld [vmem:[%s10040_s7 + $0x60] sm:$0xff] }
 0x5ce   : > { %v4145_v9 = vadd.f32 %v4135_v42, %v4061_v1  ;;  %v9068_v37 = vld [vmem:[#allocation3 + $0x21] sm:$0xff]  ;;  %v4428_v45 = vor.u32 1.1754944e-38, %v4427_v33 }
 0x5cf   : > { %v9070_v53 = vld [vmem:[#allocation3 + $0x20] sm:$0xff]  ;;  %4514 = vst.msk [vmem:[#allocation3 + $0x31] sm:$0xff] %vm3549_vm3, %v4486_v2  ;;  %v4405_v30 = vadd.f32 %v6705_v25, %v4404_v15  ;;  %v4344_v17 = vmul.f32 1.442695, %v4330_v48  ;;  %6518 = vmatmul.msk.f32.gmra.mxu3 %vm3549_vm3, %v9068_v37 }
 0x5d0   : > { %v9072_v41 = vld [vmem:[#allocation3 + $0x22] sm:$0xff]  ;;  %6526 = vmatmul.msk.f32.gmra.mxu0 %vm3549_vm3, %v9070_v53  ;;  %v4228_v23 = vadd.f32 %v4218_v5, %v4145_v9  ;;  %6541 = vmatmul.msk.f32.gmra.mxu2 %vm3549_vm3, %v9070_v53 }
 0x5d1   : > { %6534 = vmatmul.msk.f32.gmra.mxu1 %vm3549_vm3, %v9072_v41  ;;  %v4409_v4 = vsel %vm4408_vm8, %v6705_v25, %v4405_v30  ;;  %6712 = vpow2.f32 %v4344_v17  ;;  %v5011_v25 = vld [vmem:[%s10040_s7 + $0x68] sm:$0xff]  ;;  %v5094_v9 = vld [vmem:[%s10040_s7 + $0x78] sm:$0xff]  ;;  %v5093_v30 = vld [vmem:[%s10040_s7 + $0x70] sm:$0xff] }
 0x5d2   : > { %v6709_v7 = vpop.eup %6708  ;;  %v4414_v55 = vsel %vm4411_vm4, %v4413_v46, %v4409_v4  ;;  %v4311_v52 = vadd.f32 %v4301_v40, %v4228_v23  ;;  %5050 = vmatpush.msrb.mxu1 %v5011_v25  ;;  %5133 = vmatpush.msrb.mxu2 %v5094_v9 }
 0x5d3   : > { %v6711_v16 = vpop.eup %6710  ;;  %v4479_v62 = vmul.f32 %v4414_v55, %v8999_v54  ;;  %v4417_v22 = vmul.f32 %v6709_v7, %v9056_v35  ;;  %vm4422_vm9 = vweird.f32 %v6709_v7 }
 0x5d4   : > { %v9087_v32 = vadd.f32 1.0, %v6711_v16  ;;  %v9090_v39 = vadd.f32 %v8937_v57, %v4311_v52  ;;  %v4425_v57 = vand.u32 2147483647, %v9056_v35  ;;  %vm4423_vm11 = vmor %vm4421_vm10, %vm4422_vm9  ;;  %5051 = vmatpush.msrb.mxu1 %v5010_v60  ;;  %5134 = vmatpush.msrb.mxu2 %v5093_v30 }
 0x5d5   : > { %v4487_v19 = vadd.f32 %v4479_v62, %v8580_v36  ;;  %v4418_v56 = vsub.f32 1.0, %v4417_v22 }
 0x5d6   : > { %6714 = vrcp.f32 %v9087_v32  ;;  %v9095_v49 = vld [vmem:[#allocation3 + $0x31] sm:$0xff]  ;;  %v4331_v36 = vsub.f32 0.0, %v9090_v39  ;;  %vm4426_vm12 = vcmp.eq.f32.partialorder %v4425_v57, 8.507059e+37  ;;  %v4442_v58 = vand.u32 2147483648, %v9087_v32 }
 0x5d7   : > { %v9097_v59 = vld [vmem:[#allocation3 + $0x30] sm:$0xff]  ;;  %v6713_v54 = vpop.eup %6712  ;;  %4515 = vst.msk [vmem:[#allocation3 + $0x41] sm:$0xff] %vm3549_vm3, %v4487_v19  ;;  %v4419_v20 = vmul.f32 %v6709_v7, %v4418_v56  ;;  %6519 = vmatmul.msk.f32.gmra.mxu3 %vm3549_vm3, %v9095_v49  ;;  %v4440_v24 = vand.u32 2147483647, %v9087_v32  ;;  %vm4436_vm14 = vweird.f32 %v9087_v32 }
 0x5d8   : > { %v9099_v8 = vld [vmem:[#allocation3 + $0x32] sm:$0xff]  ;;  %6527 = vmatmul.msk.f32.gmra.mxu0 %vm3549_vm3, %v9097_v59  ;;  %v9108_v10 = vadd.f32 1.0, %v6713_v54  ;;  %6542 = vmatmul.msk.f32.gmra.mxu2 %vm3549_vm3, %v9097_v59  ;;  %v4346_v51 = vmul.f32 1.442695, %v4331_v36  ;;  %v4443_v48 = vor.u32 1.1754944e-38, %v4442_v58 }
 0x5d9   : > { %6535 = vmatmul.msk.f32.gmra.mxu1 %vm3549_vm3, %v9099_v8  ;;  %v4420_v61 = vadd.f32 %v6709_v7, %v4419_v20  ;;  %vm4441_vm1 = vcmp.eq.f32.partialorder %v4440_v24, 8.507059e+37 }
 0x5da   : > { %6716 = vrcp.f32 %v9108_v10  ;;  %v4457_v5 = vand.u32 2147483648, %v9108_v10  ;;  %v4455_v46 = vand.u32 2147483647, %v9108_v10  ;;  %vm4451_vm2 = vweird.f32 %v9108_v10 }
 0x5db   : > { %v4424_v50 = vsel %vm4423_vm11, %v6709_v7, %v4420_v61  ;;  %6718 = vpow2.f32 %v4346_v51 }
 0x5dc   : > { %v6715_v34 = vpop.eup %6714  ;;  %v4429_v63 = vsel %vm4426_vm12, %v4428_v45, %v4424_v50  ;;  %v4458_v55 = vor.u32 1.1754944e-38, %v4457_v5  ;;  %vm4456_vm6 = vcmp.eq.f32.partialorder %v4455_v46, 8.507059e+37 }
 0x5dd   : > { %v4480_v26 = vmul.f32 %v4429_v63, %v9020_v14  ;;  %v4432_v28 = vmul.f32 %v6715_v34, %v9087_v32  ;;  %vm4437_vm13 = vweird.f32 %v6715_v34 }
 0x5de   : > { %v9130_v13 = vld [vmem:[#allocation3 + $0x41] sm:$0xff]  ;;  %vm4438_vm15 = vmor %vm4436_vm14, %vm4437_vm13 }
 0x5df   : > { %v9132_v44 = vld [vmem:[#allocation3 + $0x40] sm:$0xff]  ;;  %v4488_v43 = vadd.f32 %v4480_v26, %v8618_v3  ;;  %v4433_v14 = vsub.f32 1.0, %v4432_v28  ;;  %6520 = vmatmul.msk.f32.gmra.mxu3 %vm3549_vm3, %v9130_v13 }
 0x5e0   : > { %6528 = vmatmul.msk.f32.gmra.mxu0 %vm3549_vm3, %v9132_v44  ;;  %v9142_v35 = vld [vmem:[#allocation3 + $0x42] sm:$0xff]  ;;  %v6717_v1 = vpop.eup %6716  ;;  %6543 = vmatmul.msk.f32.gmra.mxu2 %vm3549_vm3, %v9132_v44 }
 0x5e1   : > { %6536 = vmatmul.msk.f32.gmra.mxu1 %vm3549_vm3, %v9142_v35  ;;  %v6719_v3 = vpop.eup %6718  ;;  %4516 = vst.msk [vmem:[#allocation3 + $0x51] sm:$0xff] %vm3549_vm3, %v4488_v43  ;;  %v4434_v0 = vmul.f32 %v6715_v34, %v4433_v14  ;;  %v4447_v27 = vmul.f32 %v6717_v1, %v9108_v10  ;;  %vm4452_vm0 = vweird.f32 %v6717_v1  ;;  %v5092_v14 = vld [vmem:[#allocation3 + $0x91] sm:$0xff] }
 0x5e2   : > { %v4355_v42 = vadd.f32 1.0, %v6719_v3  ;;  %vm4453_vm5 = vmor %vm4451_vm2, %vm4452_vm0 }
 0x5e3   : > { %v4435_v2 = vadd.f32 %v6715_v34, %v4434_v0  ;;  %v4448_v15 = vsub.f32 1.0, %v4447_v27 }
 0x5e4   : > { %6720 = vrcp.f32 %v4355_v42  ;;  %v4472_v57 = vand.u32 2147483648, %v4355_v42  ;;  %v4470_v10 = vand.u32 2147483647, %v4355_v42  ;;  %vm4466_vm8 = vweird.f32 %v4355_v42 }
 0x5e5   : > { %v4439_v17 = vsel %vm4438_vm15, %v6715_v34, %v4435_v2  ;;  %v4449_v40 = vmul.f32 %v6717_v1, %v4448_v15 }
 0x5e6   : > { %v4444_v23 = vsel %vm4441_vm1, %v4443_v48, %v4439_v17  ;;  %v4473_v51 = vor.u32 1.1754944e-38, %v4472_v57  ;;  %vm4471_vm9 = vcmp.eq.f32.partialorder %v4470_v10, 8.507059e+37 }
 0x5e7   : > { %v4481_v4 = vmul.f32 %v4444_v23, %v9039_v31  ;;  %v4450_v7 = vadd.f32 %v6717_v1, %v4449_v40 }
 0x5e8   : > { %v9166_v52 = vld [vmem:[#allocation3 + $0x51] sm:$0xff] }
 0x5e9   : > { %v4525_v16 = vld [vmem:[#allocation3 + $0x50] sm:$0xff]  ;;  %v4489_v22 = vadd.f32 %v4481_v4, %v8656_v29  ;;  %v4454_v32 = vsel %vm4453_vm5, %v6717_v1, %v4450_v7  ;;  %6521 = vmatmul.msk.f32.gmra.mxu3 %vm3549_vm3, %v9166_v52 }
 0x5ea   : > { %v9168_v62 = vld [vmem:[#allocation3 + $0x52] sm:$0xff]  ;;  %6529 = vmatmul.msk.f32.gmra.mxu0 %vm3549_vm3, %v4525_v16  ;;  %v6721_v19 = vpop.eup %6720  ;;  %v4459_v31 = vsel %vm4456_vm6, %v4458_v55, %v4454_v32  ;;  %6544 = vmatmul.msk.f32.gmra.mxu2 %vm3549_vm3, %v4525_v16  ;;  %v10041_v29 = vld [vmem:[#allocation63_spill] sm:$0xff] }
 0x5eb   : > { %6537 = vmatmul.msk.f32.gmra.mxu1 %vm3549_vm3, %v9168_v62  ;;  %4517 = vst.msk [vmem:[#allocation3 + $0x61] sm:$0xff] %vm3549_vm3, %v4489_v22  ;;  %v4482_v56 = vmul.f32 %v4459_v31, %v9061_v6  ;;  %v4462_v33 = vmul.f32 %v6721_v19, %v4355_v42  ;;  %vm4467_vm7 = vweird.f32 %v6721_v19 }
 0x5ec   : > { %vm4468_vm4 = vmor %vm4466_vm8, %vm4467_vm7  ;;  %vm5416_vm8 = vcmask 261120  }
 0x5ed   : > { %v4490_v54 = vadd.f32 %v4482_v56, %v10041_v29  ;;  %v4463_v20 = vsub.f32 1.0, %v4462_v33 }
 0x5ef   : > { %4518 = vst.msk [vmem:[#allocation3 + $0x71] sm:$0xff] %vm3549_vm3, %v4490_v54  ;;  %v4464_v36 = vmul.f32 %v6721_v19, %v4463_v20 }
 0x5f1   : > { %v4465_v61 = vadd.f32 %v6721_v19, %v4464_v36 }
 0x5f2   : > { %v4536_v45 = vld [vmem:[#allocation3 + $0x61] sm:$0xff] }
 0x5f3   : > { %v4526_v50 = vld [vmem:[#allocation3 + $0x60] sm:$0xff]  ;;  %v4469_v63 = vsel %vm4468_vm4, %v6721_v19, %v4465_v61  ;;  %6522 = vmatmul.msk.f32.gmra.mxu3 %vm3549_vm3, %v4536_v45 }
 0x5f4   : > { %v9181_v34 = vld [vmem:[#allocation3 + $0x62] sm:$0xff]  ;;  %6530 = vmatmul.msk.f32.gmra.mxu0 %vm3549_vm3, %v4526_v50  ;;  %v4474_v6 = vsel %vm4471_vm9, %v4473_v51, %v4469_v63  ;;  %6545 = vmatmul.msk.f32.gmra.mxu2 %vm3549_vm3, %v4526_v50 }
 0x5f5   : > { %6538 = vmatmul.msk.f32.gmra.mxu1 %vm3549_vm3, %v9181_v34  ;;  %v4483_v12 = vmul.f32 %v4474_v6, %v9090_v39 }
 0x5f6   : > { %v4537_v26 = vld [vmem:[#allocation3 + $0x71] sm:$0xff] }
 0x5f7   : > { %v4491_v25 = vadd.f32 %v4483_v12, %v10042_v47  ;;  %v4527_v28 = vld [vmem:[#allocation3 + $0x70] sm:$0xff] }
 0x5f8   : > { %v9191_v21 = vld [vmem:[#allocation3 + $0x72] sm:$0xff] }
 0x5f9   : > { %4519 = vst.msk [vmem:[#allocation3 + $0x81] sm:$0xff] %vm3549_vm3, %v4491_v25 }
 0x5fb   : > { %6523 = vmatmul.msk.f32.gmra.mxu3 %vm3549_vm3, %v4537_v26 }
 0x5fc   : > { %6531 = vmatmul.msk.f32.gmra.mxu0 %vm3549_vm3, %v4527_v28  ;;  %6546 = vmatmul.msk.f32.gmra.mxu2 %vm3549_vm3, %v4527_v28 }
 0x5fd   : > { %6539 = vmatmul.msk.f32.gmra.mxu1 %vm3549_vm3, %v9191_v21 }
 0x600   : > { %v4760_v18 = vld [vmem:[#allocation3 + $0x80] sm:$0xff] }
 0x601   : > { %v4926_v43 = vld [vmem:[#allocation3 + $0x82] sm:$0xff] }
 0x603   : > { %6548 = vmatmul.msk.f32.vlgmr.msrb.gmra.mxu3 %vm3549_vm3, %v9041_v38  ;;  %v5177_v38 = vld [vmem:[%s10040_s7 + $0x88] sm:$0xff] }
 0x604   : > { %6556 = vmatmul.msk.f32.vlgmr.msra.gmra.mxu0 %vm3549_vm3, %v9043_v11  ;;  %6547 = vmatmul.msk.f32.gmra.mxu2 %vm3549_vm3, %v4760_v18  ;;  %v5176_v11 = vld [vmem:[%s10040_s7 + $0x80] sm:$0xff]  ;;  %s6082_s7 = scalar_lea.hbm %s9705_s24, %s7000_s6 }
 0x605   : > { %6564 = vmatmul.msk.f32.vlgmr.msrb.gmra.mxu1 %vm3549_vm3, %v9070_v53  ;;  %5216 = vmatpush.msra.mxu3 %v5177_v38  ;;  %s6086_s22 = sshll.u32 %s6082_s7, 4  ;;  %s6087_s22 = int_to_ptr.hbm [resolvable:$true] %s6086_s22 }
 0x606   : > { %s6802_s29 = sshra.s32 %s6087_s22, 4  ;;  %s6803_s29 = int_to_ptr.hbm [resolvable:$true] %s6802_s29 }
 0x607   : > { %5217 = vmatpush.msra.mxu3 %v5176_v11  ;;  %p6809_p0 = scmp.lt.s32.totalorder %s6803_s29, %s9705_s24 }
 0x60b   : > { %6549 = vmatmul.msk.f32.gmra.mxu3 %vm3549_vm3, %v9068_v37 }
 0x60c   : > { %6557 = vmatmul.msk.f32.gmra.mxu0 %vm3549_vm3, %v9072_v41  ;;  %6572 = vmatmul.msk.f32.vlgmr.msrb.gmra.mxu2 %vm3549_vm3, %v9068_v37 }
 0x60d   : > { %6565 = vmatmul.msk.f32.gmra.mxu1 %vm3549_vm3, %v9097_v59 }
 0x613   : > { %6550 = vmatmul.msk.f32.gmra.mxu3 %vm3549_vm3, %v9095_v49 }
 0x614   : > { %6558 = vmatmul.msk.f32.gmra.mxu0 %vm3549_vm3, %v9099_v8  ;;  %6573 = vmatmul.msk.f32.gmra.mxu2 %vm3549_vm3, %v9095_v49 }
 0x615   : > { %6566 = vmatmul.msk.f32.gmra.mxu1 %vm3549_vm3, %v9132_v44  ;;  %v4843_v44 = vld [vmem:[#allocation3 + $0x81] sm:$0xff] }
 0x616   : > { %v4646_v53 = vpop.f32.mrf.mxu0 }
 0x617   : > { %v4721_v49 = vpop.f32.mrf.mxu1 }
 0x619   : > { %v4581_v37 = vpop.f32.mrf.mxu3 }
 0x61a   : > { %v4647_v39 = vadd.f32 %v4646_v53, %v4581_v37 }
 0x61b   : > { %6551 = vmatmul.msk.f32.gmra.mxu3 %vm3549_vm3, %v9130_v13 }
 0x61c   : > { %6559 = vmatmul.msk.f32.gmra.mxu0 %vm3549_vm3, %v9142_v35  ;;  %6574 = vmatmul.msk.f32.gmra.mxu2 %vm3549_vm3, %v9130_v13  ;;  %v4745_v59 = vadd.f32 %v4721_v49, %v4647_v39  ;;  %v5009_v13 = vld [vmem:[#allocation3 + $0x90] sm:$0xff] }
 0x61d   : > { %6567 = vmatmul.msk.f32.gmra.mxu1 %vm3549_vm3, %v4525_v16 }
 0x623   : > { %6552 = vmatmul.msk.f32.gmra.mxu3 %vm3549_vm3, %v9166_v52 }
 0x624   : > { %6560 = vmatmul.msk.f32.gmra.mxu0 %vm3549_vm3, %v9168_v62  ;;  %6575 = vmatmul.msk.f32.gmra.mxu2 %vm3549_vm3, %v9166_v52 }
 0x625   : > { %6568 = vmatmul.msk.f32.gmra.mxu1 %vm3549_vm3, %v4526_v50 }
 0x62b   : > { %6553 = vmatmul.msk.f32.gmra.mxu3 %vm3549_vm3, %v4536_v45 }
 0x62c   : > { %6561 = vmatmul.msk.f32.gmra.mxu0 %vm3549_vm3, %v9181_v34  ;;  %6576 = vmatmul.msk.f32.gmra.mxu2 %vm3549_vm3, %v4536_v45  ;;  %v5175_v45 = vld [vmem:[#allocation3 + $0x92] sm:$0xff] }
 0x62d   : > { %6569 = vmatmul.msk.f32.gmra.mxu1 %vm3549_vm3, %v4527_v28 }
 0x633   : > { %6554 = vmatmul.msk.f32.gmra.mxu3 %vm3549_vm3, %v4537_v26 }
 0x634   : > { %6562 = vmatmul.msk.f32.gmra.mxu0 %vm3549_vm3, %v9191_v21  ;;  %6577 = vmatmul.msk.f32.gmra.mxu2 %vm3549_vm3, %v4537_v26 }
 0x635   : > { %6570 = vmatmul.msk.f32.gmra.mxu1 %vm3549_vm3, %v4760_v18 }
 0x63b   : > { %6555 = vmatmul.msk.f32.gmra.mxu3 %vm3549_vm3, %v4843_v44 }
 0x63c   : > { %6563 = vmatmul.msk.f32.gmra.mxu0 %vm3549_vm3, %v4926_v43  ;;  %6578 = vmatmul.msk.f32.gmra.mxu2 %vm3549_vm3, %v4843_v44 }
 0x63d   : > { %6571 = vmatmul.msk.f32.gmra.mxu1 %vm3549_vm3, %v5009_v13 }
 0x643   : > { %6580 = vmatmul.msk.f32.vlgmr.msra.gmra.mxu3 %vm3549_vm3, %v9072_v41 }
 0x644   : > { %6579 = vmatmul.msk.f32.gmra.mxu2 %vm3549_vm3, %v5092_v14 }
 0x645   : > { %v4649_v60 = vpop.f32.mrf.mxu0 }
 0x646   : > { %v4724_v1 = vpop.f32.mrf.mxu1 }
 0x64a   : > { %v4584_v58 = vpop.f32.mrf.mxu3 }
 0x64b   : > { %6581 = vmatmul.msk.f32.gmra.mxu3 %vm3549_vm3, %v9099_v8  ;;  %v4650_v3 = vadd.f32 %v4649_v60, %v4584_v58  ;;  %v4804_v0 = vpop.f32.mrf.mxu2 }
 0x64c   : > { %v4828_v24 = vadd.f32 %v4804_v0, %v4745_v59 }
 0x64d   : > { %v4652_v27 = vpop.f32.mrf.mxu0  ;;  %v4746_v42 = vadd.f32 %v4724_v1, %v4650_v3 }
 0x64e   : > { %v4727_v2 = vpop.f32.mrf.mxu1 }
 0x652   : > { %v4587_v15 = vpop.f32.mrf.mxu3 }
 0x653   : > { %6582 = vmatmul.msk.f32.gmra.mxu3 %vm3549_vm3, %v9142_v35  ;;  %v4653_v48 = vadd.f32 %v4652_v27, %v4587_v15  ;;  %v4807_v41 = vpop.f32.mrf.mxu2 }
 0x654   : > { %v4829_v5 = vadd.f32 %v4807_v41, %v4746_v42 }
 0x655   : > { %v4747_v9 = vadd.f32 %v4727_v2, %v4653_v48  ;;  %v4655_v30 = vpop.f32.mrf.mxu0 }
 0x656   : > { %v4730_v17 = vpop.f32.mrf.mxu1 }
 0x65a   : > { %v4590_v40 = vpop.f32.mrf.mxu3 }
 0x65b   : > { %6583 = vmatmul.msk.f32.gmra.mxu3 %vm3549_vm3, %v9168_v62  ;;  %v4656_v8 = vadd.f32 %v4655_v30, %v4590_v40  ;;  %v4810_v46 = vpop.f32.mrf.mxu2 }
 0x65c   : > { %v4830_v23 = vadd.f32 %v4810_v46, %v4747_v9 }
 0x65d   : > { %v4748_v4 = vadd.f32 %v4730_v17, %v4656_v8  ;;  %v4658_v7 = vpop.f32.mrf.mxu0 }
 0x65e   : > { %v4733_v55 = vpop.f32.mrf.mxu1 }
 0x662   : > { %v4593_v52 = vpop.f32.mrf.mxu3 }
 0x663   : > { %6584 = vmatmul.msk.f32.gmra.mxu3 %vm3549_vm3, %v9181_v34  ;;  %v4659_v35 = vadd.f32 %v4658_v7, %v4593_v52  ;;  %v4813_v16 = vpop.f32.mrf.mxu2 }
 0x664   : > { %v4831_v22 = vadd.f32 %v4813_v16, %v4748_v4 }
 0x665   : > { %v4749_v32 = vadd.f32 %v4733_v55, %v4659_v35 }
 0x667   : > { %v4661_v19 = vpop.f32.mrf.mxu0 }
 0x668   : > { %v4736_v31 = vpop.f32.mrf.mxu1 }
 0x66b   : > { %6585 = vmatmul.msk.f32.gmra.mxu3 %vm3549_vm3, %v9191_v21 }
 0x66c   : > { %v4596_v62 = vpop.f32.mrf.mxu3 }
 0x66d   : > { %v4662_v56 = vadd.f32 %v4661_v19, %v4596_v62  ;;  %v4816_v33 = vpop.f32.mrf.mxu2 }
 0x66e   : > { %v4832_v29 = vadd.f32 %v4816_v33, %v4749_v32 }
 0x66f   : > { %v4750_v54 = vadd.f32 %v4736_v31, %v4662_v56 }
 0x671   : > { %v4664_v20 = vpop.f32.mrf.mxu0 }
 0x672   : > { %v4739_v57 = vpop.f32.mrf.mxu1 }
 0x673   : > { %6586 = vmatmul.msk.f32.gmra.mxu3 %vm3549_vm3, %v4926_v43 }
 0x676   : > { %v4599_v36 = vpop.f32.mrf.mxu3 }
 0x677   : > { %v4665_v10 = vadd.f32 %v4664_v20, %v4599_v36  ;;  %v4819_v61 = vpop.f32.mrf.mxu2 }
 0x678   : > { %v4833_v51 = vadd.f32 %v4819_v61, %v4750_v54 }
 0x679   : > { %v4751_v50 = vadd.f32 %v4739_v57, %v4665_v10  ;;  %v4667_v34 = vpop.f32.mrf.mxu0 }
 0x67a   : > { %v4742_v12 = vpop.f32.mrf.mxu1 }
 0x67b   : > { %6587 = vmatmul.msk.f32.gmra.mxu3 %vm3549_vm3, %v5175_v45  ;;  %vm5257_vm3 = vcmask 523264  }
 0x67e   : > { %v4602_v63 = vpop.f32.mrf.mxu3 }
 0x67f   : > { %v4822_v6 = vpop.f32.mrf.mxu2  ;;  %v4668_v32 = vadd.f32 %v4667_v34, %v4602_v63 }
 0x680   : > { %v4834_v47 = vadd.f32 %v4822_v6, %v4751_v50 }
 0x681   : > { %v4970_v21 = vpop.f32.mrf.mxu0  ;;  %v4752_v62 = vadd.f32 %v4742_v12, %v4668_v32 }
 0x682   : > { %v5053_v38 = vpop.f32.mrf.mxu1 }
 0x686   : > { %v4887_v25 = vpop.f32.mrf.mxu3 }
 0x687   : > { %v4825_v26 = vpop.f32.mrf.mxu2  ;;  %v4911_v28 = vadd.f32 %v4887_v25, %v4828_v24 }
 0x689   : > { %v4994_v18 = vadd.f32 %v4970_v21, %v4911_v28  ;;  %v4973_v24 = vpop.f32.mrf.mxu0 }
 0x68a   : > { %v5056_v27 = vpop.f32.mrf.mxu1 }
 0x68b   : > { %v5077_v11 = vadd.f32 %v5053_v38, %v4994_v18 }
 0x68e   : > { %v4890_v37 = vpop.f32.mrf.mxu3 }
 0x68f   : > { %v9270_v53 = vadd.f32 %v4890_v37, %v4829_v5  ;;  %v5136_v39 = vpop.f32.mrf.mxu2 }
 0x690   : > { %v5160_v49 = vadd.f32 %v5136_v39, %v5077_v11 }
 0x691   : > { %v4976_v15 = vpop.f32.mrf.mxu0  ;;  %v4995_v37 = vadd.f32 %v4973_v24, %v9270_v53  ;;  %v5251_v53 = vld [vmem:[%s10043_s23] sm:$0xff]  ;;  %v5252_v24 = vld [vmem:[%s10043_s23 + $0x8] sm:$0xff]  ;;  %s10045_s23 = sld [smem:[#allocation89_spill]] }
 0x692   : > { %v5059_v41 = vpop.f32.mrf.mxu1 }
 0x696   : > { %v4893_v59 = vpop.f32.mrf.mxu3 }
 0x697   : > { %v4913_v13 = vadd.f32 %v4893_v59, %v4830_v23  ;;  %v5139_v42 = vpop.f32.mrf.mxu2 }
 0x699   : > { %v4979_v30 = vpop.f32.mrf.mxu0  ;;  %v4996_v18 = vadd.f32 %v4976_v15, %v4913_v13  ;;  %v5331_v15 = vld [vmem:[%s10044_s30 + $0x20] sm:$0xff] }
 0x69a   : > { %v5062_v40 = vpop.f32.mrf.mxu1 }
 0x69e   : > { %v4896_v44 = vpop.f32.mrf.mxu3 }
 0x69f   : > { %v4914_v43 = vadd.f32 %v4896_v44, %v4831_v22  ;;  %v5142_v9 = vpop.f32.mrf.mxu2  ;;  %v5079_v44 = vadd.f32 %v5059_v41, %v4996_v18  ;;  %v6644_v41 = vld [vmem:[%s10045_s23] ss:$0 sm:$0xff]  ;;  %v5410_v18 = vld [vmem:[%s10046_s9 + $0x10] sm:$0xff]  ;;  %s6074_s23 = scalar_lea.sflag [#allocation6], %s728_s25 }
 0x6a1   : > { %v4982_v23 = vpop.f32.mrf.mxu0  ;;  %v4997_v34 = vadd.f32 %v4979_v30, %v4914_v43  ;;  %v5162_v43 = vadd.f32 %v5142_v9, %v5079_v44  ;;  %v5328_v30 = vld [vmem:[%s10044_s30 + $0x8] sm:$0xff] }
 0x6a2   : > { %v5065_v4 = vpop.f32.mrf.mxu1 }
 0x6a3   : > { %v5080_v39 = vadd.f32 %v5062_v40, %v4997_v34  ;;  %v5327_v40 = vld [vmem:[%s10044_s30] sm:$0xff] }
 0x6a6   : > { %v4899_v14 = vpop.f32.mrf.mxu3 }
 0x6a7   : > { %v4915_v60 = vadd.f32 %v4899_v14, %v4832_v29  ;;  %v5145_v8 = vpop.f32.mrf.mxu2  ;;  %v4835_v29 = vadd.f32 %v4825_v26, %v4752_v62 }
 0x6a8   : > { %v5163_v14 = vadd.f32 %v5145_v8, %v5080_v39 }
 0x6a9   : > { %v4985_v52 = vpop.f32.mrf.mxu0  ;;  %v4998_v6 = vadd.f32 %v4982_v23, %v4915_v60 }
 0x6aa   : > { %v5068_v35 = vpop.f32.mrf.mxu1 }
 0x6ab   : > { %v5081_v38 = vadd.f32 %v5065_v4, %v4998_v6 }
 0x6ae   : > { %v4902_v1 = vpop.f32.mrf.mxu3 }
 0x6af   : > { %v4916_v58 = vadd.f32 %v4902_v1, %v4833_v51  ;;  %v5148_v7 = vpop.f32.mrf.mxu2  ;;  %v5078_v1 = vadd.f32 %v5056_v27, %v4995_v37  ;;  %v5334_v27 = vld [vmem:[%s10044_s30 + $0x38] sm:$0xff]  ;;  %v5408_v37 = vld [vmem:[%s10046_s9] sm:$0xff] }
 0x6b0   : > { %5353 = vmatpush.msra.mxu1 %v5334_v27 }
 0x6b1   : > { %v4988_v19 = vpop.f32.mrf.mxu0  ;;  %v4999_v45 = vadd.f32 %v4985_v52, %v4916_v58 }
 0x6b2   : > { %v5071_v56 = vpop.f32.mrf.mxu1 }
 0x6b3   : > { %v5082_v63 = vadd.f32 %v5068_v35, %v4999_v45 }
 0x6b6   : > { %v4905_v3 = vpop.f32.mrf.mxu3 }
 0x6b7   : > { %v4917_v0 = vadd.f32 %v4905_v3, %v4834_v47  ;;  %v5151_v16 = vpop.f32.mrf.mxu2  ;;  %v5161_v3 = vadd.f32 %v5139_v42, %v5078_v1  ;;  %v5333_v42 = vld [vmem:[%s10044_s30 + $0x30] sm:$0xff] }
 0x6b8   : > { %v5165_v26 = vadd.f32 %v5151_v16, %v5082_v63  ;;  %5354 = vmatpush.msra.mxu1 %v5333_v42 }
 0x6b9   : > { %v4991_v20 = vpop.f32.mrf.mxu0  ;;  %v5000_v61 = vadd.f32 %v4988_v19, %v4917_v0 }
 0x6ba   : > { %v5074_v10 = vpop.f32.mrf.mxu1 }
 0x6bb   : > { %v5083_v47 = vadd.f32 %v5071_v56, %v5000_v61 }
 0x6be   : > { %v4908_v2 = vpop.f32.mrf.mxu3 }
 0x6bf   : > { %v5154_v33 = vpop.f32.mrf.mxu2  ;;  %v4918_v54 = vadd.f32 %v4908_v2, %v4835_v29  ;;  %v5332_v2 = vld [vmem:[%s10044_s30 + $0x28] sm:$0xff] }
 0x6c0   : > { %v5166_v21 = vadd.f32 %v5154_v33, %v5083_v47  ;;  %5355 = vmatpush.msra.mxu1 %v5332_v2 }
 0x6c1   : > { %v5001_v36 = vadd.f32 %v4991_v20, %v4918_v54 }
 0x6c2   : > { %5356 = vmatpush.msra.mxu1 %v5331_v15 }
 0x6c3   : > { %v5084_v50 = vadd.f32 %v5074_v10, %v5001_v36 }
 0x6c6   : > { %v5219_v48 = vpop.f32.mrf.mxu3 }
 0x6c7   : > { %v9272_v5 = vadd.f32 %v5219_v48, %v5160_v49  ;;  %v5157_v51 = vpop.f32.mrf.mxu2  ;;  %v5164_v49 = vadd.f32 %v5148_v7, %v5081_v38  ;;  %v5330_v48 = vld [vmem:[%s10044_s30 + $0x18] sm:$0xff] }
 0x6c8   : > { %v5167_v25 = vadd.f32 %v5157_v51, %v5084_v50  ;;  %5357 = vmatpush.msra.mxu1 %v5330_v48 }
 0x6ce   : > { %v5222_v17 = vpop.f32.mrf.mxu3 }
 0x6cf   : > { %v5244_v0 = vadd.f32 %v5222_v17, %v5161_v3 }
 0x6d6   : > { %v5225_v46 = vpop.f32.mrf.mxu3 }
 0x6d7   : > { %v5245_v13 = vadd.f32 %v5225_v46, %v5162_v43 }
 0x6de   : > { %v5228_v55 = vpop.f32.mrf.mxu3 }
 0x6df   : > { %v5246_v58 = vadd.f32 %v5228_v55, %v5163_v14 }
 0x6e6   : > { %v5231_v22 = vpop.f32.mrf.mxu3 }
 0x6e7   : > { %v5247_v60 = vadd.f32 %v5231_v22, %v5164_v49 }
 0x6ee   : > { %v5234_v31 = vpop.f32.mrf.mxu3 }
 0x6ef   : > { %v5248_v59 = vadd.f32 %v5234_v31, %v5165_v26  ;;  %v5409_v26 = vld [vmem:[%s10046_s9 + $0x8] sm:$0xff] }
 0x6f6   : > { %v5237_v57 = vpop.f32.mrf.mxu3 }
 0x6f7   : > { %v5249_v11 = vadd.f32 %v5237_v57, %v5166_v21  ;;  %v5411_v21 = vld [vmem:[%s10046_s9 + $0x18] sm:$0xff]  ;;  %s6804_s9 = scalar_lea.hbm %s6803_s29, 1 }
 0x6f8   : > { %5435 = vmatpush.msra.mxu2 %v5411_v21  ;;  %v5517_v21 = vld [vmem:[#allocation4 + $0x1] sm:$0xf]  ;;  %p6805_p11 = scmp.ne.s32.totalorder %s6803_s29, %s6804_s9 }
 0x6fa   : > { %5436 = vmatpush.msra.mxu2 %v5410_v18  ;;  %p6806_p12 = pnand %p6805_p11, %p7017_p5 }
 0x6fc   : > { %5437 = vmatpush.msra.mxu2 %v5409_v26  ;;  %p6807_p13 = pneg %p6806_p12 }
 0x6fe   : > { %v5240_v28 = vpop.f32.mrf.mxu3  ;;  %5438 = vmatpush.msra.mxu2 %v5408_v37 }
 0x6ff   : > { %v5250_v12 = vadd.f32 %v5240_v28, %v5167_v25 }
 0x701   : > { %5272 = vmatpush.msrb.mxu0 %v5250_v12  ;;  %v6645_v12 = vld [vmem:[%s10047_s0] ss:$0 sm:$0xff]  ;;  %s6808_s0 = scalar_lea.hbm %s9705_s24, 2 }
 0x702   : > { %p6810_p1 = scmp.lt.s32.totalorder %s6808_s0, %s6804_s9 }
 0x703   : > { %5273 = vmatpush.msrb.mxu0 %v5249_v11 }
 0x704   : > { %p6811_p2 = por %p6810_p1, %p6809_p0 }
 0x705   : > { %5274 = vmatpush.msrb.mxu0 %v5248_v59 }
 0x706   : > { %p6812_p3 = pnand %p6811_p2, %p6807_p13 }
 0x707   : > { %5275 = vmatpush.msrb.mxu0 %v5247_v60 }
 0x709   : > { %5276 = vmatpush.msrb.mxu0 %v5246_v58 }
 0x70b   : > { %5277 = vmatpush.msrb.mxu0 %v5245_v13 }
 0x70d   : > { %5278 = vmatpush.msrb.mxu0 %v5244_v0 }
 0x70f   : > { %5279 = vmatpush.msrb.mxu0 %v9272_v5  ;;  %v5329_v5 = vld [vmem:[%s10044_s30 + $0x10] sm:$0xff] }
 0x710   : > { %6588 = vmatmul.msk.f32.vlgmr.msrb.gmra.mxu0 %vm5257_vm3, %v5251_v53  ;;  %5358 = vmatpush.msra.mxu1 %v5329_v5 }
 0x712   : > { %5359 = vmatpush.msra.mxu1 %v5328_v30 }
 0x714   : > { %5360 = vmatpush.msra.mxu1 %v5327_v40 }
 0x718   : > { %6589 = vmatmul.msk.f32.gmra.mxu0 %vm5257_vm3, %v5252_v24 }
 0x78d   : > { %v5281_v9 = vpop.f32.mrf.mxu0 }
 0x78e   : > { %v5282_v17 = vadd.f32 %v6644_v41, %v5281_v9 }
 0x790   : > { %v5287_v8 = vsub.f32 0.0, %v5282_v17 }
 0x792   : > { %v5289_v46 = vmul.f32 1.442695, %v5287_v8 }
 0x794   : > { %6722 = vpow2.f32 %v5289_v46 }
 0x795   : > { %v5284_v23 = vpop.f32.mrf.mxu0 }
 0x796   : > { %v5285_v4 = vadd.f32 %v6644_v41, %v5284_v23 }
 0x798   : > { %v5288_v7 = vsub.f32 0.0, %v5285_v4 }
 0x79a   : > { %v6723_v55 = vpop.eup %6722  ;;  %v5291_v52 = vmul.f32 1.442695, %v5288_v7 }
 0x79b   : > { %v5293_v35 = vadd.f32 1.0, %v6723_v55 }
 0x79c   : > { %6724 = vpow2.f32 %v5291_v52 }
 0x79d   : > { %6726 = vrcp.f32 %v5293_v35  ;;  %v5306_v62 = vand.u32 2147483648, %v5293_v35  ;;  %v5304_v33 = vand.u32 2147483647, %v5293_v35  ;;  %vm5300_vm11 = vweird.f32 %v5293_v35 }
 0x79f   : > { %v5307_v20 = vor.u32 1.1754944e-38, %v5306_v62  ;;  %vm5305_vm13 = vcmp.eq.f32.partialorder %v5304_v33, 8.507059e+37 }
 0x7a2   : > { %v6725_v16 = vpop.eup %6724 }
 0x7a3   : > { %v6727_v22 = vpop.eup %6726  ;;  %v5294_v32 = vadd.f32 1.0, %v6725_v16 }
 0x7a4   : > { %v5296_v19 = vmul.f32 %v6727_v22, %v5293_v35  ;;  %vm5301_vm10 = vweird.f32 %v6727_v22  ;;  %v6646_v35 = vld [vmem:[%s9691_s10] ss:$0 sm:$0xff] }
 0x7a5   : > { %6728 = vrcp.f32 %v5294_v32  ;;  %vm5302_vm12 = vmor %vm5300_vm11, %vm5301_vm10  ;;  %v5321_v45 = vand.u32 2147483648, %v5294_v32  ;;  %v5319_v6 = vand.u32 2147483647, %v5294_v32  ;;  %vm5315_vm15 = vweird.f32 %v5294_v32 }
 0x7a6   : > { %v5297_v31 = vsub.f32 1.0, %v5296_v19 }
 0x7a7   : > { %v5322_v25 = vor.u32 1.1754944e-38, %v5321_v45  ;;  %vm5320_vm1 = vcmp.eq.f32.partialorder %v5319_v6, 8.507059e+37 }
 0x7a8   : > { %v5298_v56 = vmul.f32 %v6727_v22, %v5297_v31 }
 0x7aa   : > { %v5299_v29 = vadd.f32 %v6727_v22, %v5298_v56 }
 0x7ab   : > { %v6729_v54 = vpop.eup %6728 }
 0x7ac   : > { %v5303_v57 = vsel %vm5302_vm12, %v6727_v22, %v5299_v29  ;;  %v5311_v36 = vmul.f32 %v6729_v54, %v5294_v32  ;;  %vm5316_vm14 = vweird.f32 %v6729_v54 }
 0x7ad   : > { %v5308_v10 = vsel %vm5305_vm13, %v5307_v20, %v5303_v57  ;;  %vm5317_vm0 = vmor %vm5315_vm15, %vm5316_vm14 }
 0x7ae   : > { %v5325_v61 = vmul.f32 %v5308_v10, %v5282_v17  ;;  %v5312_v51 = vsub.f32 1.0, %v5311_v36 }
 0x7b0   : > { %v5313_v50 = vmul.f32 %v6729_v54, %v5312_v51  ;;  %6590 = vmatmul.msk.f32.vlgmr.msra.gmra.mxu1 %vm5257_vm3, %v5325_v61 }
 0x7b2   : > { %v5314_v47 = vadd.f32 %v6729_v54, %v5313_v50 }
 0x7b4   : > { %v5318_v28 = vsel %vm5317_vm0, %v6729_v54, %v5314_v47 }
 0x7b5   : > { %v5323_v34 = vsel %vm5320_vm1, %v5322_v25, %v5318_v28  ;;  %v9345_v25 = vld [vmem:[%s9692_s11] ss:$0 sm:$0xff]  ;;  %v9350_v28 = vld [vmem:[%s9692_s11 + $0x1] ss:$0 sm:$0xff] }
 0x7b6   : > { %v5326_v63 = vmul.f32 %v5323_v34, %v5285_v4  ;;  %v5523_v37 = vmul.f32 %v9350_v28, %v5517_v21 }
 0x7b8   : > { %6591 = vmatmul.msk.f32.gmra.mxu1 %vm5257_vm3, %v5326_v63  ;;  %v5503_v63 = vld [vmem:[#allocation4] sm:$0xf] }
 0x82d   : > { %v5362_v38 = vpop.f32.mrf.mxu1 }
 0x82e   : > { %v5363_v11 = vadd.f32 %v6645_v12, %v5362_v38 }
 0x830   : > { %v5368_v39 = vsub.f32 0.0, %v5363_v11 }
 0x832   : > { %v5370_v49 = vmul.f32 1.442695, %v5368_v39  ;;  %v9357_v39 = vld [vmem:[%s9692_s11 + $0x2] ss:$0 sm:$0xff] }
 0x834   : > { %6730 = vpow2.f32 %v5370_v49 }
 0x835   : > { %v5365_v59 = vpop.f32.mrf.mxu1 }
 0x836   : > { %v5366_v44 = vadd.f32 %v6645_v12, %v5365_v59  ;;  %v5531_v59 = vld [vmem:[#allocation4 + $0x2] sm:$0xf] }
 0x838   : > { %v5369_v14 = vsub.f32 0.0, %v5366_v44 }
 0x83a   : > { %v6731_v60 = vpop.eup %6730  ;;  %v5372_v1 = vmul.f32 1.442695, %v5369_v14 }
 0x83b   : > { %v5374_v43 = vadd.f32 1.0, %v6731_v60 }
 0x83c   : > { %6732 = vpow2.f32 %v5372_v1 }
 0x83d   : > { %6734 = vrcp.f32 %v5374_v43  ;;  %v5387_v24 = vand.u32 2147483648, %v5374_v43  ;;  %v5385_v42 = vand.u32 2147483647, %v5374_v43  ;;  %vm5381_vm5 = vweird.f32 %v5374_v43 }
 0x83f   : > { %v5388_v48 = vor.u32 1.1754944e-38, %v5387_v24  ;;  %vm5386_vm7 = vcmp.eq.f32.partialorder %v5385_v42, 8.507059e+37 }
 0x842   : > { %v6733_v58 = vpop.eup %6732 }
 0x843   : > { %v6735_v3 = vpop.eup %6734  ;;  %v5375_v13 = vadd.f32 1.0, %v6733_v58  ;;  %v5537_v58 = vmul.f32 %v9357_v39, %v5531_v59 }
 0x844   : > { %v5377_v0 = vmul.f32 %v6735_v3, %v5374_v43  ;;  %vm5382_vm2 = vweird.f32 %v6735_v3 }
 0x845   : > { %6736 = vrcp.f32 %v5375_v13  ;;  %vm5383_vm6 = vmor %vm5381_vm5, %vm5382_vm2  ;;  %v5402_v40 = vand.u32 2147483648, %v5375_v13  ;;  %v5400_v46 = vand.u32 2147483647, %v5375_v13  ;;  %vm5396_vm9 = vweird.f32 %v5375_v13 }
 0x846   : > { %v5378_v53 = vsub.f32 1.0, %v5377_v0 }
 0x847   : > { %v5403_v4 = vor.u32 1.1754944e-38, %v5402_v40  ;;  %vm5401_vm10 = vcmp.eq.f32.partialorder %v5400_v46, 8.507059e+37  ;;  %v9375_v40 = vld [vmem:[%s9692_s11 + $0x5] ss:$0 sm:$0xff] }
 0x848   : > { %v5379_v27 = vmul.f32 %v6735_v3, %v5378_v53  ;;  %v9368_v53 = vld [vmem:[%s9692_s11 + $0x4] ss:$0 sm:$0xff] }
 0x84a   : > { %v5380_v2 = vadd.f32 %v6735_v3, %v5379_v27 }
 0x84b   : > { %v6737_v15 = vpop.eup %6736 }
 0x84c   : > { %v5384_v41 = vsel %vm5383_vm6, %v6735_v3, %v5380_v2  ;;  %v5392_v5 = vmul.f32 %v6737_v15, %v5375_v13  ;;  %vm5397_vm4 = vweird.f32 %v6737_v15  ;;  %v9363_v13 = vld [vmem:[%s9692_s11 + $0x3] ss:$0 sm:$0xff] }
 0x84d   : > { %v5389_v9 = vsel %vm5386_vm7, %v5388_v48, %v5384_v41  ;;  %vm5398_vm3 = vmor %vm5396_vm9, %vm5397_vm4 }
 0x84e   : > { %v9328_v30 = vmul.f32 %v5389_v9, %v5363_v11  ;;  %v5393_v17 = vsub.f32 1.0, %v5392_v5  ;;  %v5509_v11 = vmul.f32 %v9345_v25, %v5503_v63 }
 0x850   : > { %v5394_v8 = vmul.f32 %v6737_v15, %v5393_v17  ;;  %6592 = vmatmul.msk.f32.vlgmr.msra.gmra.mxu2 %vm5416_vm8, %v9328_v30  ;;  %v5527_v43 = vadd.f32 %v5523_v37, %v5509_v11 }
 0x852   : > { %v5395_v23 = vadd.f32 %v6737_v15, %v5394_v8 }
 0x854   : > { %v5399_v7 = vsel %vm5398_vm3, %v6737_v15, %v5395_v23  ;;  %v5541_v15 = vadd.f32 %v5537_v58, %v5527_v43 }
 0x855   : > { %v5404_v55 = vsel %vm5401_vm10, %v5403_v4, %v5399_v7 }
 0x856   : > { %v9332_v52 = vmul.f32 %v5404_v55, %v5366_v44 }
 0x858   : > { %6593 = vmatmul.msk.f32.gmra.mxu2 %vm5416_vm8, %v9332_v52 }
 0x8d3   : > { %v5440_v16 = vpop.f32.mrf.mxu2 }
 0x8d4   : > { %v5441_v22 = vadd.f32 %v6646_v35, %v5440_v16 }
 0x8d6   : > { %v5446_v32 = vsub.f32 0.0, %v5441_v22 }
 0x8d8   : > { %v5448_v19 = vmul.f32 1.442695, %v5446_v32 }
 0x8da   : > { %6738 = vpow2.f32 %v5448_v19 }
 0x8db   : > { %v5443_v31 = vpop.f32.mrf.mxu2 }
 0x8dc   : > { %v9339_v62 = vadd.f32 %v6646_v35, %v5443_v31  ;;  %v9384_v31 = vld [vmem:[%s9692_s11 + $0x6] ss:$0 sm:$0xff] }
 0x8de   : > { %v5447_v56 = vsub.f32 0.0, %v9339_v62 }
 0x8e0   : > { %v6739_v33 = vpop.eup %6738  ;;  %v5450_v54 = vmul.f32 1.442695, %v5447_v56 }
 0x8e1   : > { %v5452_v29 = vadd.f32 1.0, %v6739_v33 }
 0x8e3   : > { %6740 = vrcp.f32 %v5452_v29  ;;  %v5465_v51 = vand.u32 2147483648, %v5452_v29  ;;  %v5463_v50 = vand.u32 2147483647, %v5452_v29  ;;  %vm5459_vm12 = vweird.f32 %v5452_v29 }
 0x8e4   : > { %6742 = vpow2.f32 %v5450_v54 }
 0x8e5   : > { %v5466_v47 = vor.u32 1.1754944e-38, %v5465_v51  ;;  %vm5464_vm14 = vcmp.eq.f32.partialorder %v5463_v50, 8.507059e+37 }
 0x8e9   : > { %v6741_v20 = vpop.eup %6740 }
 0x8ea   : > { %v6743_v57 = vpop.eup %6742  ;;  %v5455_v36 = vmul.f32 %v6741_v20, %v5452_v29  ;;  %vm5460_vm11 = vweird.f32 %v6741_v20 }
 0x8eb   : > { %v5453_v10 = vadd.f32 1.0, %v6743_v57  ;;  %vm5461_vm13 = vmor %vm5459_vm12, %vm5460_vm11 }
 0x8ec   : > { %v5456_v61 = vsub.f32 1.0, %v5455_v36  ;;  %v9393_v36 = vld [vmem:[%s9692_s11 + $0x7] ss:$0 sm:$0xff] }
 0x8ed   : > { %6744 = vrcp.f32 %v5453_v10  ;;  %v5480_v14 = vand.u32 2147483648, %v5453_v10  ;;  %v5478_v1 = vand.u32 2147483647, %v5453_v10  ;;  %vm5474_vm0 = vweird.f32 %v5453_v10 }
 0x8ee   : > { %v5457_v45 = vmul.f32 %v6741_v20, %v5456_v61 }
 0x8ef   : > { %v5481_v0 = vor.u32 1.1754944e-38, %v5480_v14  ;;  %vm5479_vm2 = vcmp.eq.f32.partialorder %v5478_v1, 8.507059e+37 }
 0x8f0   : > { %v5458_v6 = vadd.f32 %v6741_v20, %v5457_v45 }
 0x8f2   : > { %v5462_v34 = vsel %vm5461_vm13, %v6741_v20, %v5458_v6 }
 0x8f3   : > { %v6745_v12 = vpop.eup %6744  ;;  %v5467_v18 = vsel %vm5464_vm14, %v5466_v47, %v5462_v34  ;;  %v9400_v34 = vld [vmem:[%s9692_s11 + $0x8] ss:$0 sm:$0xff] }
 0x8f4   : > { %v5484_v38 = vmul.f32 %v5467_v18, %v5441_v22  ;;  %v5470_v26 = vmul.f32 %v6745_v12, %v5453_v10  ;;  %vm5475_vm15 = vweird.f32 %v6745_v12 }
 0x8f5   : > { %vm5476_vm1 = vmor %vm5474_vm0, %vm5475_vm15 }
 0x8f6   : > { %v5494_v49 = vrot.slane %v5484_v38, 4  ;;  %5499 = vst [vmem:[#allocation4 + $0x9] sm:$0xf] %v5484_v38  ;;  %v5471_v44 = vsub.f32 1.0, %v5470_v26 }
 0x8f8   : > { %5500 = vst [vmem:[#allocation4 + $0x11] sm:$0xf] %v5494_v49  ;;  %v5472_v60 = vmul.f32 %v6745_v12, %v5471_v44 }
 0x8fa   : > { %v5473_v3 = vadd.f32 %v6745_v12, %v5472_v60 }
 0x8fc   : > { %v5477_v24 = vsel %vm5476_vm1, %v6745_v12, %v5473_v3 }
 0x8fd   : > { %v5504_v27 = vld [vmem:[#allocation4 + $0x8] sm:$0xf]  ;;  %v5482_v48 = vsel %vm5479_vm2, %v5481_v0, %v5477_v24 }
 0x8fe   : > { %v5518_v42 = vld [vmem:[#allocation4 + $0x9] sm:$0xf]  ;;  %v5510_v41 = vmul.f32 %v9345_v25, %v5504_v27  ;;  %v5485_v8 = vmul.f32 %v5482_v48, %v9339_v62 }
 0x8ff   : > { %v5532_v2 = vld [vmem:[#allocation4 + $0xa] sm:$0xf]  ;;  %v5524_v5 = vmul.f32 %v9350_v28, %v5518_v42  ;;  %v5505_v4 = vld [vmem:[#allocation4 + $0x10] sm:$0xf] }
 0x900   : > { %v5545_v9 = vld [vmem:[#allocation4 + $0x8] sm:$0xf]  ;;  %v5519_v7 = vld [vmem:[#allocation4 + $0x11] sm:$0xf]  ;;  %v5538_v35 = vmul.f32 %v9357_v39, %v5532_v2  ;;  %5501 = vst [vmem:[#allocation4 + $0x19] sm:$0xf] %v5485_v8  ;;  %v5511_v54 = vmul.f32 %v9345_v25, %v5505_v4 }
 0x901   : > { %v5559_v17 = vld [vmem:[#allocation4 + $0x9] sm:$0xf]  ;;  %v5551_v46 = vmul.f32 %v9363_v13, %v5545_v9  ;;  %v5528_v55 = vadd.f32 %v5524_v5, %v5510_v41  ;;  %v5546_v16 = vld [vmem:[#allocation4 + $0x10] sm:$0xf]  ;;  %v5525_v20 = vmul.f32 %v9350_v28, %v5519_v7  ;;  %v5495_v10 = vrot.slane %v5485_v8, 4 }
 0x902   : > { %v5573_v23 = vld [vmem:[#allocation4 + $0xa] sm:$0xf]  ;;  %v5560_v32 = vld [vmem:[#allocation4 + $0x11] sm:$0xf]  ;;  %v5565_v19 = vmul.f32 %v9368_v53, %v5559_v17  ;;  %v5552_v62 = vmul.f32 %v9363_v13, %v5546_v16 }
 0x903   : > { %v5555_v22 = vadd.f32 %v5551_v46, %v5541_v15  ;;  %v5542_v56 = vadd.f32 %v5538_v35, %v5528_v55  ;;  %v5579_v33 = vmul.f32 %v9375_v40, %v5573_v23  ;;  %v5588_v29 = vld [vmem:[#allocation4 + $0x10] sm:$0xf]  ;;  %v5566_v51 = vmul.f32 %v9368_v53, %v5560_v32  ;;  %5502 = vst [vmem:[#allocation4 + $0x21] sm:$0xf] %v5495_v10  ;;  %v5605_v10 = vld [vmem:[#allocation4 + $0x29] sm:$0xf] }
 0x904   : > { %v5602_v45 = vld [vmem:[#allocation4 + $0x11] sm:$0xf]  ;;  %v5594_v47 = vmul.f32 %v9384_v31, %v5588_v29  ;;  %v5529_v18 = vadd.f32 %v5525_v20, %v5511_v54 }
 0x905   : > { %v5569_v57 = vadd.f32 %v5565_v19, %v5555_v22  ;;  %v5556_v61 = vadd.f32 %v5552_v62, %v5542_v56  ;;  %v5574_v50 = vld [vmem:[#allocation4 + $0x12] sm:$0xf]  ;;  %v5608_v26 = vmul.f32 %v9393_v36, %v5602_v45  ;;  %v5591_v56 = vld [vmem:[#allocation4 + $0x28] sm:$0xf] }
 0x906   : > { %v5533_v63 = vld [vmem:[#allocation4 + $0x12] sm:$0xf]  ;;  %v5580_v11 = vmul.f32 %v9375_v40, %v5574_v50  ;;  %v5597_v45 = vmul.f32 %v9384_v31, %v5591_v56 }
 0x907   : > { %v5583_v6 = vadd.f32 %v5579_v33, %v5569_v57  ;;  %v5570_v21 = vadd.f32 %v5566_v51, %v5556_v61  ;;  %v5616_v12 = vld [vmem:[#allocation4 + $0x12] sm:$0xf]  ;;  %v5539_v37 = vmul.f32 %v9357_v39, %v5533_v63  ;;  %v5506_v44 = vld [vmem:[#allocation4 + $0x18] sm:$0xf] }
 0x908   : > { %v5622_v59 = vmul.f32 %v9400_v34, %v5616_v12  ;;  %v5520_v14 = vld [vmem:[#allocation4 + $0x19] sm:$0xf]  ;;  %v5512_v1 = vmul.f32 %v9345_v25, %v5506_v44  ;;  %v5619_v12 = vld [vmem:[#allocation4 + $0x2a] sm:$0xf]  ;;  %v5745_v56 = vld [vmem:[%s9693_s12 + $0x28] sm:$0xff] }
 0x909   : > { %v5598_v38 = vadd.f32 %v5594_v47, %v5583_v6  ;;  %v5534_v60 = vld [vmem:[#allocation4 + $0x1a] sm:$0xf]  ;;  %v5526_v43 = vmul.f32 %v9350_v28, %v5520_v14  ;;  %v5584_v0 = vadd.f32 %v5580_v11, %v5570_v21  ;;  %v5543_v27 = vadd.f32 %v5539_v37, %v5529_v18 }
 0x90a   : > { %v5547_v58 = vld [vmem:[#allocation4 + $0x18] sm:$0xf]  ;;  %v5540_v41 = vmul.f32 %v9357_v39, %v5534_v60  ;;  %v5548_v5 = vld [vmem:[#allocation4 + $0x20] sm:$0xf]  ;;  %v5611_v21 = vmul.f32 %v9393_v36, %v5605_v10 }
 0x90b   : > { %v5612_v49 = vadd.f32 %v5608_v26, %v5598_v38  ;;  %v5561_v3 = vld [vmem:[#allocation4 + $0x19] sm:$0xf]  ;;  %v5553_v42 = vmul.f32 %v9363_v13, %v5547_v58  ;;  %v5530_v48 = vadd.f32 %v5526_v43, %v5512_v1  ;;  %v5562_v8 = vld [vmem:[#allocation4 + $0x21] sm:$0xf]  ;;  %v5554_v7 = vmul.f32 %v9363_v13, %v5548_v5  ;;  %v5753_v43 = vld [vmem:[%s9693_s12 + $0x68] sm:$0xff] }
 0x90c   : > { %v5589_v2 = vld [vmem:[#allocation4 + $0x18] sm:$0xf]  ;;  %v5567_v46 = vmul.f32 %v9368_v53, %v5561_v3  ;;  %v5590_v55 = vld [vmem:[#allocation4 + $0x20] sm:$0xf]  ;;  %v5568_v33 = vmul.f32 %v9368_v53, %v5562_v8  ;;  %v5752_v3 = vld [vmem:[%s9693_s12 + $0x60] sm:$0xff] }
 0x90d   : > { %v9408_v24 = vadd.f32 %v5622_v59, %v5612_v49  ;;  %v5603_v15 = vld [vmem:[#allocation4 + $0x19] sm:$0xf]  ;;  %v5595_v17 = vmul.f32 %v9384_v31, %v5589_v2  ;;  %v5557_v28 = vadd.f32 %v5553_v42, %v5543_v27  ;;  %v5544_v4 = vadd.f32 %v5540_v41, %v5530_v48  ;;  %v5576_v32 = vld [vmem:[#allocation4 + $0x22] sm:$0xf]  ;;  %v5749_v5 = vld [vmem:[%s9693_s12 + $0x48] sm:$0xff] }
 0x90e   : > { %v5575_v9 = vld [vmem:[#allocation4 + $0x1a] sm:$0xf]  ;;  %v5609_v16 = vmul.f32 %v9393_v36, %v5603_v15  ;;  %v5604_v29 = vld [vmem:[#allocation4 + $0x21] sm:$0xf]  ;;  %v5596_v13 = vmul.f32 %v9384_v31, %v5590_v55  ;;  %v5582_v51 = vmul.f32 %v9375_v40, %v5576_v32  ;;  %v5625_v31 = vmul.f32 %v9400_v34, %v5619_v12 }
 0x90f   : > { %v5630_v25 = vsub.f32 0.0, %v9408_v24  ;;  %v5617_v23 = vld [vmem:[#allocation4 + $0x1a] sm:$0xf]  ;;  %v5599_v35 = vadd.f32 %v5595_v17, %v5584_v0  ;;  %v5571_v39 = vadd.f32 %v5567_v46, %v5557_v28  ;;  %v5581_v19 = vmul.f32 %v9375_v40, %v5575_v9  ;;  %v5618_v50 = vld [vmem:[#allocation4 + $0x22] sm:$0xf] }
 0x910   : > { %v5558_v62 = vadd.f32 %v5554_v7, %v5544_v4  ;;  %v5623_v20 = vmul.f32 %v9400_v34, %v5617_v23  ;;  %v5610_v53 = vmul.f32 %v9393_v36, %v5604_v29  ;;  %v5624_v26 = vmul.f32 %v9400_v34, %v5618_v50  ;;  %v5755_v59 = vld [vmem:[%s9693_s12 + $0x78] sm:$0xff]  ;;  %v5754_v60 = vld [vmem:[%s9693_s12 + $0x70] sm:$0xff] }
 0x911   : > { %v5634_v22 = vmul.f32 1.442695, %v5630_v25  ;;  %v5613_v54 = vadd.f32 %v5609_v16, %v5599_v35  ;;  %v5585_v57 = vadd.f32 %v5581_v19, %v5571_v39  ;;  %5757 = vmatpush.msrb.mxu3 %v5755_v59  ;;  %v5751_v0 = vld [vmem:[%s9693_s12 + $0x58] sm:$0xff]  ;;  %v5750_v15 = vld [vmem:[%s9693_s12 + $0x50] sm:$0xff]  ;;  %v5748_v25 = vld [vmem:[%s9693_s12 + $0x40] sm:$0xff] }
 0x912   : > { %v5572_v61 = vadd.f32 %v5568_v33, %v5558_v62  ;;  %v5747_v4 = vld [vmem:[%s9693_s12 + $0x38] sm:$0xff]  ;;  %v5746_v35 = vld [vmem:[%s9693_s12 + $0x30] sm:$0xff]  ;;  %v5740_v59 = vld [vmem:[%s9693_s12] sm:$0xff] }
 0x913   : > { %6746 = vpow2.f32 %v5634_v22  ;;  %v9423_v6 = vadd.f32 %v5623_v20, %v5613_v54  ;;  %v5600_v47 = vadd.f32 %v5596_v13, %v5585_v57  ;;  %5758 = vmatpush.msrb.mxu3 %v5754_v60  ;;  %v5744_v54 = vld [vmem:[%s9693_s12 + $0x20] sm:$0xff]  ;;  %v5742_v50 = vld [vmem:[%s9693_s12 + $0x10] sm:$0xff] }
 0x914   : > { %v5586_v63 = vadd.f32 %v5582_v51, %v5572_v61  ;;  %v5743_v51 = vld [vmem:[%s9693_s12 + $0x18] sm:$0xff] }
 0x915   : > { %v5631_v18 = vsub.f32 0.0, %v9423_v6  ;;  %v5614_v38 = vadd.f32 %v5610_v53, %v5600_v47  ;;  %5759 = vmatpush.msrb.mxu3 %v5753_v43 }
 0x916   : > { %v5601_v11 = vadd.f32 %v5597_v45, %v5586_v63 }
 0x917   : > { %v5636_v37 = vmul.f32 1.442695, %v5631_v18  ;;  %v9430_v49 = vadd.f32 %v5624_v26, %v5614_v38  ;;  %5760 = vmatpush.msrb.mxu3 %v5752_v3  ;;  %v5741_v26 = vld [vmem:[%s9693_s12 + $0x8] sm:$0xff] }
 0x918   : > { %v5615_v14 = vadd.f32 %v5611_v21, %v5601_v11 }
 0x919   : > { %v6747_v40 = vpop.eup %6746  ;;  %6748 = vpow2.f32 %v5636_v37  ;;  %v5632_v36 = vsub.f32 0.0, %v9430_v49  ;;  %5761 = vmatpush.msrb.mxu3 %v5751_v0 }
 0x91a   : > { %v5642_v44 = vadd.f32 1.0, %v6747_v40  ;;  %v9439_v1 = vadd.f32 %v5625_v31, %v5615_v14 }
 0x91b   : > { %v5638_v34 = vmul.f32 1.442695, %v5632_v36  ;;  %5762 = vmatpush.msrb.mxu3 %v5750_v15 }
 0x91c   : > { %6750 = vrcp.f32 %v5642_v44  ;;  %v5633_v58 = vsub.f32 0.0, %v9439_v1  ;;  %v5657_v28 = vand.u32 2147483648, %v5642_v44  ;;  %v5655_v23 = vand.u32 2147483647, %v5642_v44 }
 0x91d   : > { %6752 = vpow2.f32 %v5638_v34  ;;  %5763 = vmatpush.msrb.mxu3 %v5749_v5  ;;  %vm5651_vm6 = vweird.f32 %v5642_v44 }
 0x91e   : > { %v5640_v42 = vmul.f32 1.442695, %v5633_v58  ;;  %v5658_v22 = vor.u32 1.1754944e-38, %v5657_v28  ;;  %vm5656_vm4 = vcmp.eq.f32.partialorder %v5655_v23, 8.507059e+37 }
 0x91f   : > { %v6749_v27 = vpop.eup %6748  ;;  %5764 = vmatpush.msrb.mxu3 %v5748_v25 }
 0x920   : > { %v5643_v2 = vadd.f32 1.0, %v6749_v27  ;;  %6754 = vpow2.f32 %v5640_v42 }
 0x921   : > { %5765 = vmatpush.msrb.mxu3 %v5747_v4 }
 0x922   : > { %v6751_v48 = vpop.eup %6750  ;;  %6756 = vrcp.f32 %v5643_v2  ;;  %v5670_v57 = vand.u32 2147483647, %v5643_v2  ;;  %v5672_v13 = vand.u32 2147483648, %v5643_v2  ;;  %vm5666_vm3 = vweird.f32 %v5643_v2 }
 0x923   : > { %v5647_v41 = vmul.f32 %v6751_v48, %v5642_v44  ;;  %v6753_v9 = vpop.eup %6752  ;;  %vm5652_vm5 = vweird.f32 %v6751_v48  ;;  %5766 = vmatpush.msrb.mxu3 %v5746_v35  ;;  %v5756_v35 = vld [vmem:[%s9694_s13] sm:$0x1] }
 0x924   : > { %v5644_v8 = vadd.f32 1.0, %v6753_v9  ;;  %vm5653_vm7 = vmor %vm5651_vm6, %vm5652_vm5  ;;  %vm5671_vm11 = vcmp.eq.f32.partialorder %v5670_v57, 8.507059e+37  ;;  %v5673_v53 = vor.u32 1.1754944e-38, %v5672_v13 }
 0x925   : > { %v5648_v17 = vsub.f32 1.0, %v5647_v41  ;;  %5767 = vmatpush.msrb.mxu3 %v5745_v56 }
 0x926   : > { %6758 = vrcp.f32 %v5644_v8  ;;  %v6755_v7 = vpop.eup %6754  ;;  %v5685_v63 = vand.u32 2147483647, %v5644_v8  ;;  %v5687_v21 = vand.u32 2147483648, %v5644_v8  ;;  %vm5681_vm13 = vweird.f32 %v5644_v8 }
 0x927   : > { %v5649_v46 = vmul.f32 %v6751_v48, %v5648_v17  ;;  %v9466_v39 = vadd.f32 1.0, %v6755_v7  ;;  %5768 = vmatpush.msrb.mxu3 %v5744_v54 }
 0x928   : > { %v6757_v16 = vpop.eup %6756  ;;  %vm5686_vm15 = vcmp.eq.f32.partialorder %v5685_v63, 8.507059e+37  ;;  %v5688_v44 = vor.u32 1.1754944e-38, %v5687_v21  ;;  %v5863_v63 = vld [vmem:[%s9697_s16 + $0x68] sm:$0xff]  ;;  %v5862_v21 = vld [vmem:[%s9697_s16 + $0x60] sm:$0xff] }
 0x929   : > { %v5650_v55 = vadd.f32 %v6751_v48, %v5649_v46  ;;  %v5662_v19 = vmul.f32 %v6757_v16, %v5643_v2  ;;  %6760 = vrcp.f32 %v9466_v39  ;;  %vm5667_vm9 = vweird.f32 %v6757_v16  ;;  %5769 = vmatpush.msrb.mxu3 %v5743_v51 }
 0x92a   : > { %vm5668_vm10 = vmor %vm5666_vm3, %vm5667_vm9  ;;  %v5702_v14 = vand.u32 2147483648, %v9466_v39  ;;  %v5700_v34 = vand.u32 2147483647, %v9466_v39  ;;  %vm5696_vm1 = vweird.f32 %v9466_v39 }
 0x92b   : > { %v5654_v32 = vsel %vm5653_vm7, %v6751_v48, %v5650_v55  ;;  %v5663_v29 = vsub.f32 1.0, %v5662_v19  ;;  %5770 = vmatpush.msrb.mxu3 %v5742_v50 }
 0x92c   : > { %v5659_v62 = vsel %vm5656_vm4, %v5658_v22, %v5654_v32  ;;  %v6759_v20 = vpop.eup %6758  ;;  %v5703_v0 = vor.u32 1.1754944e-38, %v5702_v14  ;;  %vm5701_vm5 = vcmp.eq.f32.partialorder %v5700_v34, 8.507059e+37  ;;  %v5856_v14 = vld [vmem:[%s9697_s16 + $0x30] sm:$0xff]  ;;  %v5854_v34 = vld [vmem:[%s9697_s16 + $0x20] sm:$0xff] }
 0x92d   : > { %v9473_v33 = vmul.f32 %v5659_v62, %v9408_v24  ;;  %v5664_v10 = vmul.f32 %v6757_v16, %v5663_v29  ;;  %v5677_v61 = vmul.f32 %v6759_v20, %v5644_v8  ;;  %vm5682_vm12 = vweird.f32 %v6759_v20  ;;  %5771 = vmatpush.msrb.mxu3 %v5741_v26  ;;  %v5798_v26 = vld [vmem:[%s9696_s15] sm:$0x1] }
 0x92e   : > { %vm5683_vm14 = vmor %vm5681_vm13, %vm5682_vm12 }
 0x92f   : > { %5714 = vst [vmem:[#allocation1] ss:$2 sm:$0xff] %v9473_v33  ;;  %v5665_v24 = vadd.f32 %v6757_v16, %v5664_v10  ;;  %v5678_v45 = vsub.f32 1.0, %v5677_v61  ;;  %v6761_v47 = vpop.eup %6760  ;;  %5772 = vmatpush.msrb.mxu3 %v5740_v59  ;;  %v5857_v59 = vld [vmem:[%s9697_s16 + $0x38] sm:$0xff] }
 0x930   : > { %v5692_v38 = vmul.f32 %v6761_v47, %v9466_v39  ;;  %vm5697_vm0 = vweird.f32 %v6761_v47  ;;  %v5797_v39 = vld [vmem:[%s9695_s14] sm:$0xff] }
 0x931   : > { %v5669_v12 = vsel %vm5668_vm10, %v6757_v16, %v5665_v24  ;;  %v5679_v18 = vmul.f32 %v6759_v20, %v5678_v45  ;;  %vm5698_vm2 = vmor %vm5696_vm1, %vm5697_vm0  ;;  %5818 = vmatpush.msra.mxu3 %v5797_v39  ;;  %vm5799_vm10 = vcmask 64512   ;;  %v6656_v39 = vld [vmem:[%s9698_s17] ss:$0 sm:$0xff] }
 0x932   : > { %v5674_v11 = vsel %vm5671_vm11, %v5673_v53, %v5669_v12  ;;  %v5693_v40 = vsub.f32 1.0, %v5692_v38  ;;  %v5864_v53 = vld [vmem:[%s9697_s16 + $0x70] sm:$0xff]  ;;  %v5861_v12 = vld [vmem:[%s9697_s16 + $0x58] sm:$0xff]  ;;  %v5859_v38 = vld [vmem:[%s9697_s16 + $0x48] sm:$0xff] }
 0x933   : > { %v5680_v37 = vadd.f32 %v6759_v20, %v5679_v18  ;;  %v9490_v31 = vmul.f32 %v5674_v11, %v9423_v6  ;;  %v6853_v6 = vmov 16.0   ;;  %v5860_v18 = vld [vmem:[%s9697_s16 + $0x50] sm:$0xff]  ;;  %v5858_v11 = vld [vmem:[%s9697_s16 + $0x40] sm:$0xff] }
 0x934   : > { %v5694_v60 = vmul.f32 %v6761_v47, %v5693_v40  ;;  %6762 = vrcp.f32 %v6853_v6  ;;  %v5852_v6 = vld [vmem:[%s9697_s16 + $0x10] sm:$0xff] }
 0x935   : > { %v5684_v36 = vsel %vm5683_vm14, %v6759_v20, %v5680_v37  ;;  %5716 = vst [vmem:[#allocation1 + $0x1] ss:$2 sm:$0xff] %v9490_v31 }
 0x936   : > { %v5689_v43 = vsel %vm5686_vm15, %v5688_v44, %v5684_v36  ;;  %v5695_v58 = vadd.f32 %v6761_v47, %v5694_v60  ;;  %v5855_v60 = vld [vmem:[%s9697_s16 + $0x28] sm:$0xff] }
 0x937   : > { %v9500_v3 = vmul.f32 %v5689_v43, %v9430_v49  ;;  %v5853_v43 = vld [vmem:[%s9697_s16 + $0x18] sm:$0xff] }
 0x938   : > { %v5699_v27 = vsel %vm5698_vm2, %v6761_v47, %v5695_v58  ;;  %v5865_v47 = vld [vmem:[%s9697_s16 + $0x78] sm:$0xff]  ;;  %v5851_v58 = vld [vmem:[%s9697_s16 + $0x8] sm:$0xff] }
 0x939   : > { %5718 = vst [vmem:[#allocation1 + $0x10] ss:$2 sm:$0xff] %v9500_v3  ;;  %v5704_v42 = vsel %vm5701_vm5, %v5703_v0, %v5699_v27  ;;  %5885 = vmatpush.msra.mxu0 %v5865_v47  ;;  %v5850_v27 = vld [vmem:[%s9697_s16] sm:$0xff] }
 0x93a   : > { %v9504_v2 = vmul.f32 %v5704_v42, %v9439_v1  ;;  %v6763_v15 = vpop.eup %6762 }
 0x93b   : > { %v5733_v48 = vmul.f32 16.0, %v6763_v15  ;;  %vm5737_vm6 = vweird.f32 %v6763_v15  ;;  %5886 = vmatpush.msra.mxu0 %v5864_v53 }
 0x93c   : > { %5720 = vst [vmem:[#allocation1 + $0x11] ss:$2 sm:$0xff] %v9504_v2  ;;  %v5721_v5 = vld.sshfl [vmem:[#allocation1] sm:$0xff pattern:$0x75316420] }
 0x93d   : > { %v5734_v41 = vsub.f32 1.0, %v5733_v48  ;;  %5887 = vmatpush.msra.mxu0 %v5863_v63 }
 0x93f   : > { %v5735_v25 = vmul.f32 %v6763_v15, %v5734_v41  ;;  %5888 = vmatpush.msra.mxu0 %v5862_v21 }
 0x941   : > { %v5736_v46 = vadd.f32 %v6763_v15, %v5735_v25  ;;  %5889 = vmatpush.msra.mxu0 %v5861_v12 }
 0x943   : > { %v5722_v9 = vld.sshfl [vmem:[#allocation1 + $0x10] sm:$0xff pattern:$0x75316420]  ;;  %v9507_v7 = vsel %vm5737_vm6, %v6763_v15, %v5736_v46  ;;  %5890 = vmatpush.msra.mxu0 %v5860_v18 }
 0x944   : > { %v5725_v17 = vadd.f32 %v5722_v9, %v5721_v5 }
 0x945   : > { %5891 = vmatpush.msra.mxu0 %v5859_v38 }
 0x946   : > { %v5726_v49 = vrot.slane %v5725_v17, 4 }
 0x947   : > { %5892 = vmatpush.msra.mxu0 %v5858_v11 }
 0x948   : > { %v5727_v28 = vadd.f32 %v5726_v49, %v5725_v17 }
 0x949   : > { %5893 = vmatpush.msra.mxu0 %v5857_v59 }
 0x94a   : > { %v5728_v8 = vrot.slane %v5727_v28, 2 }
 0x94b   : > { %5894 = vmatpush.msra.mxu0 %v5856_v14 }
 0x94c   : > { %v5729_v23 = vadd.f32 %v5728_v8, %v5727_v28 }
 0x94d   : > { %5895 = vmatpush.msra.mxu0 %v5855_v60 }
 0x94e   : > { %v5730_v4 = vrot.slane %v5729_v23, 1 }
 0x94f   : > { %5896 = vmatpush.msra.mxu0 %v5854_v34 }
 0x950   : > { %v5731_v1 = vadd.f32 %v5730_v4, %v5729_v23 }
 0x951   : > { %5897 = vmatpush.msra.mxu0 %v5853_v43 }
 0x952   : > { %v5739_v55 = vmul.f32 %v9507_v7, %v5731_v1 }
 0x953   : > { %5898 = vmatpush.msra.mxu0 %v5852_v6 }
 0x954   : > { %5773 = vmatmul.f32.vlgmr.msrb.gmra.mxu3 %v5739_v55 }
 0x955   : > { %5899 = vmatpush.msra.mxu0 %v5851_v58 }
 0x957   : > { %5900 = vmatpush.msra.mxu0 %v5850_v27  ;;  %v6050_v27 = vld [vmem:[%s9701_s20 + $0x78] sm:$0xff] }
 0x958   : > { %6052 = vmatpush.msrb.mxu2 %v6050_v27 }
 0x9d7   : > { %v5774_v16 = vpop.f32.mrf.mxu3 }
 0x9d8   : > { %v5775_v22 = vadd.f32 %v5774_v16, %v5756_v35 }
 0x9da   : > { %v5777_v32 = vsub.f32 0.0, %v5775_v22 }
 0x9dc   : > { %v5778_v19 = vmul.f32 1.442695, %v5777_v32 }
 0x9de   : > { %6764 = vpow2.f32 %v5778_v19  ;;  %v5951_v19 = vld [vmem:[%s9699_s18 + $0x8] sm:$0xff] }
 0x9e4   : > { %v6765_v56 = vpop.eup %6764 }
 0x9e5   : > { %v5780_v62 = vadd.f32 1.0, %v6765_v56 }
 0x9e7   : > { %6766 = vrcp.f32 %v5780_v62  ;;  %v5792_v57 = vand.u32 2147483648, %v5780_v62  ;;  %v5790_v10 = vand.u32 2147483647, %v5780_v62  ;;  %vm5786_vm4 = vweird.f32 %v5780_v62 }
 0x9e9   : > { %v5793_v51 = vor.u32 1.1754944e-38, %v5792_v57  ;;  %vm5791_vm3 = vcmp.eq.f32.partialorder %v5790_v10, 8.507059e+37 }
 0x9ed   : > { %v6767_v29 = vpop.eup %6766 }
 0x9ee   : > { %v5782_v54 = vmul.f32 %v6767_v29, %v5780_v62  ;;  %vm5787_vm7 = vweird.f32 %v6767_v29  ;;  %v5950_v62 = vld [vmem:[%s9699_s18] sm:$0xff] }
 0x9ef   : > { %vm5788_vm9 = vmor %vm5786_vm4, %vm5787_vm7 }
 0x9f0   : > { %v5783_v20 = vsub.f32 1.0, %v5782_v54 }
 0x9f2   : > { %v5784_v13 = vmul.f32 %v6767_v29, %v5783_v20 }
 0x9f4   : > { %v5785_v61 = vadd.f32 %v6767_v29, %v5784_v13 }
 0x9f6   : > { %v5789_v24 = vsel %vm5788_vm9, %v6767_v29, %v5785_v61 }
 0x9f7   : > { %v5794_v45 = vsel %vm5791_vm3, %v5793_v51, %v5789_v24 }
 0x9f8   : > { %v5796_v50 = vmul.f32 %v5794_v45, %v5775_v22 }
 0x9fa   : > { %6594 = vmatmul.msk.f32.vlgmr.msra.gmra.mxu3 %vm5799_vm10, %v5796_v50 }
 0xa7d   : > { %v5820_v37 = vpop.f32.mrf.mxu3 }
 0xa7e   : > { %v5821_v40 = vadd.f32 %v5820_v37, %v5798_v26 }
 0xa80   : > { %v5823_v44 = vsub.f32 0.0, %v5821_v40 }
 0xa82   : > { %v5824_v36 = vmul.f32 1.442695, %v5823_v44 }
 0xa84   : > { %6768 = vpow2.f32 %v5824_v36 }
 0xa8a   : > { %v6769_v0 = vpop.eup %6768 }
 0xa8b   : > { %v5826_v42 = vadd.f32 1.0, %v6769_v0 }
 0xa8d   : > { %6770 = vrcp.f32 %v5826_v42  ;;  %v5838_v5 = vand.u32 2147483648, %v5826_v42  ;;  %v5836_v17 = vand.u32 2147483647, %v5826_v42  ;;  %vm5832_vm12 = vweird.f32 %v5826_v42 }
 0xa8f   : > { %v5839_v25 = vor.u32 1.1754944e-38, %v5838_v5  ;;  %vm5837_vm14 = vcmp.eq.f32.partialorder %v5836_v17, 8.507059e+37  ;;  %v6047_v5 = vld [vmem:[%s9701_s20 + $0x60] sm:$0xff]  ;;  %v6046_v17 = vld [vmem:[%s9701_s20 + $0x58] sm:$0xff] }
 0xa93   : > { %v6771_v15 = vpop.eup %6770 }
 0xa94   : > { %v5828_v48 = vmul.f32 %v6771_v15, %v5826_v42  ;;  %vm5833_vm11 = vweird.f32 %v6771_v15  ;;  %v6049_v42 = vld [vmem:[%s9701_s20 + $0x70] sm:$0xff] }
 0xa95   : > { %vm5834_vm13 = vmor %vm5832_vm12, %vm5833_vm11  ;;  %6053 = vmatpush.msrb.mxu2 %v6049_v42 }
 0xa96   : > { %v5829_v41 = vsub.f32 1.0, %v5828_v48 }
 0xa98   : > { %v5830_v9 = vmul.f32 %v6771_v15, %v5829_v41 }
 0xa9a   : > { %v5831_v49 = vadd.f32 %v6771_v15, %v5830_v9 }
 0xa9c   : > { %v5835_v28 = vsel %vm5834_vm13, %v6771_v15, %v5831_v49  ;;  %v6045_v49 = vld [vmem:[%s9701_s20 + $0x50] sm:$0xff] }
 0xa9d   : > { %v5840_v8 = vsel %vm5837_vm14, %v5839_v25, %v5835_v28 }
 0xa9e   : > { %v5842_v46 = vperm.slane %v5840_v8, 0  ;;  %v6044_v8 = vld [vmem:[%s9701_s20 + $0x48] sm:$0xff] }
 0xaa0   : > { %v5844_v23 = vrot.slane %v5842_v46, 4  ;;  %v5846_v4 = vmul.f32 %v5842_v46, %v9473_v33  ;;  %v5848_v1 = vmul.f32 %v5842_v46, %v9500_v3  ;;  %v5953_v33 = vld [vmem:[%s9699_s18 + $0x18] sm:$0xff] }
 0xaa1   : > { %5976 = vmatpush.msrb.mxu1 %v5953_v33 }
 0xaa2   : > { %v5847_v55 = vmul.f32 %v5844_v23, %v9490_v31  ;;  %v5849_v35 = vmul.f32 %v5844_v23, %v9504_v2  ;;  %5874 = vst [vmem:[#allocation1] ss:$2 sm:$0xff] %v5846_v4  ;;  %v5952_v2 = vld [vmem:[%s9699_s18 + $0x10] sm:$0xff]  ;;  %v6043_v23 = vld [vmem:[%s9701_s20 + $0x40] sm:$0xff] }
 0xaa3   : > { %5878 = vst [vmem:[#allocation1 + $0x10] ss:$2 sm:$0xff] %v5848_v1  ;;  %5977 = vmatpush.msrb.mxu1 %v5952_v2 }
 0xaa4   : > { %5876 = vst [vmem:[#allocation1 + $0x1] ss:$2 sm:$0xff] %v5847_v55  ;;  %v6042_v55 = vld [vmem:[%s9701_s20 + $0x38] sm:$0xff] }
 0xaa5   : > { %5880 = vst [vmem:[#allocation1 + $0x11] ss:$2 sm:$0xff] %v5849_v35  ;;  %5978 = vmatpush.msrb.mxu1 %v5951_v19  ;;  %v6037_v19 = vld [vmem:[%s9701_s20 + $0x10] sm:$0xff] }
 0xaa7   : > { %5979 = vmatpush.msrb.mxu1 %v5950_v62 }
 0xaab   : > { %v5881_v16 = vld.sshfl [vmem:[#allocation1] sm:$0xff pattern:$0x75316420] }
 0xaac   : > { %5901 = vmatmul.f32.vlgmr.msra.gmra.mxu0 %v5881_v16  ;;  %v5882_v22 = vld.sshfl [vmem:[#allocation1 + $0x10] sm:$0xff pattern:$0x75316420] }
 0xaad   : > { %v6041_v16 = vld [vmem:[%s9701_s20 + $0x30] sm:$0xff] }
 0xab4   : > { %5904 = vmatmul.f32.gmra.mxu0 %v5882_v22  ;;  %v6040_v22 = vld [vmem:[%s9701_s20 + $0x28] sm:$0xff] }
 0xb29   : > { %v5902_v3 = vpop.f32.mrf.mxu0 }
 0xb2a   : > { %v5903_v31 = vadd.f32 %v6656_v39, %v5902_v3  ;;  %v6038_v3 = vld [vmem:[%s9701_s20 + $0x18] sm:$0xff] }
 0xb2c   : > { %v5908_v32 = vsub.f32 0.0, %v5903_v31 }
 0xb2e   : > { %v5910_v56 = vmul.f32 1.442695, %v5908_v32 }
 0xb30   : > { %6772 = vpow2.f32 %v5910_v56  ;;  %v6036_v56 = vld [vmem:[%s9701_s20 + $0x8] sm:$0xff] }
 0xb31   : > { %v5905_v29 = vpop.f32.mrf.mxu0 }
 0xb32   : > { %v5906_v54 = vadd.f32 %v6656_v39, %v5905_v29  ;;  %v6039_v39 = vld [vmem:[%s9701_s20 + $0x20] sm:$0xff] }
 0xb33   : > { %v6035_v29 = vld [vmem:[%s9701_s20] sm:$0xff] }
 0xb34   : > { %v5909_v20 = vsub.f32 0.0, %v5906_v54 }
 0xb36   : > { %v6773_v57 = vpop.eup %6772  ;;  %v5912_v13 = vmul.f32 1.442695, %v5909_v20 }
 0xb37   : > { %v5914_v10 = vadd.f32 1.0, %v6773_v57 }
 0xb38   : > { %6774 = vpow2.f32 %v5912_v13 }
 0xb39   : > { %6776 = vrcp.f32 %v5914_v10  ;;  %v5927_v47 = vand.u32 2147483648, %v5914_v10  ;;  %v5925_v63 = vand.u32 2147483647, %v5914_v10  ;;  %vm5921_vm0 = vweird.f32 %v5914_v10 }
 0xb3b   : > { %v5928_v18 = vor.u32 1.1754944e-38, %v5927_v47  ;;  %vm5926_vm2 = vcmp.eq.f32.partialorder %v5925_v63, 8.507059e+37 }
 0xb3e   : > { %v6775_v61 = vpop.eup %6774 }
 0xb3f   : > { %v6777_v51 = vpop.eup %6776  ;;  %v5915_v24 = vadd.f32 1.0, %v6775_v61 }
 0xb40   : > { %v5917_v45 = vmul.f32 %v6777_v51, %v5914_v10  ;;  %vm5922_vm15 = vweird.f32 %v6777_v51 }
 0xb41   : > { %6778 = vrcp.f32 %v5915_v24  ;;  %vm5923_vm1 = vmor %vm5921_vm0, %vm5922_vm15  ;;  %v5942_v59 = vand.u32 2147483648, %v5915_v24  ;;  %v5940_v36 = vand.u32 2147483647, %v5915_v24  ;;  %vm5936_vm6 = vweird.f32 %v5915_v24 }
 0xb42   : > { %v5918_v50 = vsub.f32 1.0, %v5917_v45 }
 0xb43   : > { %v5943_v34 = vor.u32 1.1754944e-38, %v5942_v59  ;;  %vm5941_vm4 = vcmp.eq.f32.partialorder %v5940_v36, 8.507059e+37 }
 0xb44   : > { %v5919_v53 = vmul.f32 %v6777_v51, %v5918_v50 }
 0xb46   : > { %v5920_v21 = vadd.f32 %v6777_v51, %v5919_v53 }
 0xb47   : > { %v6779_v12 = vpop.eup %6778 }
 0xb48   : > { %v5924_v38 = vsel %vm5923_vm1, %v6777_v51, %v5920_v21  ;;  %v5932_v26 = vmul.f32 %v6779_v12, %v5915_v24  ;;  %vm5937_vm5 = vweird.f32 %v6779_v12 }
 0xb49   : > { %v5929_v11 = vsel %vm5926_vm2, %v5928_v18, %v5924_v38  ;;  %vm5938_vm7 = vmor %vm5936_vm6, %vm5937_vm5 }
 0xb4a   : > { %v5946_v37 = vmul.f32 %v5929_v11, %v5903_v31  ;;  %v5933_v40 = vsub.f32 1.0, %v5932_v26 }
 0xb4c   : > { %v5948_v44 = vadd.f32 %v5946_v37, %v9328_v30  ;;  %v5934_v14 = vmul.f32 %v6779_v12, %v5933_v40  ;;  %v6657_v30 = vld [vmem:[%s9700_s19] ss:$0 sm:$0xff] }
 0xb4e   : > { %v5935_v60 = vadd.f32 %v6779_v12, %v5934_v14  ;;  %6595 = vmatmul.msk.f32.vlgmr.msrb.gmra.mxu1 %vm5416_vm8, %v5948_v44 }
 0xb50   : > { %v5939_v43 = vsel %vm5938_vm7, %v6779_v12, %v5935_v60 }
 0xb51   : > { %v5944_v6 = vsel %vm5941_vm4, %v5943_v34, %v5939_v43  ;;  %v6051_v43 = vld [vmem:[%s9702_s21] sm:$0x1] }
 0xb52   : > { %v5947_v58 = vmul.f32 %v5944_v6, %v5906_v54 }
 0xb54   : > { %v5949_v0 = vadd.f32 %v5947_v58, %v9332_v52  ;;  %v6048_v52 = vld [vmem:[%s9701_s20 + $0x68] sm:$0xff] }
 0xb55   : > { %6054 = vmatpush.msrb.mxu2 %v6048_v52 }
 0xb56   : > { %6596 = vmatmul.msk.f32.gmra.mxu1 %vm5416_vm8, %v5949_v0 }
 0xb57   : > { %6055 = vmatpush.msrb.mxu2 %v6047_v5 }
 0xb59   : > { %6056 = vmatpush.msrb.mxu2 %v6046_v17 }
 0xb5b   : > { %6057 = vmatpush.msrb.mxu2 %v6045_v49 }
 0xb5d   : > { %6058 = vmatpush.msrb.mxu2 %v6044_v8 }
 0xb5f   : > { %6059 = vmatpush.msrb.mxu2 %v6043_v23 }
 0xb61   : > { %6060 = vmatpush.msrb.mxu2 %v6042_v55 }
 0xb63   : > { %6061 = vmatpush.msrb.mxu2 %v6041_v16 }
 0xb65   : > { %6062 = vmatpush.msrb.mxu2 %v6040_v22 }
 0xb67   : > { %6063 = vmatpush.msrb.mxu2 %v6039_v39 }
 0xb69   : > { %6064 = vmatpush.msrb.mxu2 %v6038_v3 }
 0xb6b   : > { %6065 = vmatpush.msrb.mxu2 %v6037_v19 }
 0xb6d   : > { %6066 = vmatpush.msrb.mxu2 %v6036_v56 }
 0xb6f   : > { %6067 = vmatpush.msrb.mxu2 %v6035_v29 }
 0xbcb   : > { %v5981_v15 = vpop.f32.mrf.mxu1 }
 0xbcc   : > { %v9599_v48 = vadd.f32 %v6657_v30, %v5981_v15 }
 0xbce   : > { %v5987_v41 = vsub.f32 0.0, %v9599_v48 }
 0xbd0   : > { %v5989_v9 = vmul.f32 1.442695, %v5987_v41 }
 0xbd2   : > { %6780 = vpow2.f32 %v5989_v9 }
 0xbd3   : > { %v5984_v25 = vpop.f32.mrf.mxu1 }
 0xbd4   : > { %v5985_v28 = vadd.f32 %v6657_v30, %v5984_v25 }
 0xbd6   : > { %v5988_v46 = vsub.f32 0.0, %v5985_v28 }
 0xbd8   : > { %v6781_v4 = vpop.eup %6780  ;;  %v5991_v1 = vmul.f32 1.442695, %v5988_v46 }
 0xbd9   : > { %v5993_v35 = vadd.f32 1.0, %v6781_v4 }
 0xbda   : > { %6782 = vpow2.f32 %v5991_v1 }
 0xbdb   : > { %6784 = vrcp.f32 %v5993_v35  ;;  %v6006_v10 = vand.u32 2147483648, %v5993_v35  ;;  %vm6000_vm9 = vweird.f32 %v5993_v35  ;;  %v6004_v61 = vand.u32 2147483647, %v5993_v35 }
 0xbdd   : > { %v6007_v53 = vor.u32 1.1754944e-38, %v6006_v10  ;;  %vm6005_vm11 = vcmp.eq.f32.partialorder %v6004_v61, 8.507059e+37 }
 0xbe0   : > { %v6783_v33 = vpop.eup %6782 }
 0xbe1   : > { %v6785_v31 = vpop.eup %6784  ;;  %v5994_v2 = vadd.f32 1.0, %v6783_v33 }
 0xbe2   : > { %v5996_v32 = vmul.f32 %v6785_v31, %v5993_v35  ;;  %vm6001_vm8 = vweird.f32 %v6785_v31 }
 0xbe3   : > { %6786 = vrcp.f32 %v5994_v2  ;;  %vm6002_vm3 = vmor %vm6000_vm9, %vm6001_vm8  ;;  %v6021_v24 = vand.u32 2147483648, %v5994_v2  ;;  %v6019_v47 = vand.u32 2147483647, %v5994_v2  ;;  %vm6015_vm12 = vweird.f32 %v5994_v2 }
 0xbe4   : > { %v5997_v62 = vsub.f32 1.0, %v5996_v32 }
 0xbe5   : > { %v6022_v12 = vor.u32 1.1754944e-38, %v6021_v24  ;;  %vm6020_vm14 = vcmp.eq.f32.partialorder %v6019_v47, 8.507059e+37 }
 0xbe6   : > { %v5998_v54 = vmul.f32 %v6785_v31, %v5997_v62 }
 0xbe8   : > { %v5999_v57 = vadd.f32 %v6785_v31, %v5998_v54 }
 0xbe9   : > { %v6787_v20 = vpop.eup %6786 }
 0xbea   : > { %v6011_v13 = vmul.f32 %v6787_v20, %v5994_v2  ;;  %v6003_v45 = vsel %vm6002_vm3, %v6785_v31, %v5999_v57  ;;  %vm6016_vm10 = vweird.f32 %v6787_v20 }
 0xbeb   : > { %v6008_v21 = vsel %vm6005_vm11, %v6007_v53, %v6003_v45  ;;  %vm6017_vm13 = vmor %vm6015_vm12, %vm6016_vm10 }
 0xbec   : > { %v6012_v51 = vsub.f32 1.0, %v6011_v13  ;;  %v6025_v26 = vmul.f32 %v6008_v21, %v9599_v48 }
 0xbee   : > { %v6013_v50 = vmul.f32 %v6787_v20, %v6012_v51 }
 0xbf0   : > { %v6014_v63 = vadd.f32 %v6787_v20, %v6013_v50 }
 0xbf2   : > { %v6018_v18 = vsel %vm6017_vm13, %v6787_v20, %v6014_v63 }
 0xbf3   : > { %v6023_v38 = vsel %vm6020_vm14, %v6022_v12, %v6018_v18 }
 0xbf4   : > { %v6026_v11 = vmul.f32 %v6023_v38, %v5985_v28 }
 0xbf6   : > { %v6027_v37 = vadd.f32 %v6026_v11, %v6025_v26 }
 0xbf8   : > { %v6028_v40 = vrot.slane %v6027_v37, 4 }
 0xbfa   : > { %v6029_v59 = vadd.f32 %v6028_v40, %v6027_v37 }
 0xbfc   : > { %v6030_v44 = vrot.slane %v6029_v59, 2 }
 0xbfe   : > { %v6031_v14 = vadd.f32 %v6030_v44, %v6029_v59 }
 0xc00   : > { %v6032_v36 = vrot.slane %v6031_v14, 1 }
 0xc02   : > { %v6033_v60 = vadd.f32 %v6032_v36, %v6031_v14 }
 0xc04   : > { %v6034_v34 = vmul.f32 %v6033_v60, %v9507_v7 }
 0xc06   : > { %6068 = vmatmul.f32.vlgmr.msrb.gmra.mxu2 %v6034_v34 }
 0xc89   : > { %v6069_v6 = vpop.f32.mrf.mxu2 }
 0xc8a   : > { %v6070_v58 = vadd.f32 %v6069_v6, %v6051_v43 }
 0xc8c   : > { %6072 = vst [vmem:[%s729_s1] sm:$0x1] %v6070_v58 }
 0xc8d   : > { %6815 = shalt.err (!%p6812_p3)
}
 0xc8e   : > { %6601 = dma.vmem_to_hbm [thread:$0]  (%p7017_p5), %s6085_s8, 16, %s6087_s22, %s6074_s23  }
 0xc8f PF: > { %p6607_p4 = scmp.ge.s32.totalorder %s6850_s28, 2  ;;  %s6098_s7 = sand.u32 1, %s6838_s5  }
 0xc90   : > { %s6099_s1 = scalar_lea.sflag [#allocation6], %s6098_s7 }
 0xc91   : > { %p6604_p7 = pnand %p6607_p4, %p7021_p6 }
 0xc93   : > { %p6605_p8 = pneg %p6604_p7 }
 0xc95   : > { %6833 = dma.done.wait (%p6605_p8), %s6099_s1, 16  }
 0xc96   : > { %6835 = vsyncadd (%p6605_p8), %s6099_s1, 4294967280  ;;  %s10049_s28 = sld [smem:[#allocation9_spill]]  ;;  %s10052_s5 = smov %s6842_s26 }
 0xc97   : > { %s10050_s9 = sld [smem:[#allocation8_spill]] }
 0xc98   : > { %s10051_s27 = sld [smem:[#allocation10_spill]] }
 0xc9c   : > { %p34_p9 = scmp.ge.s32.totalorder %s10049_s28, 4  }
 0xc9d   : > { %s10053_s26 = smov %s10050_s9 }
 0xc9e   :  { %36 = sbr.rel (!%p34_p9) target bundleno = 16 (0x10), region = 163 }
 0xca3   :  { %6104 = vsyncpa [#allocation6], 1 }
 0xca4   :  { %6106 = vsyncpa [#allocation6 + $0x1], 1 }

</bundles_post_ra>
